<compile_context>
chip_gen: v5e
topology: v5e:2x2
jax: 0.10.0
libtpu: 0.0.40
codegen_flags: <defaults>
</compile_context>

<pallas_src>
import functools

import jax
import jax.numpy as jnp
from jax.experimental import pallas as pl
from jax.experimental.pallas import tpu as pltpu

EPS = 1e-5
LRELU_SLOPE = 0.2


def _round_up(x, m):
    return (x + m - 1) // m * m


def _leaky_relu(x):
    return jnp.maximum(x, LRELU_SLOPE * x)


# --------------------------------------------------------------------------
# Kernel 1a: tiled matmul + bias (+ optional fused LeakyReLU), no BN stats.
# grid = (n_m, n_k); K is the reduction axis, f32 accumulator in VMEM scratch.
# --------------------------------------------------------------------------
def _conv_mm_kernel(x_ref, w_ref, b_ref, y_ref, acc_ref, *, n_k_tiles, fuse_lrelu):
    k = pl.program_id(1)

    @pl.when(k == 0)
    def _():
        acc_ref[...] = jnp.zeros_like(acc_ref)

    acc_ref[...] += jnp.dot(x_ref[...], w_ref[...],
                            preferred_element_type=jnp.float32)

    @pl.when(k == n_k_tiles - 1)
    def _():
        y = acc_ref[...] + b_ref[...]
        if fuse_lrelu:
            y = _leaky_relu(y)
        y_ref[...] = y


# --------------------------------------------------------------------------
# Kernel 1b: same matmul, but also accumulates per-channel sum / sum-of-squares
# (for BatchNorm batch statistics) into a (2, C) accumulator output that stays
# resident across the whole grid (constant index_map).
# --------------------------------------------------------------------------
def _conv_mm_stats_kernel(x_ref, w_ref, b_ref, y_ref, stats_ref, acc_ref,
                          *, n_k_tiles, tm, m_valid):
    i = pl.program_id(0)
    k = pl.program_id(1)

    @pl.when(jnp.logical_and(i == 0, k == 0))
    def _():
        stats_ref[...] = jnp.zeros_like(stats_ref)

    @pl.when(k == 0)
    def _():
        acc_ref[...] = jnp.zeros_like(acc_ref)

    acc_ref[...] += jnp.dot(x_ref[...], w_ref[...],
                            preferred_element_type=jnp.float32)

    @pl.when(k == n_k_tiles - 1)
    def _():
        y = acc_ref[...] + b_ref[...]
        y_ref[...] = y
        # Mask rows that are only M-padding so they don't bias the statistics.
        c = y.shape[-1]
        row = i * tm + jax.lax.broadcasted_iota(jnp.int32, (tm, c), 0)
        ym = jnp.where(row < m_valid, y, 0.0)
        contrib = jnp.concatenate(
            [jnp.sum(ym, axis=0, keepdims=True),
             jnp.sum(ym * ym, axis=0, keepdims=True)], axis=0)
        stats_ref[...] += contrib


# --------------------------------------------------------------------------
# Kernel 2: BatchNorm (from sum / sum-of-squares) + LeakyReLU, elementwise.
# --------------------------------------------------------------------------
def _bn_lrelu_kernel(y_ref, stats_ref, g_ref, be_ref, o_ref, *, m_valid):
    inv_m = 1.0 / float(m_valid)
    mean = stats_ref[0:1, :] * inv_m
    var = jnp.maximum(stats_ref[1:2, :] * inv_m - mean * mean, 0.0)
    scale = jax.lax.rsqrt(var + EPS) * g_ref[...]
    o_ref[...] = _leaky_relu((y_ref[...] - mean) * scale + be_ref[...])


# --------------------------------------------------------------------------
# One Conv2d(4x4, pad=1) layer (+ optional BatchNorm + LeakyReLU) on NHWC.
# --------------------------------------------------------------------------
def conv4x4_layer(x_nhwc, w, b, *, stride, gamma=None, beta=None,
                  fuse_lrelu=False):
    N, H, W, Cin = x_nhwc.shape
    Cout = w.shape[-1]
    Ho = (H + 2 - 4) // stride + 1
    Wo = (W + 2 - 4) // stride + 1
    M = N * Ho * Wo
    K = 16 * Cin

    # ---- im2col in the wrapper (layout plumbing only) ----------------------
    xp = jnp.pad(x_nhwc, ((0, 0), (1, 1), (1, 1), (0, 0)))
    cols = []
    for dy in range(4):
        for dx in range(4):
            cols.append(xp[:, dy:dy + stride * (Ho - 1) + 1:stride,
                           dx:dx + stride * (Wo - 1) + 1:stride, :])
    x_cols = jnp.concatenate(cols, axis=-1).reshape(M, K)

    # ---- tile sizes / hardware-friendly padding ----------------------------
    tm = min(_round_up(M, 16), 128)            # sublane axis (bf16-safe)
    m_pad = _round_up(M, tm)
    tk = min(_round_up(K, 128), 512)           # contracting axis
    k_pad = _round_up(K, tk)
    c_pad = _round_up(Cout, 128)               # lane-dense output channels

    x_cols = jnp.pad(x_cols, ((0, m_pad - M), (0, k_pad - K))).astype(jnp.bfloat16)
    w_mat = jnp.pad(w.reshape(K, Cout),
                    ((0, k_pad - K), (0, c_pad - Cout))).astype(jnp.bfloat16)
    b_row = jnp.pad(b, (0, c_pad - Cout)).reshape(1, c_pad).astype(jnp.float32)

    n_m = m_pad // tm
    n_k = k_pad // tk

    x_spec = pl.BlockSpec((tm, tk), lambda i, k: (i, k))
    w_spec = pl.BlockSpec((tk, c_pad), lambda i, k: (k, 0))
    b_spec = pl.BlockSpec((1, c_pad), lambda i, k: (0, 0))
    y_spec = pl.BlockSpec((tm, c_pad), lambda i, k: (i, 0))

    normalize = gamma is not None
    if normalize:
        kernel = functools.partial(_conv_mm_stats_kernel,
                                   n_k_tiles=n_k, tm=tm, m_valid=M)
        y_pad, stats = pl.pallas_call(
            kernel,
            out_shape=(jax.ShapeDtypeStruct((m_pad, c_pad), jnp.float32),
                       jax.ShapeDtypeStruct((2, c_pad), jnp.float32)),
            grid_spec=pltpu.PrefetchScalarGridSpec(
                num_scalar_prefetch=0, grid=(n_m, n_k),
                in_specs=[x_spec, w_spec, b_spec],
                out_specs=(y_spec, pl.BlockSpec((2, c_pad), lambda i, k: (0, 0))),
                scratch_shapes=[pltpu.VMEM((tm, c_pad), jnp.float32)]),
            compiler_params=pltpu.CompilerParams(
                dimension_semantics=("arbitrary", "arbitrary")),
        )(x_cols, w_mat, b_row)

        g_row = jnp.pad(gamma, (0, c_pad - Cout),
                        constant_values=1.0).reshape(1, c_pad).astype(jnp.float32)
        be_row = jnp.pad(beta, (0, c_pad - Cout)).reshape(1, c_pad).astype(jnp.float32)

        out_pad = pl.pallas_call(
            functools.partial(_bn_lrelu_kernel, m_valid=M),
            out_shape=jax.ShapeDtypeStruct((m_pad, c_pad), jnp.float32),
            grid_spec=pltpu.PrefetchScalarGridSpec(
                num_scalar_prefetch=0, grid=(n_m,),
                in_specs=[pl.BlockSpec((tm, c_pad), lambda i: (i, 0)),
                          pl.BlockSpec((2, c_pad), lambda i: (0, 0)),
                          pl.BlockSpec((1, c_pad), lambda i: (0, 0)),
                          pl.BlockSpec((1, c_pad), lambda i: (0, 0))],
                out_specs=pl.BlockSpec((tm, c_pad), lambda i: (i, 0))),
            compiler_params=pltpu.CompilerParams(
                dimension_semantics=("parallel",)),
        )(y_pad, stats, g_row, be_row)
    else:
        kernel = functools.partial(_conv_mm_kernel, n_k_tiles=n_k,
                                   fuse_lrelu=fuse_lrelu)
        out_pad = pl.pallas_call(
            kernel,
            out_shape=jax.ShapeDtypeStruct((m_pad, c_pad), jnp.float32),
            grid_spec=pltpu.PrefetchScalarGridSpec(
                num_scalar_prefetch=0, grid=(n_m, n_k),
                in_specs=[x_spec, w_spec, b_spec],
                out_specs=y_spec,
                scratch_shapes=[pltpu.VMEM((tm, c_pad), jnp.float32)]),
            compiler_params=pltpu.CompilerParams(
                dimension_semantics=("parallel", "arbitrary")),
        )(x_cols, w_mat, b_row)

    return out_pad[:M, :Cout].reshape(N, Ho, Wo, Cout)


# --------------------------------------------------------------------------
# Full PatchDiscriminator forward (NCHW in/out, like the PyTorch module).
# --------------------------------------------------------------------------
def patch_discriminator(sketch_edge, face, params):
    x = jnp.concatenate([sketch_edge, face], axis=1)          # (N, 9, H, W)
    x = jnp.transpose(x, (0, 2, 3, 1)).astype(jnp.float32)    # NHWC

    (w1, b1), (w2, b2, g2, be2), (w3, b3, g3, be3), \
        (w4, b4, g4, be4), (w5, b5) = params

    h = conv4x4_layer(x, w1, b1, stride=2, fuse_lrelu=True)                # no BN
    h = conv4x4_layer(h, w2, b2, stride=2, gamma=g2, beta=be2)
    h = conv4x4_layer(h, w3, b3, stride=2, gamma=g3, beta=be3)
    h = conv4x4_layer(h, w4, b4, stride=2, gamma=g4, beta=be4)
    h = conv4x4_layer(h, w5, b5, stride=1)                                 # final conv
    return jnp.transpose(h, (0, 3, 1, 2))                                  # NCHW


# --------------------------------------------------------------------------
# Pure-JAX reference (same training-mode-BN semantics), f32 HIGHEST precision.
# --------------------------------------------------------------------------
def _reference(sketch_edge, face, params):
    x = jnp.concatenate([sketch_edge, face], axis=1)
    x = jnp.transpose(x, (0, 2, 3, 1)).astype(jnp.float32)

    def conv(h, w, b, stride):
        y = jax.lax.conv_general_dilated(
            h, w, (stride, stride), ((1, 1), (1, 1)),
            dimension_numbers=('NHWC', 'HWIO', 'NHWC'),
            precision=jax.lax.Precision.HIGHEST)
        return y + b

    def bn(y, g, be):
        m = jnp.mean(y, axis=(0, 1, 2), keepdims=True)
        v = jnp.mean((y - m) ** 2, axis=(0, 1, 2), keepdims=True)
        return (y - m) * jax.lax.rsqrt(v + EPS) * g + be

    (w1, b1), (w2, b2, g2, be2), (w3, b3, g3, be3), \
        (w4, b4, g4, be4), (w5, b5) = params

    h = _leaky_relu(conv(x, w1, b1, 2))
    h = _leaky_relu(bn(conv(h, w2, b2, 2), g2, be2))
    h = _leaky_relu(bn(conv(h, w3, b3, 2), g3, be3))
    h = _leaky_relu(bn(conv(h, w4, b4, 2), g4, be4))
    h = conv(h, w5, b5, 1)
    return jnp.transpose(h, (0, 3, 1, 2))


def make_params(key):
    def conv_p(k, cin, cout):
        k1, k2 = jax.random.split(k)
        w = jax.random.normal(k1, (4, 4, cin, cout), jnp.float32) * \
            jnp.sqrt(2.0 / (16 * cin))
        b = 0.02 * jax.random.normal(k2, (cout,), jnp.float32)
        return w, b

    def bn_p(k, c):
        k1, k2 = jax.random.split(k)
        return (1.0 + 0.1 * jax.random.normal(k1, (c,), jnp.float32),
                0.1 * jax.random.normal(k2, (c,), jnp.float32))

    ks = jax.random.split(key, 8)
    w1, b1 = conv_p(ks[0], 9, 64)
    w2, b2 = conv_p(ks[1], 64, 128); g2, be2 = bn_p(ks[2], 128)
    w3, b3 = conv_p(ks[3], 128, 256); g3, be3 = bn_p(ks[4], 256)
    w4, b4 = conv_p(ks[5], 256, 512); g4, be4 = bn_p(ks[6], 512)
    w5, b5 = conv_p(ks[7], 512, 1)
    return ((w1, b1), (w2, b2, g2, be2), (w3, b3, g3, be3),
            (w4, b4, g4, be4), (w5, b5))


if __name__ == "__main__":
    key = jax.random.PRNGKey(0)
    k_s, k_f, k_p = jax.random.split(key, 3)

    # Small but architecture-consistent shapes: 4 stride-2 convs + final 4x4
    # conv need spatial >= 32; use 64 so later-layer BN statistics are sane.
    N, H, W = 2, 64, 64
    sketch_edge = jax.random.normal(k_s, (N, 6, H, W), jnp.float32)
    face = jax.random.normal(k_f, (N, 3, H, W), jnp.float32)
    params = make_params(k_p)

    fwd = jax.jit(patch_discriminator)
    out = jax.block_until_ready(fwd(sketch_edge, face, params))
    ref = jax.block_until_ready(_reference(sketch_edge, face, params))

    assert out.shape == ref.shape == (N, 1, H // 16 - 1, W // 16 - 1), out.shape
    max_err = float(jnp.max(jnp.abs(out - ref)))
    # bf16 MXU inputs vs f32-HIGHEST reference across 5 layers.
    assert jnp.allclose(out, ref, atol=1e-1, rtol=1e-1), f"max abs err = {max_err}"

    print("KERNEL_OK")
</pallas_src>

<mosaic_0001>
module attributes {stable_mosaic.version = 11 : i64} {
  func.func @_conv_mm_kernel(%arg0: i32, %arg1: i32, %arg2: memref<128x256xbf16, #tpu.memory_space<vmem>>, %arg3: memref<256x128xbf16, #tpu.memory_space<vmem>>, %arg4: memref<1x128xf32, #tpu.memory_space<vmem>>, %arg5: memref<128x128xf32, #tpu.memory_space<vmem>>, %arg6: memref<128x128xf32, #tpu.memory_space<vmem>>) attributes {dimension_semantics = [#tpu.dimension_semantics<parallel>, #tpu.dimension_semantics<arbitrary>], iteration_bounds = array<i64: 16, 1>, scalar_prefetch = 0 : i64, scratch_operands = 1 : i64, tpu.core_type = #tpu.core_type<tc>, window_params = [{transform_indices = @transform_0, window_bounds = array<i64: 128, 256>}, {transform_indices = @transform_1, window_bounds = array<i64: 256, 128>}, {pipeline_mode = #tpu.pipeline_mode<synchronous>, transform_indices = @transform_2, window_bounds = array<i64: 1, 128>}, {transform_indices = @transform_3, window_bounds = array<i64: 128, 128>}]} {
    %c0_i32 = arith.constant 0 : i32
    %0 = arith.cmpi eq, %arg1, %c0_i32 : i32
    %1 = arith.extui %0 : i1 to i32
    %c0_i32_0 = arith.constant 0 : i32
    %2 = arith.cmpi ne, %1, %c0_i32_0 : i32
    scf.if %2 {
      %cst_10 = arith.constant 0.000000e+00 : f32
      %12 = vector.broadcast %cst_10 : f32 to vector<128x128xf32>
      %c0_11 = arith.constant 0 : index
      %c0_12 = arith.constant 0 : index
      %13 = vector.load %arg6[%c0_11, %c0_12] : memref<128x128xf32, #tpu.memory_space<vmem>>, vector<128x128xf32>
      tpu.vector_store %arg6[%c0_11, %c0_12], %12 {strides = array<i32>} : memref<128x128xf32, #tpu.memory_space<vmem>>, vector<128x128xf32>,
    } else {
    }
    %c0 = arith.constant 0 : index
    %c0_1 = arith.constant 0 : index
    %3 = vector.load %arg6[%c0, %c0_1] : memref<128x128xf32, #tpu.memory_space<vmem>>, vector<128x128xf32>
    %c0_2 = arith.constant 0 : index
    %c0_3 = arith.constant 0 : index
    %4 = vector.load %arg2[%c0_2, %c0_3] : memref<128x256xbf16, #tpu.memory_space<vmem>>, vector<128x256xbf16>
    %c0_4 = arith.constant 0 : index
    %c0_5 = arith.constant 0 : index
    %5 = vector.load %arg3[%c0_4, %c0_5] : memref<256x128xbf16, #tpu.memory_space<vmem>>, vector<256x128xbf16>
    %cst = arith.constant dense<0.000000e+00> : vector<128x128xf32>
    %6 = tpu.matmul %4, %5, %cst {dimension_numbers = #tpu.dot_dimension_numbers<[1], [0], [0], [1], [0, 0, 1, 1], [], []>} : vector<128x256xbf16>, vector<256x128xbf16>, vector<128x128xf32> -> vector<128x128xf32>
    %7 = arith.addf %3, %6 : vector<128x128xf32>
    %c0_6 = arith.constant 0 : index
    %c0_7 = arith.constant 0 : index
    %8 = vector.load %arg6[%c0_6, %c0_7] : memref<128x128xf32, #tpu.memory_space<vmem>>, vector<128x128xf32>
    tpu.vector_store %arg6[%c0_6, %c0_7], %7 {strides = array<i32>} : memref<128x128xf32, #tpu.memory_space<vmem>>, vector<128x128xf32>,
    %c0_i32_8 = arith.constant 0 : i32
    %9 = arith.cmpi eq, %arg1, %c0_i32_8 : i32
    %10 = arith.extui %9 : i1 to i32
    %c0_i32_9 = arith.constant 0 : i32
    %11 = arith.cmpi ne, %10, %c0_i32_9 : i32
    scf.if %11 {
      %c0_10 = arith.constant 0 : index
      %c0_11 = arith.constant 0 : index
      %12 = vector.load %arg6[%c0_10, %c0_11] : memref<128x128xf32, #tpu.memory_space<vmem>>, vector<128x128xf32>
      %c0_12 = arith.constant 0 : index
      %c0_13 = arith.constant 0 : index
      %13 = vector.load %arg4[%c0_12, %c0_13] : memref<1x128xf32, #tpu.memory_space<vmem>>, vector<1x128xf32>
      %14 = vector.broadcast %13 : vector<1x128xf32> to vector<128x128xf32>
      %15 = arith.addf %12, %14 : vector<128x128xf32>
      %cst_14 = arith.constant 2.000000e-01 : f32
      %16 = vector.broadcast %cst_14 : f32 to vector<128x128xf32>
      %17 = arith.mulf %16, %15 : vector<128x128xf32>
      %18 = arith.maximumf %15, %17 : vector<128x128xf32>
      %c0_15 = arith.constant 0 : index
      %c0_16 = arith.constant 0 : index
      %19 = vector.load %arg5[%c0_15, %c0_16] : memref<128x128xf32, #tpu.memory_space<vmem>>, vector<128x128xf32>
      tpu.vector_store %arg5[%c0_15, %c0_16], %18 {strides = array<i32>} : memref<128x128xf32, #tpu.memory_space<vmem>>, vector<128x128xf32>,
    } else {
    }
    return
  }
  func.func @transform_0(%arg0: i32, %arg1: i32) -> (i32, i32) {
    %c0_i32 = arith.constant 0 : i32
    return %arg0, %arg1 : i32, i32
  }
  func.func @transform_1(%arg0: i32, %arg1: i32) -> (i32, i32) {
    %c0_i32 = arith.constant 0 : i32
    %c0_i32_0 = arith.constant 0 : i32
    return %arg1, %c0_i32 : i32, i32
  }
  func.func @transform_2(%arg0: i32, %arg1: i32) -> (i32, i32) {
    %c0_i32 = arith.constant 0 : i32
    %c0_i32_0 = arith.constant 0 : i32
    %c0_i32_1 = arith.constant 0 : i32
    return %c0_i32, %c0_i32_0 : i32, i32
  }
  func.func @transform_3(%arg0: i32, %arg1: i32) -> (i32, i32) {
    %c0_i32 = arith.constant 0 : i32
    %c0_i32_0 = arith.constant 0 : i32
    return %arg0, %c0_i32 : i32, i32
  }
}

module attributes {stable_mosaic.version = 11 : i64} {
  func.func @_bn_lrelu_kernel(%arg0: i32, %arg1: memref<128x128xf32, #tpu.memory_space<vmem>>, %arg2: memref<2x128xf32, #tpu.memory_space<vmem>>, %arg3: memref<1x128xf32, #tpu.memory_space<vmem>>, %arg4: memref<1x128xf32, #tpu.memory_space<vmem>>, %arg5: memref<128x128xf32, #tpu.memory_space<vmem>>) attributes {dimension_semantics = [#tpu.dimension_semantics<parallel>], iteration_bounds = array<i64: 4>, scalar_prefetch = 0 : i64, scratch_operands = 0 : i64, tpu.core_type = #tpu.core_type<tc>, window_params = [{transform_indices = @transform_0, window_bounds = array<i64: 128, 128>}, {pipeline_mode = #tpu.pipeline_mode<synchronous>, transform_indices = @transform_1, window_bounds = array<i64: 2, 128>}, {pipeline_mode = #tpu.pipeline_mode<synchronous>, transform_indices = @transform_2, window_bounds = array<i64: 1, 128>}, {pipeline_mode = #tpu.pipeline_mode<synchronous>, transform_indices = @transform_3, window_bounds = array<i64: 1, 128>}, {transform_indices = @transform_4, window_bounds = array<i64: 128, 128>}]} {
    %c0 = arith.constant 0 : index
    %c0_0 = arith.constant 0 : index
    %0 = vector.load %arg2[%c0, %c0_0] : memref<2x128xf32, #tpu.memory_space<vmem>>, vector<1x128xf32>
    %cst = arith.constant 0.001953125 : f32
    %1 = vector.broadcast %cst : f32 to vector<1x128xf32>
    %2 = arith.mulf %0, %1 : vector<1x128xf32>
    %c1 = arith.constant 1 : index
    %c0_1 = arith.constant 0 : index
    %3 = vector.load %arg2[%c1, %c0_1] : memref<2x128xf32, #tpu.memory_space<vmem>>, vector<1x128xf32>
    %cst_2 = arith.constant 0.001953125 : f32
    %4 = vector.broadcast %cst_2 : f32 to vector<1x128xf32>
    %5 = arith.mulf %3, %4 : vector<1x128xf32>
    %6 = arith.mulf %2, %2 : vector<1x128xf32>
    %7 = arith.subf %5, %6 : vector<1x128xf32>
    %cst_3 = arith.constant 0.000000e+00 : f32
    %8 = vector.broadcast %cst_3 : f32 to vector<1x128xf32>
    %9 = arith.maximumf %7, %8 : vector<1x128xf32>
    %cst_4 = arith.constant 9.99999974E-6 : f32
    %10 = vector.broadcast %cst_4 : f32 to vector<1x128xf32>
    %11 = arith.addf %9, %10 : vector<1x128xf32>
    %12 = math.rsqrt %11 : vector<1x128xf32>
    %c0_5 = arith.constant 0 : index
    %c0_6 = arith.constant 0 : index
    %13 = vector.load %arg3[%c0_5, %c0_6] : memref<1x128xf32, #tpu.memory_space<vmem>>, vector<1x128xf32>
    %14 = arith.mulf %12, %13 : vector<1x128xf32>
    %c0_7 = arith.constant 0 : index
    %c0_8 = arith.constant 0 : index
    %15 = vector.load %arg1[%c0_7, %c0_8] : memref<128x128xf32, #tpu.memory_space<vmem>>, vector<128x128xf32>
    %16 = vector.broadcast %2 : vector<1x128xf32> to vector<128x128xf32>
    %17 = arith.subf %15, %16 : vector<128x128xf32>
    %18 = vector.broadcast %14 : vector<1x128xf32> to vector<128x128xf32>
    %19 = arith.mulf %17, %18 : vector<128x128xf32>
    %c0_9 = arith.constant 0 : index
    %c0_10 = arith.constant 0 : index
    %20 = vector.load %arg4[%c0_9, %c0_10] : memref<1x128xf32, #tpu.memory_space<vmem>>, vector<1x128xf32>
    %21 = vector.broadcast %20 : vector<1x128xf32> to vector<128x128xf32>
    %22 = arith.addf %19, %21 : vector<128x128xf32>
    %cst_11 = arith.constant 2.000000e-01 : f32
    %23 = vector.broadcast %cst_11 : f32 to vector<128x128xf32>
    %24 = arith.mulf %23, %22 : vector<128x128xf32>
    %25 = arith.maximumf %22, %24 : vector<128x128xf32>
    %c0_12 = arith.constant 0 : index
    %c0_13 = arith.constant 0 : index
    %26 = vector.load %arg5[%c0_12, %c0_13] : memref<128x128xf32, #tpu.memory_space<vmem>>, vector<128x128xf32>
    tpu.vector_store %arg5[%c0_12, %c0_13], %25 {strides = array<i32>} : memref<128x128xf32, #tpu.memory_space<vmem>>, vector<128x128xf32>,
    return
  }
  func.func @transform_0(%arg0: i32) -> (i32, i32) {
    %c0_i32 = arith.constant 0 : i32
    %c0_i32_0 = arith.constant 0 : i32
    return %arg0, %c0_i32 : i32, i32
  }
  func.func @transform_1(%arg0: i32) -> (i32, i32) {
    %c0_i32 = arith.constant 0 : i32
    %c0_i32_0 = arith.constant 0 : i32
    %c0_i32_1 = arith.constant 0 : i32
    return %c0_i32, %c0_i32_0 : i32, i32
  }
  func.func @transform_2(%arg0: i32) -> (i32, i32) {
    %c0_i32 = arith.constant 0 : i32
    %c0_i32_0 = arith.constant 0 : i32
    %c0_i32_1 = arith.constant 0 : i32
    return %c0_i32, %c0_i32_0 : i32, i32
  }
  func.func @transform_3(%arg0: i32) -> (i32, i32) {
    %c0_i32 = arith.constant 0 : i32
    %c0_i32_0 = arith.constant 0 : i32
    %c0_i32_1 = arith.constant 0 : i32
    return %c0_i32, %c0_i32_0 : i32, i32
  }
  func.func @transform_4(%arg0: i32) -> (i32, i32) {
    %c0_i32 = arith.constant 0 : i32
    %c0_i32_0 = arith.constant 0 : i32
    return %arg0, %c0_i32 : i32, i32
  }
}

module attributes {stable_mosaic.version = 11 : i64} {
  func.func @_conv_mm_stats_kernel(%arg0: i32, %arg1: i32, %arg2: memref<128x512xbf16, #tpu.memory_space<vmem>>, %arg3: memref<512x128xbf16, #tpu.memory_space<vmem>>, %arg4: memref<1x128xf32, #tpu.memory_space<vmem>>, %arg5: memref<128x128xf32, #tpu.memory_space<vmem>>, %arg6: memref<2x128xf32, #tpu.memory_space<vmem>>, %arg7: memref<128x128xf32, #tpu.memory_space<vmem>>) attributes {dimension_semantics = [#tpu.dimension_semantics<arbitrary>, #tpu.dimension_semantics<arbitrary>], iteration_bounds = array<i64: 4, 2>, scalar_prefetch = 0 : i64, scratch_operands = 1 : i64, tpu.core_type = #tpu.core_type<tc>, window_params = [{transform_indices = @transform_0, window_bounds = array<i64: 128, 512>}, {transform_indices = @transform_1, window_bounds = array<i64: 512, 128>}, {pipeline_mode = #tpu.pipeline_mode<synchronous>, transform_indices = @transform_2, window_bounds = array<i64: 1, 128>}, {transform_indices = @transform_3, window_bounds = array<i64: 128, 128>}, {pipeline_mode = #tpu.pipeline_mode<synchronous>, transform_indices = @transform_4, window_bounds = array<i64: 2, 128>}]} {
    %c0_i32 = arith.constant 0 : i32
    %0 = arith.cmpi eq, %arg0, %c0_i32 : i32
    %c0_i32_0 = arith.constant 0 : i32
    %1 = arith.cmpi eq, %arg1, %c0_i32_0 : i32
    %2 = arith.andi %0, %1 : i1
    %3 = arith.extui %2 : i1 to i32
    %c0_i32_1 = arith.constant 0 : i32
    %4 = arith.cmpi ne, %3, %c0_i32_1 : i32
    scf.if %4 {
      %cst_12 = arith.constant 0.000000e+00 : f32
      %17 = vector.broadcast %cst_12 : f32 to vector<2x128xf32>
      %c0_13 = arith.constant 0 : index
      %c0_14 = arith.constant 0 : index
      %18 = vector.load %arg6[%c0_13, %c0_14] : memref<2x128xf32, #tpu.memory_space<vmem>>, vector<2x128xf32>
      tpu.vector_store %arg6[%c0_13, %c0_14], %17 {strides = array<i32>} : memref<2x128xf32, #tpu.memory_space<vmem>>, vector<2x128xf32>,
    } else {
    }
    %c0_i32_2 = arith.constant 0 : i32
    %5 = arith.cmpi eq, %arg1, %c0_i32_2 : i32
    %6 = arith.extui %5 : i1 to i32
    %c0_i32_3 = arith.constant 0 : i32
    %7 = arith.cmpi ne, %6, %c0_i32_3 : i32
    scf.if %7 {
      %cst_12 = arith.constant 0.000000e+00 : f32
      %17 = vector.broadcast %cst_12 : f32 to vector<128x128xf32>
      %c0_13 = arith.constant 0 : index
      %c0_14 = arith.constant 0 : index
      %18 = vector.load %arg7[%c0_13, %c0_14] : memref<128x128xf32, #tpu.memory_space<vmem>>, vector<128x128xf32>
      tpu.vector_store %arg7[%c0_13, %c0_14], %17 {strides = array<i32>} : memref<128x128xf32, #tpu.memory_space<vmem>>, vector<128x128xf32>,
    } else {
    }
    %c0 = arith.constant 0 : index
    %c0_4 = arith.constant 0 : index
    %8 = vector.load %arg7[%c0, %c0_4] : memref<128x128xf32, #tpu.memory_space<vmem>>, vector<128x128xf32>
    %c0_5 = arith.constant 0 : index
    %c0_6 = arith.constant 0 : index
    %9 = vector.load %arg2[%c0_5, %c0_6] : memref<128x512xbf16, #tpu.memory_space<vmem>>, vector<128x512xbf16>
    %c0_7 = arith.constant 0 : index
    %c0_8 = arith.constant 0 : index
    %10 = vector.load %arg3[%c0_7, %c0_8] : memref<512x128xbf16, #tpu.memory_space<vmem>>, vector<512x128xbf16>
    %cst = arith.constant dense<0.000000e+00> : vector<128x128xf32>
    %11 = tpu.matmul %9, %10, %cst {dimension_numbers = #tpu.dot_dimension_numbers<[1], [0], [0], [1], [0, 0, 1, 1], [], []>} : vector<128x512xbf16>, vector<512x128xbf16>, vector<128x128xf32> -> vector<128x128xf32>
    %12 = arith.addf %8, %11 : vector<128x128xf32>
    %c0_9 = arith.constant 0 : index
    %c0_10 = arith.constant 0 : index
    %13 = vector.load %arg7[%c0_9, %c0_10] : memref<128x128xf32, #tpu.memory_space<vmem>>, vector<128x128xf32>
    tpu.vector_store %arg7[%c0_9, %c0_10], %12 {strides = array<i32>} : memref<128x128xf32, #tpu.memory_space<vmem>>, vector<128x128xf32>,
    %c1_i32 = arith.constant 1 : i32
    %14 = arith.cmpi eq, %arg1, %c1_i32 : i32
    %15 = arith.extui %14 : i1 to i32
    %c0_i32_11 = arith.constant 0 : i32
    %16 = arith.cmpi ne, %15, %c0_i32_11 : i32
    scf.if %16 {
      %c0_12 = arith.constant 0 : index
      %c0_13 = arith.constant 0 : index
      %17 = vector.load %arg7[%c0_12, %c0_13] : memref<128x128xf32, #tpu.memory_space<vmem>>, vector<128x128xf32>
      %c0_14 = arith.constant 0 : index
      %c0_15 = arith.constant 0 : index
      %18 = vector.load %arg4[%c0_14, %c0_15] : memref<1x128xf32, #tpu.memory_space<vmem>>, vector<1x128xf32>
      %19 = vector.broadcast %18 : vector<1x128xf32> to vector<128x128xf32>
      %20 = arith.addf %17, %19 : vector<128x128xf32>
      %c0_16 = arith.constant 0 : index
      %c0_17 = arith.constant 0 : index
      %21 = vector.load %arg5[%c0_16, %c0_17] : memref<128x128xf32, #tpu.memory_space<vmem>>, vector<128x128xf32>
      tpu.vector_store %arg5[%c0_16, %c0_17], %20 {strides = array<i32>} : memref<128x128xf32, #tpu.memory_space<vmem>>, vector<128x128xf32>,
      %c128_i32 = arith.constant 128 : i32
      %22 = arith.muli %arg0, %c128_i32 : i32
      %23 = tpu.iota {dimensions = array<i32: 0>} : vector<128x128xi32>
      %24 = vector.broadcast %22 : i32 to vector<128x128xi32>
      %25 = arith.addi %24, %23 : vector<128x128xi32>
      %c512_i32 = arith.constant 512 : i32
      %26 = vector.broadcast %c512_i32 : i32 to vector<128x128xi32>
      %27 = arith.cmpi slt, %25, %26 : vector<128x128xi32>
      %cst_18 = arith.constant 0.000000e+00 : f32
      %28 = vector.broadcast %cst_18 : f32 to vector<128x128xf32>
      %29 = arith.select %27, %20, %28 : vector<128x128xi1>, vector<128x128xf32>
      %cst_19 = arith.constant dense<0.000000e+00> : vector<128xf32>
      %30 = vector.multi_reduction <add>, %29, %cst_19 [0] : vector<128x128xf32> to vector<128xf32>
      %31 = vector.shape_cast %30 : vector<128xf32> to vector<1x128xf32>
      %32 = arith.mulf %29, %29 : vector<128x128xf32>
      %cst_20 = arith.constant dense<0.000000e+00> : vector<128xf32>
      %33 = vector.multi_reduction <add>, %32, %cst_20 [0] : vector<128x128xf32> to vector<128xf32>
      %34 = vector.shape_cast %33 : vector<128xf32> to vector<1x128xf32>
      %35 = tpu.concatenate %31, %34 in 0 : vector<1x128xf32>, vector<1x128xf32> -> vector<2x128xf32>
      %c0_21 = arith.constant 0 : index
      %c0_22 = arith.constant 0 : index
      %36 = vector.load %arg6[%c0_21, %c0_22] : memref<2x128xf32, #tpu.memory_space<vmem>>, vector<2x128xf32>
      %37 = arith.addf %36, %35 : vector<2x128xf32>
      %c0_23 = arith.constant 0 : index
      %c0_24 = arith.constant 0 : index
      %38 = vector.load %arg6[%c0_23, %c0_24] : memref<2x128xf32, #tpu.memory_space<vmem>>, vector<2x128xf32>
      tpu.vector_store %arg6[%c0_23, %c0_24], %37 {strides = array<i32>} : memref<2x128xf32, #tpu.memory_space<vmem>>, vector<2x128xf32>,
    } else {
    }
    return
  }
  func.func @transform_0(%arg0: i32, %arg1: i32) -> (i32, i32) {
    %c0_i32 = arith.constant 0 : i32
    return %arg0, %arg1 : i32, i32
  }
  func.func @transform_1(%arg0: i32, %arg1: i32) -> (i32, i32) {
    %c0_i32 = arith.constant 0 : i32
    %c0_i32_0 = arith.constant 0 : i32
    return %arg1, %c0_i32 : i32, i32
  }
  func.func @transform_2(%arg0: i32, %arg1: i32) -> (i32, i32) {
    %c0_i32 = arith.constant 0 : i32
    %c0_i32_0 = arith.constant 0 : i32
    %c0_i32_1 = arith.constant 0 : i32
    return %c0_i32, %c0_i32_0 : i32, i32
  }
  func.func @transform_3(%arg0: i32, %arg1: i32) -> (i32, i32) {
    %c0_i32 = arith.constant 0 : i32
    %c0_i32_0 = arith.constant 0 : i32
    return %arg0, %c0_i32 : i32, i32
  }
  func.func @transform_4(%arg0: i32, %arg1: i32) -> (i32, i32) {
    %c0_i32 = arith.constant 0 : i32
    %c0_i32_0 = arith.constant 0 : i32
    %c0_i32_1 = arith.constant 0 : i32
    return %c0_i32, %c0_i32_0 : i32, i32
  }
}

module attributes {stable_mosaic.version = 11 : i64} {
  func.func @_conv_mm_stats_kernel(%arg0: i32, %arg1: i32, %arg2: memref<128x512xbf16, #tpu.memory_space<vmem>>, %arg3: memref<512x256xbf16, #tpu.memory_space<vmem>>, %arg4: memref<1x256xf32, #tpu.memory_space<vmem>>, %arg5: memref<128x256xf32, #tpu.memory_space<vmem>>, %arg6: memref<2x256xf32, #tpu.memory_space<vmem>>, %arg7: memref<128x256xf32, #tpu.memory_space<vmem>>) attributes {dimension_semantics = [#tpu.dimension_semantics<arbitrary>, #tpu.dimension_semantics<arbitrary>], iteration_bounds = array<i64: 1, 4>, scalar_prefetch = 0 : i64, scratch_operands = 1 : i64, tpu.core_type = #tpu.core_type<tc>, window_params = [{transform_indices = @transform_0, window_bounds = array<i64: 128, 512>}, {transform_indices = @transform_1, window_bounds = array<i64: 512, 256>}, {pipeline_mode = #tpu.pipeline_mode<synchronous>, transform_indices = @transform_2, window_bounds = array<i64: 1, 256>}, {transform_indices = @transform_3, window_bounds = array<i64: 128, 256>}, {pipeline_mode = #tpu.pipeline_mode<synchronous>, transform_indices = @transform_4, window_bounds = array<i64: 2, 256>}]} {
    %c0_i32 = arith.constant 0 : i32
    %0 = arith.cmpi eq, %arg0, %c0_i32 : i32
    %c0_i32_0 = arith.constant 0 : i32
    %1 = arith.cmpi eq, %arg1, %c0_i32_0 : i32
    %2 = arith.andi %0, %1 : i1
    %3 = arith.extui %2 : i1 to i32
    %c0_i32_1 = arith.constant 0 : i32
    %4 = arith.cmpi ne, %3, %c0_i32_1 : i32
    scf.if %4 {
      %cst_12 = arith.constant 0.000000e+00 : f32
      %17 = vector.broadcast %cst_12 : f32 to vector<2x256xf32>
      %c0_13 = arith.constant 0 : index
      %c0_14 = arith.constant 0 : index
      %18 = vector.load %arg6[%c0_13, %c0_14] : memref<2x256xf32, #tpu.memory_space<vmem>>, vector<2x256xf32>
      tpu.vector_store %arg6[%c0_13, %c0_14], %17 {strides = array<i32>} : memref<2x256xf32, #tpu.memory_space<vmem>>, vector<2x256xf32>,
    } else {
    }
    %c0_i32_2 = arith.constant 0 : i32
    %5 = arith.cmpi eq, %arg1, %c0_i32_2 : i32
    %6 = arith.extui %5 : i1 to i32
    %c0_i32_3 = arith.constant 0 : i32
    %7 = arith.cmpi ne, %6, %c0_i32_3 : i32
    scf.if %7 {
      %cst_12 = arith.constant 0.000000e+00 : f32
      %17 = vector.broadcast %cst_12 : f32 to vector<128x256xf32>
      %c0_13 = arith.constant 0 : index
      %c0_14 = arith.constant 0 : index
      %18 = vector.load %arg7[%c0_13, %c0_14] : memref<128x256xf32, #tpu.memory_space<vmem>>, vector<128x256xf32>
      tpu.vector_store %arg7[%c0_13, %c0_14], %17 {strides = array<i32>} : memref<128x256xf32, #tpu.memory_space<vmem>>, vector<128x256xf32>,
    } else {
    }
    %c0 = arith.constant 0 : index
    %c0_4 = arith.constant 0 : index
    %8 = vector.load %arg7[%c0, %c0_4] : memref<128x256xf32, #tpu.memory_space<vmem>>, vector<128x256xf32>
    %c0_5 = arith.constant 0 : index
    %c0_6 = arith.constant 0 : index
    %9 = vector.load %arg2[%c0_5, %c0_6] : memref<128x512xbf16, #tpu.memory_space<vmem>>, vector<128x512xbf16>
    %c0_7 = arith.constant 0 : index
    %c0_8 = arith.constant 0 : index
    %10 = vector.load %arg3[%c0_7, %c0_8] : memref<512x256xbf16, #tpu.memory_space<vmem>>, vector<512x256xbf16>
    %cst = arith.constant dense<0.000000e+00> : vector<128x256xf32>
    %11 = tpu.matmul %9, %10, %cst {dimension_numbers = #tpu.dot_dimension_numbers<[1], [0], [0], [1], [0, 0, 1, 1], [], []>} : vector<128x512xbf16>, vector<512x256xbf16>, vector<128x256xf32> -> vector<128x256xf32>
    %12 = arith.addf %8, %11 : vector<128x256xf32>
    %c0_9 = arith.constant 0 : index
    %c0_10 = arith.constant 0 : index
    %13 = vector.load %arg7[%c0_9, %c0_10] : memref<128x256xf32, #tpu.memory_space<vmem>>, vector<128x256xf32>
    tpu.vector_store %arg7[%c0_9, %c0_10], %12 {strides = array<i32>} : memref<128x256xf32, #tpu.memory_space<vmem>>, vector<128x256xf32>,
    %c3_i32 = arith.constant 3 : i32
    %14 = arith.cmpi eq, %arg1, %c3_i32 : i32
    %15 = arith.extui %14 : i1 to i32
    %c0_i32_11 = arith.constant 0 : i32
    %16 = arith.cmpi ne, %15, %c0_i32_11 : i32
    scf.if %16 {
      %c0_12 = arith.constant 0 : index
      %c0_13 = arith.constant 0 : index
      %17 = vector.load %arg7[%c0_12, %c0_13] : memref<128x256xf32, #tpu.memory_space<vmem>>, vector<128x256xf32>
      %c0_14 = arith.constant 0 : index
      %c0_15 = arith.constant 0 : index
      %18 = vector.load %arg4[%c0_14, %c0_15] : memref<1x256xf32, #tpu.memory_space<vmem>>, vector<1x256xf32>
      %19 = vector.broadcast %18 : vector<1x256xf32> to vector<128x256xf32>
      %20 = arith.addf %17, %19 : vector<128x256xf32>
      %c0_16 = arith.constant 0 : index
      %c0_17 = arith.constant 0 : index
      %21 = vector.load %arg5[%c0_16, %c0_17] : memref<128x256xf32, #tpu.memory_space<vmem>>, vector<128x256xf32>
      tpu.vector_store %arg5[%c0_16, %c0_17], %20 {strides = array<i32>} : memref<128x256xf32, #tpu.memory_space<vmem>>, vector<128x256xf32>,
      %c128_i32 = arith.constant 128 : i32
      %22 = arith.muli %arg0, %c128_i32 : i32
      %23 = tpu.iota {dimensions = array<i32: 0>} : vector<128x256xi32>
      %24 = vector.broadcast %22 : i32 to vector<128x256xi32>
      %25 = arith.addi %24, %23 : vector<128x256xi32>
      %c128_i32_18 = arith.constant 128 : i32
      %26 = vector.broadcast %c128_i32_18 : i32 to vector<128x256xi32>
      %27 = arith.cmpi slt, %25, %26 : vector<128x256xi32>
      %cst_19 = arith.constant 0.000000e+00 : f32
      %28 = vector.broadcast %cst_19 : f32 to vector<128x256xf32>
      %29 = arith.select %27, %20, %28 : vector<128x256xi1>, vector<128x256xf32>
      %cst_20 = arith.constant dense<0.000000e+00> : vector<256xf32>
      %30 = vector.multi_reduction <add>, %29, %cst_20 [0] : vector<128x256xf32> to vector<256xf32>
      %31 = vector.shape_cast %30 : vector<256xf32> to vector<1x256xf32>
      %32 = arith.mulf %29, %29 : vector<128x256xf32>
      %cst_21 = arith.constant dense<0.000000e+00> : vector<256xf32>
      %33 = vector.multi_reduction <add>, %32, %cst_21 [0] : vector<128x256xf32> to vector<256xf32>
      %34 = vector.shape_cast %33 : vector<256xf32> to vector<1x256xf32>
      %35 = tpu.concatenate %31, %34 in 0 : vector<1x256xf32>, vector<1x256xf32> -> vector<2x256xf32>
      %c0_22 = arith.constant 0 : index
      %c0_23 = arith.constant 0 : index
      %36 = vector.load %arg6[%c0_22, %c0_23] : memref<2x256xf32, #tpu.memory_space<vmem>>, vector<2x256xf32>
      %37 = arith.addf %36, %35 : vector<2x256xf32>
      %c0_24 = arith.constant 0 : index
      %c0_25 = arith.constant 0 : index
      %38 = vector.load %arg6[%c0_24, %c0_25] : memref<2x256xf32, #tpu.memory_space<vmem>>, vector<2x256xf32>
      tpu.vector_store %arg6[%c0_24, %c0_25], %37 {strides = array<i32>} : memref<2x256xf32, #tpu.memory_space<vmem>>, vector<2x256xf32>,
    } else {
    }
    return
  }
  func.func @transform_0(%arg0: i32, %arg1: i32) -> (i32, i32) {
    %c0_i32 = arith.constant 0 : i32
    return %arg0, %arg1 : i32, i32
  }
  func.func @transform_1(%arg0: i32, %arg1: i32) -> (i32, i32) {
    %c0_i32 = arith.constant 0 : i32
    %c0_i32_0 = arith.constant 0 : i32
    return %arg1, %c0_i32 : i32, i32
  }
  func.func @transform_2(%arg0: i32, %arg1: i32) -> (i32, i32) {
    %c0_i32 = arith.constant 0 : i32
    %c0_i32_0 = arith.constant 0 : i32
    %c0_i32_1 = arith.constant 0 : i32
    return %c0_i32, %c0_i32_0 : i32, i32
  }
  func.func @transform_3(%arg0: i32, %arg1: i32) -> (i32, i32) {
    %c0_i32 = arith.constant 0 : i32
    %c0_i32_0 = arith.constant 0 : i32
    return %arg0, %c0_i32 : i32, i32
  }
  func.func @transform_4(%arg0: i32, %arg1: i32) -> (i32, i32) {
    %c0_i32 = arith.constant 0 : i32
    %c0_i32_0 = arith.constant 0 : i32
    %c0_i32_1 = arith.constant 0 : i32
    return %c0_i32, %c0_i32_0 : i32, i32
  }
}

module attributes {stable_mosaic.version = 11 : i64} {
  func.func @_bn_lrelu_kernel(%arg0: i32, %arg1: memref<128x256xf32, #tpu.memory_space<vmem>>, %arg2: memref<2x256xf32, #tpu.memory_space<vmem>>, %arg3: memref<1x256xf32, #tpu.memory_space<vmem>>, %arg4: memref<1x256xf32, #tpu.memory_space<vmem>>, %arg5: memref<128x256xf32, #tpu.memory_space<vmem>>) attributes {dimension_semantics = [#tpu.dimension_semantics<parallel>], iteration_bounds = array<i64: 1>, scalar_prefetch = 0 : i64, scratch_operands = 0 : i64, tpu.core_type = #tpu.core_type<tc>, window_params = [{transform_indices = @transform_0, window_bounds = array<i64: 128, 256>}, {pipeline_mode = #tpu.pipeline_mode<synchronous>, transform_indices = @transform_1, window_bounds = array<i64: 2, 256>}, {pipeline_mode = #tpu.pipeline_mode<synchronous>, transform_indices = @transform_2, window_bounds = array<i64: 1, 256>}, {pipeline_mode = #tpu.pipeline_mode<synchronous>, transform_indices = @transform_3, window_bounds = array<i64: 1, 256>}, {transform_indices = @transform_4, window_bounds = array<i64: 128, 256>}]} {
    %c0 = arith.constant 0 : index
    %c0_0 = arith.constant 0 : index
    %0 = vector.load %arg2[%c0, %c0_0] : memref<2x256xf32, #tpu.memory_space<vmem>>, vector<1x256xf32>
    %cst = arith.constant 7.812500e-03 : f32
    %1 = vector.broadcast %cst : f32 to vector<1x256xf32>
    %2 = arith.mulf %0, %1 : vector<1x256xf32>
    %c1 = arith.constant 1 : index
    %c0_1 = arith.constant 0 : index
    %3 = vector.load %arg2[%c1, %c0_1] : memref<2x256xf32, #tpu.memory_space<vmem>>, vector<1x256xf32>
    %cst_2 = arith.constant 7.812500e-03 : f32
    %4 = vector.broadcast %cst_2 : f32 to vector<1x256xf32>
    %5 = arith.mulf %3, %4 : vector<1x256xf32>
    %6 = arith.mulf %2, %2 : vector<1x256xf32>
    %7 = arith.subf %5, %6 : vector<1x256xf32>
    %cst_3 = arith.constant 0.000000e+00 : f32
    %8 = vector.broadcast %cst_3 : f32 to vector<1x256xf32>
    %9 = arith.maximumf %7, %8 : vector<1x256xf32>
    %cst_4 = arith.constant 9.99999974E-6 : f32
    %10 = vector.broadcast %cst_4 : f32 to vector<1x256xf32>
    %11 = arith.addf %9, %10 : vector<1x256xf32>
    %12 = math.rsqrt %11 : vector<1x256xf32>
    %c0_5 = arith.constant 0 : index
    %c0_6 = arith.constant 0 : index
    %13 = vector.load %arg3[%c0_5, %c0_6] : memref<1x256xf32, #tpu.memory_space<vmem>>, vector<1x256xf32>
    %14 = arith.mulf %12, %13 : vector<1x256xf32>
    %c0_7 = arith.constant 0 : index
    %c0_8 = arith.constant 0 : index
    %15 = vector.load %arg1[%c0_7, %c0_8] : memref<128x256xf32, #tpu.memory_space<vmem>>, vector<128x256xf32>
    %16 = vector.broadcast %2 : vector<1x256xf32> to vector<128x256xf32>
    %17 = arith.subf %15, %16 : vector<128x256xf32>
    %18 = vector.broadcast %14 : vector<1x256xf32> to vector<128x256xf32>
    %19 = arith.mulf %17, %18 : vector<128x256xf32>
    %c0_9 = arith.constant 0 : index
    %c0_10 = arith.constant 0 : index
    %20 = vector.load %arg4[%c0_9, %c0_10] : memref<1x256xf32, #tpu.memory_space<vmem>>, vector<1x256xf32>
    %21 = vector.broadcast %20 : vector<1x256xf32> to vector<128x256xf32>
    %22 = arith.addf %19, %21 : vector<128x256xf32>
    %cst_11 = arith.constant 2.000000e-01 : f32
    %23 = vector.broadcast %cst_11 : f32 to vector<128x256xf32>
    %24 = arith.mulf %23, %22 : vector<128x256xf32>
    %25 = arith.maximumf %22, %24 : vector<128x256xf32>
    %c0_12 = arith.constant 0 : index
    %c0_13 = arith.constant 0 : index
    %26 = vector.load %arg5[%c0_12, %c0_13] : memref<128x256xf32, #tpu.memory_space<vmem>>, vector<128x256xf32>
    tpu.vector_store %arg5[%c0_12, %c0_13], %25 {strides = array<i32>} : memref<128x256xf32, #tpu.memory_space<vmem>>, vector<128x256xf32>,
    return
  }
  func.func @transform_0(%arg0: i32) -> (i32, i32) {
    %c0_i32 = arith.constant 0 : i32
    %c0_i32_0 = arith.constant 0 : i32
    return %arg0, %c0_i32 : i32, i32
  }
  func.func @transform_1(%arg0: i32) -> (i32, i32) {
    %c0_i32 = arith.constant 0 : i32
    %c0_i32_0 = arith.constant 0 : i32
    %c0_i32_1 = arith.constant 0 : i32
    return %c0_i32, %c0_i32_0 : i32, i32
  }
  func.func @transform_2(%arg0: i32) -> (i32, i32) {
    %c0_i32 = arith.constant 0 : i32
    %c0_i32_0 = arith.constant 0 : i32
    %c0_i32_1 = arith.constant 0 : i32
    return %c0_i32, %c0_i32_0 : i32, i32
  }
  func.func @transform_3(%arg0: i32) -> (i32, i32) {
    %c0_i32 = arith.constant 0 : i32
    %c0_i32_0 = arith.constant 0 : i32
    %c0_i32_1 = arith.constant 0 : i32
    return %c0_i32, %c0_i32_0 : i32, i32
  }
  func.func @transform_4(%arg0: i32) -> (i32, i32) {
    %c0_i32 = arith.constant 0 : i32
    %c0_i32_0 = arith.constant 0 : i32
    return %arg0, %c0_i32 : i32, i32
  }
}

module attributes {stable_mosaic.version = 11 : i64} {
  func.func @_bn_lrelu_kernel(%arg0: i32, %arg1: memref<32x512xf32, #tpu.memory_space<vmem>>, %arg2: memref<2x512xf32, #tpu.memory_space<vmem>>, %arg3: memref<1x512xf32, #tpu.memory_space<vmem>>, %arg4: memref<1x512xf32, #tpu.memory_space<vmem>>, %arg5: memref<32x512xf32, #tpu.memory_space<vmem>>) attributes {dimension_semantics = [#tpu.dimension_semantics<parallel>], iteration_bounds = array<i64: 1>, scalar_prefetch = 0 : i64, scratch_operands = 0 : i64, tpu.core_type = #tpu.core_type<tc>, window_params = [{transform_indices = @transform_0, window_bounds = array<i64: 32, 512>}, {pipeline_mode = #tpu.pipeline_mode<synchronous>, transform_indices = @transform_1, window_bounds = array<i64: 2, 512>}, {pipeline_mode = #tpu.pipeline_mode<synchronous>, transform_indices = @transform_2, window_bounds = array<i64: 1, 512>}, {pipeline_mode = #tpu.pipeline_mode<synchronous>, transform_indices = @transform_3, window_bounds = array<i64: 1, 512>}, {transform_indices = @transform_4, window_bounds = array<i64: 32, 512>}]} {
    %c0 = arith.constant 0 : index
    %c0_0 = arith.constant 0 : index
    %0 = vector.load %arg2[%c0, %c0_0] : memref<2x512xf32, #tpu.memory_space<vmem>>, vector<1x512xf32>
    %cst = arith.constant 3.125000e-02 : f32
    %1 = vector.broadcast %cst : f32 to vector<1x512xf32>
    %2 = arith.mulf %0, %1 : vector<1x512xf32>
    %c1 = arith.constant 1 : index
    %c0_1 = arith.constant 0 : index
    %3 = vector.load %arg2[%c1, %c0_1] : memref<2x512xf32, #tpu.memory_space<vmem>>, vector<1x512xf32>
    %cst_2 = arith.constant 3.125000e-02 : f32
    %4 = vector.broadcast %cst_2 : f32 to vector<1x512xf32>
    %5 = arith.mulf %3, %4 : vector<1x512xf32>
    %6 = arith.mulf %2, %2 : vector<1x512xf32>
    %7 = arith.subf %5, %6 : vector<1x512xf32>
    %cst_3 = arith.constant 0.000000e+00 : f32
    %8 = vector.broadcast %cst_3 : f32 to vector<1x512xf32>
    %9 = arith.maximumf %7, %8 : vector<1x512xf32>
    %cst_4 = arith.constant 9.99999974E-6 : f32
    %10 = vector.broadcast %cst_4 : f32 to vector<1x512xf32>
    %11 = arith.addf %9, %10 : vector<1x512xf32>
    %12 = math.rsqrt %11 : vector<1x512xf32>
    %c0_5 = arith.constant 0 : index
    %c0_6 = arith.constant 0 : index
    %13 = vector.load %arg3[%c0_5, %c0_6] : memref<1x512xf32, #tpu.memory_space<vmem>>, vector<1x512xf32>
    %14 = arith.mulf %12, %13 : vector<1x512xf32>
    %c0_7 = arith.constant 0 : index
    %c0_8 = arith.constant 0 : index
    %15 = vector.load %arg1[%c0_7, %c0_8] : memref<32x512xf32, #tpu.memory_space<vmem>>, vector<32x512xf32>
    %16 = vector.broadcast %2 : vector<1x512xf32> to vector<32x512xf32>
    %17 = arith.subf %15, %16 : vector<32x512xf32>
    %18 = vector.broadcast %14 : vector<1x512xf32> to vector<32x512xf32>
    %19 = arith.mulf %17, %18 : vector<32x512xf32>
    %c0_9 = arith.constant 0 : index
    %c0_10 = arith.constant 0 : index
    %20 = vector.load %arg4[%c0_9, %c0_10] : memref<1x512xf32, #tpu.memory_space<vmem>>, vector<1x512xf32>
    %21 = vector.broadcast %20 : vector<1x512xf32> to vector<32x512xf32>
    %22 = arith.addf %19, %21 : vector<32x512xf32>
    %cst_11 = arith.constant 2.000000e-01 : f32
    %23 = vector.broadcast %cst_11 : f32 to vector<32x512xf32>
    %24 = arith.mulf %23, %22 : vector<32x512xf32>
    %25 = arith.maximumf %22, %24 : vector<32x512xf32>
    %c0_12 = arith.constant 0 : index
    %c0_13 = arith.constant 0 : index
    %26 = vector.load %arg5[%c0_12, %c0_13] : memref<32x512xf32, #tpu.memory_space<vmem>>, vector<32x512xf32>
    tpu.vector_store %arg5[%c0_12, %c0_13], %25 {strides = array<i32>} : memref<32x512xf32, #tpu.memory_space<vmem>>, vector<32x512xf32>,
    return
  }
  func.func @transform_0(%arg0: i32) -> (i32, i32) {
    %c0_i32 = arith.constant 0 : i32
    %c0_i32_0 = arith.constant 0 : i32
    return %arg0, %c0_i32 : i32, i32
  }
  func.func @transform_1(%arg0: i32) -> (i32, i32) {
    %c0_i32 = arith.constant 0 : i32
    %c0_i32_0 = arith.constant 0 : i32
    %c0_i32_1 = arith.constant 0 : i32
    return %c0_i32, %c0_i32_0 : i32, i32
  }
  func.func @transform_2(%arg0: i32) -> (i32, i32) {
    %c0_i32 = arith.constant 0 : i32
    %c0_i32_0 = arith.constant 0 : i32
    %c0_i32_1 = arith.constant 0 : i32
    return %c0_i32, %c0_i32_0 : i32, i32
  }
  func.func @transform_3(%arg0: i32) -> (i32, i32) {
    %c0_i32 = arith.constant 0 : i32
    %c0_i32_0 = arith.constant 0 : i32
    %c0_i32_1 = arith.constant 0 : i32
    return %c0_i32, %c0_i32_0 : i32, i32
  }
  func.func @transform_4(%arg0: i32) -> (i32, i32) {
    %c0_i32 = arith.constant 0 : i32
    %c0_i32_0 = arith.constant 0 : i32
    return %arg0, %c0_i32 : i32, i32
  }
}

module attributes {stable_mosaic.version = 11 : i64} {
  func.func @_conv_mm_stats_kernel(%arg0: i32, %arg1: i32, %arg2: memref<32x512xbf16, #tpu.memory_space<vmem>>, %arg3: memref<512x512xbf16, #tpu.memory_space<vmem>>, %arg4: memref<1x512xf32, #tpu.memory_space<vmem>>, %arg5: memref<32x512xf32, #tpu.memory_space<vmem>>, %arg6: memref<2x512xf32, #tpu.memory_space<vmem>>, %arg7: memref<32x512xf32, #tpu.memory_space<vmem>>) attributes {dimension_semantics = [#tpu.dimension_semantics<arbitrary>, #tpu.dimension_semantics<arbitrary>], iteration_bounds = array<i64: 1, 8>, scalar_prefetch = 0 : i64, scratch_operands = 1 : i64, tpu.core_type = #tpu.core_type<tc>, window_params = [{transform_indices = @transform_0, window_bounds = array<i64: 32, 512>}, {transform_indices = @transform_1, window_bounds = array<i64: 512, 512>}, {pipeline_mode = #tpu.pipeline_mode<synchronous>, transform_indices = @transform_2, window_bounds = array<i64: 1, 512>}, {transform_indices = @transform_3, window_bounds = array<i64: 32, 512>}, {pipeline_mode = #tpu.pipeline_mode<synchronous>, transform_indices = @transform_4, window_bounds = array<i64: 2, 512>}]} {
    %c0_i32 = arith.constant 0 : i32
    %0 = arith.cmpi eq, %arg0, %c0_i32 : i32
    %c0_i32_0 = arith.constant 0 : i32
    %1 = arith.cmpi eq, %arg1, %c0_i32_0 : i32
    %2 = arith.andi %0, %1 : i1
    %3 = arith.extui %2 : i1 to i32
    %c0_i32_1 = arith.constant 0 : i32
    %4 = arith.cmpi ne, %3, %c0_i32_1 : i32
    scf.if %4 {
      %cst_12 = arith.constant 0.000000e+00 : f32
      %17 = vector.broadcast %cst_12 : f32 to vector<2x512xf32>
      %c0_13 = arith.constant 0 : index
      %c0_14 = arith.constant 0 : index
      %18 = vector.load %arg6[%c0_13, %c0_14] : memref<2x512xf32, #tpu.memory_space<vmem>>, vector<2x512xf32>
      tpu.vector_store %arg6[%c0_13, %c0_14], %17 {strides = array<i32>} : memref<2x512xf32, #tpu.memory_space<vmem>>, vector<2x512xf32>,
    } else {
    }
    %c0_i32_2 = arith.constant 0 : i32
    %5 = arith.cmpi eq, %arg1, %c0_i32_2 : i32
    %6 = arith.extui %5 : i1 to i32
    %c0_i32_3 = arith.constant 0 : i32
    %7 = arith.cmpi ne, %6, %c0_i32_3 : i32
    scf.if %7 {
      %cst_12 = arith.constant 0.000000e+00 : f32
      %17 = vector.broadcast %cst_12 : f32 to vector<32x512xf32>
      %c0_13 = arith.constant 0 : index
      %c0_14 = arith.constant 0 : index
      %18 = vector.load %arg7[%c0_13, %c0_14] : memref<32x512xf32, #tpu.memory_space<vmem>>, vector<32x512xf32>
      tpu.vector_store %arg7[%c0_13, %c0_14], %17 {strides = array<i32>} : memref<32x512xf32, #tpu.memory_space<vmem>>, vector<32x512xf32>,
    } else {
    }
    %c0 = arith.constant 0 : index
    %c0_4 = arith.constant 0 : index
    %8 = vector.load %arg7[%c0, %c0_4] : memref<32x512xf32, #tpu.memory_space<vmem>>, vector<32x512xf32>
    %c0_5 = arith.constant 0 : index
    %c0_6 = arith.constant 0 : index
    %9 = vector.load %arg2[%c0_5, %c0_6] : memref<32x512xbf16, #tpu.memory_space<vmem>>, vector<32x512xbf16>
    %c0_7 = arith.constant 0 : index
    %c0_8 = arith.constant 0 : index
    %10 = vector.load %arg3[%c0_7, %c0_8] : memref<512x512xbf16, #tpu.memory_space<vmem>>, vector<512x512xbf16>
    %cst = arith.constant dense<0.000000e+00> : vector<32x512xf32>
    %11 = tpu.matmul %9, %10, %cst {dimension_numbers = #tpu.dot_dimension_numbers<[1], [0], [0], [1], [0, 0, 1, 1], [], []>} : vector<32x512xbf16>, vector<512x512xbf16>, vector<32x512xf32> -> vector<32x512xf32>
    %12 = arith.addf %8, %11 : vector<32x512xf32>
    %c0_9 = arith.constant 0 : index
    %c0_10 = arith.constant 0 : index
    %13 = vector.load %arg7[%c0_9, %c0_10] : memref<32x512xf32, #tpu.memory_space<vmem>>, vector<32x512xf32>
    tpu.vector_store %arg7[%c0_9, %c0_10], %12 {strides = array<i32>} : memref<32x512xf32, #tpu.memory_space<vmem>>, vector<32x512xf32>,
    %c7_i32 = arith.constant 7 : i32
    %14 = arith.cmpi eq, %arg1, %c7_i32 : i32
    %15 = arith.extui %14 : i1 to i32
    %c0_i32_11 = arith.constant 0 : i32
    %16 = arith.cmpi ne, %15, %c0_i32_11 : i32
    scf.if %16 {
      %c0_12 = arith.constant 0 : index
      %c0_13 = arith.constant 0 : index
      %17 = vector.load %arg7[%c0_12, %c0_13] : memref<32x512xf32, #tpu.memory_space<vmem>>, vector<32x512xf32>
      %c0_14 = arith.constant 0 : index
      %c0_15 = arith.constant 0 : index
      %18 = vector.load %arg4[%c0_14, %c0_15] : memref<1x512xf32, #tpu.memory_space<vmem>>, vector<1x512xf32>
      %19 = vector.broadcast %18 : vector<1x512xf32> to vector<32x512xf32>
      %20 = arith.addf %17, %19 : vector<32x512xf32>
      %c0_16 = arith.constant 0 : index
      %c0_17 = arith.constant 0 : index
      %21 = vector.load %arg5[%c0_16, %c0_17] : memref<32x512xf32, #tpu.memory_space<vmem>>, vector<32x512xf32>
      tpu.vector_store %arg5[%c0_16, %c0_17], %20 {strides = array<i32>} : memref<32x512xf32, #tpu.memory_space<vmem>>, vector<32x512xf32>,
      %c32_i32 = arith.constant 32 : i32
      %22 = arith.muli %arg0, %c32_i32 : i32
      %23 = tpu.iota {dimensions = array<i32: 0>} : vector<32x512xi32>
      %24 = vector.broadcast %22 : i32 to vector<32x512xi32>
      %25 = arith.addi %24, %23 : vector<32x512xi32>
      %c32_i32_18 = arith.constant 32 : i32
      %26 = vector.broadcast %c32_i32_18 : i32 to vector<32x512xi32>
      %27 = arith.cmpi slt, %25, %26 : vector<32x512xi32>
      %cst_19 = arith.constant 0.000000e+00 : f32
      %28 = vector.broadcast %cst_19 : f32 to vector<32x512xf32>
      %29 = arith.select %27, %20, %28 : vector<32x512xi1>, vector<32x512xf32>
      %cst_20 = arith.constant dense<0.000000e+00> : vector<512xf32>
      %30 = vector.multi_reduction <add>, %29, %cst_20 [0] : vector<32x512xf32> to vector<512xf32>
      %31 = vector.shape_cast %30 : vector<512xf32> to vector<1x512xf32>
      %32 = arith.mulf %29, %29 : vector<32x512xf32>
      %cst_21 = arith.constant dense<0.000000e+00> : vector<512xf32>
      %33 = vector.multi_reduction <add>, %32, %cst_21 [0] : vector<32x512xf32> to vector<512xf32>
      %34 = vector.shape_cast %33 : vector<512xf32> to vector<1x512xf32>
      %35 = tpu.concatenate %31, %34 in 0 : vector<1x512xf32>, vector<1x512xf32> -> vector<2x512xf32>
      %c0_22 = arith.constant 0 : index
      %c0_23 = arith.constant 0 : index
      %36 = vector.load %arg6[%c0_22, %c0_23] : memref<2x512xf32, #tpu.memory_space<vmem>>, vector<2x512xf32>
      %37 = arith.addf %36, %35 : vector<2x512xf32>
      %c0_24 = arith.constant 0 : index
      %c0_25 = arith.constant 0 : index
      %38 = vector.load %arg6[%c0_24, %c0_25] : memref<2x512xf32, #tpu.memory_space<vmem>>, vector<2x512xf32>
      tpu.vector_store %arg6[%c0_24, %c0_25], %37 {strides = array<i32>} : memref<2x512xf32, #tpu.memory_space<vmem>>, vector<2x512xf32>,
    } else {
    }
    return
  }
  func.func @transform_0(%arg0: i32, %arg1: i32) -> (i32, i32) {
    %c0_i32 = arith.constant 0 : i32
    return %arg0, %arg1 : i32, i32
  }
  func.func @transform_1(%arg0: i32, %arg1: i32) -> (i32, i32) {
    %c0_i32 = arith.constant 0 : i32
    %c0_i32_0 = arith.constant 0 : i32
    return %arg1, %c0_i32 : i32, i32
  }
  func.func @transform_2(%arg0: i32, %arg1: i32) -> (i32, i32) {
    %c0_i32 = arith.constant 0 : i32
    %c0_i32_0 = arith.constant 0 : i32
    %c0_i32_1 = arith.constant 0 : i32
    return %c0_i32, %c0_i32_0 : i32, i32
  }
  func.func @transform_3(%arg0: i32, %arg1: i32) -> (i32, i32) {
    %c0_i32 = arith.constant 0 : i32
    %c0_i32_0 = arith.constant 0 : i32
    return %arg0, %c0_i32 : i32, i32
  }
  func.func @transform_4(%arg0: i32, %arg1: i32) -> (i32, i32) {
    %c0_i32 = arith.constant 0 : i32
    %c0_i32_0 = arith.constant 0 : i32
    %c0_i32_1 = arith.constant 0 : i32
    return %c0_i32, %c0_i32_0 : i32, i32
  }
}

module attributes {stable_mosaic.version = 11 : i64} {
  func.func @_conv_mm_kernel(%arg0: i32, %arg1: i32, %arg2: memref<32x512xbf16, #tpu.memory_space<vmem>>, %arg3: memref<512x128xbf16, #tpu.memory_space<vmem>>, %arg4: memref<1x128xf32, #tpu.memory_space<vmem>>, %arg5: memref<32x128xf32, #tpu.memory_space<vmem>>, %arg6: memref<32x128xf32, #tpu.memory_space<vmem>>) attributes {dimension_semantics = [#tpu.dimension_semantics<parallel>, #tpu.dimension_semantics<arbitrary>], iteration_bounds = array<i64: 1, 16>, scalar_prefetch = 0 : i64, scratch_operands = 1 : i64, tpu.core_type = #tpu.core_type<tc>, window_params = [{transform_indices = @transform_0, window_bounds = array<i64: 32, 512>}, {transform_indices = @transform_1, window_bounds = array<i64: 512, 128>}, {pipeline_mode = #tpu.pipeline_mode<synchronous>, transform_indices = @transform_2, window_bounds = array<i64: 1, 128>}, {transform_indices = @transform_3, window_bounds = array<i64: 32, 128>}]} {
    %c0_i32 = arith.constant 0 : i32
    %0 = arith.cmpi eq, %arg1, %c0_i32 : i32
    %1 = arith.extui %0 : i1 to i32
    %c0_i32_0 = arith.constant 0 : i32
    %2 = arith.cmpi ne, %1, %c0_i32_0 : i32
    scf.if %2 {
      %cst_9 = arith.constant 0.000000e+00 : f32
      %12 = vector.broadcast %cst_9 : f32 to vector<32x128xf32>
      %c0_10 = arith.constant 0 : index
      %c0_11 = arith.constant 0 : index
      %13 = vector.load %arg6[%c0_10, %c0_11] : memref<32x128xf32, #tpu.memory_space<vmem>>, vector<32x128xf32>
      tpu.vector_store %arg6[%c0_10, %c0_11], %12 {strides = array<i32>} : memref<32x128xf32, #tpu.memory_space<vmem>>, vector<32x128xf32>,
    } else {
    }
    %c0 = arith.constant 0 : index
    %c0_1 = arith.constant 0 : index
    %3 = vector.load %arg6[%c0, %c0_1] : memref<32x128xf32, #tpu.memory_space<vmem>>, vector<32x128xf32>
    %c0_2 = arith.constant 0 : index
    %c0_3 = arith.constant 0 : index
    %4 = vector.load %arg2[%c0_2, %c0_3] : memref<32x512xbf16, #tpu.memory_space<vmem>>, vector<32x512xbf16>
    %c0_4 = arith.constant 0 : index
    %c0_5 = arith.constant 0 : index
    %5 = vector.load %arg3[%c0_4, %c0_5] : memref<512x128xbf16, #tpu.memory_space<vmem>>, vector<512x128xbf16>
    %cst = arith.constant dense<0.000000e+00> : vector<32x128xf32>
    %6 = tpu.matmul %4, %5, %cst {dimension_numbers = #tpu.dot_dimension_numbers<[1], [0], [0], [1], [0, 0, 1, 1], [], []>} : vector<32x512xbf16>, vector<512x128xbf16>, vector<32x128xf32> -> vector<32x128xf32>
    %7 = arith.addf %3, %6 : vector<32x128xf32>
    %c0_6 = arith.constant 0 : index
    %c0_7 = arith.constant 0 : index
    %8 = vector.load %arg6[%c0_6, %c0_7] : memref<32x128xf32, #tpu.memory_space<vmem>>, vector<32x128xf32>
    tpu.vector_store %arg6[%c0_6, %c0_7], %7 {strides = array<i32>} : memref<32x128xf32, #tpu.memory_space<vmem>>, vector<32x128xf32>,
    %c15_i32 = arith.constant 15 : i32
    %9 = arith.cmpi eq, %arg1, %c15_i32 : i32
    %10 = arith.extui %9 : i1 to i32
    %c0_i32_8 = arith.constant 0 : i32
    %11 = arith.cmpi ne, %10, %c0_i32_8 : i32
    scf.if %11 {
      %c0_9 = arith.constant 0 : index
      %c0_10 = arith.constant 0 : index
      %12 = vector.load %arg6[%c0_9, %c0_10] : memref<32x128xf32, #tpu.memory_space<vmem>>, vector<32x128xf32>
      %c0_11 = arith.constant 0 : index
      %c0_12 = arith.constant 0 : index
      %13 = vector.load %arg4[%c0_11, %c0_12] : memref<1x128xf32, #tpu.memory_space<vmem>>, vector<1x128xf32>
      %14 = vector.broadcast %13 : vector<1x128xf32> to vector<32x128xf32>
      %15 = arith.addf %12, %14 : vector<32x128xf32>
      %c0_13 = arith.constant 0 : index
      %c0_14 = arith.constant 0 : index
      %16 = vector.load %arg5[%c0_13, %c0_14] : memref<32x128xf32, #tpu.memory_space<vmem>>, vector<32x128xf32>
      tpu.vector_store %arg5[%c0_13, %c0_14], %15 {strides = array<i32>} : memref<32x128xf32, #tpu.memory_space<vmem>>, vector<32x128xf32>,
    } else {
    }
    return
  }
  func.func @transform_0(%arg0: i32, %arg1: i32) -> (i32, i32) {
    %c0_i32 = arith.constant 0 : i32
    return %arg0, %arg1 : i32, i32
  }
  func.func @transform_1(%arg0: i32, %arg1: i32) -> (i32, i32) {
    %c0_i32 = arith.constant 0 : i32
    %c0_i32_0 = arith.constant 0 : i32
    return %arg1, %c0_i32 : i32, i32
  }
  func.func @transform_2(%arg0: i32, %arg1: i32) -> (i32, i32) {
    %c0_i32 = arith.constant 0 : i32
    %c0_i32_0 = arith.constant 0 : i32
    %c0_i32_1 = arith.constant 0 : i32
    return %c0_i32, %c0_i32_0 : i32, i32
  }
  func.func @transform_3(%arg0: i32, %arg1: i32) -> (i32, i32) {
    %c0_i32 = arith.constant 0 : i32
    %c0_i32_0 = arith.constant 0 : i32
    return %arg0, %c0_i32 : i32, i32
  }
}

</mosaic_0001>

<bundles_post_ra>
// kernel: patch_discriminator.8
= control target key start
LH: loop header
LB: loop body
LE: loop exit
PB: predicated region body
PF: predicated region fallthrough
CT: control target
= control target key end

     0   :  { %s1049_s12 = smov 0   ;;  %s1051_s13 = smov 0   ;;  %s1213_s0 = inlined_call_operand.vmem [shape: bf16[2048,256], index: 0, kind: input, shape index: {}]   ;;  %s1214_s1 = inlined_call_operand.vmem [shape: bf16[256,128], index: 1, kind: input, shape index: {}]   ;;  %s1215_s2 = inlined_call_operand.vmem [shape: f32[1,128], index: 2, kind: input, shape index: {}]   ;;  %s1216_s3 = inlined_call_operand.vmem [shape: f32[2048,128], index: 3, kind: output, shape index: {}]  }
   0x1   :  { %s1053_s14 = smov 0  }
   0x2 LB: > { %s25_s15 = sadd.s32 1, %s1023_s13  ;;  %p795_p0 = scmp.ge.s32.totalorder %s1027_s14, 1  ;;  %s1027_s14 = sphi %s1053_s14, %s13_s14   ;;  %s1023_s13 = sphi %s1051_s13, %s1218_s13   ;;  %s1019_s12 = sphi %s1049_s12, %s1217_s12  }
   0x3   : > { %p27_p1 = scmp.ge.s32.totalorder %s25_s15, 16  ;;  %p169_p2 = scmp.lt.s32.totalorder %s1027_s14, 17 }
   0x5   : > { %s1220_s15 = smov (%p27_p1, %s25_s15), 0  ;;  %p170_p3 = pnand %p795_p0, %p169_p2 }
   0x6   : > { %s796_s28 = sshll.u32 (!%p170_p3), %s1019_s12, 4 }
   0x7   : > { %173 = sbr.rel (%p170_p3) target bundleno = 242 (0xf2), region = 32  ;;  %p205_p4 = scmp.lt.s32.totalorder (!%p170_p3), %s796_s28, 255 }
   0xc   : > { %v955_v0 = vld [vmem:[%s1214_s1 + $0x38] sm:$0xff]  ;;  %v954_v2 = vld [vmem:[%s1214_s1 + $0x30] sm:$0xff]  ;;  %v953_v4 = vld [vmem:[%s1214_s1 + $0x28] sm:$0xff]  ;;  %s1222_s28 = smov (!%p205_p4, %s796_s28), 255 }
   0xd   : > { %v963_v1 = vld [vmem:[%s1214_s1 + $0x78] sm:$0xff]  ;;  %487 = vmatpush.bf16.msra.mxu0 %v955_v0  ;;  %964 = vmatpush.bf16.msra.mxu2 %v955_v0  ;;  %v962_v3 = vld [vmem:[%s1214_s1 + $0x70] sm:$0xff]  ;;  %v961_v5 = vld [vmem:[%s1214_s1 + $0x68] sm:$0xff]  ;;  %s931_s17 = sshll.u32 %s1222_s28, 3 }
   0xe   : > { %536 = vmatpush.bf16.msra.mxu1 %v963_v1  ;;  %972 = vmatpush.bf16.msra.mxu3 %v963_v1  ;;  %v952_v6 = vld [vmem:[%s1214_s1 + $0x20] sm:$0xff]  ;;  %v951_v8 = vld [vmem:[%s1214_s1 + $0x18] sm:$0xff]  ;;  %v950_v10 = vld [vmem:[%s1214_s1 + $0x10] sm:$0xff]  ;;  %s1117_s22 = scalar_lea.vmem %s1213_s0, %s931_s17  ;;  %s1171_s7 = scalar_lea.vmem %s1216_s3, %s931_s17 }
   0xf   : > { %v960_v7 = vld [vmem:[%s1214_s1 + $0x60] sm:$0xff]  ;;  %v959_v9 = vld [vmem:[%s1214_s1 + $0x58] sm:$0xff]  ;;  %v958_v11 = vld [vmem:[%s1214_s1 + $0x50] sm:$0xff] }
  0x10   : > { %v949_v12 = vld [vmem:[%s1214_s1 + $0x8] sm:$0xff]  ;;  %v948_v14 = vld [vmem:[%s1214_s1] sm:$0xff]  ;;  %v811_v28 = vld [vmem:[%s1117_s22 + $0x10] sm:$0xf] }
  0x11   : > { %488 = vmatpush.bf16.msra.mxu0 %v954_v2  ;;  %965 = vmatpush.bf16.msra.mxu2 %v954_v2  ;;  %v957_v13 = vld [vmem:[%s1214_s1 + $0x48] sm:$0xff]  ;;  %v956_v15 = vld [vmem:[%s1214_s1 + $0x40] sm:$0xff]  ;;  %v935_v29 = vld [vmem:[%s1117_s22 + $0x14] sm:$0xf0] }
  0x12   : > { %537 = vmatpush.bf16.msra.mxu1 %v962_v3  ;;  %973 = vmatpush.bf16.msra.mxu3 %v962_v3  ;;  %v803_v16 = vld [vmem:[%s1117_s22] sm:$0xf]  ;;  %v933_v17 = vld [vmem:[%s1117_s22 + $0x4] sm:$0xf0]  ;;  %v932_v20 = vld [vmem:[%s1117_s22 + $0x4] sm:$0xf]  ;;  %v812_v36 = vor.u32 %v935_v29, %v811_v28 }
  0x13   : > { %v835_v18 = vld [vmem:[%s1117_s22 + $0x40] sm:$0xf]  ;;  %v941_v19 = vld [vmem:[%s1117_s22 + $0x44] sm:$0xf0]  ;;  %v805_v21 = vld [vmem:[%s1117_s22 + $0x8] sm:$0xf0]  ;;  %v804_v24 = vor.u32 %v933_v17, %v803_v16 }
  0x14   : > { %v940_v22 = vld [vmem:[%s1117_s22 + $0x44] sm:$0xf]  ;;  %v837_v23 = vld [vmem:[%s1117_s22 + $0x48] sm:$0xf0]  ;;  %v836_v25 = vor.u32 %v941_v19, %v835_v18  ;;  %v808_v26 = vor.u32 %v932_v20, %v805_v21  ;;  %v843_v30 = vld [vmem:[%s1117_s22 + $0x50] sm:$0xf] }
  0x15   : > { %489 = vmatpush.bf16.msra.mxu0 %v953_v4  ;;  %966 = vmatpush.bf16.msra.mxu2 %v953_v4  ;;  %v840_v27 = vor.u32 %v940_v22, %v837_v23  ;;  %v943_v31 = vld [vmem:[%s1117_s22 + $0x54] sm:$0xf0]  ;;  %v934_v32 = vld [vmem:[%s1117_s22 + $0x14] sm:$0xf]  ;;  %v813_v33 = vld [vmem:[%s1117_s22 + $0x18] sm:$0xf0] }
  0x16   : > { %538 = vmatpush.bf16.msra.mxu1 %v961_v5  ;;  %974 = vmatpush.bf16.msra.mxu3 %v961_v5  ;;  %v942_v34 = vld [vmem:[%s1117_s22 + $0x54] sm:$0xf]  ;;  %v845_v35 = vld [vmem:[%s1117_s22 + $0x58] sm:$0xf0]  ;;  %v844_v37 = vor.u32 %v943_v31, %v843_v30  ;;  %v816_v38 = vor.u32 %v934_v32, %v813_v33  ;;  %v819_v40 = vld [vmem:[%s1117_s22 + $0x20] sm:$0xf] }
  0x17   : > { %v848_v39 = vor.u32 %v942_v34, %v845_v35  ;;  %v937_v41 = vld [vmem:[%s1117_s22 + $0x24] sm:$0xf0]  ;;  %v851_v42 = vld [vmem:[%s1117_s22 + $0x60] sm:$0xf]  ;;  %v936_v44 = vld [vmem:[%s1117_s22 + $0x24] sm:$0xf] }
  0x18   : > { %v945_v43 = vld [vmem:[%s1117_s22 + $0x64] sm:$0xf0]  ;;  %v821_v45 = vld [vmem:[%s1117_s22 + $0x28] sm:$0xf0]  ;;  %v944_v46 = vld [vmem:[%s1117_s22 + $0x64] sm:$0xf]  ;;  %v820_v48 = vor.u32 %v937_v41, %v819_v40 }
  0x19   : > { %490 = vmatpush.bf16.msra.mxu0 %v952_v6  ;;  %967 = vmatpush.bf16.msra.mxu2 %v952_v6  ;;  %v853_v47 = vld [vmem:[%s1117_s22 + $0x68] sm:$0xf0]  ;;  %v852_v49 = vor.u32 %v945_v43, %v851_v42  ;;  %v824_v50 = vor.u32 %v936_v44, %v821_v45  ;;  %v827_v52 = vld [vmem:[%s1117_s22 + $0x30] sm:$0xf]  ;;  %v939_v53 = vld [vmem:[%s1117_s22 + $0x34] sm:$0xf0] }
  0x1a   : > { %539 = vmatpush.bf16.msra.mxu1 %v960_v7  ;;  %975 = vmatpush.bf16.msra.mxu3 %v960_v7  ;;  %v856_v51 = vor.u32 %v944_v46, %v853_v47  ;;  %v859_v54 = vld [vmem:[%s1117_s22 + $0x70] sm:$0xf]  ;;  %v947_v55 = vld [vmem:[%s1117_s22 + $0x74] sm:$0xf0]  ;;  %v938_v56 = vld [vmem:[%s1117_s22 + $0x34] sm:$0xf]  ;;  %v828_v60 = vor.u32 %v939_v53, %v827_v52 }
  0x1b   : > { %v829_v57 = vld [vmem:[%s1117_s22 + $0x38] sm:$0xf0]  ;;  %v946_v58 = vld [vmem:[%s1117_s22 + $0x74] sm:$0xf]  ;;  %v860_v61 = vor.u32 %v947_v55, %v859_v54  ;;  %v1163_v1 = vld [vmem:[%s1215_s2] ss:$0 sm:$0xff] }
  0x1c   : > { %v861_v59 = vld [vmem:[%s1117_s22 + $0x78] sm:$0xf0]  ;;  %v832_v62 = vor.u32 %v938_v56, %v829_v57 }
  0x1d   : > { %491 = vmatpush.bf16.msra.mxu0 %v951_v8  ;;  %968 = vmatpush.bf16.msra.mxu2 %v951_v8  ;;  %v864_v63 = vor.u32 %v946_v58, %v861_v59 }
  0x1e   : > { %540 = vmatpush.bf16.msra.mxu1 %v959_v9  ;;  %976 = vmatpush.bf16.msra.mxu3 %v959_v9 }
  0x21   : > { %492 = vmatpush.bf16.msra.mxu0 %v950_v10  ;;  %969 = vmatpush.bf16.msra.mxu2 %v950_v10 }
  0x22   : > { %541 = vmatpush.bf16.msra.mxu1 %v958_v11  ;;  %977 = vmatpush.bf16.msra.mxu3 %v958_v11 }
  0x25   : > { %493 = vmatpush.bf16.msra.mxu0 %v949_v12  ;;  %970 = vmatpush.bf16.msra.mxu2 %v949_v12 }
  0x26   : > { %542 = vmatpush.bf16.msra.mxu1 %v957_v13  ;;  %978 = vmatpush.bf16.msra.mxu3 %v957_v13 }
  0x29   : > { %494 = vmatpush.bf16.msra.mxu0 %v948_v14  ;;  %971 = vmatpush.bf16.msra.mxu2 %v948_v14 }
  0x2a   : > { %543 = vmatpush.bf16.msra.mxu1 %v956_v15  ;;  %979 = vmatpush.bf16.msra.mxu3 %v956_v15 }
  0x2c   : > { %495 = vmatmul.bf16.vlgmr.msra.gmra.mxu0 %v804_v24  ;;  %515 = vmatmul.bf16.vlgmr.msra.gmra.mxu2 %v836_v25 }
  0x2d   : > { %544 = vmatmul.bf16.vlgmr.msra.gmra.mxu1 %v808_v26  ;;  %564 = vmatmul.bf16.vlgmr.msra.gmra.mxu3 %v840_v27 }
  0x3c   : > { %500 = vmatmul.bf16.gmra.mxu0 %v812_v36  ;;  %520 = vmatmul.bf16.gmra.mxu2 %v844_v37 }
  0x3d   : > { %549 = vmatmul.bf16.gmra.mxu1 %v816_v38  ;;  %569 = vmatmul.bf16.gmra.mxu3 %v848_v39 }
  0x4c   : > { %505 = vmatmul.bf16.gmra.mxu0 %v820_v48  ;;  %525 = vmatmul.bf16.gmra.mxu2 %v852_v49 }
  0x4d   : > { %554 = vmatmul.bf16.gmra.mxu1 %v824_v50  ;;  %574 = vmatmul.bf16.gmra.mxu3 %v856_v51 }
  0x5c   : > { %510 = vmatmul.bf16.gmra.mxu0 %v828_v60  ;;  %530 = vmatmul.bf16.gmra.mxu2 %v860_v61 }
  0x5d   : > { %559 = vmatmul.bf16.gmra.mxu1 %v832_v62  ;;  %579 = vmatmul.bf16.gmra.mxu3 %v864_v63 }
  0xa9   : > { %v496_v0 = vpop.f32.mrf.mxu0 }
  0xaa   : > { %v545_v2 = vpop.f32.mrf.mxu1 }
  0xab   : > { %v546_v3 = vadd.f32 %v545_v2, %v496_v0 }
  0xad   : > { %v640_v4 = vadd.f32 %v1163_v1, %v546_v3 }
  0xaf   : > { %v656_v5 = vmul.f32 0.2, %v640_v4  ;;  %v516_v6 = vpop.f32.mrf.mxu2 }
  0xb0   : > { %v565_v7 = vpop.f32.mrf.mxu3 }
  0xb1   : > { %v672_v8 = vmax.f32 %v640_v4, %v656_v5  ;;  %v566_v9 = vadd.f32 %v565_v7, %v516_v6  ;;  %v498_v10 = vpop.f32.mrf.mxu0 }
  0xb2   : > { %v547_v11 = vpop.f32.mrf.mxu1 }
  0xb3   : > { %688 = vst [vmem:[%s1171_s7] sm:$0xff] %v672_v8  ;;  %v648_v12 = vadd.f32 %v1163_v1, %v566_v9  ;;  %v548_v13 = vadd.f32 %v547_v11, %v498_v10 }
  0xb5   : > { %v664_v14 = vmul.f32 0.2, %v648_v12  ;;  %v641_v15 = vadd.f32 %v1163_v1, %v548_v13 }
  0xb7   : > { %v680_v16 = vmax.f32 %v648_v12, %v664_v14  ;;  %v657_v17 = vmul.f32 0.2, %v641_v15  ;;  %v518_v18 = vpop.f32.mrf.mxu2 }
  0xb8   : > { %v567_v19 = vpop.f32.mrf.mxu3 }
  0xb9   : > { %696 = vst [vmem:[%s1171_s7 + $0x40] sm:$0xff] %v680_v16  ;;  %v673_v20 = vmax.f32 %v641_v15, %v657_v17  ;;  %v568_v21 = vadd.f32 %v567_v19, %v518_v18  ;;  %v501_v22 = vpop.f32.mrf.mxu0 }
  0xba   : > { %v550_v23 = vpop.f32.mrf.mxu1 }
  0xbb   : > { %689 = vst [vmem:[%s1171_s7 + $0x8] sm:$0xff] %v673_v20  ;;  %v649_v24 = vadd.f32 %v1163_v1, %v568_v21  ;;  %v551_v25 = vadd.f32 %v550_v23, %v501_v22 }
  0xbd   : > { %v665_v26 = vmul.f32 0.2, %v649_v24  ;;  %v642_v27 = vadd.f32 %v1163_v1, %v551_v25 }
  0xbf   : > { %v681_v28 = vmax.f32 %v649_v24, %v665_v26  ;;  %v658_v29 = vmul.f32 0.2, %v642_v27  ;;  %v521_v30 = vpop.f32.mrf.mxu2 }
  0xc0   : > { %v570_v31 = vpop.f32.mrf.mxu3 }
  0xc1   : > { %697 = vst [vmem:[%s1171_s7 + $0x48] sm:$0xff] %v681_v28  ;;  %v674_v32 = vmax.f32 %v642_v27, %v658_v29  ;;  %v571_v33 = vadd.f32 %v570_v31, %v521_v30  ;;  %v503_v34 = vpop.f32.mrf.mxu0 }
  0xc2   : > { %v552_v35 = vpop.f32.mrf.mxu1 }
  0xc3   : > { %690 = vst [vmem:[%s1171_s7 + $0x10] sm:$0xff] %v674_v32  ;;  %v650_v36 = vadd.f32 %v1163_v1, %v571_v33  ;;  %v553_v37 = vadd.f32 %v552_v35, %v503_v34 }
  0xc5   : > { %v666_v38 = vmul.f32 0.2, %v650_v36  ;;  %v643_v39 = vadd.f32 %v1163_v1, %v553_v37 }
  0xc7   : > { %v682_v40 = vmax.f32 %v650_v36, %v666_v38  ;;  %v659_v41 = vmul.f32 0.2, %v643_v39  ;;  %v523_v42 = vpop.f32.mrf.mxu2 }
  0xc8   : > { %v572_v43 = vpop.f32.mrf.mxu3 }
  0xc9   : > { %698 = vst [vmem:[%s1171_s7 + $0x50] sm:$0xff] %v682_v40  ;;  %v675_v44 = vmax.f32 %v643_v39, %v659_v41  ;;  %v573_v45 = vadd.f32 %v572_v43, %v523_v42  ;;  %v506_v46 = vpop.f32.mrf.mxu0 }
  0xca   : > { %v555_v47 = vpop.f32.mrf.mxu1 }
  0xcb   : > { %691 = vst [vmem:[%s1171_s7 + $0x18] sm:$0xff] %v675_v44  ;;  %v651_v48 = vadd.f32 %v1163_v1, %v573_v45  ;;  %v556_v49 = vadd.f32 %v555_v47, %v506_v46 }
  0xcd   : > { %v667_v50 = vmul.f32 0.2, %v651_v48  ;;  %v644_v51 = vadd.f32 %v1163_v1, %v556_v49 }
  0xcf   : > { %v683_v52 = vmax.f32 %v651_v48, %v667_v50  ;;  %v660_v53 = vmul.f32 0.2, %v644_v51  ;;  %v526_v54 = vpop.f32.mrf.mxu2 }
  0xd0   : > { %v575_v55 = vpop.f32.mrf.mxu3 }
  0xd1   : > { %699 = vst [vmem:[%s1171_s7 + $0x58] sm:$0xff] %v683_v52  ;;  %v676_v56 = vmax.f32 %v644_v51, %v660_v53  ;;  %v576_v57 = vadd.f32 %v575_v55, %v526_v54  ;;  %v508_v58 = vpop.f32.mrf.mxu0 }
  0xd2   : > { %v557_v59 = vpop.f32.mrf.mxu1 }
  0xd3   : > { %692 = vst [vmem:[%s1171_s7 + $0x20] sm:$0xff] %v676_v56  ;;  %v652_v60 = vadd.f32 %v1163_v1, %v576_v57  ;;  %v558_v61 = vadd.f32 %v557_v59, %v508_v58 }
  0xd5   : > { %v668_v62 = vmul.f32 0.2, %v652_v60  ;;  %v645_v63 = vadd.f32 %v1163_v1, %v558_v61 }
  0xd7   : > { %v684_v0 = vmax.f32 %v652_v60, %v668_v62  ;;  %v661_v2 = vmul.f32 0.2, %v645_v63  ;;  %v528_v3 = vpop.f32.mrf.mxu2 }
  0xd8   : > { %v577_v4 = vpop.f32.mrf.mxu3 }
  0xd9   : > { %700 = vst [vmem:[%s1171_s7 + $0x60] sm:$0xff] %v684_v0  ;;  %v677_v5 = vmax.f32 %v645_v63, %v661_v2  ;;  %v578_v6 = vadd.f32 %v577_v4, %v528_v3  ;;  %v511_v7 = vpop.f32.mrf.mxu0 }
  0xda   : > { %v560_v8 = vpop.f32.mrf.mxu1 }
  0xdb   : > { %693 = vst [vmem:[%s1171_s7 + $0x28] sm:$0xff] %v677_v5  ;;  %v653_v9 = vadd.f32 %v1163_v1, %v578_v6  ;;  %v561_v10 = vadd.f32 %v560_v8, %v511_v7 }
  0xdd   : > { %v669_v11 = vmul.f32 0.2, %v653_v9  ;;  %v646_v12 = vadd.f32 %v1163_v1, %v561_v10 }
  0xdf   : > { %v685_v13 = vmax.f32 %v653_v9, %v669_v11  ;;  %v662_v14 = vmul.f32 0.2, %v646_v12  ;;  %v531_v15 = vpop.f32.mrf.mxu2 }
  0xe0   : > { %v580_v16 = vpop.f32.mrf.mxu3 }
  0xe1   : > { %701 = vst [vmem:[%s1171_s7 + $0x68] sm:$0xff] %v685_v13  ;;  %v678_v17 = vmax.f32 %v646_v12, %v662_v14  ;;  %v581_v18 = vadd.f32 %v580_v16, %v531_v15  ;;  %v513_v19 = vpop.f32.mrf.mxu0 }
  0xe2   : > { %v562_v20 = vpop.f32.mrf.mxu1 }
  0xe3   : > { %694 = vst [vmem:[%s1171_s7 + $0x30] sm:$0xff] %v678_v17  ;;  %v654_v21 = vadd.f32 %v1163_v1, %v581_v18  ;;  %v563_v22 = vadd.f32 %v562_v20, %v513_v19 }
  0xe5   : > { %v670_v23 = vmul.f32 0.2, %v654_v21  ;;  %v647_v24 = vadd.f32 %v1163_v1, %v563_v22 }
  0xe7   : > { %v686_v25 = vmax.f32 %v654_v21, %v670_v23  ;;  %v663_v26 = vmul.f32 0.2, %v647_v24  ;;  %v533_v27 = vpop.f32.mrf.mxu2 }
  0xe8   : > { %v582_v28 = vpop.f32.mrf.mxu3 }
  0xe9   : > { %702 = vst [vmem:[%s1171_s7 + $0x70] sm:$0xff] %v686_v25  ;;  %v679_v29 = vmax.f32 %v647_v24, %v663_v26  ;;  %v583_v30 = vadd.f32 %v582_v28, %v533_v27 }
  0xeb   : > { %695 = vst [vmem:[%s1171_s7 + $0x38] sm:$0xff] %v679_v29  ;;  %v655_v31 = vadd.f32 %v1163_v1, %v583_v30 }
  0xed   : > { %v671_v32 = vmul.f32 0.2, %v655_v31 }
  0xef   : > { %v687_v33 = vmax.f32 %v655_v31, %v671_v32 }
  0xf1   : > { %703 = vst [vmem:[%s1171_s7 + $0x78] sm:$0xff] %v687_v33 }
  0xf2 PF: > { %s13_s14 = sadd.s32 1, %s1027_s14   ;;  %s1217_s12 = smov %s1023_s13 }
  0xf3   : > { %p10_p5 = scmp.ge.s32.totalorder %s13_s14, 18   ;;  %s1218_s13 = smov %s1220_s15 }
  0xf5   :  { %12 = sbr.rel (!%p10_p5) target bundleno = 2 (0x2), region = 73 }

// kernel: patch_discriminator.10
= control target key start
LH: loop header
LB: loop body
LE: loop exit
PB: predicated region body
PF: predicated region fallthrough
CT: control target
= control target key end

     0   :  { %s450_s15 = smov 0   ;;  %s576_s0 = inlined_call_operand.vmem [shape: f32[512,128], index: 0, kind: input, shape index: {}]   ;;  %s577_s1 = inlined_call_operand.vmem [shape: f32[2,128], index: 1, kind: input, shape index: {}]   ;;  %s578_s2 = inlined_call_operand.vmem [shape: f32[1,128], index: 2, kind: input, shape index: {}]   ;;  %s579_s3 = inlined_call_operand.vmem [shape: f32[1,128], index: 3, kind: input, shape index: {}]   ;;  %s580_s4 = inlined_call_operand.vmem [shape: f32[512,128], index: 4, kind: output, shape index: {}]  }
   0x1 LB: > { %s395_s16 = sadd.s32 4294967295, %s423_s15   ;;  %p399_p0 = scmp.ge.s32.totalorder %s423_s15, 1  ;;  %s423_s15 = sphi %s450_s15, %s14_s15  }
   0x2   : > { %p163_p1 = scmp.lt.s32.totalorder %s423_s15, 5 }
   0x4   : > { %p164_p2 = pnand %p399_p0, %p163_p1 }
   0x5   : > { %s400_s21 = sshll.u32 (!%p164_p2), %s395_s16, 4 }
   0x6   : > { %167 = sbr.rel (%p164_p2) target bundleno = 68 (0x44), region = 36  ;;  %p190_p3 = scmp.lt.s32.totalorder (!%p164_p2), %s400_s21, 63 }
   0xb   : > { %v201_v0 = vld [vmem:[%s577_s1] sm:$0x1]  ;;  %v203_v1 = vld [vmem:[%s577_s1 + $0x1] sm:$0x1]  ;;  %s584_s21 = smov (!%p190_p3, %s400_s21), 63 }
   0xc   : > { %v202_v2 = vmul.f32 0.001953125, %v201_v0  ;;  %v204_v3 = vmul.f32 0.001953125, %v203_v1  ;;  %s401_s22 = sshll.u32 %s584_s21, 3  ;;  %v219_v13 = vld [vmem:[%s578_s2] sm:$0x1] }
   0xd   : > { %s472_s25 = scalar_lea.vmem %s576_s0, %s401_s22  ;;  %v521_v45 = vld [vmem:[%s579_s3] ss:$0 sm:$0xff]  ;;  %s547_s6 = scalar_lea.vmem %s580_s4, %s401_s22 }
   0xe   : > { %v205_v4 = vmul.f32 %v202_v2, %v202_v2  ;;  %v221_v14 = vld [vmem:[%s472_s25] sm:$0xff]  ;;  %v478_v15 = vperm.slane %v202_v2, 0  ;;  %v222_v16 = vld [vmem:[%s472_s25 + $0x8] sm:$0xff]  ;;  %v223_v18 = vld [vmem:[%s472_s25 + $0x10] sm:$0xff] }
   0xf   : > { %v224_v19 = vld [vmem:[%s472_s25 + $0x18] sm:$0xff]  ;;  %v225_v21 = vld [vmem:[%s472_s25 + $0x20] sm:$0xff]  ;;  %v226_v22 = vld [vmem:[%s472_s25 + $0x28] sm:$0xff] }
  0x10   : > { %v206_v5 = vsub.f32 %v204_v3, %v205_v4  ;;  %v227_v23 = vld [vmem:[%s472_s25 + $0x30] sm:$0xff]  ;;  %v228_v24 = vld [vmem:[%s472_s25 + $0x38] sm:$0xff]  ;;  %v229_v25 = vld [vmem:[%s472_s25 + $0x40] sm:$0xff]  ;;  %v238_v28 = vsub.f32 %v221_v14, %v478_v15  ;;  %v239_v29 = vsub.f32 %v222_v16, %v478_v15  ;;  %v240_v34 = vsub.f32 %v223_v18, %v478_v15 }
  0x11   : > { %v230_v26 = vld [vmem:[%s472_s25 + $0x48] sm:$0xff]  ;;  %v231_v30 = vld [vmem:[%s472_s25 + $0x50] sm:$0xff]  ;;  %v499_v31 = vld [vmem:[%s472_s25 + $0x58] sm:$0xff]  ;;  %v241_v35 = vsub.f32 %v224_v19, %v478_v15  ;;  %v242_v36 = vsub.f32 %v225_v21, %v478_v15  ;;  %v243_v40 = vsub.f32 %v226_v22, %v478_v15  ;;  %v244_v41 = vsub.f32 %v227_v23, %v478_v15 }
  0x12   : > { %v207_v6 = vmax.f32 %v206_v5, 0.0  ;;  %v502_v32 = vld [vmem:[%s472_s25 + $0x60] sm:$0xff]  ;;  %v234_v37 = vld [vmem:[%s472_s25 + $0x68] sm:$0xff]  ;;  %v509_v38 = vld [vmem:[%s472_s25 + $0x70] sm:$0xff]  ;;  %v245_v42 = vsub.f32 %v228_v24, %v478_v15  ;;  %v246_v43 = vsub.f32 %v229_v25, %v478_v15  ;;  %v247_v46 = vsub.f32 %v230_v26, %v478_v15 }
  0x13   : > { %v512_v39 = vld [vmem:[%s472_s25 + $0x78] sm:$0xff]  ;;  %v248_v47 = vsub.f32 %v231_v30, %v478_v15  ;;  %v249_v48 = vsub.f32 %v499_v31, %v478_v15  ;;  %v250_v49 = vsub.f32 %v502_v32, %v478_v15  ;;  %v251_v50 = vsub.f32 %v234_v37, %v478_v15 }
  0x14   : > { %v208_v7 = vadd.f32 1e-05, %v207_v6  ;;  %v252_v51 = vsub.f32 %v509_v38, %v478_v15  ;;  %v253_v52 = vsub.f32 %v512_v39, %v478_v15 }
  0x16   : > { %415 = vrsqrt.f32 %v208_v7  ;;  %vm215_vm0 = vweird.f32 %v208_v7 }
  0x1c   : > { %v416_v8 = vpop.eup %415 }
  0x1d   : > { %v210_v9 = vmul.f32 %v416_v8, %v208_v7  ;;  %vm216_vm1 = vweird.f32 %v416_v8 }
  0x1e   : > { %vm481_vm2 = vmor %vm215_vm0, %vm216_vm1 }
  0x1f   : > { %v211_v10 = vmul.f32 %v416_v8, %v210_v9 }
  0x21   : > { %v212_v11 = vmul.f32 0.5, %v211_v10 }
  0x23   : > { %v213_v12 = vsub.f32 1.5, %v212_v11 }
  0x25   : > { %v214_v20 = vmul.f32 %v416_v8, %v213_v12 }
  0x27   : > { %v218_v27 = vsel %vm481_vm2, %v416_v8, %v214_v20 }
  0x28   : > { %v220_v33 = vmul.f32 %v219_v13, %v218_v27 }
  0x2a   : > { %v254_v44 = vperm.slane %v220_v33, 0 }
  0x2c   : > { %v255_v53 = vmul.f32 %v254_v44, %v238_v28  ;;  %v256_v54 = vmul.f32 %v254_v44, %v239_v29  ;;  %v257_v55 = vmul.f32 %v254_v44, %v240_v34  ;;  %v258_v56 = vmul.f32 %v254_v44, %v241_v35 }
  0x2d   : > { %v259_v57 = vmul.f32 %v254_v44, %v242_v36  ;;  %v260_v58 = vmul.f32 %v254_v44, %v243_v40  ;;  %v261_v59 = vmul.f32 %v254_v44, %v244_v41  ;;  %v262_v60 = vmul.f32 %v254_v44, %v245_v42 }
  0x2e   : > { %v275_v61 = vadd.f32 %v521_v45, %v255_v53  ;;  %v276_v62 = vadd.f32 %v521_v45, %v256_v54  ;;  %v277_v63 = vadd.f32 %v521_v45, %v257_v55  ;;  %v278_v0 = vadd.f32 %v521_v45, %v258_v56 }
  0x2f   : > { %v279_v1 = vadd.f32 %v521_v45, %v259_v57  ;;  %v280_v2 = vadd.f32 %v521_v45, %v260_v58  ;;  %v281_v3 = vadd.f32 %v521_v45, %v261_v59  ;;  %v282_v4 = vadd.f32 %v521_v45, %v262_v60 }
  0x30   : > { %v291_v5 = vmul.f32 0.2, %v275_v61  ;;  %v292_v6 = vmul.f32 0.2, %v276_v62  ;;  %v293_v7 = vmul.f32 0.2, %v277_v63  ;;  %v263_v8 = vmul.f32 %v254_v44, %v246_v43 }
  0x31   : > { %v294_v9 = vmul.f32 0.2, %v278_v0  ;;  %v295_v10 = vmul.f32 0.2, %v279_v1  ;;  %v296_v11 = vmul.f32 0.2, %v280_v2  ;;  %v264_v12 = vmul.f32 %v254_v44, %v247_v46 }
  0x32   : > { %v307_v13 = vmax.f32 %v275_v61, %v291_v5  ;;  %v308_v14 = vmax.f32 %v276_v62, %v292_v6  ;;  %v309_v15 = vmax.f32 %v277_v63, %v293_v7  ;;  %v297_v16 = vmul.f32 0.2, %v281_v3 }
  0x33   : > { %v310_v17 = vmax.f32 %v278_v0, %v294_v9  ;;  %v311_v18 = vmax.f32 %v279_v1, %v295_v10  ;;  %v312_v19 = vmax.f32 %v280_v2, %v296_v11  ;;  %v298_v20 = vmul.f32 0.2, %v282_v4 }
  0x34   : > { %323 = vst [vmem:[%s547_s6] sm:$0xff] %v307_v13  ;;  %v313_v21 = vmax.f32 %v281_v3, %v297_v16  ;;  %v283_v22 = vadd.f32 %v521_v45, %v263_v8  ;;  %v284_v23 = vadd.f32 %v521_v45, %v264_v12  ;;  %v265_v24 = vmul.f32 %v254_v44, %v248_v47 }
  0x35   : > { %324 = vst [vmem:[%s547_s6 + $0x8] sm:$0xff] %v308_v14  ;;  %v314_v25 = vmax.f32 %v282_v4, %v298_v20  ;;  %v266_v26 = vmul.f32 %v254_v44, %v249_v48  ;;  %v267_v27 = vmul.f32 %v254_v44, %v250_v49  ;;  %v268_v28 = vmul.f32 %v254_v44, %v251_v50 }
  0x36   : > { %325 = vst [vmem:[%s547_s6 + $0x10] sm:$0xff] %v309_v15  ;;  %v299_v29 = vmul.f32 0.2, %v283_v22  ;;  %v300_v30 = vmul.f32 0.2, %v284_v23  ;;  %v285_v31 = vadd.f32 %v521_v45, %v265_v24  ;;  %v269_v32 = vmul.f32 %v254_v44, %v252_v51 }
  0x37   : > { %326 = vst [vmem:[%s547_s6 + $0x18] sm:$0xff] %v310_v17  ;;  %v286_v33 = vadd.f32 %v521_v45, %v266_v26  ;;  %v287_v34 = vadd.f32 %v521_v45, %v267_v27  ;;  %v288_v35 = vadd.f32 %v521_v45, %v268_v28  ;;  %v270_v36 = vmul.f32 %v254_v44, %v253_v52 }
  0x38   : > { %327 = vst [vmem:[%s547_s6 + $0x20] sm:$0xff] %v311_v18  ;;  %v315_v37 = vmax.f32 %v283_v22, %v299_v29  ;;  %v301_v38 = vmul.f32 0.2, %v285_v31  ;;  %v289_v39 = vadd.f32 %v521_v45, %v269_v32  ;;  %v316_v40 = vmax.f32 %v284_v23, %v300_v30 }
  0x39   : > { %328 = vst [vmem:[%s547_s6 + $0x28] sm:$0xff] %v312_v19  ;;  %v302_v41 = vmul.f32 0.2, %v286_v33  ;;  %v303_v42 = vmul.f32 0.2, %v287_v34  ;;  %v290_v43 = vadd.f32 %v521_v45, %v270_v36 }
  0x3a   : > { %329 = vst [vmem:[%s547_s6 + $0x30] sm:$0xff] %v313_v21  ;;  %v317_v46 = vmax.f32 %v285_v31, %v301_v38  ;;  %v304_v44 = vmul.f32 0.2, %v288_v35  ;;  %v305_v47 = vmul.f32 0.2, %v289_v39 }
  0x3b   : > { %330 = vst [vmem:[%s547_s6 + $0x38] sm:$0xff] %v314_v25  ;;  %v318_v48 = vmax.f32 %v286_v33, %v302_v41  ;;  %v306_v49 = vmul.f32 0.2, %v290_v43  ;;  %v319_v50 = vmax.f32 %v287_v34, %v303_v42 }
  0x3c   : > { %331 = vst [vmem:[%s547_s6 + $0x40] sm:$0xff] %v315_v37  ;;  %v320_v51 = vmax.f32 %v288_v35, %v304_v44  ;;  %v321_v52 = vmax.f32 %v289_v39, %v305_v47 }
  0x3d   : > { %332 = vst [vmem:[%s547_s6 + $0x48] sm:$0xff] %v316_v40  ;;  %v322_v53 = vmax.f32 %v290_v43, %v306_v49 }
  0x3e   : > { %333 = vst [vmem:[%s547_s6 + $0x50] sm:$0xff] %v317_v46 }
  0x3f   : > { %334 = vst [vmem:[%s547_s6 + $0x58] sm:$0xff] %v318_v48 }
  0x40   : > { %335 = vst [vmem:[%s547_s6 + $0x60] sm:$0xff] %v319_v50 }
  0x41   : > { %336 = vst [vmem:[%s547_s6 + $0x68] sm:$0xff] %v320_v51 }
  0x42   : > { %337 = vst [vmem:[%s547_s6 + $0x70] sm:$0xff] %v321_v52 }
  0x43   : > { %338 = vst [vmem:[%s547_s6 + $0x78] sm:$0xff] %v322_v53 }
  0x44 PF: > { %s14_s15 = sadd.s32 1, %s423_s15  }
  0x45   : > { %p11_p4 = scmp.ge.s32.totalorder %s14_s15, 6  }
  0x47   :  { %13 = sbr.rel (!%p11_p4) target bundleno = 1 (0x1), region = 66 }

// kernel: patch_discriminator.9
= control target key start
LH: loop header
LB: loop body
LE: loop exit
PB: predicated region body
PF: predicated region fallthrough
CT: control target
= control target key end

     0   :  { %s1802_s15 = smov 0   ;;  %s1804_s16 = smov 0   ;;  %s2151_s0 = inlined_call_operand.vmem [shape: bf16[512,1024], index: 0, kind: input, shape index: {}]   ;;  %s2152_s1 = inlined_call_operand.vmem [shape: bf16[1024,128], index: 1, kind: input, shape index: {}]   ;;  %s2153_s2 = inlined_call_operand.vmem [shape: f32[1,128], index: 2, kind: input, shape index: {}]   ;;  %s2154_s3 = inlined_call_operand.vmem [shape: f32[512,128], index: 3, kind: output, shape index: {0}]   ;;  %s2155_s4 = inlined_call_operand.vmem [shape: f32[2,128], index: 4, kind: output, shape index: {1}]  }
   0x1   :  { %s1806_s17 = smov 0   ;;  %s1808_s18 = smov 0  }
   0x2   :  { %s1810_s19 = smov 0   ;;  %s1812_s20 = smov 0  }
   0x3   :  { %s1814_s21 = smov 0  }
   0x4 LB: > { %s24_s22 = sadd.s32 1, %s1765_s19  ;;  %s27_s23 = sadd.s32 1, %s1769_s20  ;;  %s1773_s21 = sphi %s1814_s21, %s15_s21   ;;  %s1769_s20 = sphi %s1812_s20, %s2161_s20   ;;  %s1765_s19 = sphi %s1810_s19, %s2160_s19   ;;  %s1761_s18 = sphi %s1808_s18, %s2159_s18   ;;  %s1757_s17 = sphi %s1806_s17, %s2158_s17   ;;  %s1753_s16 = sphi %s1804_s16, %s2157_s16   ;;  %s1749_s15 = sphi %s1802_s15, %s2156_s15  }
   0x5   : > { %p25_p0 = scmp.ge.s32.totalorder %s24_s22, 2  ;;  %p43_p1 = scmp.ne.s32.totalorder %s1753_s16, %s1749_s15 }
   0x6   : > { %p44_p2 = scmp.eq.s32.totalorder %s1773_s21, 0  ;;  %s36_s27 = sadd.s32 1, %s1753_s16 }
   0x7   : > { %s2163_s22 = smov (%p25_p0, %s24_s22), 0  ;;  %s2165_s23 = smov (!%p25_p0, %s27_s23), %s1769_s20 }
   0x8   : > { %p45_p3 = por %p44_p2, %p43_p1  ;;  %p29_p4 = scmp.ge.s32.totalorder %s2165_s23, 4 }
   0x9   : > { %s32_s24 = ssub.s32 %s1765_s19, %s2163_s22  ;;  %p1322_p6 = scmp.ge.s32.totalorder %s1773_s21, 8 }
   0xa   : > { %s2167_s23 = smov (%p29_p4, %s2165_s23), 0 }
   0xb   : > { %s31_s25 = ssub.s32 %s1769_s20, %s2167_s23  ;;  %166 = sbr.rel (%p1322_p6) target bundleno = 55 (0x37), region = 20 }
   0xc   : > { %s33_s26 = sor.u32 %s32_s24, %s31_s25 }
   0xd   : > { %p34_p5 = scmp.eq.s32.totalorder %s33_s26, 0 }
   0xf   : > { %s1853_s28 = scalar_select %p34_p5, %s1753_s16, %s36_s27  }
  0x10   : > { %169 = sbr.rel (!%p45_p3) target bundleno = 55 (0x37), region = 24  ;;  %s171_s29 = sand.u32 (%p45_p3), 1, %s1753_s16  }
  0x11   : > { %s1325_s30 = sshll.u32 (%p45_p3), %s1765_s19, 2  ;;  %s1323_s5 = sshll.u32 (%p45_p3), %s171_s29, 8 }
  0x12   : > { %s1595_s6 = sshll.u32 (%p45_p3), %s1769_s20, 7  ;;  %s1867_s12 = scalar_lea.vmem (%p45_p3), [#allocation3], %s1323_s5 }
  0x13   : > { %s177_s7 = sadd.s32 (%p45_p3), %s1595_s6, %s1325_s30 }
  0x14   : > { %s1327_s8 = sshll.u32 (%p45_p3), %s177_s7, 2 }
  0x15   : > { %s1862_s11 = scalar_lea.vmem %s2151_s0, %s1327_s8 }
  0x16   : > { %v192_v0 = vld [vmem:[%s1862_s11] sm:$0xff]  ;;  %v194_v1 = vld [vmem:[%s1862_s11 + $0x8] sm:$0xff] }
  0x17   : > { %v196_v2 = vld [vmem:[%s1862_s11 + $0x20] sm:$0xff]  ;;  %193 = vst [vmem:[%s1867_s12] sm:$0xff] %v192_v0  ;;  %v198_v3 = vld [vmem:[%s1862_s11 + $0x28] sm:$0xff] }
  0x18   : > { %195 = vst [vmem:[%s1867_s12 + $0x8] sm:$0xff] %v194_v1  ;;  %v200_v4 = vld [vmem:[%s1862_s11 + $0x40] sm:$0xff]  ;;  %v202_v5 = vld [vmem:[%s1862_s11 + $0x48] sm:$0xff] }
  0x19   : > { %197 = vst [vmem:[%s1867_s12 + $0x10] sm:$0xff] %v196_v2  ;;  %v204_v6 = vld [vmem:[%s1862_s11 + $0x60] sm:$0xff]  ;;  %v206_v7 = vld [vmem:[%s1862_s11 + $0x68] sm:$0xff] }
  0x1a   : > { %199 = vst [vmem:[%s1867_s12 + $0x18] sm:$0xff] %v198_v3  ;;  %v208_v8 = vld [vmem:[%s1862_s11 + $0x80] sm:$0xff]  ;;  %v210_v9 = vld [vmem:[%s1862_s11 + $0x88] sm:$0xff] }
  0x1b   : > { %201 = vst [vmem:[%s1867_s12 + $0x20] sm:$0xff] %v200_v4  ;;  %v212_v10 = vld [vmem:[%s1862_s11 + $0xa0] sm:$0xff]  ;;  %v214_v11 = vld [vmem:[%s1862_s11 + $0xa8] sm:$0xff] }
  0x1c   : > { %203 = vst [vmem:[%s1867_s12 + $0x28] sm:$0xff] %v202_v5  ;;  %v216_v12 = vld [vmem:[%s1862_s11 + $0xc0] sm:$0xff]  ;;  %v218_v13 = vld [vmem:[%s1862_s11 + $0xc8] sm:$0xff] }
  0x1d   : > { %205 = vst [vmem:[%s1867_s12 + $0x30] sm:$0xff] %v204_v6  ;;  %v220_v14 = vld [vmem:[%s1862_s11 + $0xe0] sm:$0xff]  ;;  %v222_v15 = vld [vmem:[%s1862_s11 + $0xe8] sm:$0xff] }
  0x1e   : > { %207 = vst [vmem:[%s1867_s12 + $0x38] sm:$0xff] %v206_v7  ;;  %v224_v16 = vld [vmem:[%s1862_s11 + $0x100] sm:$0xff]  ;;  %v226_v17 = vld [vmem:[%s1862_s11 + $0x108] sm:$0xff] }
  0x1f   : > { %209 = vst [vmem:[%s1867_s12 + $0x40] sm:$0xff] %v208_v8  ;;  %v228_v18 = vld [vmem:[%s1862_s11 + $0x120] sm:$0xff]  ;;  %v230_v19 = vld [vmem:[%s1862_s11 + $0x128] sm:$0xff] }
  0x20   : > { %211 = vst [vmem:[%s1867_s12 + $0x48] sm:$0xff] %v210_v9  ;;  %v232_v20 = vld [vmem:[%s1862_s11 + $0x140] sm:$0xff]  ;;  %v234_v21 = vld [vmem:[%s1862_s11 + $0x148] sm:$0xff] }
  0x21   : > { %213 = vst [vmem:[%s1867_s12 + $0x50] sm:$0xff] %v212_v10  ;;  %v236_v22 = vld [vmem:[%s1862_s11 + $0x160] sm:$0xff]  ;;  %v238_v23 = vld [vmem:[%s1862_s11 + $0x168] sm:$0xff] }
  0x22   : > { %215 = vst [vmem:[%s1867_s12 + $0x58] sm:$0xff] %v214_v11  ;;  %v240_v24 = vld [vmem:[%s1862_s11 + $0x180] sm:$0xff]  ;;  %v242_v25 = vld [vmem:[%s1862_s11 + $0x188] sm:$0xff] }
  0x23   : > { %217 = vst [vmem:[%s1867_s12 + $0x60] sm:$0xff] %v216_v12  ;;  %v244_v26 = vld [vmem:[%s1862_s11 + $0x1a0] sm:$0xff]  ;;  %v246_v27 = vld [vmem:[%s1862_s11 + $0x1a8] sm:$0xff] }
  0x24   : > { %219 = vst [vmem:[%s1867_s12 + $0x68] sm:$0xff] %v218_v13  ;;  %v248_v28 = vld [vmem:[%s1862_s11 + $0x1c0] sm:$0xff]  ;;  %v250_v29 = vld [vmem:[%s1862_s11 + $0x1c8] sm:$0xff] }
  0x25   : > { %221 = vst [vmem:[%s1867_s12 + $0x70] sm:$0xff] %v220_v14  ;;  %v252_v30 = vld [vmem:[%s1862_s11 + $0x1e0] sm:$0xff]  ;;  %v254_v31 = vld [vmem:[%s1862_s11 + $0x1e8] sm:$0xff] }
  0x26   : > { %223 = vst [vmem:[%s1867_s12 + $0x78] sm:$0xff] %v222_v15 }
  0x27   : > { %225 = vst [vmem:[%s1867_s12 + $0x80] sm:$0xff] %v224_v16 }
  0x28   : > { %227 = vst [vmem:[%s1867_s12 + $0x88] sm:$0xff] %v226_v17 }
  0x29   : > { %229 = vst [vmem:[%s1867_s12 + $0x90] sm:$0xff] %v228_v18 }
  0x2a   : > { %231 = vst [vmem:[%s1867_s12 + $0x98] sm:$0xff] %v230_v19 }
  0x2b   : > { %233 = vst [vmem:[%s1867_s12 + $0xa0] sm:$0xff] %v232_v20 }
  0x2c   : > { %235 = vst [vmem:[%s1867_s12 + $0xa8] sm:$0xff] %v234_v21 }
  0x2d   : > { %237 = vst [vmem:[%s1867_s12 + $0xb0] sm:$0xff] %v236_v22 }
  0x2e   : > { %239 = vst [vmem:[%s1867_s12 + $0xb8] sm:$0xff] %v238_v23 }
  0x2f   : > { %241 = vst [vmem:[%s1867_s12 + $0xc0] sm:$0xff] %v240_v24 }
  0x30   : > { %243 = vst [vmem:[%s1867_s12 + $0xc8] sm:$0xff] %v242_v25 }
  0x31   : > { %245 = vst [vmem:[%s1867_s12 + $0xd0] sm:$0xff] %v244_v26 }
  0x32   : > { %247 = vst [vmem:[%s1867_s12 + $0xd8] sm:$0xff] %v246_v27 }
  0x33   : > { %249 = vst [vmem:[%s1867_s12 + $0xe0] sm:$0xff] %v248_v28 }
  0x34   : > { %251 = vst [vmem:[%s1867_s12 + $0xe8] sm:$0xff] %v250_v29 }
  0x35   : > { %253 = vst [vmem:[%s1867_s12 + $0xf0] sm:$0xff] %v252_v30 }
  0x36   : > { %255 = vst [vmem:[%s1867_s12 + $0xf8] sm:$0xff] %v254_v31 }
  0x37 PF: > { %p1328_p7 = scmp.ge.s32.totalorder %s1773_s21, 1  ;;  %p269_p8 = scmp.lt.s32.totalorder %s1773_s21, 9 }
  0x39   : > { %p270_p9 = pnand %p1328_p7, %p269_p8 }
  0x3a   : > { %s276_s13 = sand.u32 (!%p270_p9), 1, %s1749_s15   ;;  %s1330_s14 = sshll.u32 (!%p270_p9), %s1757_s17, 6 }
  0x3b   : > { %273 = sbr.rel (%p270_p9) target bundleno = 449 (0x1c1), region = 51  ;;  %s1329_s24 = sshll.u32 (!%p270_p9), %s276_s13, 8 }
  0x3c   : > { %p309_p10 = scmp.lt.s32.totalorder (!%p270_p9), %s1330_s14, 127  ;;  %s1332_s25 = sshll.u32 (!%p270_p9), %s1761_s18, 4 }
  0x3d   : > { %p315_p11 = scmp.lt.s32.totalorder (!%p270_p9), %s1332_s25, 63  ;;  %p320_p12 = scmp.eq.s32.totalorder (!%p270_p9), %s1761_s18, 0 }
  0x3e   : > { %p321_p13 = scmp.eq.s32.totalorder (!%p270_p9), %s1757_s17, 0  ;;  %s1947_s8 = scalar_lea.vmem (!%p270_p9), [#allocation3], %s1329_s24 }
  0x40   : > { %s2169_s14 = smov (!%p309_p10, %s1330_s14), 127  ;;  %s2171_s25 = smov (!%p315_p11, %s1332_s25), 63 }
  0x41   : > { %s1331_s26 = sshll.u32 %s2169_s14, 2  ;;  %p322_p0 = pnand %p321_p13, %p320_p12 }
  0x42   : > { %s1940_s30 = scalar_lea.vmem %s2152_s1, %s1331_s26  ;;  %s1333_s5 = sshll.u32 %s2171_s25, 3 }
  0x43   : > { %s1945_s15 = scalar_lea.vmem %s2154_s3, %s1333_s5  ;;  %325 = sbr.rel (%p322_p0) target bundleno = 74 (0x4a), region = 59 }
  0x48   : > { %v1775_v32 = vmov 0.0  }
  0x49   : > { %326 = vst [vmem:[%s2155_s4] sm:$0x3] %v1775_v32 }
  0x4a PF: > { %p1334_p1 = scmp.ne.s32.totalorder %s1757_s17, 0 }
  0x4c   : > { %329 = sbr.rel (%p1334_p1) target bundleno = 98 (0x62), region = 63 }
  0x51   : > { %v1776_v33 = vmov 0.0  }
  0x52   : > { %330 = vst [vmem:[#allocation2 + $0x30] sm:$0xff] %v1776_v33 }
  0x53   : > { %331 = vst [vmem:[#allocation2] sm:$0xff] %v1776_v33 }
  0x54   : > { %332 = vst [vmem:[#allocation2 + $0x58] sm:$0xff] %v1776_v33 }
  0x55   : > { %333 = vst [vmem:[#allocation2 + $0x18] sm:$0xff] %v1776_v33 }
  0x56   : > { %334 = vst [vmem:[#allocation2 + $0x50] sm:$0xff] %v1776_v33 }
  0x57   : > { %335 = vst [vmem:[#allocation2 + $0x68] sm:$0xff] %v1776_v33 }
  0x58   : > { %336 = vst [vmem:[#allocation2 + $0x8] sm:$0xff] %v1776_v33 }
  0x59   : > { %337 = vst [vmem:[#allocation2 + $0x48] sm:$0xff] %v1776_v33 }
  0x5a   : > { %338 = vst [vmem:[#allocation2 + $0x40] sm:$0xff] %v1776_v33 }
  0x5b   : > { %339 = vst [vmem:[#allocation2 + $0x20] sm:$0xff] %v1776_v33 }
  0x5c   : > { %340 = vst [vmem:[#allocation2 + $0x10] sm:$0xff] %v1776_v33 }
  0x5d   : > { %341 = vst [vmem:[#allocation2 + $0x38] sm:$0xff] %v1776_v33 }
  0x5e   : > { %342 = vst [vmem:[#allocation2 + $0x60] sm:$0xff] %v1776_v33 }
  0x5f   : > { %343 = vst [vmem:[#allocation2 + $0x70] sm:$0xff] %v1776_v33 }
  0x60   : > { %344 = vst [vmem:[#allocation2 + $0x78] sm:$0xff] %v1776_v33 }
  0x61   : > { %345 = vst [vmem:[#allocation2 + $0x28] sm:$0xff] %v1776_v33 }
  0x62 PF: > { %v1635_v34 = vld [vmem:[%s1940_s30 + $0x38] sm:$0xff]  ;;  %v1634_v38 = vld [vmem:[%s1940_s30 + $0x30] sm:$0xff]  ;;  %v1633_v42 = vld [vmem:[%s1940_s30 + $0x28] sm:$0xff]  ;;  %p1591_p2 = scmp.ne.s32.totalorder %s1757_s17, 1 }
  0x63   : > { %v1643_v35 = vld [vmem:[%s1940_s30 + $0x78] sm:$0xff]  ;;  %810 = vmatpush.bf16.msra.mxu0 %v1635_v34  ;;  %v1642_v39 = vld [vmem:[%s1940_s30 + $0x70] sm:$0xff]  ;;  %v1641_v43 = vld [vmem:[%s1940_s30 + $0x68] sm:$0xff]  ;;  %s1592_s13 = sshll.u32 (!%p1591_p2), %s1761_s18, 7 }
  0x64   : > { %v1651_v36 = vld [vmem:[%s1940_s30 + $0xb8] sm:$0xff]  ;;  %859 = vmatpush.bf16.msra.mxu1 %v1643_v35  ;;  %v1650_v40 = vld [vmem:[%s1940_s30 + $0xb0] sm:$0xff]  ;;  %v1649_v44 = vld [vmem:[%s1940_s30 + $0xa8] sm:$0xff] }
  0x65   : > { %v1659_v37 = vld [vmem:[%s1940_s30 + $0xf8] sm:$0xff]  ;;  %908 = vmatpush.bf16.msra.mxu2 %v1651_v36  ;;  %v1658_v41 = vld [vmem:[%s1940_s30 + $0xf0] sm:$0xff]  ;;  %v1657_v45 = vld [vmem:[%s1940_s30 + $0xe8] sm:$0xff] }
  0x66   : > { %957 = vmatpush.bf16.msra.mxu3 %v1659_v37  ;;  %v1632_v46 = vld [vmem:[%s1940_s30 + $0x20] sm:$0xff]  ;;  %v1631_v50 = vld [vmem:[%s1940_s30 + $0x18] sm:$0xff]  ;;  %v1630_v54 = vld [vmem:[%s1940_s30 + $0x10] sm:$0xff] }
  0x67   : > { %811 = vmatpush.bf16.msra.mxu0 %v1634_v38  ;;  %v1640_v47 = vld [vmem:[%s1940_s30 + $0x60] sm:$0xff]  ;;  %v1639_v51 = vld [vmem:[%s1940_s30 + $0x58] sm:$0xff]  ;;  %v1638_v55 = vld [vmem:[%s1940_s30 + $0x50] sm:$0xff] }
  0x68   : > { %860 = vmatpush.bf16.msra.mxu1 %v1642_v39  ;;  %v1648_v48 = vld [vmem:[%s1940_s30 + $0xa0] sm:$0xff]  ;;  %v1647_v52 = vld [vmem:[%s1940_s30 + $0x98] sm:$0xff]  ;;  %v1646_v56 = vld [vmem:[%s1940_s30 + $0x90] sm:$0xff] }
  0x69   : > { %909 = vmatpush.bf16.msra.mxu2 %v1650_v40  ;;  %v1656_v49 = vld [vmem:[%s1940_s30 + $0xe0] sm:$0xff]  ;;  %v1655_v53 = vld [vmem:[%s1940_s30 + $0xd8] sm:$0xff]  ;;  %v1654_v57 = vld [vmem:[%s1940_s30 + $0xd0] sm:$0xff] }
  0x6a   : > { %958 = vmatpush.bf16.msra.mxu3 %v1658_v41  ;;  %v1629_v58 = vld [vmem:[%s1940_s30 + $0x8] sm:$0xff]  ;;  %v1628_v62 = vld [vmem:[%s1940_s30] sm:$0xff]  ;;  %v1598_v3 = vld [vmem:[%s1947_s8 + $0xc] sm:$0xf0] }
  0x6b   : > { %812 = vmatpush.bf16.msra.mxu0 %v1633_v42  ;;  %v1637_v59 = vld [vmem:[%s1940_s30 + $0x48] sm:$0xff]  ;;  %v1636_v63 = vld [vmem:[%s1940_s30 + $0x40] sm:$0xff]  ;;  %v1339_v5 = vld [vmem:[%s1947_s8 + $0x10] sm:$0xf0] }
  0x6c   : > { %861 = vmatpush.bf16.msra.mxu1 %v1641_v43  ;;  %v1645_v60 = vld [vmem:[%s1940_s30 + $0x88] sm:$0xff]  ;;  %v1644_v0 = vld [vmem:[%s1940_s30 + $0x80] sm:$0xff]  ;;  %v1599_v7 = vld [vmem:[%s1947_s8 + $0x14] sm:$0xf0] }
  0x6d   : > { %910 = vmatpush.bf16.msra.mxu2 %v1649_v44  ;;  %v1653_v61 = vld [vmem:[%s1940_s30 + $0xc8] sm:$0xff]  ;;  %v1652_v1 = vld [vmem:[%s1940_s30 + $0xc0] sm:$0xff]  ;;  %v1347_v9 = vld [vmem:[%s1947_s8 + $0x18] sm:$0xf0] }
  0x6e   : > { %959 = vmatpush.bf16.msra.mxu3 %v1657_v45  ;;  %v1337_v2 = vld [vmem:[%s1947_s8] sm:$0xf]  ;;  %v1596_v4 = vld [vmem:[%s1947_s8 + $0x4] sm:$0xf]  ;;  %v1345_v6 = vld [vmem:[%s1947_s8 + $0x8] sm:$0xf] }
  0x6f   : > { %813 = vmatpush.bf16.msra.mxu0 %v1632_v46  ;;  %v1597_v8 = vld [vmem:[%s1947_s8 + $0xc] sm:$0xf]  ;;  %v1338_v10 = vor.u32 %v1598_v3, %v1337_v2  ;;  %v1342_v11 = vor.u32 %v1596_v4, %v1339_v5  ;;  %v1346_v12 = vor.u32 %v1599_v7, %v1345_v6  ;;  %v1353_v14 = vld [vmem:[%s1947_s8 + $0x20] sm:$0xf]  ;;  %v1602_v15 = vld [vmem:[%s1947_s8 + $0x2c] sm:$0xf0] }
  0x70   : > { %862 = vmatpush.bf16.msra.mxu1 %v1640_v47  ;;  %v1350_v13 = vor.u32 %v1597_v8, %v1347_v9  ;;  %v1600_v16 = vld [vmem:[%s1947_s8 + $0x24] sm:$0xf]  ;;  %v1355_v17 = vld [vmem:[%s1947_s8 + $0x30] sm:$0xf0]  ;;  %v1361_v18 = vld [vmem:[%s1947_s8 + $0x28] sm:$0xf]  ;;  %v1354_v22 = vor.u32 %v1602_v15, %v1353_v14 }
  0x71   : > { %911 = vmatpush.bf16.msra.mxu2 %v1648_v48  ;;  %v1603_v19 = vld [vmem:[%s1947_s8 + $0x34] sm:$0xf0]  ;;  %v1601_v20 = vld [vmem:[%s1947_s8 + $0x2c] sm:$0xf]  ;;  %v1363_v21 = vld [vmem:[%s1947_s8 + $0x38] sm:$0xf0]  ;;  %v1358_v23 = vor.u32 %v1600_v16, %v1355_v17 }
  0x72   : > { %960 = vmatpush.bf16.msra.mxu3 %v1656_v49  ;;  %v1362_v24 = vor.u32 %v1603_v19, %v1361_v18  ;;  %v1366_v25 = vor.u32 %v1601_v20, %v1363_v21  ;;  %v1369_v26 = vld [vmem:[%s1947_s8 + $0x40] sm:$0xf]  ;;  %v1606_v27 = vld [vmem:[%s1947_s8 + $0x4c] sm:$0xf0]  ;;  %v1604_v28 = vld [vmem:[%s1947_s8 + $0x44] sm:$0xf] }
  0x73   : > { %814 = vmatpush.bf16.msra.mxu0 %v1631_v50  ;;  %v1371_v29 = vld [vmem:[%s1947_s8 + $0x50] sm:$0xf0]  ;;  %v1377_v30 = vld [vmem:[%s1947_s8 + $0x48] sm:$0xf]  ;;  %v1607_v31 = vld [vmem:[%s1947_s8 + $0x54] sm:$0xf0]  ;;  %v1370_v34 = vor.u32 %v1606_v27, %v1369_v26 }
  0x74   : > { %863 = vmatpush.bf16.msra.mxu1 %v1639_v51  ;;  %v1605_v32 = vld [vmem:[%s1947_s8 + $0x4c] sm:$0xf]  ;;  %v1379_v33 = vld [vmem:[%s1947_s8 + $0x58] sm:$0xf0]  ;;  %v1374_v35 = vor.u32 %v1604_v28, %v1371_v29  ;;  %v1378_v36 = vor.u32 %v1607_v31, %v1377_v30  ;;  %v1385_v38 = vld [vmem:[%s1947_s8 + $0x60] sm:$0xf] }
  0x75   : > { %912 = vmatpush.bf16.msra.mxu2 %v1647_v52  ;;  %v1382_v37 = vor.u32 %v1605_v32, %v1379_v33  ;;  %v1610_v39 = vld [vmem:[%s1947_s8 + $0x6c] sm:$0xf0]  ;;  %v1608_v40 = vld [vmem:[%s1947_s8 + $0x64] sm:$0xf]  ;;  %v1387_v41 = vld [vmem:[%s1947_s8 + $0x70] sm:$0xf0] }
  0x76   : > { %961 = vmatpush.bf16.msra.mxu3 %v1655_v53  ;;  %v1393_v42 = vld [vmem:[%s1947_s8 + $0x68] sm:$0xf]  ;;  %v1611_v43 = vld [vmem:[%s1947_s8 + $0x74] sm:$0xf0]  ;;  %v1609_v44 = vld [vmem:[%s1947_s8 + $0x6c] sm:$0xf]  ;;  %v1386_v46 = vor.u32 %v1610_v39, %v1385_v38  ;;  %v1390_v47 = vor.u32 %v1608_v40, %v1387_v41 }
  0x77   : > { %815 = vmatpush.bf16.msra.mxu0 %v1630_v54  ;;  %v1395_v45 = vld [vmem:[%s1947_s8 + $0x78] sm:$0xf0]  ;;  %v1394_v48 = vor.u32 %v1611_v43, %v1393_v42  ;;  %v1401_v50 = vld [vmem:[%s1947_s8 + $0x80] sm:$0xf]  ;;  %v1614_v51 = vld [vmem:[%s1947_s8 + $0x8c] sm:$0xf0] }
  0x78   : > { %864 = vmatpush.bf16.msra.mxu1 %v1638_v55  ;;  %v1398_v49 = vor.u32 %v1609_v44, %v1395_v45  ;;  %v1612_v52 = vld [vmem:[%s1947_s8 + $0x84] sm:$0xf]  ;;  %v1403_v53 = vld [vmem:[%s1947_s8 + $0x90] sm:$0xf0]  ;;  %v1409_v54 = vld [vmem:[%s1947_s8 + $0x88] sm:$0xf] }
  0x79   : > { %913 = vmatpush.bf16.msra.mxu2 %v1646_v56  ;;  %v1615_v55 = vld [vmem:[%s1947_s8 + $0x94] sm:$0xf0]  ;;  %v1613_v56 = vld [vmem:[%s1947_s8 + $0x8c] sm:$0xf]  ;;  %v1425_v2 = vld [vmem:[%s1947_s8 + $0xa8] sm:$0xf] }
  0x7a   : > { %962 = vmatpush.bf16.msra.mxu3 %v1654_v57  ;;  %v1411_v57 = vld [vmem:[%s1947_s8 + $0x98] sm:$0xf0]  ;;  %v1619_v3 = vld [vmem:[%s1947_s8 + $0xb4] sm:$0xf0]  ;;  %v1617_v4 = vld [vmem:[%s1947_s8 + $0xac] sm:$0xf] }
  0x7b   : > { %816 = vmatpush.bf16.msra.mxu0 %v1629_v58  ;;  %v1402_v58 = vor.u32 %v1614_v51, %v1401_v50  ;;  %v1427_v5 = vld [vmem:[%s1947_s8 + $0xb8] sm:$0xf0]  ;;  %v1426_v8 = vor.u32 %v1619_v3, %v1425_v2  ;;  %v1441_v14 = vld [vmem:[%s1947_s8 + $0xc8] sm:$0xf]  ;;  %v1623_v15 = vld [vmem:[%s1947_s8 + $0xd4] sm:$0xf0] }
  0x7c   : > { %865 = vmatpush.bf16.msra.mxu1 %v1637_v59  ;;  %v1406_v59 = vor.u32 %v1612_v52, %v1403_v53  ;;  %v1430_v9 = vor.u32 %v1617_v4, %v1427_v5  ;;  %v1621_v16 = vld [vmem:[%s1947_s8 + $0xcc] sm:$0xf]  ;;  %v1443_v17 = vld [vmem:[%s1947_s8 + $0xd8] sm:$0xf0]  ;;  %v1442_v20 = vor.u32 %v1623_v15, %v1441_v14  ;;  %v1457_v26 = vld [vmem:[%s1947_s8 + $0xe8] sm:$0xf] }
  0x7d   : > { %914 = vmatpush.bf16.msra.mxu2 %v1645_v60  ;;  %v1410_v60 = vor.u32 %v1615_v55, %v1409_v54  ;;  %v1446_v21 = vor.u32 %v1621_v16, %v1443_v17  ;;  %v1627_v27 = vld [vmem:[%s1947_s8 + $0xf4] sm:$0xf0]  ;;  %v1625_v28 = vld [vmem:[%s1947_s8 + $0xec] sm:$0xf]  ;;  %v1459_v29 = vld [vmem:[%s1947_s8 + $0xf8] sm:$0xf0] }
  0x7e   : > { %963 = vmatpush.bf16.msra.mxu3 %v1653_v61  ;;  %v1414_v61 = vor.u32 %v1613_v56, %v1411_v57  ;;  %v1458_v32 = vor.u32 %v1627_v27, %v1457_v26  ;;  %v1462_v33 = vor.u32 %v1625_v28, %v1459_v29  ;;  %v346_v42 = vld [vmem:[#allocation2 + $0x30] sm:$0xff]  ;;  %v347_v51 = vld [vmem:[#allocation2] sm:$0xff]  ;;  %v349_v5 = vld [vmem:[#allocation2 + $0x18] sm:$0xff] }
  0x7f   : > { %817 = vmatpush.bf16.msra.mxu0 %v1628_v62  ;;  %v1417_v62 = vld [vmem:[%s1947_s8 + $0xa0] sm:$0xf]  ;;  %v350_v14 = vld [vmem:[#allocation2 + $0x50] sm:$0xff] }
  0x80   : > { %866 = vmatpush.bf16.msra.mxu1 %v1636_v63  ;;  %v1618_v63 = vld [vmem:[%s1947_s8 + $0xac] sm:$0xf0] }
  0x81   : > { %915 = vmatpush.bf16.msra.mxu2 %v1644_v0  ;;  %v1616_v0 = vld [vmem:[%s1947_s8 + $0xa4] sm:$0xf]  ;;  %v1418_v6 = vor.u32 %v1618_v63, %v1417_v62 }
  0x82   : > { %964 = vmatpush.bf16.msra.mxu3 %v1652_v1  ;;  %818 = vmatmul.bf16.vlgmr.msra.gmra.mxu0 %v1338_v10  ;;  %v1419_v1 = vld [vmem:[%s1947_s8 + $0xb0] sm:$0xf0]  ;;  %v1433_v10 = vld [vmem:[%s1947_s8 + $0xc0] sm:$0xf] }
  0x83   : > { %867 = vmatmul.bf16.vlgmr.msra.gmra.mxu1 %v1342_v11  ;;  %v1422_v7 = vor.u32 %v1616_v0, %v1419_v1  ;;  %v1622_v11 = vld [vmem:[%s1947_s8 + $0xcc] sm:$0xf0] }
  0x84   : > { %916 = vmatmul.bf16.vlgmr.msra.gmra.mxu2 %v1346_v12  ;;  %v1620_v12 = vld [vmem:[%s1947_s8 + $0xc4] sm:$0xf]  ;;  %v1434_v18 = vor.u32 %v1622_v11, %v1433_v10 }
  0x85   : > { %965 = vmatmul.bf16.vlgmr.msra.gmra.mxu3 %v1350_v13  ;;  %v1435_v13 = vld [vmem:[%s1947_s8 + $0xd0] sm:$0xf0] }
  0x86   : > { %v1438_v19 = vor.u32 %v1620_v12, %v1435_v13 }
  0x92   : > { %823 = vmatmul.bf16.gmra.mxu0 %v1354_v22  ;;  %v1449_v22 = vld [vmem:[%s1947_s8 + $0xe0] sm:$0xf] }
  0x93   : > { %872 = vmatmul.bf16.gmra.mxu1 %v1358_v23  ;;  %v1626_v23 = vld [vmem:[%s1947_s8 + $0xec] sm:$0xf0] }
  0x94   : > { %921 = vmatmul.bf16.gmra.mxu2 %v1362_v24  ;;  %v1624_v24 = vld [vmem:[%s1947_s8 + $0xe4] sm:$0xf]  ;;  %v1450_v30 = vor.u32 %v1626_v23, %v1449_v22  ;;  %v351_v23 = vld [vmem:[#allocation2 + $0x68] sm:$0xff] }
  0x95   : > { %970 = vmatmul.bf16.gmra.mxu3 %v1366_v25  ;;  %v1451_v25 = vld [vmem:[%s1947_s8 + $0xf0] sm:$0xf0] }
  0x96   : > { %v1454_v31 = vor.u32 %v1624_v24, %v1451_v25 }
  0xa2   : > { %828 = vmatmul.bf16.gmra.mxu0 %v1370_v34 }
  0xa3   : > { %877 = vmatmul.bf16.gmra.mxu1 %v1374_v35 }
  0xa4   : > { %926 = vmatmul.bf16.gmra.mxu2 %v1378_v36 }
  0xa5   : > { %975 = vmatmul.bf16.gmra.mxu3 %v1382_v37 }
  0xb2   : > { %833 = vmatmul.bf16.gmra.mxu0 %v1386_v46 }
  0xb3   : > { %882 = vmatmul.bf16.gmra.mxu1 %v1390_v47 }
  0xb4   : > { %931 = vmatmul.bf16.gmra.mxu2 %v1394_v48 }
  0xb5   : > { %980 = vmatmul.bf16.gmra.mxu3 %v1398_v49 }
  0xc2   : > { %838 = vmatmul.bf16.gmra.mxu0 %v1402_v58 }
  0xc3   : > { %887 = vmatmul.bf16.gmra.mxu1 %v1406_v59 }
  0xc4   : > { %936 = vmatmul.bf16.gmra.mxu2 %v1410_v60  ;;  %v348_v60 = vld [vmem:[#allocation2 + $0x58] sm:$0xff] }
  0xc5   : > { %985 = vmatmul.bf16.gmra.mxu3 %v1414_v61 }
  0xd2   : > { %843 = vmatmul.bf16.gmra.mxu0 %v1418_v6 }
  0xd3   : > { %892 = vmatmul.bf16.gmra.mxu1 %v1422_v7 }
  0xd4   : > { %941 = vmatmul.bf16.gmra.mxu2 %v1426_v8 }
  0xd5   : > { %990 = vmatmul.bf16.gmra.mxu3 %v1430_v9 }
  0xe2   : > { %848 = vmatmul.bf16.gmra.mxu0 %v1434_v18 }
  0xe3   : > { %897 = vmatmul.bf16.gmra.mxu1 %v1438_v19 }
  0xe4   : > { %946 = vmatmul.bf16.gmra.mxu2 %v1442_v20 }
  0xe5   : > { %995 = vmatmul.bf16.gmra.mxu3 %v1446_v21 }
  0xf2   : > { %853 = vmatmul.bf16.gmra.mxu0 %v1450_v30 }
  0xf3   : > { %902 = vmatmul.bf16.gmra.mxu1 %v1454_v31 }
  0xf4   : > { %951 = vmatmul.bf16.gmra.mxu2 %v1458_v32  ;;  %v352_v32 = vld [vmem:[#allocation2 + $0x8] sm:$0xff] }
  0xf5   : > { %1000 = vmatmul.bf16.gmra.mxu3 %v1462_v33 }
  0xff   : > { %v819_v34 = vpop.f32.mrf.mxu0 }
 0x100   : > { %v868_v35 = vpop.f32.mrf.mxu1 }
 0x101   : > { %v869_v36 = vadd.f32 %v868_v35, %v819_v34 }
 0x107   : > { %v917_v37 = vpop.f32.mrf.mxu2  ;;  %v821_v40 = vpop.f32.mrf.mxu0 }
 0x108   : > { %v966_v38 = vpop.f32.mrf.mxu3  ;;  %v918_v39 = vadd.f32 %v917_v37, %v869_v36  ;;  %v870_v41 = vpop.f32.mrf.mxu1 }
 0x109   : > { %v871_v45 = vadd.f32 %v870_v41, %v821_v40  ;;  %v353_v41 = vld [vmem:[#allocation2 + $0x48] sm:$0xff] }
 0x10a   : > { %v967_v43 = vadd.f32 %v966_v38, %v918_v39 }
 0x10c   : > { %v1006_v44 = vadd.f32 %v967_v43, %v346_v42 }
 0x10e   : > { %1022 = vst [vmem:[#allocation2 + $0x30] sm:$0xff] %v1006_v44 }
 0x10f   : > { %v919_v46 = vpop.f32.mrf.mxu2  ;;  %v824_v49 = vpop.f32.mrf.mxu0 }
 0x110   : > { %v968_v47 = vpop.f32.mrf.mxu3  ;;  %v920_v48 = vadd.f32 %v919_v46, %v871_v45  ;;  %v873_v50 = vpop.f32.mrf.mxu1 }
 0x111   : > { %v874_v54 = vadd.f32 %v873_v50, %v824_v49  ;;  %v354_v50 = vld [vmem:[#allocation2 + $0x40] sm:$0xff] }
 0x112   : > { %v969_v52 = vadd.f32 %v968_v47, %v920_v48 }
 0x114   : > { %v1007_v53 = vadd.f32 %v969_v52, %v347_v51 }
 0x116   : > { %1023 = vst [vmem:[#allocation2] sm:$0xff] %v1007_v53 }
 0x117   : > { %v922_v55 = vpop.f32.mrf.mxu2  ;;  %v826_v58 = vpop.f32.mrf.mxu0 }
 0x118   : > { %v971_v56 = vpop.f32.mrf.mxu3  ;;  %v923_v57 = vadd.f32 %v922_v55, %v874_v54  ;;  %v875_v59 = vpop.f32.mrf.mxu1 }
 0x119   : > { %v876_v63 = vadd.f32 %v875_v59, %v826_v58  ;;  %v355_v59 = vld [vmem:[#allocation2 + $0x20] sm:$0xff] }
 0x11a   : > { %v972_v61 = vadd.f32 %v971_v56, %v923_v57 }
 0x11c   : > { %v1008_v62 = vadd.f32 %v972_v61, %v348_v60 }
 0x11e   : > { %1024 = vst [vmem:[#allocation2 + $0x58] sm:$0xff] %v1008_v62 }
 0x11f   : > { %v924_v0 = vpop.f32.mrf.mxu2  ;;  %v829_v3 = vpop.f32.mrf.mxu0 }
 0x120   : > { %v973_v1 = vpop.f32.mrf.mxu3  ;;  %v925_v2 = vadd.f32 %v924_v0, %v876_v63  ;;  %v878_v4 = vpop.f32.mrf.mxu1 }
 0x121   : > { %v879_v8 = vadd.f32 %v878_v4, %v829_v3  ;;  %v356_v4 = vld [vmem:[#allocation2 + $0x10] sm:$0xff] }
 0x122   : > { %v974_v6 = vadd.f32 %v973_v1, %v925_v2 }
 0x124   : > { %v1009_v7 = vadd.f32 %v974_v6, %v349_v5 }
 0x126   : > { %1025 = vst [vmem:[#allocation2 + $0x18] sm:$0xff] %v1009_v7 }
 0x127   : > { %v927_v9 = vpop.f32.mrf.mxu2  ;;  %v831_v12 = vpop.f32.mrf.mxu0 }
 0x128   : > { %v976_v10 = vpop.f32.mrf.mxu3  ;;  %v928_v11 = vadd.f32 %v927_v9, %v879_v8  ;;  %v880_v13 = vpop.f32.mrf.mxu1 }
 0x129   : > { %v881_v17 = vadd.f32 %v880_v13, %v831_v12  ;;  %v357_v13 = vld [vmem:[#allocation2 + $0x38] sm:$0xff] }
 0x12a   : > { %v977_v15 = vadd.f32 %v976_v10, %v928_v11 }
 0x12c   : > { %v1010_v16 = vadd.f32 %v977_v15, %v350_v14 }
 0x12e   : > { %1026 = vst [vmem:[#allocation2 + $0x50] sm:$0xff] %v1010_v16 }
 0x12f   : > { %v929_v18 = vpop.f32.mrf.mxu2  ;;  %v834_v21 = vpop.f32.mrf.mxu0 }
 0x130   : > { %v978_v19 = vpop.f32.mrf.mxu3  ;;  %v930_v20 = vadd.f32 %v929_v18, %v881_v17  ;;  %v883_v22 = vpop.f32.mrf.mxu1 }
 0x131   : > { %v884_v26 = vadd.f32 %v883_v22, %v834_v21  ;;  %v358_v22 = vld [vmem:[#allocation2 + $0x60] sm:$0xff] }
 0x132   : > { %v979_v24 = vadd.f32 %v978_v19, %v930_v20 }
 0x134   : > { %v1011_v25 = vadd.f32 %v979_v24, %v351_v23 }
 0x136   : > { %1027 = vst [vmem:[#allocation2 + $0x68] sm:$0xff] %v1011_v25 }
 0x137   : > { %v932_v27 = vpop.f32.mrf.mxu2  ;;  %v836_v30 = vpop.f32.mrf.mxu0 }
 0x138   : > { %v981_v28 = vpop.f32.mrf.mxu3  ;;  %v933_v29 = vadd.f32 %v932_v27, %v884_v26  ;;  %v885_v31 = vpop.f32.mrf.mxu1 }
 0x139   : > { %v886_v35 = vadd.f32 %v885_v31, %v836_v30 }
 0x13a   : > { %v982_v33 = vadd.f32 %v981_v28, %v933_v29  ;;  %v359_v29 = vld [vmem:[#allocation2 + $0x70] sm:$0xff] }
 0x13c   : > { %v1012_v34 = vadd.f32 %v982_v33, %v352_v32 }
 0x13e   : > { %1028 = vst [vmem:[#allocation2 + $0x8] sm:$0xff] %v1012_v34 }
 0x13f   : > { %v934_v36 = vpop.f32.mrf.mxu2  ;;  %v839_v39 = vpop.f32.mrf.mxu0 }
 0x140   : > { %v983_v37 = vpop.f32.mrf.mxu3  ;;  %v935_v38 = vadd.f32 %v934_v36, %v886_v35  ;;  %v888_v40 = vpop.f32.mrf.mxu1 }
 0x141   : > { %v889_v44 = vadd.f32 %v888_v40, %v839_v39 }
 0x142   : > { %v984_v42 = vadd.f32 %v983_v37, %v935_v38  ;;  %v360_v38 = vld [vmem:[#allocation2 + $0x78] sm:$0xff] }
 0x144   : > { %v1013_v43 = vadd.f32 %v984_v42, %v353_v41 }
 0x146   : > { %1029 = vst [vmem:[#allocation2 + $0x48] sm:$0xff] %v1013_v43 }
 0x147   : > { %v937_v45 = vpop.f32.mrf.mxu2  ;;  %v841_v48 = vpop.f32.mrf.mxu0 }
 0x148   : > { %v986_v46 = vpop.f32.mrf.mxu3  ;;  %v938_v47 = vadd.f32 %v937_v45, %v889_v44  ;;  %v890_v49 = vpop.f32.mrf.mxu1 }
 0x149   : > { %v891_v53 = vadd.f32 %v890_v49, %v841_v48 }
 0x14a   : > { %v987_v51 = vadd.f32 %v986_v46, %v938_v47  ;;  %v361_v46 = vld [vmem:[#allocation2 + $0x28] sm:$0xff] }
 0x14c   : > { %v1014_v52 = vadd.f32 %v987_v51, %v354_v50 }
 0x14e   : > { %1030 = vst [vmem:[#allocation2 + $0x40] sm:$0xff] %v1014_v52 }
 0x14f   : > { %v939_v54 = vpop.f32.mrf.mxu2  ;;  %v844_v57 = vpop.f32.mrf.mxu0 }
 0x150   : > { %v988_v55 = vpop.f32.mrf.mxu3  ;;  %v940_v56 = vadd.f32 %v939_v54, %v891_v53  ;;  %v893_v58 = vpop.f32.mrf.mxu1 }
 0x151   : > { %v894_v62 = vadd.f32 %v893_v58, %v844_v57 }
 0x152   : > { %v989_v60 = vadd.f32 %v988_v55, %v940_v56 }
 0x154   : > { %v1015_v61 = vadd.f32 %v989_v60, %v355_v59 }
 0x156   : > { %1031 = vst [vmem:[#allocation2 + $0x20] sm:$0xff] %v1015_v61 }
 0x157   : > { %v942_v63 = vpop.f32.mrf.mxu2  ;;  %v846_v2 = vpop.f32.mrf.mxu0 }
 0x158   : > { %v991_v0 = vpop.f32.mrf.mxu3  ;;  %v943_v1 = vadd.f32 %v942_v63, %v894_v62  ;;  %v895_v3 = vpop.f32.mrf.mxu1 }
 0x159   : > { %v896_v7 = vadd.f32 %v895_v3, %v846_v2 }
 0x15a   : > { %v992_v5 = vadd.f32 %v991_v0, %v943_v1 }
 0x15c   : > { %v1016_v6 = vadd.f32 %v992_v5, %v356_v4 }
 0x15e   : > { %1032 = vst [vmem:[#allocation2 + $0x10] sm:$0xff] %v1016_v6 }
 0x15f   : > { %v944_v8 = vpop.f32.mrf.mxu2  ;;  %v849_v11 = vpop.f32.mrf.mxu0 }
 0x160   : > { %v993_v9 = vpop.f32.mrf.mxu3  ;;  %v945_v10 = vadd.f32 %v944_v8, %v896_v7  ;;  %v898_v12 = vpop.f32.mrf.mxu1 }
 0x161   : > { %v899_v16 = vadd.f32 %v898_v12, %v849_v11 }
 0x162   : > { %v994_v14 = vadd.f32 %v993_v9, %v945_v10 }
 0x164   : > { %v1017_v15 = vadd.f32 %v994_v14, %v357_v13 }
 0x166   : > { %1033 = vst [vmem:[#allocation2 + $0x38] sm:$0xff] %v1017_v15 }
 0x167   : > { %v947_v17 = vpop.f32.mrf.mxu2  ;;  %v851_v20 = vpop.f32.mrf.mxu0 }
 0x168   : > { %v996_v18 = vpop.f32.mrf.mxu3  ;;  %v948_v19 = vadd.f32 %v947_v17, %v899_v16  ;;  %v900_v21 = vpop.f32.mrf.mxu1 }
 0x169   : > { %v901_v25 = vadd.f32 %v900_v21, %v851_v20 }
 0x16a   : > { %v997_v23 = vadd.f32 %v996_v18, %v948_v19 }
 0x16c   : > { %v1018_v24 = vadd.f32 %v997_v23, %v358_v22 }
 0x16e   : > { %1034 = vst [vmem:[#allocation2 + $0x60] sm:$0xff] %v1018_v24 }
 0x16f   : > { %v949_v26 = vpop.f32.mrf.mxu2  ;;  %v854_v30 = vpop.f32.mrf.mxu0 }
 0x170   : > { %v998_v27 = vpop.f32.mrf.mxu3  ;;  %v950_v28 = vadd.f32 %v949_v26, %v901_v25  ;;  %v903_v31 = vpop.f32.mrf.mxu1 }
 0x171   : > { %v904_v34 = vadd.f32 %v903_v31, %v854_v30 }
 0x172   : > { %v999_v32 = vadd.f32 %v998_v27, %v950_v28 }
 0x174   : > { %v1019_v33 = vadd.f32 %v999_v32, %v359_v29 }
 0x176   : > { %1035 = vst [vmem:[#allocation2 + $0x70] sm:$0xff] %v1019_v33 }
 0x177   : > { %v952_v35 = vpop.f32.mrf.mxu2  ;;  %v856_v40 = vpop.f32.mrf.mxu0 }
 0x178   : > { %v1001_v36 = vpop.f32.mrf.mxu3  ;;  %v953_v37 = vadd.f32 %v952_v35, %v904_v34  ;;  %v905_v41 = vpop.f32.mrf.mxu1 }
 0x179   : > { %v906_v43 = vadd.f32 %v905_v41, %v856_v40 }
 0x17a   : > { %v1002_v39 = vadd.f32 %v1001_v36, %v953_v37 }
 0x17c   : > { %v1020_v42 = vadd.f32 %v1002_v39, %v360_v38 }
 0x17e   : > { %1036 = vst [vmem:[#allocation2 + $0x78] sm:$0xff] %v1020_v42 }
 0x17f   : > { %v954_v44 = vpop.f32.mrf.mxu2 }
 0x180   : > { %v955_v45 = vadd.f32 %v954_v44, %v906_v43  ;;  %v1003_v47 = vpop.f32.mrf.mxu3 }
 0x182   : > { %v1004_v48 = vadd.f32 %v1003_v47, %v955_v45  ;;  %1041 = sbr.rel (%p1591_p2) target bundleno = 449 (0x1c1), region = 67 }
 0x184   : > { %v1021_v49 = vadd.f32 %v1004_v48, %v361_v46 }
 0x186   : > { %1037 = vst [vmem:[#allocation2 + $0x28] sm:$0xff] %v1021_v49 }
 0x187   : > { %v1042_v50 = vld [vmem:[#allocation2 + $0x30] sm:$0xff]  ;;  %v2053_v51 = vld [vmem:[%s2153_s2] ss:$0 sm:$0xff]  ;;  %v1095_v52 = vlaneseq  ;;  %v2056_v53 = vstv %s1592_s13  ;;  %v1044_v55 = vld [vmem:[#allocation2 + $0x58] sm:$0xff] }
 0x188   : > { %v1043_v54 = vld [vmem:[#allocation2] sm:$0xff]  ;;  %v1045_v56 = vld [vmem:[#allocation2 + $0x18] sm:$0xff]  ;;  %v1062_v57 = vadd.f32 %v2053_v51, %v1042_v50  ;;  %v1064_v60 = vadd.f32 %v2053_v51, %v1044_v55  ;;  %v1046_v61 = vld [vmem:[#allocation2 + $0x50] sm:$0xff] }
 0x189   : > { %v2059_v58 = vshrl.u32 %v1095_v52, 7  ;;  %v1063_v59 = vadd.f32 %v2053_v51, %v1043_v54  ;;  %v1047_v62 = vld [vmem:[#allocation2 + $0x68] sm:$0xff]  ;;  %v1065_v0 = vadd.f32 %v2053_v51, %v1045_v56  ;;  %v1066_v1 = vadd.f32 %v2053_v51, %v1046_v61  ;;  %v1050_v27 = vld [vmem:[#allocation2 + $0x40] sm:$0xff]  ;;  %v1052_v39 = vld [vmem:[#allocation2 + $0x10] sm:$0xff] }
 0x18a   : > { %v1048_v63 = vld [vmem:[#allocation2 + $0x8] sm:$0xff]  ;;  %v1067_v2 = vadd.f32 %v2053_v51, %v1047_v62  ;;  %1078 = vst [vmem:[%s1945_s15] sm:$0xff] %v1062_v57  ;;  %v1051_v34 = vld [vmem:[#allocation2 + $0x20] sm:$0xff]  ;;  %v1070_v38 = vadd.f32 %v2053_v51, %v1050_v27  ;;  %v1053_v44 = vld [vmem:[#allocation2 + $0x38] sm:$0xff]  ;;  %v1072_v52 = vadd.f32 %v2053_v51, %v1052_v39 }
 0x18b   : > { %v1068_v3 = vadd.f32 %v2053_v51, %v1048_v63  ;;  %v1049_v4 = vld [vmem:[#allocation2 + $0x48] sm:$0xff]  ;;  %v1113_v5 = vadd.s32 %v2056_v53, %v2059_v58  ;;  %v1097_v6 = vadd.s32 8, %v2059_v58  ;;  %v1098_v7 = vadd.s32 16, %v2059_v58  ;;  %1079 = vst [vmem:[%s1945_s15 + $0x8] sm:$0xff] %v1063_v59  ;;  %v1054_v54 = vld [vmem:[#allocation2 + $0x60] sm:$0xff] }
 0x18c   : > { %v1099_v8 = vadd.s32 24, %v2059_v58  ;;  %v1100_v9 = vadd.s32 32, %v2059_v58  ;;  %v1101_v10 = vadd.s32 40, %v2059_v58  ;;  %v1102_v11 = vadd.s32 48, %v2059_v58  ;;  %1080 = vst [vmem:[%s1945_s15 + $0x10] sm:$0xff] %v1064_v60 }
 0x18d   : > { %v1069_v12 = vadd.f32 %v2053_v51, %v1049_v4  ;;  %vm1129_vm0 = vcmp.lt.s32.totalorder %v1113_v5, 512  ;;  %v1114_v13 = vadd.s32 %v2056_v53, %v1097_v6  ;;  %v1115_v14 = vadd.s32 %v2056_v53, %v1098_v7  ;;  %1081 = vst [vmem:[%s1945_s15 + $0x18] sm:$0xff] %v1065_v0 }
 0x18e   : > { %v1116_v15 = vadd.s32 %v2056_v53, %v1099_v8  ;;  %v1145_v16 = vsel %vm1129_vm0, %v1062_v57, 0.0  ;;  %v1117_v17 = vadd.s32 %v2056_v53, %v1100_v9  ;;  %v1118_v18 = vadd.s32 %v2056_v53, %v1101_v10  ;;  %1082 = vst [vmem:[%s1945_s15 + $0x20] sm:$0xff] %v1066_v1  ;;  %v1056_v9 = vld [vmem:[#allocation2 + $0x78] sm:$0xff] }
 0x18f   : > { %v1119_v19 = vadd.s32 %v2056_v53, %v1102_v11  ;;  %v1182_v20 = vmul.f32 %v1145_v16, %v1145_v16  ;;  %vm1130_vm1 = vcmp.lt.s32.totalorder %v1114_v13, 512  ;;  %vm1131_vm2 = vcmp.lt.s32.totalorder %v1115_v14, 512  ;;  %1083 = vst [vmem:[%s1945_s15 + $0x28] sm:$0xff] %v1067_v2 }
 0x190   : > { %vm1132_vm3 = vcmp.lt.s32.totalorder %v1116_v15, 512  ;;  %v1146_v21 = vsel %vm1130_vm1, %v1063_v59, 0.0  ;;  %v1147_v22 = vsel %vm1131_vm2, %v1064_v60, 0.0  ;;  %vm1133_vm4 = vcmp.lt.s32.totalorder %v1117_v17, 512  ;;  %1084 = vst [vmem:[%s1945_s15 + $0x30] sm:$0xff] %v1068_v3  ;;  %v1057_v17 = vld [vmem:[#allocation2 + $0x28] sm:$0xff] }
 0x191   : > { %v1148_v23 = vsel %vm1132_vm3, %v1065_v0, 0.0  ;;  %v1161_v24 = vadd.f32 %v1146_v21, %v1145_v16  ;;  %v1183_v25 = vmul.f32 %v1146_v21, %v1146_v21  ;;  %v1184_v26 = vmul.f32 %v1147_v22, %v1147_v22  ;;  %1085 = vst [vmem:[%s1945_s15 + $0x38] sm:$0xff] %v1069_v12 }
 0x192   : > { %v1149_v28 = vsel %vm1133_vm4, %v1066_v1, 0.0  ;;  %vm1134_vm5 = vcmp.lt.s32.totalorder %v1118_v18, 512  ;;  %vm1135_vm6 = vcmp.lt.s32.totalorder %v1119_v19, 512  ;;  %v1103_v29 = vadd.s32 56, %v2059_v58  ;;  %1086 = vst [vmem:[%s1945_s15 + $0x40] sm:$0xff] %v1070_v38 }
 0x193   : > { %v1198_v30 = vadd.f32 %v1183_v25, %v1182_v20  ;;  %v1162_v31 = vadd.f32 %v1161_v24, %v1147_v22  ;;  %v1185_v32 = vmul.f32 %v1148_v23, %v1148_v23  ;;  %v1150_v33 = vsel %vm1134_vm5, %v1067_v2, 0.0  ;;  %1088 = vst [vmem:[%s1945_s15 + $0x50] sm:$0xff] %v1072_v52  ;;  %v1055_v2 = vld [vmem:[#allocation2 + $0x70] sm:$0xff] }
 0x194   : > { %v1186_v35 = vmul.f32 %v1149_v28, %v1149_v28  ;;  %v1151_v36 = vsel %vm1135_vm6, %v1068_v3, 0.0  ;;  %v1120_v37 = vadd.s32 %v2056_v53, %v1103_v29  ;;  %v1187_v42 = vmul.f32 %v1150_v33, %v1150_v33 }
 0x195   : > { %v1199_v40 = vadd.f32 %v1198_v30, %v1184_v26  ;;  %v1163_v41 = vadd.f32 %v1162_v31, %v1148_v23  ;;  %v1104_v43 = vadd.s32 64, %v2059_v58  ;;  %v1188_v45 = vmul.f32 %v1151_v36, %v1151_v36 }
 0x196   : > { %vm1136_vm7 = vcmp.lt.s32.totalorder %v1120_v37, 512  ;;  %v1071_v46 = vadd.f32 %v2053_v51, %v1051_v34  ;;  %v1105_v47 = vadd.s32 72, %v2059_v58  ;;  %v1106_v57 = vadd.s32 80, %v2059_v58 }
 0x197   : > { %v1200_v48 = vadd.f32 %v1199_v40, %v1185_v32  ;;  %v1164_v49 = vadd.f32 %v1163_v41, %v1149_v28  ;;  %v1121_v50 = vadd.s32 %v2056_v53, %v1104_v43  ;;  %v1152_v55 = vsel %vm1136_vm7, %v1069_v12, 0.0 }
 0x198   : > { %1087 = vst [vmem:[%s1945_s15 + $0x48] sm:$0xff] %v1071_v46  ;;  %v1122_v56 = vadd.s32 %v2056_v53, %v1105_v47  ;;  %v1073_v59 = vadd.f32 %v2053_v51, %v1053_v44  ;;  %v1107_v62 = vadd.s32 88, %v2059_v58  ;;  %v1123_v0 = vadd.s32 %v2056_v53, %v1106_v57 }
 0x199   : > { %v1201_v60 = vadd.f32 %v1200_v48, %v1186_v35  ;;  %v1165_v61 = vadd.f32 %v1164_v49, %v1150_v33  ;;  %vm1137_vm8 = vcmp.lt.s32.totalorder %v1121_v50, 512  ;;  %v1074_v1 = vadd.f32 %v2053_v51, %v1054_v54 }
 0x19a   : > { %v1153_v63 = vsel %vm1137_vm8, %v1070_v38, 0.0  ;;  %vm1138_vm9 = vcmp.lt.s32.totalorder %v1122_v56, 512  ;;  %1089 = vst [vmem:[%s1945_s15 + $0x58] sm:$0xff] %v1073_v59  ;;  %v1189_v5 = vmul.f32 %v1152_v55, %v1152_v55  ;;  %vm1139_vm10 = vcmp.lt.s32.totalorder %v1123_v0, 512 }
 0x19b   : > { %v1202_v3 = vadd.f32 %v1201_v60, %v1187_v42  ;;  %v1166_v4 = vadd.f32 %v1165_v61, %v1151_v36  ;;  %v1154_v6 = vsel %vm1138_vm9, %v1071_v46, 0.0  ;;  %v1124_v7 = vadd.s32 %v2056_v53, %v1107_v62  ;;  %1090 = vst [vmem:[%s1945_s15 + $0x60] sm:$0xff] %v1074_v1 }
 0x19c   : > { %v1108_v8 = vadd.s32 96, %v2059_v58  ;;  %v1190_v12 = vmul.f32 %v1153_v63, %v1153_v63  ;;  %v1075_v13 = vadd.f32 %v2053_v51, %v1055_v2  ;;  %v1155_v14 = vsel %vm1139_vm10, %v1072_v52, 0.0  ;;  %v1221_v2 = vld [vmem:[%s2155_s4] sm:$0x3] }
 0x19d   : > { %v1203_v10 = vadd.f32 %v1202_v3, %v1188_v45  ;;  %v1167_v11 = vadd.f32 %v1166_v4, %v1152_v55  ;;  %vm1140_vm11 = vcmp.lt.s32.totalorder %v1124_v7, 512  ;;  %v1109_v16 = vadd.s32 104, %v2059_v58 }
 0x19e   : > { %v1125_v15 = vadd.s32 %v2056_v53, %v1108_v8  ;;  %v1191_v20 = vmul.f32 %v1154_v6, %v1154_v6  ;;  %1091 = vst [vmem:[%s1945_s15 + $0x68] sm:$0xff] %v1075_v13  ;;  %v1076_v21 = vadd.f32 %v2053_v51, %v1056_v9  ;;  %v1156_v22 = vsel %vm1140_vm11, %v1073_v59, 0.0 }
 0x19f   : > { %v1204_v18 = vadd.f32 %v1203_v10, %v1189_v5  ;;  %v1168_v19 = vadd.f32 %v1167_v11, %v1153_v63  ;;  %v1126_v23 = vadd.s32 %v2056_v53, %v1109_v16  ;;  %v1110_v24 = vadd.s32 112, %v2059_v58 }
 0x1a0   : > { %vm1141_vm12 = vcmp.lt.s32.totalorder %v1125_v15, 512  ;;  %v1192_v27 = vmul.f32 %v1155_v14, %v1155_v14  ;;  %1092 = vst [vmem:[%s1945_s15 + $0x70] sm:$0xff] %v1076_v21  ;;  %v1077_v28 = vadd.f32 %v2053_v51, %v1057_v17  ;;  %v1111_v31 = vadd.s32 120, %v2059_v58 }
 0x1a1   : > { %v1205_v25 = vadd.f32 %v1204_v18, %v1190_v12  ;;  %v1169_v26 = vadd.f32 %v1168_v19, %v1154_v6  ;;  %v1157_v29 = vsel %vm1141_vm12, %v1074_v1, 0.0  ;;  %vm1142_vm13 = vcmp.lt.s32.totalorder %v1126_v23, 512 }
 0x1a2   : > { %v1127_v30 = vadd.s32 %v2056_v53, %v1110_v24  ;;  %v1193_v34 = vmul.f32 %v1156_v22, %v1156_v22  ;;  %1093 = vst [vmem:[%s1945_s15 + $0x78] sm:$0xff] %v1077_v28  ;;  %v1158_v35 = vsel %vm1142_vm13, %v1075_v13, 0.0  ;;  %v1128_v36 = vadd.s32 %v2056_v53, %v1111_v31 }
 0x1a3   : > { %v1206_v32 = vadd.f32 %v1205_v25, %v1191_v20  ;;  %v1170_v33 = vadd.f32 %v1169_v26, %v1155_v14  ;;  %v1194_v39 = vmul.f32 %v1157_v29, %v1157_v29  ;;  %v1195_v42 = vmul.f32 %v1158_v35, %v1158_v35 }
 0x1a4   : > { %vm1143_vm14 = vcmp.lt.s32.totalorder %v1127_v30, 512  ;;  %vm1144_vm15 = vcmp.lt.s32.totalorder %v1128_v36, 512  ;;  %vm1219_vm0 = vcmask 1040384  }
 0x1a5   : > { %v1207_v37 = vadd.f32 %v1206_v32, %v1192_v27  ;;  %v1171_v38 = vadd.f32 %v1170_v33, %v1156_v22  ;;  %v1159_v40 = vsel %vm1143_vm14, %v1076_v21, 0.0  ;;  %v1160_v43 = vsel %vm1144_vm15, %v1077_v28, 0.0 }
 0x1a6   : > { %v1196_v58 = vmul.f32 %v1159_v40, %v1159_v40  ;;  %v1197_v48 = vmul.f32 %v1160_v43, %v1160_v43 }
 0x1a7   : > { %v1208_v51 = vadd.f32 %v1207_v37, %v1193_v34  ;;  %v1172_v41 = vadd.f32 %v1171_v38, %v1157_v29 }
 0x1a9   : > { %v1209_v44 = vadd.f32 %v1208_v51, %v1194_v39  ;;  %v1173_v45 = vadd.f32 %v1172_v41, %v1158_v35 }
 0x1ab   : > { %v1210_v46 = vadd.f32 %v1209_v44, %v1195_v42  ;;  %v1174_v47 = vadd.f32 %v1173_v45, %v1159_v40 }
 0x1ad   : > { %v1211_v49 = vadd.f32 %v1210_v46, %v1196_v58  ;;  %v1175_v50 = vadd.f32 %v1174_v47, %v1160_v43 }
 0x1af   : > { %v1176_v52 = vrot.slane %v1175_v50, 4  ;;  %v1212_v54 = vadd.f32 %v1211_v49, %v1197_v48 }
 0x1b1   : > { %v1177_v53 = vadd.f32 %v1176_v52, %v1175_v50  ;;  %v1213_v55 = vrot.slane %v1212_v54, 4 }
 0x1b3   : > { %v1178_v56 = vrot.slane %v1177_v53, 2  ;;  %v1214_v57 = vadd.f32 %v1213_v55, %v1212_v54 }
 0x1b5   : > { %v1179_v59 = vadd.f32 %v1178_v56, %v1177_v53  ;;  %v1215_v60 = vrot.slane %v1214_v57, 2 }
 0x1b7   : > { %v1180_v61 = vrot.slane %v1179_v59, 1  ;;  %v1216_v62 = vadd.f32 %v1215_v60, %v1214_v57 }
 0x1b9   : > { %v1181_v63 = vadd.f32 %v1180_v61, %v1179_v59  ;;  %v1217_v0 = vrot.slane %v1216_v62, 1 }
 0x1bb   : > { %v1218_v1 = vadd.f32 %v1217_v0, %v1216_v62 }
 0x1bd   : > { %v1220_v3 = vsel %vm1219_vm0, %v1181_v63, %v1218_v1 }
 0x1be   : > { %v1222_v4 = vadd.f32 %v1221_v2, %v1220_v3 }
 0x1c0   : > { %1223 = vst [vmem:[%s2155_s4] sm:$0x3] %v1222_v4 }
 0x1c1 PF: > { %s15_s21 = sadd.s32 1, %s1773_s21   ;;  %s2156_s15 = smov %s1753_s16 }
 0x1c2   : > { %p12_p3 = scmp.ge.s32.totalorder %s15_s21, 10   ;;  %s2157_s16 = smov %s1853_s28 }
 0x1c3   : > { %s2158_s17 = smov %s1765_s19  ;;  %s2159_s18 = smov %s1769_s20 }
 0x1c4   : > { %s2160_s19 = smov %s2163_s22  ;;  %s2161_s20 = smov %s2167_s23 }
 0x1c5   :  { %14 = sbr.rel (!%p12_p3) target bundleno = 4 (0x4), region = 113 }

// kernel: patch_discriminator.12
= control target key start
LH: loop header
LB: loop body
LE: loop exit
PB: predicated region body
PF: predicated region fallthrough
CT: control target
= control target key end

     0   :  { %s794_s1 = inlined_call_operand.vmem [shape: f32[2,256], index: 1, kind: input, shape index: {}]   ;;  %s795_s0 = inlined_call_operand.vmem [shape: f32[128,256], index: 0, kind: input, shape index: {}]   ;;  %s796_s3 = inlined_call_operand.vmem [shape: f32[1,256], index: 3, kind: input, shape index: {}]   ;;  %s797_s2 = inlined_call_operand.vmem [shape: f32[1,256], index: 2, kind: input, shape index: {}]   ;;  %s798_s4 = inlined_call_operand.vmem [shape: f32[128,256], index: 4, kind: output, shape index: {}]  }
   0x1   :  { %v17_v0 = vld [vmem:[%s794_s1] ss:$2 sm:$0x3]  ;;  %v282_v1 = vld [vmem:[%s794_s1 + $0x1] ss:$2 sm:$0x3] }
   0x2   :  { %v18_v2 = vmul.f32 0.0078125, %v17_v0  ;;  %v21_v3 = vmul.f32 0.0078125, %v282_v1  ;;  %v322_v10 = vld [vmem:[%s795_s0] sm:$0xff]  ;;  %v332_v13 = vld [vmem:[%s795_s0 + $0x8] sm:$0xff]  ;;  %v340_v16 = vld [vmem:[%s795_s0 + $0x10] sm:$0xff] }
   0x3   :  { %v144_v12 = vld [vmem:[%s796_s3] sm:$0x3]  ;;  %v345_v17 = vld [vmem:[%s795_s0 + $0x18] sm:$0xff]  ;;  %v355_v19 = vld [vmem:[%s795_s0 + $0x28] sm:$0xff] }
   0x4   :  { %v22_v4 = vmul.f32 %v18_v2, %v18_v2  ;;  %v324_v11 = vperm.slane %v18_v2, 0  ;;  %v335_v15 = vperm.slane %v18_v2, 1  ;;  %v350_v18 = vld [vmem:[%s795_s0 + $0x20] sm:$0xff]  ;;  %v360_v20 = vld [vmem:[%s795_s0 + $0x30] sm:$0xff]  ;;  %v365_v21 = vld [vmem:[%s795_s0 + $0x38] sm:$0xff]  ;;  %v385_v27 = vperm.slane %v144_v12, 0 }
   0x5   :  { %v371_v23 = vld [vmem:[%s795_s0 + $0x40] sm:$0xff]  ;;  %v376_v24 = vld [vmem:[%s795_s0 + $0x48] sm:$0xff]  ;;  %v381_v25 = vld [vmem:[%s795_s0 + $0x50] sm:$0xff]  ;;  %v387_v28 = vperm.slane %v144_v12, 1 }
   0x6   :  { %v23_v5 = vsub.f32 %v21_v3, %v22_v4  ;;  %v75_v26 = vsub.f32 %v322_v10, %v324_v11  ;;  %v392_v29 = vld [vmem:[%s795_s0 + $0x58] sm:$0xff]  ;;  %v397_v30 = vld [vmem:[%s795_s0 + $0x60] sm:$0xff]  ;;  %v402_v31 = vld [vmem:[%s795_s0 + $0x68] sm:$0xff]  ;;  %v76_v34 = vsub.f32 %v332_v13, %v335_v15  ;;  %v77_v35 = vsub.f32 %v340_v16, %v324_v11 }
   0x7   :  { %v36_v33 = vld [vmem:[%s797_s2] sm:$0x3]  ;;  %v78_v36 = vsub.f32 %v345_v17, %v335_v15  ;;  %v416_v37 = vld [vmem:[%s795_s0 + $0x70] sm:$0xff]  ;;  %v421_v38 = vld [vmem:[%s795_s0 + $0x78] sm:$0xff]  ;;  %v79_v41 = vsub.f32 %v350_v18, %v324_v11  ;;  %v80_v42 = vsub.f32 %v355_v19, %v335_v15  ;;  %v81_v43 = vsub.f32 %v360_v20, %v324_v11 }
   0x8   :  { %v24_v6 = vmax.f32 %v23_v5, 0.0  ;;  %v426_v39 = vld [vmem:[%s795_s0 + $0x80] sm:$0xff]  ;;  %v82_v44 = vsub.f32 %v365_v21, %v335_v15  ;;  %v446_v45 = vld [vmem:[%s795_s0 + $0x88] sm:$0xff]  ;;  %v451_v46 = vld [vmem:[%s795_s0 + $0x90] sm:$0xff]  ;;  %v83_v48 = vsub.f32 %v371_v23, %v324_v11  ;;  %v84_v49 = vsub.f32 %v376_v24, %v335_v15 }
   0x9   :  { %v85_v50 = vsub.f32 %v381_v25, %v324_v11  ;;  %v463_v51 = vld [vmem:[%s795_s0 + $0x98] sm:$0xff]  ;;  %v468_v52 = vld [vmem:[%s795_s0 + $0xa0] sm:$0xff]  ;;  %v473_v53 = vld [vmem:[%s795_s0 + $0xa8] sm:$0xff]  ;;  %v86_v54 = vsub.f32 %v392_v29, %v335_v15  ;;  %v87_v55 = vsub.f32 %v397_v30, %v324_v11  ;;  %v88_v56 = vsub.f32 %v402_v31, %v335_v15 }
   0xa   :  { %v25_v7 = vadd.f32 1e-05, %v24_v6  ;;  %v89_v57 = vsub.f32 %v416_v37, %v324_v11  ;;  %v486_v58 = vld [vmem:[%s795_s0 + $0xb0] sm:$0xff]  ;;  %v491_v59 = vld [vmem:[%s795_s0 + $0xb8] sm:$0xff]  ;;  %v496_v60 = vld [vmem:[%s795_s0 + $0xc0] sm:$0xff]  ;;  %v90_v62 = vsub.f32 %v421_v38, %v335_v15  ;;  %v91_v63 = vsub.f32 %v426_v39, %v324_v11 }
   0xb   :  { %v92_v0 = vsub.f32 %v446_v45, %v335_v15  ;;  %v510_v1 = vld [vmem:[%s795_s0 + $0xc8] sm:$0xff]  ;;  %v515_v2 = vld [vmem:[%s795_s0 + $0xd0] sm:$0xff]  ;;  %v520_v3 = vld [vmem:[%s795_s0 + $0xd8] sm:$0xff]  ;;  %v93_v5 = vsub.f32 %v451_v46, %v324_v11 }
   0xc   :  { %283 = vrsqrt.f32 %v25_v7  ;;  %vm32_vm0 = vweird.f32 %v25_v7  ;;  %v541_v10 = vld [vmem:[%s795_s0 + $0xf0] sm:$0xff] }
  0x12   :  { %v316_v8 = vpop.eup %283 }
  0x13   :  { %v27_v9 = vmul.f32 %v316_v8, %v25_v7  ;;  %vm33_vm1 = vweird.f32 %v316_v8 }
  0x14   :  { %vm431_vm2 = vmor %vm32_vm0, %vm33_vm1 }
  0x15   :  { %v28_v14 = vmul.f32 %v316_v8, %v27_v9  ;;  %v536_v9 = vld [vmem:[%s795_s0 + $0xe8] sm:$0xff] }
  0x17   :  { %v29_v22 = vmul.f32 0.5, %v28_v14 }
  0x19   :  { %v30_v32 = vsub.f32 1.5, %v29_v22 }
  0x1b   :  { %v31_v47 = vmul.f32 %v316_v8, %v30_v32 }
  0x1d   :  { %v35_v61 = vsel %vm431_vm2, %v316_v8, %v31_v47  ;;  %v531_v8 = vld [vmem:[%s795_s0 + $0xe0] sm:$0xff] }
  0x1e   :  { %v37_v4 = vmul.f32 %v36_v33, %v35_v61 }
  0x20   :  { %v551_v17 = vperm.slane %v37_v4, 0  ;;  %v553_v18 = vperm.slane %v37_v4, 1 }
  0x22   :  { %v112_v32 = vmul.f32 %v551_v17, %v75_v26  ;;  %v113_v33 = vmul.f32 %v553_v18, %v76_v34  ;;  %v114_v40 = vmul.f32 %v551_v17, %v77_v35  ;;  %v115_v47 = vmul.f32 %v553_v18, %v78_v36 }
  0x23   :  { %v116_v61 = vmul.f32 %v551_v17, %v79_v41  ;;  %v117_v4 = vmul.f32 %v553_v18, %v80_v42  ;;  %v118_v22 = vmul.f32 %v551_v17, %v81_v43  ;;  %v119_v21 = vmul.f32 %v553_v18, %v82_v44 }
  0x24   :  { %v150_v23 = vadd.f32 %v385_v27, %v112_v32  ;;  %v151_v24 = vadd.f32 %v387_v28, %v113_v33  ;;  %v152_v26 = vadd.f32 %v385_v27, %v114_v40  ;;  %v153_v34 = vadd.f32 %v387_v28, %v115_v47 }
  0x25   :  { %v154_v35 = vadd.f32 %v385_v27, %v116_v61  ;;  %v155_v36 = vadd.f32 %v387_v28, %v117_v4  ;;  %v156_v41 = vadd.f32 %v385_v27, %v118_v22  ;;  %v157_v42 = vadd.f32 %v387_v28, %v119_v21 }
  0x26   :  { %v182_v20 = vmul.f32 0.2, %v150_v23  ;;  %v183_v43 = vmul.f32 0.2, %v151_v24  ;;  %v184_v19 = vmul.f32 0.2, %v152_v26  ;;  %v120_v44 = vmul.f32 %v551_v17, %v83_v48 }
  0x27   :  { %v185_v32 = vmul.f32 0.2, %v153_v34  ;;  %v186_v16 = vmul.f32 0.2, %v154_v35  ;;  %v187_v33 = vmul.f32 0.2, %v155_v36  ;;  %v121_v40 = vmul.f32 %v553_v18, %v84_v49 }
  0x28   :  { %v214_v14 = vmax.f32 %v150_v23, %v182_v20  ;;  %v215_v47 = vmax.f32 %v151_v24, %v183_v43  ;;  %v216_v13 = vmax.f32 %v152_v26, %v184_v19  ;;  %v188_v61 = vmul.f32 0.2, %v156_v41 }
  0x29   :  { %v217_v12 = vmax.f32 %v153_v34, %v185_v32  ;;  %v218_v4 = vmax.f32 %v154_v35, %v186_v16  ;;  %v219_v7 = vmax.f32 %v155_v36, %v187_v33  ;;  %v189_v22 = vmul.f32 0.2, %v157_v42 }
  0x2a   :  { %246 = vst [vmem:[%s798_s4] sm:$0xff] %v214_v14  ;;  %v220_v21 = vmax.f32 %v156_v41, %v188_v61  ;;  %v158_v48 = vadd.f32 %v385_v27, %v120_v44  ;;  %v159_v6 = vadd.f32 %v387_v28, %v121_v40  ;;  %v122_v49 = vmul.f32 %v551_v17, %v85_v50 }
  0x2b   :  { %247 = vst [vmem:[%s798_s4 + $0x8] sm:$0xff] %v215_v47  ;;  %v221_v16 = vmax.f32 %v157_v42, %v189_v22  ;;  %v123_v14 = vmul.f32 %v553_v18, %v86_v54  ;;  %v124_v19 = vmul.f32 %v551_v17, %v87_v55  ;;  %v125_v25 = vmul.f32 %v553_v18, %v88_v56 }
  0x2c   :  { %248 = vst [vmem:[%s798_s4 + $0x10] sm:$0xff] %v216_v13  ;;  %v190_v50 = vmul.f32 0.2, %v158_v48  ;;  %v191_v20 = vmul.f32 0.2, %v159_v6  ;;  %v160_v29 = vadd.f32 %v385_v27, %v122_v49  ;;  %v126_v30 = vmul.f32 %v551_v17, %v89_v57 }
  0x2d   :  { %249 = vst [vmem:[%s798_s4 + $0x18] sm:$0xff] %v217_v12  ;;  %v161_v31 = vadd.f32 %v387_v28, %v123_v14  ;;  %v162_v54 = vadd.f32 %v385_v27, %v124_v19  ;;  %v163_v55 = vadd.f32 %v387_v28, %v125_v25  ;;  %v127_v56 = vmul.f32 %v553_v18, %v90_v62  ;;  %v69_v25 = vld [vmem:[%s795_s0 + $0xf8] sm:$0xff] }
  0x2e   :  { %250 = vst [vmem:[%s798_s4 + $0x20] sm:$0xff] %v218_v4  ;;  %v222_v37 = vmax.f32 %v158_v48, %v190_v50  ;;  %v223_v57 = vmax.f32 %v159_v6, %v191_v20  ;;  %v192_v13 = vmul.f32 0.2, %v160_v29  ;;  %v164_v12 = vadd.f32 %v385_v27, %v126_v30 }
  0x2f   :  { %251 = vst [vmem:[%s798_s4 + $0x28] sm:$0xff] %v219_v7  ;;  %v193_v23 = vmul.f32 0.2, %v161_v31  ;;  %v194_v24 = vmul.f32 0.2, %v162_v54  ;;  %v165_v26 = vadd.f32 %v387_v28, %v127_v56  ;;  %v128_v38 = vmul.f32 %v551_v17, %v91_v63 }
  0x30   :  { %252 = vst [vmem:[%s798_s4 + $0x30] sm:$0xff] %v220_v21  ;;  %v224_v62 = vmax.f32 %v160_v29, %v192_v13  ;;  %v195_v6 = vmul.f32 0.2, %v163_v55  ;;  %v196_v34 = vmul.f32 0.2, %v164_v12  ;;  %v129_v7 = vmul.f32 %v553_v18, %v92_v0 }
  0x31   :  { %253 = vst [vmem:[%s798_s4 + $0x38] sm:$0xff] %v221_v16  ;;  %v225_v35 = vmax.f32 %v161_v31, %v193_v23  ;;  %v226_v39 = vmax.f32 %v162_v54, %v194_v24  ;;  %v197_v36 = vmul.f32 0.2, %v165_v26  ;;  %v166_v63 = vadd.f32 %v385_v27, %v128_v38 }
  0x32   :  { %254 = vst [vmem:[%s798_s4 + $0x40] sm:$0xff] %v222_v37  ;;  %v227_v41 = vmax.f32 %v163_v55, %v195_v6  ;;  %v228_v42 = vmax.f32 %v164_v12, %v196_v34  ;;  %v167_v43 = vadd.f32 %v387_v28, %v129_v7  ;;  %v130_v45 = vmul.f32 %v551_v17, %v93_v5 }
  0x33   :  { %255 = vst [vmem:[%s798_s4 + $0x48] sm:$0xff] %v223_v57  ;;  %v229_v0 = vmax.f32 %v165_v26, %v197_v36  ;;  %v198_v44 = vmul.f32 0.2, %v166_v63  ;;  %v801_v32 = vsub.f32 %v463_v51, %v335_v15  ;;  %v802_v40 = vsub.f32 %v468_v52, %v324_v11 }
  0x34   :  { %256 = vst [vmem:[%s798_s4 + $0x50] sm:$0xff] %v224_v62  ;;  %v199_v46 = vmul.f32 0.2, %v167_v43  ;;  %v168_v5 = vadd.f32 %v385_v27, %v130_v45  ;;  %v803_v61 = vsub.f32 %v473_v53, %v335_v15  ;;  %v804_v51 = vsub.f32 %v486_v58, %v324_v11 }
  0x35   :  { %v131_v33 = vmul.f32 %v553_v18, %v801_v32  ;;  %v132_v47 = vmul.f32 %v551_v17, %v802_v40  ;;  %257 = vst [vmem:[%s798_s4 + $0x58] sm:$0xff] %v225_v35  ;;  %v230_v52 = vmax.f32 %v166_v63, %v198_v44  ;;  %v805_v49 = vsub.f32 %v491_v59, %v335_v15 }
  0x36   :  { %v133_v4 = vmul.f32 %v553_v18, %v803_v61  ;;  %v134_v22 = vmul.f32 %v551_v17, %v804_v51  ;;  %258 = vst [vmem:[%s798_s4 + $0x60] sm:$0xff] %v226_v39  ;;  %v231_v58 = vmax.f32 %v167_v43, %v199_v46  ;;  %v200_v16 = vmul.f32 0.2, %v168_v5 }
  0x37   :  { %v169_v21 = vadd.f32 %v387_v28, %v131_v33  ;;  %v170_v48 = vadd.f32 %v385_v27, %v132_v47  ;;  %v135_v53 = vmul.f32 %v553_v18, %v805_v49  ;;  %259 = vst [vmem:[%s798_s4 + $0x68] sm:$0xff] %v227_v41  ;;  %v806_v29 = vsub.f32 %v496_v60, %v324_v11 }
  0x38   :  { %v171_v14 = vadd.f32 %v387_v28, %v133_v4  ;;  %v172_v19 = vadd.f32 %v385_v27, %v134_v22  ;;  %260 = vst [vmem:[%s798_s4 + $0x70] sm:$0xff] %v228_v42  ;;  %v232_v31 = vmax.f32 %v168_v5, %v200_v16  ;;  %v807_v56 = vsub.f32 %v510_v1, %v335_v15 }
  0x39   :  { %v201_v59 = vmul.f32 0.2, %v169_v21  ;;  %v202_v50 = vmul.f32 0.2, %v170_v48  ;;  %v173_v20 = vadd.f32 %v387_v28, %v135_v53  ;;  %v136_v30 = vmul.f32 %v551_v17, %v806_v29  ;;  %261 = vst [vmem:[%s798_s4 + $0x78] sm:$0xff] %v229_v0 }
  0x3a   :  { %v203_v54 = vmul.f32 0.2, %v171_v14  ;;  %v204_v55 = vmul.f32 0.2, %v172_v19  ;;  %v137_v37 = vmul.f32 %v553_v18, %v807_v56  ;;  %v106_v12 = vsub.f32 %v69_v25, %v335_v15  ;;  %262 = vst [vmem:[%s798_s4 + $0x80] sm:$0xff] %v230_v52 }
  0x3b   :  { %v233_v57 = vmax.f32 %v169_v21, %v201_v59  ;;  %v205_v60 = vmul.f32 0.2, %v173_v20  ;;  %v174_v13 = vadd.f32 %v385_v27, %v136_v30  ;;  %v234_v23 = vmax.f32 %v170_v48, %v202_v50  ;;  %263 = vst [vmem:[%s798_s4 + $0x88] sm:$0xff] %v231_v58 }
  0x3c   :  { %v235_v24 = vmax.f32 %v171_v14, %v203_v54  ;;  %v175_v1 = vadd.f32 %v387_v28, %v137_v37  ;;  %v808_v26 = vsub.f32 %v515_v2, %v324_v11  ;;  %v236_v62 = vmax.f32 %v172_v19, %v204_v55  ;;  %264 = vst [vmem:[%s798_s4 + $0x90] sm:$0xff] %v232_v31 }
  0x3d   :  { %v206_v6 = vmul.f32 0.2, %v174_v13  ;;  %v809_v34 = vsub.f32 %v520_v3, %v335_v15  ;;  %v810_v35 = vsub.f32 %v531_v8, %v324_v11  ;;  %v811_v63 = vsub.f32 %v536_v9, %v335_v15  ;;  %265 = vst [vmem:[%s798_s4 + $0x98] sm:$0xff] %v233_v57 }
  0x3e   :  { %v138_v38 = vmul.f32 %v551_v17, %v808_v26  ;;  %v207_v2 = vmul.f32 0.2, %v175_v1  ;;  %v812_v3 = vsub.f32 %v541_v10, %v324_v11  ;;  %v237_v8 = vmax.f32 %v173_v20, %v205_v60  ;;  %266 = vst [vmem:[%s798_s4 + $0xa0] sm:$0xff] %v234_v23 }
  0x3f   :  { %v139_v7 = vmul.f32 %v553_v18, %v809_v34  ;;  %v140_v39 = vmul.f32 %v551_v17, %v810_v35  ;;  %v141_v41 = vmul.f32 %v553_v18, %v811_v63  ;;  %v143_v0 = vmul.f32 %v553_v18, %v106_v12  ;;  %267 = vst [vmem:[%s798_s4 + $0xa8] sm:$0xff] %v235_v24 }
  0x40   :  { %v176_v36 = vadd.f32 %v385_v27, %v138_v38  ;;  %v142_v42 = vmul.f32 %v551_v17, %v812_v3  ;;  %v238_v15 = vmax.f32 %v174_v13, %v206_v6  ;;  %v239_v17 = vmax.f32 %v175_v1, %v207_v2  ;;  %268 = vst [vmem:[%s798_s4 + $0xb0] sm:$0xff] %v236_v62 }
  0x41   :  { %v177_v43 = vadd.f32 %v387_v28, %v139_v7  ;;  %v178_v45 = vadd.f32 %v385_v27, %v140_v39  ;;  %v179_v11 = vadd.f32 %v387_v28, %v141_v41  ;;  %v181_v33 = vadd.f32 %v387_v28, %v143_v0  ;;  %269 = vst [vmem:[%s798_s4 + $0xb8] sm:$0xff] %v237_v8 }
  0x42   :  { %v208_v9 = vmul.f32 0.2, %v176_v36  ;;  %v180_v10 = vadd.f32 %v385_v27, %v142_v42  ;;  %270 = vst [vmem:[%s798_s4 + $0xc0] sm:$0xff] %v238_v15 }
  0x43   :  { %v209_v44 = vmul.f32 0.2, %v177_v43  ;;  %v210_v32 = vmul.f32 0.2, %v178_v45  ;;  %v211_v40 = vmul.f32 0.2, %v179_v11 }
  0x44   :  { %v240_v18 = vmax.f32 %v176_v36, %v208_v9  ;;  %v212_v47 = vmul.f32 0.2, %v180_v10  ;;  %v213_v46 = vmul.f32 0.2, %v181_v33  ;;  %271 = vst [vmem:[%s798_s4 + $0xc8] sm:$0xff] %v239_v17 }
  0x45   :  { %v241_v27 = vmax.f32 %v177_v43, %v209_v44  ;;  %v242_v5 = vmax.f32 %v178_v45, %v210_v32  ;;  %v243_v28 = vmax.f32 %v179_v11, %v211_v40 }
  0x46   :  { %272 = vst [vmem:[%s798_s4 + $0xd0] sm:$0xff] %v240_v18  ;;  %v244_v61 = vmax.f32 %v180_v10, %v212_v47  ;;  %v245_v4 = vmax.f32 %v181_v33, %v213_v46 }
  0x47   :  { %273 = vst [vmem:[%s798_s4 + $0xd8] sm:$0xff] %v241_v27 }
  0x48   :  { %274 = vst [vmem:[%s798_s4 + $0xe0] sm:$0xff] %v242_v5 }
  0x49   :  { %275 = vst [vmem:[%s798_s4 + $0xe8] sm:$0xff] %v243_v28 }
  0x4a   :  { %276 = vst [vmem:[%s798_s4 + $0xf0] sm:$0xff] %v244_v61 }
  0x4b   :  { %277 = vst [vmem:[%s798_s4 + $0xf8] sm:$0xff] %v245_v4 }

// kernel: patch_discriminator.11
= control target key start
LH: loop header
LB: loop body
LE: loop exit
PB: predicated region body
PF: predicated region fallthrough
CT: control target
= control target key end

     0   :  { %s2449_s15 = smov 0   ;;  %s2451_s16 = smov 0   ;;  %s3053_s0 = inlined_call_operand.vmem [shape: bf16[128,2048], index: 0, kind: input, shape index: {}]   ;;  %s3054_s1 = inlined_call_operand.vmem [shape: bf16[2048,256], index: 1, kind: input, shape index: {}]   ;;  %s3055_s2 = inlined_call_operand.vmem [shape: f32[1,256], index: 2, kind: input, shape index: {}]   ;;  %s3056_s3 = inlined_call_operand.vmem [shape: f32[128,256], index: 3, kind: output, shape index: {0}]   ;;  %s3057_s4 = inlined_call_operand.vmem [shape: f32[2,256], index: 4, kind: output, shape index: {1}]  }
   0x1   :  { %s2453_s17 = smov 0   ;;  %s2455_s18 = smov 0  }
   0x2   :  { %s2457_s19 = smov 0  }
   0x3 LB: > { %s24_s20 = sadd.s32 1, %s2416_s18  ;;  %p43_p1 = scmp.ne.s32.totalorder %s2408_s16, %s2404_s15  ;;  %s2420_s19 = sphi %s2457_s19, %s15_s19   ;;  %s2416_s18 = sphi %s2455_s18, %s3061_s18   ;;  %s2412_s17 = sphi %s2453_s17, %s3060_s17   ;;  %s2408_s16 = sphi %s2451_s16, %s3059_s16   ;;  %s2404_s15 = sphi %s2449_s15, %s3058_s15  }
   0x4   : > { %p25_p0 = scmp.ge.s32.totalorder %s24_s20, 4  ;;  %p44_p2 = scmp.eq.s32.totalorder %s2420_s19, 0 }
   0x5   : > { %s36_s22 = sadd.s32 1, %s2408_s16  ;;  %p1841_p5 = scmp.ge.s32.totalorder %s2420_s19, 4 }
   0x6   : > { %s3063_s20 = smov (%p25_p0, %s24_s20), 0  ;;  %p45_p3 = por %p44_p2, %p43_p1 }
   0x7   : > { %s32_s21 = ssub.s32 %s2416_s18, %s3063_s20  ;;  %166 = sbr.rel (%p1841_p5) target bundleno = 48 (0x30), region = 20 }
   0x8   : > { %p34_p4 = scmp.eq.s32.totalorder %s32_s21, 0 }
   0xa   : > { %s2484_s23 = scalar_select %p34_p4, %s2408_s16, %s36_s22  }
   0xc   : > { %169 = sbr.rel (!%p45_p3) target bundleno = 48 (0x30), region = 24  ;;  %s171_s24 = sand.u32 (%p45_p3), 1, %s2408_s16  }
   0xd   : > { %s2241_s25 = sshll.u32 (%p45_p3), %s2416_s18, 4  ;;  %s1842_s26 = sshll.u32 (%p45_p3), %s171_s24, 8 }
   0xe   : > { %s2492_s29 = scalar_lea.vmem (%p45_p3), %s3053_s0, %s2241_s25  ;;  %s2497_s30 = scalar_lea.vmem (%p45_p3), [#allocation3], %s1842_s26 }
   0xf   : > { %v192_v0 = vld [vmem:[%s2492_s29] sm:$0xff] (%p45_p3)  ;;  %v194_v1 = vld [vmem:[%s2492_s29 + $0x8] sm:$0xff] (%p45_p3) }
  0x10   : > { %v196_v2 = vld [vmem:[%s2492_s29 + $0x40] sm:$0xff] (%p45_p3)  ;;  %193 = vst [vmem:[%s2497_s30] sm:$0xff] (%p45_p3), %v192_v0  ;;  %v198_v3 = vld [vmem:[%s2492_s29 + $0x48] sm:$0xff] (%p45_p3) }
  0x11   : > { %195 = vst [vmem:[%s2497_s30 + $0x8] sm:$0xff] %v194_v1  ;;  %v200_v4 = vld [vmem:[%s2492_s29 + $0x80] sm:$0xff]  ;;  %v202_v5 = vld [vmem:[%s2492_s29 + $0x88] sm:$0xff] }
  0x12   : > { %197 = vst [vmem:[%s2497_s30 + $0x10] sm:$0xff] %v196_v2  ;;  %v204_v6 = vld [vmem:[%s2492_s29 + $0xc0] sm:$0xff]  ;;  %v206_v7 = vld [vmem:[%s2492_s29 + $0xc8] sm:$0xff] }
  0x13   : > { %199 = vst [vmem:[%s2497_s30 + $0x18] sm:$0xff] %v198_v3  ;;  %v208_v8 = vld [vmem:[%s2492_s29 + $0x100] sm:$0xff]  ;;  %v210_v9 = vld [vmem:[%s2492_s29 + $0x108] sm:$0xff] }
  0x14   : > { %201 = vst [vmem:[%s2497_s30 + $0x20] sm:$0xff] %v200_v4  ;;  %v212_v10 = vld [vmem:[%s2492_s29 + $0x140] sm:$0xff]  ;;  %v214_v11 = vld [vmem:[%s2492_s29 + $0x148] sm:$0xff] }
  0x15   : > { %203 = vst [vmem:[%s2497_s30 + $0x28] sm:$0xff] %v202_v5  ;;  %v216_v12 = vld [vmem:[%s2492_s29 + $0x180] sm:$0xff]  ;;  %v218_v13 = vld [vmem:[%s2492_s29 + $0x188] sm:$0xff] }
  0x16   : > { %205 = vst [vmem:[%s2497_s30 + $0x30] sm:$0xff] %v204_v6  ;;  %v220_v14 = vld [vmem:[%s2492_s29 + $0x1c0] sm:$0xff]  ;;  %v222_v15 = vld [vmem:[%s2492_s29 + $0x1c8] sm:$0xff] }
  0x17   : > { %207 = vst [vmem:[%s2497_s30 + $0x38] sm:$0xff] %v206_v7  ;;  %v224_v16 = vld [vmem:[%s2492_s29 + $0x200] sm:$0xff]  ;;  %v226_v17 = vld [vmem:[%s2492_s29 + $0x208] sm:$0xff] }
  0x18   : > { %209 = vst [vmem:[%s2497_s30 + $0x40] sm:$0xff] %v208_v8  ;;  %v228_v18 = vld [vmem:[%s2492_s29 + $0x240] sm:$0xff]  ;;  %v230_v19 = vld [vmem:[%s2492_s29 + $0x248] sm:$0xff] }
  0x19   : > { %211 = vst [vmem:[%s2497_s30 + $0x48] sm:$0xff] %v210_v9  ;;  %v232_v20 = vld [vmem:[%s2492_s29 + $0x280] sm:$0xff]  ;;  %v234_v21 = vld [vmem:[%s2492_s29 + $0x288] sm:$0xff] }
  0x1a   : > { %213 = vst [vmem:[%s2497_s30 + $0x50] sm:$0xff] %v212_v10  ;;  %v236_v22 = vld [vmem:[%s2492_s29 + $0x2c0] sm:$0xff]  ;;  %v238_v23 = vld [vmem:[%s2492_s29 + $0x2c8] sm:$0xff] }
  0x1b   : > { %215 = vst [vmem:[%s2497_s30 + $0x58] sm:$0xff] %v214_v11  ;;  %v240_v24 = vld [vmem:[%s2492_s29 + $0x300] sm:$0xff]  ;;  %v242_v25 = vld [vmem:[%s2492_s29 + $0x308] sm:$0xff] }
  0x1c   : > { %217 = vst [vmem:[%s2497_s30 + $0x60] sm:$0xff] %v216_v12  ;;  %v244_v26 = vld [vmem:[%s2492_s29 + $0x340] sm:$0xff]  ;;  %v246_v27 = vld [vmem:[%s2492_s29 + $0x348] sm:$0xff] }
  0x1d   : > { %219 = vst [vmem:[%s2497_s30 + $0x68] sm:$0xff] %v218_v13  ;;  %v248_v28 = vld [vmem:[%s2492_s29 + $0x380] sm:$0xff]  ;;  %v250_v29 = vld [vmem:[%s2492_s29 + $0x388] sm:$0xff] }
  0x1e   : > { %221 = vst [vmem:[%s2497_s30 + $0x70] sm:$0xff] %v220_v14  ;;  %v252_v30 = vld [vmem:[%s2492_s29 + $0x3c0] sm:$0xff]  ;;  %v254_v31 = vld [vmem:[%s2492_s29 + $0x3c8] sm:$0xff] }
  0x1f   : > { %223 = vst [vmem:[%s2497_s30 + $0x78] sm:$0xff] %v222_v15 }
  0x20   : > { %225 = vst [vmem:[%s2497_s30 + $0x80] sm:$0xff] %v224_v16 }
  0x21   : > { %227 = vst [vmem:[%s2497_s30 + $0x88] sm:$0xff] %v226_v17 }
  0x22   : > { %229 = vst [vmem:[%s2497_s30 + $0x90] sm:$0xff] %v228_v18 }
  0x23   : > { %231 = vst [vmem:[%s2497_s30 + $0x98] sm:$0xff] %v230_v19 }
  0x24   : > { %233 = vst [vmem:[%s2497_s30 + $0xa0] sm:$0xff] %v232_v20 }
  0x25   : > { %235 = vst [vmem:[%s2497_s30 + $0xa8] sm:$0xff] %v234_v21 }
  0x26   : > { %237 = vst [vmem:[%s2497_s30 + $0xb0] sm:$0xff] %v236_v22 }
  0x27   : > { %239 = vst [vmem:[%s2497_s30 + $0xb8] sm:$0xff] %v238_v23 }
  0x28   : > { %241 = vst [vmem:[%s2497_s30 + $0xc0] sm:$0xff] %v240_v24 }
  0x29   : > { %243 = vst [vmem:[%s2497_s30 + $0xc8] sm:$0xff] %v242_v25 }
  0x2a   : > { %245 = vst [vmem:[%s2497_s30 + $0xd0] sm:$0xff] %v244_v26 }
  0x2b   : > { %247 = vst [vmem:[%s2497_s30 + $0xd8] sm:$0xff] %v246_v27 }
  0x2c   : > { %249 = vst [vmem:[%s2497_s30 + $0xe0] sm:$0xff] %v248_v28 }
  0x2d   : > { %251 = vst [vmem:[%s2497_s30 + $0xe8] sm:$0xff] %v250_v29 }
  0x2e   : > { %253 = vst [vmem:[%s2497_s30 + $0xf0] sm:$0xff] %v252_v30 }
  0x2f   : > { %255 = vst [vmem:[%s2497_s30 + $0xf8] sm:$0xff] %v254_v31 }
  0x30 PF: > { %p1845_p6 = scmp.ge.s32.totalorder %s2420_s19, 1  ;;  %p270_p7 = scmp.lt.s32.totalorder %s2420_s19, 5 }
  0x32   : > { %p271_p8 = pnand %p1845_p6, %p270_p7 }
  0x33   : > { %s277_s5 = sand.u32 (!%p271_p8), 1, %s2404_s15   ;;  %s1847_s6 = sshll.u32 (!%p271_p8), %s2412_s17, 6 }
  0x34   : > { %274 = sbr.rel (%p271_p8) target bundleno = 582 (0x246), region = 51  ;;  %s1846_s7 = sshll.u32 (!%p271_p8), %s277_s5, 8 }
  0x35   : > { %p312_p9 = scmp.lt.s32.totalorder (!%p271_p8), %s1847_s6, 255  ;;  %p326_p10 = scmp.eq.s32.totalorder (!%p271_p8), %s2412_s17, 0 }
  0x36   : > { %s2570_s12 = scalar_lea.vmem (!%p271_p8), [#allocation3], %s1846_s7 }
  0x39   : > { %s3065_s6 = smov (!%p312_p9, %s1847_s6), 255  ;;  %330 = sbr.rel (!%p326_p10) target bundleno = 62 (0x3e), region = 59  ;;  %v2422_v32 = vmov (%p326_p10), 0.0  }
  0x3a   : > { %s2242_s8 = sshll.u32 %s3065_s6, 3  ;;  %331 = vst [vmem:[%s3057_s4] sm:$0xf] (%p326_p10), %v2422_v32 }
  0x3b   : > { %s2568_s11 = scalar_lea.vmem %s3054_s1, %s2242_s8 }
  0x3e PF: > { %p1851_p11 = scmp.ne.s32.totalorder %s2412_s17, 0 }
  0x40   : > { %334 = sbr.rel (%p1851_p11) target bundleno = 102 (0x66), region = 63 }
  0x45   : > { %v2423_v33 = vmov 0.0  }
  0x46   : > { %335 = vst [vmem:[#allocation2 + $0xb0] sm:$0xff] %v2423_v33 }
  0x47   : > { %336 = vst [vmem:[#allocation2] sm:$0xff] %v2423_v33 }
  0x48   : > { %337 = vst [vmem:[#allocation2 + $0xd8] sm:$0xff] %v2423_v33 }
  0x49   : > { %338 = vst [vmem:[#allocation2 + $0x18] sm:$0xff] %v2423_v33 }
  0x4a   : > { %339 = vst [vmem:[#allocation2 + $0x50] sm:$0xff] %v2423_v33 }
  0x4b   : > { %340 = vst [vmem:[#allocation2 + $0x68] sm:$0xff] %v2423_v33 }
  0x4c   : > { %341 = vst [vmem:[#allocation2 + $0x30] sm:$0xff] %v2423_v33 }
  0x4d   : > { %342 = vst [vmem:[#allocation2 + $0x48] sm:$0xff] %v2423_v33 }
  0x4e   : > { %343 = vst [vmem:[#allocation2 + $0x80] sm:$0xff] %v2423_v33 }
  0x4f   : > { %344 = vst [vmem:[#allocation2 + $0x88] sm:$0xff] %v2423_v33 }
  0x50   : > { %345 = vst [vmem:[#allocation2 + $0xe8] sm:$0xff] %v2423_v33 }
  0x51   : > { %346 = vst [vmem:[#allocation2 + $0xb8] sm:$0xff] %v2423_v33 }
  0x52   : > { %347 = vst [vmem:[#allocation2 + $0x60] sm:$0xff] %v2423_v33 }
  0x53   : > { %348 = vst [vmem:[#allocation2 + $0xf0] sm:$0xff] %v2423_v33 }
  0x54   : > { %349 = vst [vmem:[#allocation2 + $0x8] sm:$0xff] %v2423_v33 }
  0x55   : > { %350 = vst [vmem:[#allocation2 + $0x78] sm:$0xff] %v2423_v33 }
  0x56   : > { %351 = vst [vmem:[#allocation2 + $0x38] sm:$0xff] %v2423_v33 }
  0x57   : > { %352 = vst [vmem:[#allocation2 + $0x58] sm:$0xff] %v2423_v33 }
  0x58   : > { %353 = vst [vmem:[#allocation2 + $0x40] sm:$0xff] %v2423_v33 }
  0x59   : > { %354 = vst [vmem:[#allocation2 + $0xc8] sm:$0xff] %v2423_v33 }
  0x5a   : > { %355 = vst [vmem:[#allocation2 + $0xe0] sm:$0xff] %v2423_v33 }
  0x5b   : > { %356 = vst [vmem:[#allocation2 + $0x90] sm:$0xff] %v2423_v33 }
  0x5c   : > { %357 = vst [vmem:[#allocation2 + $0x70] sm:$0xff] %v2423_v33 }
  0x5d   : > { %358 = vst [vmem:[#allocation2 + $0xc0] sm:$0xff] %v2423_v33 }
  0x5e   : > { %359 = vst [vmem:[#allocation2 + $0xa8] sm:$0xff] %v2423_v33 }
  0x5f   : > { %360 = vst [vmem:[#allocation2 + $0xd0] sm:$0xff] %v2423_v33 }
  0x60   : > { %361 = vst [vmem:[#allocation2 + $0x10] sm:$0xff] %v2423_v33 }
  0x61   : > { %362 = vst [vmem:[#allocation2 + $0x28] sm:$0xff] %v2423_v33 }
  0x62   : > { %363 = vst [vmem:[#allocation2 + $0xa0] sm:$0xff] %v2423_v33 }
  0x63   : > { %364 = vst [vmem:[#allocation2 + $0xf8] sm:$0xff] %v2423_v33 }
  0x64   : > { %365 = vst [vmem:[#allocation2 + $0x20] sm:$0xff] %v2423_v33 }
  0x65   : > { %366 = vst [vmem:[#allocation2 + $0x98] sm:$0xff] %v2423_v33 }
  0x66 PF: > { %v2038_v34 = vld [vmem:[%s2568_s11 + $0x70] sm:$0xf]  ;;  %v2291_v35 = vld [vmem:[%s2568_s11 + $0x74] sm:$0xf0]  ;;  %v2030_v45 = vld [vmem:[%s2568_s11 + $0x60] sm:$0xf] }
  0x67   : > { %v2102_v36 = vld [vmem:[%s2568_s11 + $0xf0] sm:$0xf]  ;;  %v2039_v37 = vor.u32 %v2291_v35, %v2038_v34  ;;  %v2307_v38 = vld [vmem:[%s2568_s11 + $0xf4] sm:$0xf0]  ;;  %v2289_v47 = vld [vmem:[%s2568_s11 + $0x64] sm:$0xf0] }
  0x68   : > { %v2166_v39 = vld [vmem:[%s2568_s11 + $0x170] sm:$0xf]  ;;  %v2323_v40 = vld [vmem:[%s2568_s11 + $0x174] sm:$0xf0]  ;;  %v2103_v41 = vor.u32 %v2307_v38, %v2102_v36  ;;  %v2094_v48 = vld [vmem:[%s2568_s11 + $0xe0] sm:$0xf]  ;;  %v2031_v50 = vor.u32 %v2289_v47, %v2030_v45 }
  0x69   : > { %v2167_v42 = vor.u32 %v2323_v40, %v2166_v39  ;;  %v2230_v43 = vld [vmem:[%s2568_s11 + $0x1f0] sm:$0xf]  ;;  %v2339_v44 = vld [vmem:[%s2568_s11 + $0x1f4] sm:$0xf0]  ;;  %975 = vmatpush.bf16.msra.mxu0 %v2039_v37  ;;  %v2305_v49 = vld [vmem:[%s2568_s11 + $0xe4] sm:$0xf0] }
  0x6a   : > { %v2231_v46 = vor.u32 %v2339_v44, %v2230_v43  ;;  %1024 = vmatpush.bf16.msra.mxu1 %v2103_v41  ;;  %v2095_v51 = vor.u32 %v2305_v49, %v2094_v48  ;;  %v2158_v52 = vld [vmem:[%s2568_s11 + $0x160] sm:$0xf]  ;;  %v2321_v53 = vld [vmem:[%s2568_s11 + $0x164] sm:$0xf0]  ;;  %v2022_v57 = vld [vmem:[%s2568_s11 + $0x50] sm:$0xf] }
  0x6b   : > { %1073 = vmatpush.bf16.msra.mxu2 %v2167_v42  ;;  %v2222_v54 = vld [vmem:[%s2568_s11 + $0x1e0] sm:$0xf]  ;;  %v2159_v55 = vor.u32 %v2321_v53, %v2158_v52  ;;  %v2337_v56 = vld [vmem:[%s2568_s11 + $0x1e4] sm:$0xf0]  ;;  %v2287_v58 = vld [vmem:[%s2568_s11 + $0x54] sm:$0xf0] }
  0x6c   : > { %1122 = vmatpush.bf16.msra.mxu3 %v2231_v46  ;;  %v2223_v59 = vor.u32 %v2337_v56, %v2222_v54  ;;  %v2086_v60 = vld [vmem:[%s2568_s11 + $0xd0] sm:$0xf]  ;;  %v2303_v61 = vld [vmem:[%s2568_s11 + $0xd4] sm:$0xf0]  ;;  %v2023_v63 = vor.u32 %v2287_v58, %v2022_v57  ;;  %v2014_v5 = vld [vmem:[%s2568_s11 + $0x40] sm:$0xf] }
  0x6d   : > { %v2150_v62 = vld [vmem:[%s2568_s11 + $0x150] sm:$0xf]  ;;  %976 = vmatpush.bf16.msra.mxu0 %v2031_v50  ;;  %v2319_v0 = vld [vmem:[%s2568_s11 + $0x154] sm:$0xf0]  ;;  %v2087_v3 = vor.u32 %v2303_v61, %v2086_v60  ;;  %v2285_v6 = vld [vmem:[%s2568_s11 + $0x44] sm:$0xf0] }
  0x6e   : > { %v2214_v1 = vld [vmem:[%s2568_s11 + $0x1d0] sm:$0xf]  ;;  %v2335_v2 = vld [vmem:[%s2568_s11 + $0x1d4] sm:$0xf0]  ;;  %1025 = vmatpush.bf16.msra.mxu1 %v2095_v51  ;;  %v2151_v4 = vor.u32 %v2319_v0, %v2150_v62  ;;  %v2078_v7 = vld [vmem:[%s2568_s11 + $0xc0] sm:$0xf]  ;;  %v2015_v14 = vor.u32 %v2285_v6, %v2014_v5 }
  0x6f   : > { %1074 = vmatpush.bf16.msra.mxu2 %v2159_v55  ;;  %v2215_v8 = vor.u32 %v2335_v2, %v2214_v1  ;;  %v2301_v9 = vld [vmem:[%s2568_s11 + $0xc4] sm:$0xf0]  ;;  %v2142_v10 = vld [vmem:[%s2568_s11 + $0x140] sm:$0xf]  ;;  %v2006_v17 = vld [vmem:[%s2568_s11 + $0x30] sm:$0xf] }
  0x70   : > { %1123 = vmatpush.bf16.msra.mxu3 %v2223_v59  ;;  %v2317_v11 = vld [vmem:[%s2568_s11 + $0x144] sm:$0xf0]  ;;  %v2206_v12 = vld [vmem:[%s2568_s11 + $0x1c0] sm:$0xf]  ;;  %v2079_v15 = vor.u32 %v2301_v9, %v2078_v7  ;;  %v2283_v18 = vld [vmem:[%s2568_s11 + $0x34] sm:$0xf0] }
  0x71   : > { %v2333_v13 = vld [vmem:[%s2568_s11 + $0x1c4] sm:$0xf0]  ;;  %977 = vmatpush.bf16.msra.mxu0 %v2023_v63  ;;  %v2143_v16 = vor.u32 %v2317_v11, %v2142_v10  ;;  %v2070_v19 = vld [vmem:[%s2568_s11 + $0xb0] sm:$0xf]  ;;  %v2299_v21 = vld [vmem:[%s2568_s11 + $0xb4] sm:$0xf0]  ;;  %v2007_v26 = vor.u32 %v2283_v18, %v2006_v17 }
  0x72   : > { %1026 = vmatpush.bf16.msra.mxu1 %v2087_v3  ;;  %v2207_v20 = vor.u32 %v2333_v13, %v2206_v12  ;;  %v2134_v22 = vld [vmem:[%s2568_s11 + $0x130] sm:$0xf]  ;;  %v2315_v23 = vld [vmem:[%s2568_s11 + $0x134] sm:$0xf0]  ;;  %v2071_v27 = vor.u32 %v2299_v21, %v2070_v19  ;;  %v1998_v29 = vld [vmem:[%s2568_s11 + $0x20] sm:$0xf] }
  0x73   : > { %1075 = vmatpush.bf16.msra.mxu2 %v2151_v4  ;;  %v2198_v24 = vld [vmem:[%s2568_s11 + $0x1b0] sm:$0xf]  ;;  %v2331_v25 = vld [vmem:[%s2568_s11 + $0x1b4] sm:$0xf0]  ;;  %v2135_v28 = vor.u32 %v2315_v23, %v2134_v22  ;;  %v2281_v30 = vld [vmem:[%s2568_s11 + $0x24] sm:$0xf0] }
  0x74   : > { %1124 = vmatpush.bf16.msra.mxu3 %v2215_v8  ;;  %v2062_v31 = vld [vmem:[%s2568_s11 + $0xa0] sm:$0xf]  ;;  %v2199_v32 = vor.u32 %v2331_v25, %v2198_v24  ;;  %v2297_v33 = vld [vmem:[%s2568_s11 + $0xa4] sm:$0xf0]  ;;  %v1999_v38 = vor.u32 %v2281_v30, %v1998_v29  ;;  %v1990_v41 = vld [vmem:[%s2568_s11 + $0x10] sm:$0xf] }
  0x75   : > { %978 = vmatpush.bf16.msra.mxu0 %v2015_v14  ;;  %v2126_v34 = vld [vmem:[%s2568_s11 + $0x120] sm:$0xf]  ;;  %v2313_v35 = vld [vmem:[%s2568_s11 + $0x124] sm:$0xf0]  ;;  %v2063_v39 = vor.u32 %v2297_v33, %v2062_v31  ;;  %v2279_v42 = vld [vmem:[%s2568_s11 + $0x14] sm:$0xf0] }
  0x76   : > { %1027 = vmatpush.bf16.msra.mxu1 %v2079_v15  ;;  %v2190_v36 = vld [vmem:[%s2568_s11 + $0x1a0] sm:$0xf]  ;;  %v2329_v37 = vld [vmem:[%s2568_s11 + $0x1a4] sm:$0xf0]  ;;  %v2127_v40 = vor.u32 %v2313_v35, %v2126_v34  ;;  %v2054_v43 = vld [vmem:[%s2568_s11 + $0x90] sm:$0xf]  ;;  %v1991_v51 = vor.u32 %v2279_v42, %v1990_v41 }
  0x77   : > { %1076 = vmatpush.bf16.msra.mxu2 %v2143_v16  ;;  %v2191_v44 = vor.u32 %v2329_v37, %v2190_v36  ;;  %v2295_v45 = vld [vmem:[%s2568_s11 + $0x94] sm:$0xf0]  ;;  %v2118_v46 = vld [vmem:[%s2568_s11 + $0x110] sm:$0xf]  ;;  %v1982_v50 = vld [vmem:[%s2568_s11] sm:$0xf] }
  0x78   : > { %1125 = vmatpush.bf16.msra.mxu3 %v2207_v20  ;;  %v2311_v47 = vld [vmem:[%s2568_s11 + $0x114] sm:$0xf0]  ;;  %v2182_v48 = vld [vmem:[%s2568_s11 + $0x190] sm:$0xf]  ;;  %v2277_v52 = vld [vmem:[%s2568_s11 + $0x4] sm:$0xf0]  ;;  %v2055_v55 = vor.u32 %v2295_v45, %v2054_v43 }
  0x79   : > { %979 = vmatpush.bf16.msra.mxu0 %v2007_v26  ;;  %v2327_v49 = vld [vmem:[%s2568_s11 + $0x194] sm:$0xf0]  ;;  %v2046_v53 = vld [vmem:[%s2568_s11 + $0x80] sm:$0xf]  ;;  %v2293_v54 = vld [vmem:[%s2568_s11 + $0x84] sm:$0xf0]  ;;  %v2119_v56 = vor.u32 %v2311_v47, %v2118_v46  ;;  %v1983_v4 = vor.u32 %v2277_v52, %v1982_v50 }
  0x7a   : > { %1028 = vmatpush.bf16.msra.mxu1 %v2071_v27  ;;  %v2110_v57 = vld [vmem:[%s2568_s11 + $0x100] sm:$0xf]  ;;  %v2309_v58 = vld [vmem:[%s2568_s11 + $0x104] sm:$0xf0]  ;;  %v2183_v60 = vor.u32 %v2327_v49, %v2182_v48  ;;  %v2246_v63 = vld [vmem:[%s2570_s12 + $0xc] sm:$0xf0]  ;;  %v2047_v8 = vor.u32 %v2293_v54, %v2046_v53 }
  0x7b   : > { %1077 = vmatpush.bf16.msra.mxu2 %v2135_v28  ;;  %v2174_v59 = vld [vmem:[%s2568_s11 + $0x180] sm:$0xf]  ;;  %v2325_v61 = vld [vmem:[%s2568_s11 + $0x184] sm:$0xf0]  ;;  %v2244_v0 = vld [vmem:[%s2570_s12 + $0x4] sm:$0xf]  ;;  %v2111_v9 = vor.u32 %v2309_v58, %v2110_v57 }
  0x7c   : > { %1126 = vmatpush.bf16.msra.mxu3 %v2199_v32  ;;  %v1854_v62 = vld [vmem:[%s2570_s12] sm:$0xf]  ;;  %v1856_v1 = vld [vmem:[%s2570_s12 + $0x10] sm:$0xf0]  ;;  %v2168_v3 = vld [vmem:[%s2568_s11 + $0x178] sm:$0xf0]  ;;  %v2175_v13 = vor.u32 %v2325_v61, %v2174_v59 }
  0x7d   : > { %980 = vmatpush.bf16.msra.mxu0 %v1999_v38  ;;  %v2322_v2 = vld [vmem:[%s2568_s11 + $0x174] sm:$0xf]  ;;  %v1862_v5 = vld [vmem:[%s2570_s12 + $0x8] sm:$0xf]  ;;  %v2232_v7 = vld [vmem:[%s2568_s11 + $0x1f8] sm:$0xf0]  ;;  %v2655_v18 = vor.u32 %v2246_v63, %v1854_v62  ;;  %v2660_v23 = vor.u32 %v2244_v0, %v1856_v1 }
  0x7e   : > { %1029 = vmatpush.bf16.msra.mxu1 %v2063_v39  ;;  %v2338_v6 = vld [vmem:[%s2568_s11 + $0x1f4] sm:$0xf]  ;;  %v2247_v10 = vld [vmem:[%s2570_s12 + $0x14] sm:$0xf0]  ;;  %v2245_v11 = vld [vmem:[%s2570_s12 + $0xc] sm:$0xf]  ;;  %v2171_v14 = vor.u32 %v2322_v2, %v2168_v3 }
  0x7f   : > { %1078 = vmatpush.bf16.msra.mxu2 %v2127_v40  ;;  %v1864_v12 = vld [vmem:[%s2570_s12 + $0x18] sm:$0xf0]  ;;  %v2290_v15 = vld [vmem:[%s2568_s11 + $0x74] sm:$0xf]  ;;  %v2235_v19 = vor.u32 %v2338_v6, %v2232_v7  ;;  %v2320_v21 = vld [vmem:[%s2568_s11 + $0x164] sm:$0xf]  ;;  %v2662_v24 = vor.u32 %v2247_v10, %v1862_v5 }
  0x80   : > { %1127 = vmatpush.bf16.msra.mxu3 %v2191_v44  ;;  %v2040_v16 = vld [vmem:[%s2568_s11 + $0x78] sm:$0xf0]  ;;  %v2306_v17 = vld [vmem:[%s2568_s11 + $0xf4] sm:$0xf]  ;;  %v2160_v22 = vld [vmem:[%s2568_s11 + $0x168] sm:$0xf0]  ;;  %v2666_v27 = vor.u32 %v2245_v11, %v1864_v12 }
  0x81   : > { %981 = vmatpush.bf16.msra.mxu0 %v1991_v51  ;;  %v2104_v20 = vld [vmem:[%s2568_s11 + $0xf8] sm:$0xf0]  ;;  %v2336_v25 = vld [vmem:[%s2568_s11 + $0x1e4] sm:$0xf]  ;;  %v2224_v26 = vld [vmem:[%s2568_s11 + $0x1e8] sm:$0xf0]  ;;  %v2043_v28 = vor.u32 %v2290_v15, %v2040_v16  ;;  %v2163_v30 = vor.u32 %v2320_v21, %v2160_v22 }
  0x82   : > { %1030 = vmatpush.bf16.msra.mxu1 %v2055_v55  ;;  %v2107_v29 = vor.u32 %v2306_v17, %v2104_v20  ;;  %v2288_v31 = vld [vmem:[%s2568_s11 + $0x64] sm:$0xf]  ;;  %v2032_v32 = vld [vmem:[%s2568_s11 + $0x68] sm:$0xf0]  ;;  %v2227_v33 = vor.u32 %v2336_v25, %v2224_v26  ;;  %v2318_v37 = vld [vmem:[%s2568_s11 + $0x154] sm:$0xf] }
  0x83   : > { %1079 = vmatpush.bf16.msra.mxu2 %v2119_v56  ;;  %v2304_v34 = vld [vmem:[%s2568_s11 + $0xe4] sm:$0xf]  ;;  %v2096_v35 = vld [vmem:[%s2568_s11 + $0xe8] sm:$0xf0]  ;;  %v2035_v36 = vor.u32 %v2288_v31, %v2032_v32  ;;  %v2152_v38 = vld [vmem:[%s2568_s11 + $0x158] sm:$0xf0] }
  0x84   : > { %1128 = vmatpush.bf16.msra.mxu3 %v2183_v60  ;;  %v2334_v39 = vld [vmem:[%s2568_s11 + $0x1d4] sm:$0xf]  ;;  %v2099_v40 = vor.u32 %v2304_v34, %v2096_v35  ;;  %v2155_v41 = vor.u32 %v2318_v37, %v2152_v38  ;;  %v2216_v42 = vld [vmem:[%s2568_s11 + $0x1d8] sm:$0xf0]  ;;  %v1870_v50 = vld [vmem:[%s2570_s12 + $0x20] sm:$0xf] }
  0x85   : > { %982 = vmatpush.bf16.msra.mxu0 %v1983_v4  ;;  %v2286_v43 = vld [vmem:[%s2568_s11 + $0x54] sm:$0xf]  ;;  %v2024_v44 = vld [vmem:[%s2568_s11 + $0x58] sm:$0xf0]  ;;  %v2219_v45 = vor.u32 %v2334_v39, %v2216_v42  ;;  %v2250_v51 = vld [vmem:[%s2570_s12 + $0x2c] sm:$0xf0] }
  0x86   : > { %1031 = vmatpush.bf16.msra.mxu1 %v2047_v8  ;;  %v2302_v46 = vld [vmem:[%s2568_s11 + $0xd4] sm:$0xf]  ;;  %v2088_v47 = vld [vmem:[%s2568_s11 + $0xd8] sm:$0xf0]  ;;  %v2027_v48 = vor.u32 %v2286_v43, %v2024_v44  ;;  %v2248_v52 = vld [vmem:[%s2570_s12 + $0x24] sm:$0xf]  ;;  %v2692_v58 = vor.u32 %v2250_v51, %v1870_v50 }
  0x87   : > { %1080 = vmatpush.bf16.msra.mxu2 %v2111_v9  ;;  %v2091_v49 = vor.u32 %v2302_v46, %v2088_v47  ;;  %v1872_v53 = vld [vmem:[%s2570_s12 + $0x30] sm:$0xf0]  ;;  %v1878_v54 = vld [vmem:[%s2570_s12 + $0x28] sm:$0xf]  ;;  %v2251_v55 = vld [vmem:[%s2570_s12 + $0x34] sm:$0xf0] }
  0x88   : > { %1129 = vmatpush.bf16.msra.mxu3 %v2175_v13  ;;  %983 = vmatmul.bf16.vlgmr.msra.gmra.mxu0 %v2655_v18  ;;  %v2249_v56 = vld [vmem:[%s2570_s12 + $0x2c] sm:$0xf]  ;;  %v1880_v57 = vld [vmem:[%s2570_s12 + $0x38] sm:$0xf0]  ;;  %v2694_v59 = vor.u32 %v2248_v52, %v1872_v53  ;;  %v2696_v60 = vor.u32 %v2251_v55, %v1878_v54  ;;  %v2316_v62 = vld [vmem:[%s2568_s11 + $0x144] sm:$0xf] }
  0x89   : > { %1032 = vmatmul.bf16.vlgmr.msra.gmra.mxu1 %v2660_v23  ;;  %1171 = vmatpush.bf16.msrb.mxu0 %v2043_v28  ;;  %v2698_v61 = vor.u32 %v2249_v56, %v1880_v57  ;;  %v2144_v63 = vld [vmem:[%s2568_s11 + $0x148] sm:$0xf0]  ;;  %v2332_v0 = vld [vmem:[%s2568_s11 + $0x1c4] sm:$0xf]  ;;  %v1886_v10 = vld [vmem:[%s2570_s12 + $0x40] sm:$0xf] }
  0x8a   : > { %1081 = vmatmul.bf16.vlgmr.msra.gmra.mxu2 %v2662_v24  ;;  %1220 = vmatpush.bf16.msrb.mxu1 %v2107_v29  ;;  %v2147_v1 = vor.u32 %v2316_v62, %v2144_v63  ;;  %v2208_v2 = vld [vmem:[%s2568_s11 + $0x1c8] sm:$0xf0]  ;;  %v2284_v3 = vld [vmem:[%s2568_s11 + $0x44] sm:$0xf]  ;;  %v2254_v11 = vld [vmem:[%s2570_s12 + $0x4c] sm:$0xf0] }
  0x8b   : > { %1269 = vmatpush.bf16.msrb.mxu2 %v2171_v14  ;;  %1130 = vmatmul.bf16.vlgmr.msra.gmra.mxu3 %v2666_v27  ;;  %v2016_v4 = vld [vmem:[%s2568_s11 + $0x48] sm:$0xf0]  ;;  %v2211_v5 = vor.u32 %v2332_v0, %v2208_v2  ;;  %v2300_v7 = vld [vmem:[%s2568_s11 + $0xc4] sm:$0xf]  ;;  %v1888_v13 = vld [vmem:[%s2570_s12 + $0x50] sm:$0xf0] }
  0x8c   : > { %1318 = vmatpush.bf16.msrb.mxu3 %v2235_v19  ;;  %v2019_v6 = vor.u32 %v2284_v3, %v2016_v4  ;;  %v2080_v8 = vld [vmem:[%s2568_s11 + $0xc8] sm:$0xf0]  ;;  %v2252_v12 = vld [vmem:[%s2570_s12 + $0x44] sm:$0xf]  ;;  %v1894_v14 = vld [vmem:[%s2570_s12 + $0x48] sm:$0xf]  ;;  %v2720_v19 = vor.u32 %v2254_v11, %v1886_v10 }
  0x8d   : > { %1172 = vmatpush.bf16.msrb.mxu0 %v2035_v36  ;;  %v2083_v9 = vor.u32 %v2300_v7, %v2080_v8  ;;  %v2255_v15 = vld [vmem:[%s2570_s12 + $0x54] sm:$0xf0]  ;;  %v2253_v16 = vld [vmem:[%s2570_s12 + $0x4c] sm:$0xf]  ;;  %v1896_v17 = vld [vmem:[%s2570_s12 + $0x58] sm:$0xf0]  ;;  %v2722_v20 = vor.u32 %v2252_v12, %v1888_v13 }
  0x8e   : > { %1221 = vmatpush.bf16.msrb.mxu1 %v2099_v40  ;;  %v2724_v21 = vor.u32 %v2255_v15, %v1894_v14  ;;  %v2726_v22 = vor.u32 %v2253_v16, %v1896_v17  ;;  %v2314_v25 = vld [vmem:[%s2568_s11 + $0x134] sm:$0xf]  ;;  %v2136_v26 = vld [vmem:[%s2568_s11 + $0x138] sm:$0xf0]  ;;  %v1902_v38 = vld [vmem:[%s2570_s12 + $0x60] sm:$0xf] }
  0x8f   : > { %1270 = vmatpush.bf16.msrb.mxu2 %v2163_v30  ;;  %v2330_v28 = vld [vmem:[%s2568_s11 + $0x1b4] sm:$0xf]  ;;  %v2139_v29 = vor.u32 %v2314_v25, %v2136_v26  ;;  %v2200_v30 = vld [vmem:[%s2568_s11 + $0x1b8] sm:$0xf0]  ;;  %v2258_v39 = vld [vmem:[%s2570_s12 + $0x6c] sm:$0xf0] }
  0x90   : > { %1319 = vmatpush.bf16.msrb.mxu3 %v2227_v33  ;;  %v2282_v31 = vld [vmem:[%s2568_s11 + $0x34] sm:$0xf]  ;;  %v2008_v32 = vld [vmem:[%s2568_s11 + $0x38] sm:$0xf0]  ;;  %v2203_v33 = vor.u32 %v2330_v28, %v2200_v30  ;;  %v2256_v40 = vld [vmem:[%s2570_s12 + $0x64] sm:$0xf]  ;;  %v2748_v46 = vor.u32 %v2258_v39, %v1902_v38 }
  0x91   : > { %1173 = vmatpush.bf16.msrb.mxu0 %v2027_v48  ;;  %v2011_v34 = vor.u32 %v2282_v31, %v2008_v32  ;;  %v2298_v35 = vld [vmem:[%s2568_s11 + $0xb4] sm:$0xf]  ;;  %v2072_v36 = vld [vmem:[%s2568_s11 + $0xb8] sm:$0xf0]  ;;  %v1910_v42 = vld [vmem:[%s2570_s12 + $0x68] sm:$0xf] }
  0x92   : > { %1222 = vmatpush.bf16.msrb.mxu1 %v2091_v49  ;;  %v2075_v37 = vor.u32 %v2298_v35, %v2072_v36  ;;  %v2259_v43 = vld [vmem:[%s2570_s12 + $0x74] sm:$0xf0]  ;;  %v2257_v44 = vld [vmem:[%s2570_s12 + $0x6c] sm:$0xf]  ;;  %v2312_v50 = vld [vmem:[%s2568_s11 + $0x124] sm:$0xf] }
  0x93   : > { %1271 = vmatpush.bf16.msrb.mxu2 %v2155_v41  ;;  %v1904_v41 = vld [vmem:[%s2570_s12 + $0x70] sm:$0xf0]  ;;  %v2752_v48 = vor.u32 %v2259_v43, %v1910_v42  ;;  %v2128_v51 = vld [vmem:[%s2568_s11 + $0x128] sm:$0xf0]  ;;  %v2328_v52 = vld [vmem:[%s2568_s11 + $0x1a4] sm:$0xf] }
  0x94   : > { %1320 = vmatpush.bf16.msrb.mxu3 %v2219_v45  ;;  %v1912_v45 = vld [vmem:[%s2570_s12 + $0x78] sm:$0xf0]  ;;  %v2750_v47 = vor.u32 %v2256_v40, %v1904_v41  ;;  %v2131_v53 = vor.u32 %v2312_v50, %v2128_v51  ;;  %v2192_v54 = vld [vmem:[%s2568_s11 + $0x1a8] sm:$0xf0]  ;;  %v2280_v55 = vld [vmem:[%s2568_s11 + $0x24] sm:$0xf] }
  0x95   : > { %1174 = vmatpush.bf16.msrb.mxu0 %v2019_v6  ;;  %v2754_v49 = vor.u32 %v2257_v44, %v1912_v45  ;;  %v2000_v56 = vld [vmem:[%s2568_s11 + $0x28] sm:$0xf0]  ;;  %v2195_v57 = vor.u32 %v2328_v52, %v2192_v54  ;;  %v2296_v63 = vld [vmem:[%s2568_s11 + $0xa4] sm:$0xf]  ;;  %v1918_v2 = vld [vmem:[%s2570_s12 + $0x80] sm:$0xf] }
  0x96   : > { %1223 = vmatpush.bf16.msrb.mxu1 %v2083_v9  ;;  %v2003_v62 = vor.u32 %v2280_v55, %v2000_v56  ;;  %v2064_v0 = vld [vmem:[%s2568_s11 + $0xa8] sm:$0xf0]  ;;  %v2262_v3 = vld [vmem:[%s2570_s12 + $0x8c] sm:$0xf0]  ;;  %v2260_v4 = vld [vmem:[%s2570_s12 + $0x84] sm:$0xf] }
  0x97   : > { %1272 = vmatpush.bf16.msrb.mxu2 %v2147_v1  ;;  %v2067_v1 = vor.u32 %v2296_v63, %v2064_v0  ;;  %v1926_v6 = vld [vmem:[%s2570_s12 + $0x88] sm:$0xf]  ;;  %v2263_v7 = vld [vmem:[%s2570_s12 + $0x94] sm:$0xf0]  ;;  %v2261_v8 = vld [vmem:[%s2570_s12 + $0x8c] sm:$0xf]  ;;  %v2776_v10 = vor.u32 %v2262_v3, %v1918_v2 }
  0x98   : > { %988 = vmatmul.bf16.gmra.mxu0 %v2692_v58  ;;  %1321 = vmatpush.bf16.msrb.mxu3 %v2211_v5  ;;  %v1920_v5 = vld [vmem:[%s2570_s12 + $0x90] sm:$0xf0]  ;;  %v1928_v9 = vld [vmem:[%s2570_s12 + $0x98] sm:$0xf0]  ;;  %v2780_v12 = vor.u32 %v2263_v7, %v1926_v6  ;;  %v2266_v35 = vld [vmem:[%s2570_s12 + $0xac] sm:$0xf0] }
  0x99   : > { %1037 = vmatmul.bf16.gmra.mxu1 %v2694_v59  ;;  %1175 = vmatpush.bf16.msrb.mxu0 %v2011_v34  ;;  %v2778_v11 = vor.u32 %v2260_v4, %v1920_v5  ;;  %v2782_v13 = vor.u32 %v2261_v8, %v1928_v9  ;;  %v2310_v14 = vld [vmem:[%s2568_s11 + $0x114] sm:$0xf]  ;;  %v2120_v15 = vld [vmem:[%s2568_s11 + $0x118] sm:$0xf0]  ;;  %v1934_v34 = vld [vmem:[%s2570_s12 + $0xa0] sm:$0xf] }
  0x9a   : > { %1086 = vmatmul.bf16.gmra.mxu2 %v2696_v60  ;;  %1224 = vmatpush.bf16.msrb.mxu1 %v2075_v37  ;;  %v2326_v16 = vld [vmem:[%s2568_s11 + $0x194] sm:$0xf]  ;;  %v2123_v17 = vor.u32 %v2310_v14, %v2120_v15  ;;  %v2184_v25 = vld [vmem:[%s2568_s11 + $0x198] sm:$0xf0]  ;;  %v2264_v36 = vld [vmem:[%s2570_s12 + $0xa4] sm:$0xf]  ;;  %v2804_v42 = vor.u32 %v2266_v35, %v1934_v34 }
  0x9b   : > { %1135 = vmatmul.bf16.gmra.mxu3 %v2698_v61  ;;  %1273 = vmatpush.bf16.msrb.mxu2 %v2139_v29  ;;  %v2278_v26 = vld [vmem:[%s2568_s11 + $0x14] sm:$0xf]  ;;  %v1992_v28 = vld [vmem:[%s2568_s11 + $0x18] sm:$0xf0]  ;;  %v2187_v29 = vor.u32 %v2326_v16, %v2184_v25  ;;  %v1942_v38 = vld [vmem:[%s2570_s12 + $0xa8] sm:$0xf] }
  0x9c   : > { %1322 = vmatpush.bf16.msrb.mxu3 %v2203_v33  ;;  %v1995_v30 = vor.u32 %v2278_v26, %v1992_v28  ;;  %v2294_v31 = vld [vmem:[%s2568_s11 + $0x94] sm:$0xf]  ;;  %v2056_v32 = vld [vmem:[%s2568_s11 + $0x98] sm:$0xf0]  ;;  %v2267_v39 = vld [vmem:[%s2570_s12 + $0xb4] sm:$0xf0] }
  0x9d   : > { %1176 = vmatpush.bf16.msrb.mxu0 %v2003_v62  ;;  %v2059_v33 = vor.u32 %v2294_v31, %v2056_v32  ;;  %v1936_v37 = vld [vmem:[%s2570_s12 + $0xb0] sm:$0xf0]  ;;  %v2265_v40 = vld [vmem:[%s2570_s12 + $0xac] sm:$0xf]  ;;  %v1944_v41 = vld [vmem:[%s2570_s12 + $0xb8] sm:$0xf0]  ;;  %v2808_v44 = vor.u32 %v2267_v39, %v1942_v38 }
  0x9e   : > { %1225 = vmatpush.bf16.msrb.mxu1 %v2067_v1  ;;  %v2806_v43 = vor.u32 %v2264_v36, %v1936_v37  ;;  %v2810_v45 = vor.u32 %v2265_v40, %v1944_v41  ;;  %v2308_v50 = vld [vmem:[%s2568_s11 + $0x104] sm:$0xf]  ;;  %v2112_v51 = vld [vmem:[%s2568_s11 + $0x108] sm:$0xf0]  ;;  %v1950_v2 = vld [vmem:[%s2570_s12 + $0xc0] sm:$0xf] }
  0x9f   : > { %1274 = vmatpush.bf16.msrb.mxu2 %v2131_v53  ;;  %v2324_v52 = vld [vmem:[%s2568_s11 + $0x184] sm:$0xf]  ;;  %v2115_v53 = vor.u32 %v2308_v50, %v2112_v51  ;;  %v2176_v54 = vld [vmem:[%s2568_s11 + $0x188] sm:$0xf0]  ;;  %v2270_v3 = vld [vmem:[%s2570_s12 + $0xcc] sm:$0xf0] }
  0xa0   : > { %1323 = vmatpush.bf16.msrb.mxu3 %v2195_v57  ;;  %v2276_v55 = vld [vmem:[%s2568_s11 + $0x4] sm:$0xf]  ;;  %v1984_v56 = vld [vmem:[%s2568_s11 + $0x8] sm:$0xf0]  ;;  %v2179_v57 = vor.u32 %v2324_v52, %v2176_v54  ;;  %v1952_v5 = vld [vmem:[%s2570_s12 + $0xd0] sm:$0xf0]  ;;  %v2832_v14 = vor.u32 %v2270_v3, %v1950_v2 }
  0xa1   : > { %1177 = vmatpush.bf16.msrb.mxu0 %v1995_v30  ;;  %v1987_v62 = vor.u32 %v2276_v55, %v1984_v56  ;;  %v2292_v63 = vld [vmem:[%s2568_s11 + $0x84] sm:$0xf]  ;;  %v2048_v0 = vld [vmem:[%s2568_s11 + $0x88] sm:$0xf0]  ;;  %v1958_v6 = vld [vmem:[%s2570_s12 + $0xc8] sm:$0xf] }
  0xa2   : > { %1226 = vmatpush.bf16.msrb.mxu1 %v2059_v33  ;;  %v2051_v1 = vor.u32 %v2292_v63, %v2048_v0  ;;  %v2268_v4 = vld [vmem:[%s2570_s12 + $0xc4] sm:$0xf]  ;;  %v2271_v7 = vld [vmem:[%s2570_s12 + $0xd4] sm:$0xf0]  ;;  %v2269_v8 = vld [vmem:[%s2570_s12 + $0xcc] sm:$0xf] }
  0xa3   : > { %1275 = vmatpush.bf16.msrb.mxu2 %v2123_v17  ;;  %v1960_v9 = vld [vmem:[%s2570_s12 + $0xd8] sm:$0xf0]  ;;  %v2834_v15 = vor.u32 %v2268_v4, %v1952_v5  ;;  %v2836_v16 = vor.u32 %v2271_v7, %v1958_v6  ;;  %v1966_v25 = vld [vmem:[%s2570_s12 + $0xe0] sm:$0xf]  ;;  %v2274_v26 = vld [vmem:[%s2570_s12 + $0xec] sm:$0xf0] }
  0xa4   : > { %1324 = vmatpush.bf16.msrb.mxu3 %v2187_v29  ;;  %v2838_v17 = vor.u32 %v2269_v8, %v1960_v9  ;;  %v2272_v28 = vld [vmem:[%s2570_s12 + $0xe4] sm:$0xf]  ;;  %v1968_v29 = vld [vmem:[%s2570_s12 + $0xf0] sm:$0xf0]  ;;  %v1974_v30 = vld [vmem:[%s2570_s12 + $0xe8] sm:$0xf]  ;;  %v2852_v34 = vor.u32 %v2274_v26, %v1966_v25 }
  0xa5   : > { %1178 = vmatpush.bf16.msrb.mxu0 %v1987_v62  ;;  %v2275_v31 = vld [vmem:[%s2570_s12 + $0xf4] sm:$0xf0]  ;;  %v2273_v32 = vld [vmem:[%s2570_s12 + $0xec] sm:$0xf]  ;;  %v1976_v33 = vld [vmem:[%s2570_s12 + $0xf8] sm:$0xf0]  ;;  %v2854_v35 = vor.u32 %v2272_v28, %v1968_v29 }
  0xa6   : > { %1227 = vmatpush.bf16.msrb.mxu1 %v2051_v1  ;;  %v2856_v36 = vor.u32 %v2275_v31, %v1974_v30  ;;  %v2858_v37 = vor.u32 %v2273_v32, %v1976_v33  ;;  %v369_v1 = vld [vmem:[#allocation2 + $0xd8] sm:$0xff]  ;;  %v371_v7 = vld [vmem:[#allocation2 + $0x50] sm:$0xff]  ;;  %p2236_p12 = scmp.ne.s32.totalorder %s2412_s17, 3 }
  0xa7   : > { %1276 = vmatpush.bf16.msrb.mxu2 %v2115_v53  ;;  %v367_v53 = vld [vmem:[#allocation2 + $0xb0] sm:$0xff] }
  0xa8   : > { %993 = vmatmul.bf16.gmra.mxu0 %v2720_v19  ;;  %1325 = vmatpush.bf16.msrb.mxu3 %v2179_v57 }
  0xa9   : > { %1042 = vmatmul.bf16.gmra.mxu1 %v2722_v20 }
  0xaa   : > { %1091 = vmatmul.bf16.gmra.mxu2 %v2724_v21 }
  0xab   : > { %1140 = vmatmul.bf16.gmra.mxu3 %v2726_v22 }
  0xb8   : > { %998 = vmatmul.bf16.gmra.mxu0 %v2748_v46 }
  0xb9   : > { %1047 = vmatmul.bf16.gmra.mxu1 %v2750_v47 }
  0xba   : > { %1096 = vmatmul.bf16.gmra.mxu2 %v2752_v48 }
  0xbb   : > { %1145 = vmatmul.bf16.gmra.mxu3 %v2754_v49 }
  0xc8   : > { %1003 = vmatmul.bf16.gmra.mxu0 %v2776_v10 }
  0xc9   : > { %1052 = vmatmul.bf16.gmra.mxu1 %v2778_v11 }
  0xca   : > { %1101 = vmatmul.bf16.gmra.mxu2 %v2780_v12 }
  0xcb   : > { %1150 = vmatmul.bf16.gmra.mxu3 %v2782_v13 }
  0xd8   : > { %1008 = vmatmul.bf16.gmra.mxu0 %v2804_v42 }
  0xd9   : > { %1057 = vmatmul.bf16.gmra.mxu1 %v2806_v43 }
  0xda   : > { %1106 = vmatmul.bf16.gmra.mxu2 %v2808_v44 }
  0xdb   : > { %1155 = vmatmul.bf16.gmra.mxu3 %v2810_v45 }
  0xe8   : > { %1013 = vmatmul.bf16.gmra.mxu0 %v2832_v14 }
  0xe9   : > { %1062 = vmatmul.bf16.gmra.mxu1 %v2834_v15 }
  0xea   : > { %1111 = vmatmul.bf16.gmra.mxu2 %v2836_v16 }
  0xeb   : > { %1160 = vmatmul.bf16.gmra.mxu3 %v2838_v17 }
  0xf8   : > { %1018 = vmatmul.bf16.gmra.mxu0 %v2852_v34 }
  0xf9   : > { %1067 = vmatmul.bf16.gmra.mxu1 %v2854_v35 }
  0xfa   : > { %1116 = vmatmul.bf16.gmra.mxu2 %v2856_v36 }
  0xfb   : > { %1165 = vmatmul.bf16.gmra.mxu3 %v2858_v37 }
 0x105   : > { %v984_v38 = vpop.f32.mrf.mxu0 }
 0x106   : > { %v1033_v39 = vpop.f32.mrf.mxu1 }
 0x107   : > { %v1034_v40 = vadd.f32 %v1033_v39, %v984_v38 }
 0x108   : > { %1179 = vmatmul.bf16.vlgmr.msrb.gmra.mxu0 %v2655_v18 }
 0x109   : > { %1228 = vmatmul.bf16.vlgmr.msrb.gmra.mxu1 %v2660_v23 }
 0x10a   : > { %1277 = vmatmul.bf16.vlgmr.msrb.gmra.mxu2 %v2662_v24 }
 0x10b   : > { %1326 = vmatmul.bf16.vlgmr.msrb.gmra.mxu3 %v2666_v27 }
 0x10d   : > { %v1082_v41 = vpop.f32.mrf.mxu2  ;;  %v986_v52 = vpop.f32.mrf.mxu0 }
 0x10e   : > { %v1083_v50 = vadd.f32 %v1082_v41, %v1034_v40  ;;  %v1131_v51 = vpop.f32.mrf.mxu3  ;;  %v1035_v54 = vpop.f32.mrf.mxu1  ;;  %v375_v41 = vld [vmem:[#allocation2 + $0x80] sm:$0xff] }
 0x10f   : > { %v1036_v57 = vadd.f32 %v1035_v54, %v986_v52 }
 0x110   : > { %v1132_v55 = vadd.f32 %v1131_v51, %v1083_v50 }
 0x112   : > { %v1367_v56 = vadd.f32 %v1132_v55, %v367_v53 }
 0x114   : > { %1399 = vst [vmem:[#allocation2 + $0xb0] sm:$0xff] %v1367_v56 }
 0x115   : > { %v1084_v62 = vpop.f32.mrf.mxu2  ;;  %v989_v0 = vpop.f32.mrf.mxu0 }
 0x116   : > { %v1085_v63 = vadd.f32 %v1084_v62, %v1036_v57  ;;  %v1133_v18 = vpop.f32.mrf.mxu3  ;;  %v1038_v23 = vpop.f32.mrf.mxu1 }
 0x117   : > { %v1039_v27 = vadd.f32 %v1038_v23, %v989_v0  ;;  %v379_v23 = vld [vmem:[#allocation2 + $0x60] sm:$0xff] }
 0x118   : > { %v1134_v2 = vadd.f32 %v1133_v18, %v1085_v63  ;;  %1184 = vmatmul.bf16.gmra.mxu0 %v2692_v58 }
 0x119   : > { %1233 = vmatmul.bf16.gmra.mxu1 %v2694_v59  ;;  %v373_v59 = vld [vmem:[#allocation2 + $0x30] sm:$0xff] }
 0x11a   : > { %v1369_v24 = vadd.f32 %v1134_v2, %v369_v1  ;;  %1282 = vmatmul.bf16.gmra.mxu2 %v2696_v60 }
 0x11b   : > { %1331 = vmatmul.bf16.gmra.mxu3 %v2698_v61 }
 0x11c   : > { %1401 = vst [vmem:[#allocation2 + $0xd8] sm:$0xff] %v1369_v24 }
 0x11d   : > { %v1087_v3 = vpop.f32.mrf.mxu2  ;;  %v991_v6 = vpop.f32.mrf.mxu0 }
 0x11e   : > { %v1088_v4 = vadd.f32 %v1087_v3, %v1039_v27  ;;  %v1136_v5 = vpop.f32.mrf.mxu3  ;;  %v1040_v8 = vpop.f32.mrf.mxu1 }
 0x11f   : > { %v1041_v26 = vadd.f32 %v1040_v8, %v991_v6 }
 0x120   : > { %v1137_v9 = vadd.f32 %v1136_v5, %v1088_v4 }
 0x122   : > { %v1371_v25 = vadd.f32 %v1137_v9, %v371_v7 }
 0x124   : > { %1403 = vst [vmem:[#allocation2 + $0x50] sm:$0xff] %v1371_v25 }
 0x125   : > { %v1089_v58 = vpop.f32.mrf.mxu2  ;;  %v994_v30 = vpop.f32.mrf.mxu0 }
 0x126   : > { %v1090_v28 = vadd.f32 %v1089_v58, %v1041_v26  ;;  %v1138_v29 = vpop.f32.mrf.mxu3  ;;  %v1043_v31 = vpop.f32.mrf.mxu1 }
 0x127   : > { %v1044_v32 = vadd.f32 %v1043_v31, %v994_v30 }
 0x128   : > { %v1139_v60 = vadd.f32 %v1138_v29, %v1090_v28  ;;  %1189 = vmatmul.bf16.gmra.mxu0 %v2720_v19  ;;  %v383_v28 = vld [vmem:[#allocation2 + $0x38] sm:$0xff] }
 0x129   : > { %1238 = vmatmul.bf16.gmra.mxu1 %v2722_v20  ;;  %v377_v20 = vld [vmem:[#allocation2 + $0xe8] sm:$0xff] }
 0x12a   : > { %v1373_v61 = vadd.f32 %v1139_v60, %v373_v59  ;;  %1287 = vmatmul.bf16.gmra.mxu2 %v2724_v21 }
 0x12b   : > { %1336 = vmatmul.bf16.gmra.mxu3 %v2726_v22 }
 0x12c   : > { %1405 = vst [vmem:[#allocation2 + $0x30] sm:$0xff] %v1373_v61 }
 0x12d   : > { %v1092_v33 = vpop.f32.mrf.mxu2  ;;  %v996_v40 = vpop.f32.mrf.mxu0 }
 0x12e   : > { %v1093_v38 = vadd.f32 %v1092_v33, %v1044_v32  ;;  %v1141_v39 = vpop.f32.mrf.mxu3  ;;  %v1045_v50 = vpop.f32.mrf.mxu1 }
 0x12f   : > { %v1046_v53 = vadd.f32 %v1045_v50, %v996_v40 }
 0x130   : > { %v1142_v51 = vadd.f32 %v1141_v39, %v1093_v38 }
 0x132   : > { %v1375_v52 = vadd.f32 %v1142_v51, %v375_v41  ;;  %v387_v51 = vld [vmem:[#allocation2 + $0xe0] sm:$0xff] }
 0x134   : > { %1407 = vst [vmem:[#allocation2 + $0x80] sm:$0xff] %v1375_v52 }
 0x135   : > { %v1094_v19 = vpop.f32.mrf.mxu2  ;;  %v999_v56 = vpop.f32.mrf.mxu0 }
 0x136   : > { %v1095_v54 = vadd.f32 %v1094_v19, %v1046_v53  ;;  %v1143_v55 = vpop.f32.mrf.mxu3  ;;  %v1048_v57 = vpop.f32.mrf.mxu1 }
 0x137   : > { %v1049_v62 = vadd.f32 %v1048_v57, %v999_v56 }
 0x138   : > { %v1144_v21 = vadd.f32 %v1143_v55, %v1095_v54  ;;  %1194 = vmatmul.bf16.gmra.mxu0 %v2748_v46 }
 0x139   : > { %1243 = vmatmul.bf16.gmra.mxu1 %v2750_v47  ;;  %v381_v47 = vld [vmem:[#allocation2 + $0x8] sm:$0xff] }
 0x13a   : > { %v1377_v22 = vadd.f32 %v1144_v21, %v377_v20  ;;  %1292 = vmatmul.bf16.gmra.mxu2 %v2752_v48 }
 0x13b   : > { %1341 = vmatmul.bf16.gmra.mxu3 %v2754_v49 }
 0x13c   : > { %1409 = vst [vmem:[#allocation2 + $0xe8] sm:$0xff] %v1377_v22 }
 0x13d   : > { %v1097_v63 = vpop.f32.mrf.mxu2  ;;  %v1001_v1 = vpop.f32.mrf.mxu0 }
 0x13e   : > { %v1098_v18 = vadd.f32 %v1097_v63, %v1049_v62  ;;  %v1146_v0 = vpop.f32.mrf.mxu3  ;;  %v1050_v2 = vpop.f32.mrf.mxu1 }
 0x13f   : > { %v1051_v3 = vadd.f32 %v1050_v2, %v1001_v1 }
 0x140   : > { %v1147_v24 = vadd.f32 %v1146_v0, %v1098_v18  ;;  %v391_v0 = vld [vmem:[#allocation2 + $0xa8] sm:$0xff] }
 0x142   : > { %v1379_v27 = vadd.f32 %v1147_v24, %v379_v23 }
 0x144   : > { %1411 = vst [vmem:[#allocation2 + $0x60] sm:$0xff] %v1379_v27 }
 0x145   : > { %v1099_v46 = vpop.f32.mrf.mxu2  ;;  %v1004_v6 = vpop.f32.mrf.mxu0 }
 0x146   : > { %v1100_v4 = vadd.f32 %v1099_v46, %v1051_v3  ;;  %v1148_v5 = vpop.f32.mrf.mxu3  ;;  %v1053_v7 = vpop.f32.mrf.mxu1 }
 0x147   : > { %v1054_v8 = vadd.f32 %v1053_v7, %v1004_v6 }
 0x148   : > { %v1149_v48 = vadd.f32 %v1148_v5, %v1100_v4  ;;  %1199 = vmatmul.bf16.gmra.mxu0 %v2776_v10 }
 0x149   : > { %1248 = vmatmul.bf16.gmra.mxu1 %v2778_v11  ;;  %v385_v11 = vld [vmem:[#allocation2 + $0x40] sm:$0xff] }
 0x14a   : > { %v1381_v49 = vadd.f32 %v1149_v48, %v381_v47  ;;  %1297 = vmatmul.bf16.gmra.mxu2 %v2780_v12 }
 0x14b   : > { %1346 = vmatmul.bf16.gmra.mxu3 %v2782_v13 }
 0x14c   : > { %1413 = vst [vmem:[#allocation2 + $0x8] sm:$0xff] %v1381_v49  ;;  %v395_v49 = vld [vmem:[#allocation2 + $0xa0] sm:$0xff] }
 0x14d   : > { %v1102_v9 = vpop.f32.mrf.mxu2  ;;  %v1006_v58 = vpop.f32.mrf.mxu0 }
 0x14e   : > { %v1103_v25 = vadd.f32 %v1102_v9, %v1054_v8  ;;  %v1151_v26 = vpop.f32.mrf.mxu3  ;;  %v1055_v29 = vpop.f32.mrf.mxu1 }
 0x14f   : > { %v1056_v31 = vadd.f32 %v1055_v29, %v1006_v58 }
 0x150   : > { %v1152_v30 = vadd.f32 %v1151_v26, %v1103_v25 }
 0x152   : > { %v1383_v59 = vadd.f32 %v1152_v30, %v383_v28 }
 0x154   : > { %1415 = vst [vmem:[#allocation2 + $0x38] sm:$0xff] %v1383_v59 }
 0x155   : > { %v1104_v10 = vpop.f32.mrf.mxu2  ;;  %v1009_v32 = vpop.f32.mrf.mxu0 }
 0x156   : > { %v1105_v60 = vadd.f32 %v1104_v10, %v1056_v31  ;;  %v1153_v61 = vpop.f32.mrf.mxu3  ;;  %v1058_v33 = vpop.f32.mrf.mxu1 }
 0x157   : > { %v1059_v38 = vadd.f32 %v1058_v33, %v1009_v32  ;;  %v368_v32 = vld [vmem:[#allocation2] sm:$0xff] }
 0x158   : > { %v1154_v12 = vadd.f32 %v1153_v61, %v1105_v60  ;;  %1204 = vmatmul.bf16.gmra.mxu0 %v2804_v42 }
 0x159   : > { %1253 = vmatmul.bf16.gmra.mxu1 %v2806_v43  ;;  %v389_v43 = vld [vmem:[#allocation2 + $0x70] sm:$0xff] }
 0x15a   : > { %v1385_v13 = vadd.f32 %v1154_v12, %v385_v11  ;;  %1302 = vmatmul.bf16.gmra.mxu2 %v2808_v44 }
 0x15b   : > { %1351 = vmatmul.bf16.gmra.mxu3 %v2810_v45 }
 0x15c   : > { %1417 = vst [vmem:[#allocation2 + $0x40] sm:$0xff] %v1385_v13 }
 0x15d   : > { %v1107_v39 = vpop.f32.mrf.mxu2  ;;  %v1011_v50 = vpop.f32.mrf.mxu0 }
 0x15e   : > { %v1108_v40 = vadd.f32 %v1107_v39, %v1059_v38  ;;  %v1156_v41 = vpop.f32.mrf.mxu3  ;;  %v1060_v52 = vpop.f32.mrf.mxu1 }
 0x15f   : > { %v1061_v54 = vadd.f32 %v1060_v52, %v1011_v50  ;;  %v370_v50 = vld [vmem:[#allocation2 + $0x18] sm:$0xff] }
 0x160   : > { %v1157_v53 = vadd.f32 %v1156_v41, %v1108_v40 }
 0x162   : > { %v1387_v19 = vadd.f32 %v1157_v53, %v387_v51 }
 0x164   : > { %1419 = vst [vmem:[#allocation2 + $0xe0] sm:$0xff] %v1387_v19 }
 0x165   : > { %v1109_v42 = vpop.f32.mrf.mxu2  ;;  %v1014_v20 = vpop.f32.mrf.mxu0 }
 0x166   : > { %v1110_v55 = vadd.f32 %v1109_v42, %v1061_v54  ;;  %v1158_v56 = vpop.f32.mrf.mxu3  ;;  %v1063_v57 = vpop.f32.mrf.mxu1 }
 0x167   : > { %v1064_v21 = vadd.f32 %v1063_v57, %v1014_v20  ;;  %v372_v20 = vld [vmem:[#allocation2 + $0x68] sm:$0xff] }
 0x168   : > { %v1159_v44 = vadd.f32 %v1158_v56, %v1110_v55  ;;  %1209 = vmatmul.bf16.gmra.mxu0 %v2832_v14 }
 0x169   : > { %1258 = vmatmul.bf16.gmra.mxu1 %v2834_v15  ;;  %v393_v15 = vld [vmem:[#allocation2 + $0x10] sm:$0xff] }
 0x16a   : > { %v1389_v45 = vadd.f32 %v1159_v44, %v389_v43  ;;  %1307 = vmatmul.bf16.gmra.mxu2 %v2836_v16 }
 0x16b   : > { %1356 = vmatmul.bf16.gmra.mxu3 %v2838_v17 }
 0x16c   : > { %1421 = vst [vmem:[#allocation2 + $0x70] sm:$0xff] %v1389_v45 }
 0x16d   : > { %v1112_v22 = vpop.f32.mrf.mxu2  ;;  %v1016_v18 = vpop.f32.mrf.mxu0 }
 0x16e   : > { %v1113_v62 = vadd.f32 %v1112_v22, %v1064_v21  ;;  %v1161_v63 = vpop.f32.mrf.mxu3  ;;  %v1065_v1 = vpop.f32.mrf.mxu1 }
 0x16f   : > { %v1066_v24 = vadd.f32 %v1065_v1, %v1016_v18  ;;  %v374_v18 = vld [vmem:[#allocation2 + $0x48] sm:$0xff] }
 0x170   : > { %v1162_v23 = vadd.f32 %v1161_v63, %v1113_v62 }
 0x172   : > { %v1391_v2 = vadd.f32 %v1162_v23, %v391_v0 }
 0x174   : > { %1423 = vst [vmem:[#allocation2 + $0xa8] sm:$0xff] %v1391_v2 }
 0x175   : > { %v1114_v14 = vpop.f32.mrf.mxu2  ;;  %v1019_v46 = vpop.f32.mrf.mxu0 }
 0x176   : > { %v1115_v27 = vadd.f32 %v1114_v14, %v1066_v24  ;;  %v1163_v3 = vpop.f32.mrf.mxu3  ;;  %v1068_v4 = vpop.f32.mrf.mxu1 }
 0x177   : > { %v1069_v5 = vadd.f32 %v1068_v4, %v1019_v46  ;;  %v376_v46 = vld [vmem:[#allocation2 + $0x88] sm:$0xff] }
 0x178   : > { %v1164_v16 = vadd.f32 %v1163_v3, %v1115_v27  ;;  %1214 = vmatmul.bf16.gmra.mxu0 %v2852_v34 }
 0x179   : > { %1263 = vmatmul.bf16.gmra.mxu1 %v2854_v35  ;;  %v397_v35 = vld [vmem:[#allocation2 + $0x20] sm:$0xff] }
 0x17a   : > { %v1393_v17 = vadd.f32 %v1164_v16, %v393_v15  ;;  %1312 = vmatmul.bf16.gmra.mxu2 %v2856_v36 }
 0x17b   : > { %1361 = vmatmul.bf16.gmra.mxu3 %v2858_v37 }
 0x17c   : > { %1425 = vst [vmem:[#allocation2 + $0x10] sm:$0xff] %v1393_v17 }
 0x17d   : > { %v1117_v6 = vpop.f32.mrf.mxu2  ;;  %v1021_v48 = vpop.f32.mrf.mxu0 }
 0x17e   : > { %v1118_v47 = vadd.f32 %v1117_v6, %v1069_v5  ;;  %v1166_v7 = vpop.f32.mrf.mxu3  ;;  %v1070_v8 = vpop.f32.mrf.mxu1 }
 0x17f   : > { %v1071_v26 = vadd.f32 %v1070_v8, %v1021_v48  ;;  %v378_v48 = vld [vmem:[#allocation2 + $0xb8] sm:$0xff] }
 0x180   : > { %v1167_v9 = vadd.f32 %v1166_v7, %v1118_v47 }
 0x182   : > { %v1395_v25 = vadd.f32 %v1167_v9, %v395_v49 }
 0x184   : > { %1427 = vst [vmem:[#allocation2 + $0xa0] sm:$0xff] %v1395_v25 }
 0x185   : > { %v1119_v34 = vpop.f32.mrf.mxu2  ;;  %v1180_v29 = vpop.f32.mrf.mxu0 }
 0x186   : > { %v1120_v58 = vadd.f32 %v1119_v34, %v1071_v26  ;;  %v1168_v28 = vpop.f32.mrf.mxu3  ;;  %v1229_v30 = vpop.f32.mrf.mxu1 }
 0x187   : > { %v1230_v37 = vadd.f32 %v1229_v30, %v1180_v29  ;;  %v380_v29 = vld [vmem:[#allocation2 + $0xf0] sm:$0xff] }
 0x188   : > { %v1169_v36 = vadd.f32 %v1168_v28, %v1120_v58 }
 0x18a   : > { %v1397_v59 = vadd.f32 %v1169_v36, %v397_v35 }
 0x18c   : > { %1429 = vst [vmem:[#allocation2 + $0x20] sm:$0xff] %v1397_v59 }
 0x18d   : > { %v1278_v31 = vpop.f32.mrf.mxu2  ;;  %v1182_v61 = vpop.f32.mrf.mxu0 }
 0x18e   : > { %v1279_v10 = vadd.f32 %v1278_v31, %v1230_v37  ;;  %v1327_v60 = vpop.f32.mrf.mxu3  ;;  %v1231_v11 = vpop.f32.mrf.mxu1 }
 0x18f   : > { %v1232_v13 = vadd.f32 %v1231_v11, %v1182_v61  ;;  %v382_v61 = vld [vmem:[#allocation2 + $0x78] sm:$0xff] }
 0x190   : > { %v1328_v33 = vadd.f32 %v1327_v60, %v1279_v10 }
 0x192   : > { %v1368_v12 = vadd.f32 %v1328_v33, %v368_v32 }
 0x194   : > { %1400 = vst [vmem:[#allocation2] sm:$0xff] %v1368_v12 }
 0x195   : > { %v1280_v38 = vpop.f32.mrf.mxu2  ;;  %v1185_v41 = vpop.f32.mrf.mxu0 }
 0x196   : > { %v1281_v39 = vadd.f32 %v1280_v38, %v1232_v13  ;;  %v1329_v40 = vpop.f32.mrf.mxu3  ;;  %v1234_v51 = vpop.f32.mrf.mxu1 }
 0x197   : > { %v1235_v19 = vadd.f32 %v1234_v51, %v1185_v41  ;;  %v384_v41 = vld [vmem:[#allocation2 + $0x58] sm:$0xff] }
 0x198   : > { %v1330_v52 = vadd.f32 %v1329_v40, %v1281_v39 }
 0x19a   : > { %v1370_v53 = vadd.f32 %v1330_v52, %v370_v50 }
 0x19c   : > { %1402 = vst [vmem:[#allocation2 + $0x18] sm:$0xff] %v1370_v53 }
 0x19d   : > { %v1283_v54 = vpop.f32.mrf.mxu2  ;;  %v1187_v56 = vpop.f32.mrf.mxu0 }
 0x19e   : > { %v1284_v42 = vadd.f32 %v1283_v54, %v1235_v19  ;;  %v1332_v55 = vpop.f32.mrf.mxu3  ;;  %v1236_v43 = vpop.f32.mrf.mxu1 }
 0x19f   : > { %v1237_v45 = vadd.f32 %v1236_v43, %v1187_v56  ;;  %v386_v56 = vld [vmem:[#allocation2 + $0xc8] sm:$0xff] }
 0x1a0   : > { %v1333_v57 = vadd.f32 %v1332_v55, %v1284_v42 }
 0x1a2   : > { %v1372_v44 = vadd.f32 %v1333_v57, %v372_v20 }
 0x1a4   : > { %1404 = vst [vmem:[#allocation2 + $0x68] sm:$0xff] %v1372_v44 }
 0x1a5   : > { %v1285_v21 = vpop.f32.mrf.mxu2  ;;  %v1190_v63 = vpop.f32.mrf.mxu0 }
 0x1a6   : > { %v1286_v22 = vadd.f32 %v1285_v21, %v1237_v45  ;;  %v1334_v62 = vpop.f32.mrf.mxu3  ;;  %v1239_v0 = vpop.f32.mrf.mxu1 }
 0x1a7   : > { %v1240_v2 = vadd.f32 %v1239_v0, %v1190_v63  ;;  %v388_v63 = vld [vmem:[#allocation2 + $0x90] sm:$0xff] }
 0x1a8   : > { %v1335_v1 = vadd.f32 %v1334_v62, %v1286_v22 }
 0x1aa   : > { %v1374_v23 = vadd.f32 %v1335_v1, %v374_v18 }
 0x1ac   : > { %1406 = vst [vmem:[#allocation2 + $0x48] sm:$0xff] %v1374_v23 }
 0x1ad   : > { %v1288_v24 = vpop.f32.mrf.mxu2  ;;  %v1192_v3 = vpop.f32.mrf.mxu0 }
 0x1ae   : > { %v1289_v14 = vadd.f32 %v1288_v24, %v1240_v2  ;;  %v1337_v27 = vpop.f32.mrf.mxu3  ;;  %v1241_v15 = vpop.f32.mrf.mxu1 }
 0x1af   : > { %v1242_v17 = vadd.f32 %v1241_v15, %v1192_v3  ;;  %v390_v3 = vld [vmem:[#allocation2 + $0xc0] sm:$0xff] }
 0x1b0   : > { %v1338_v4 = vadd.f32 %v1337_v27, %v1289_v14 }
 0x1b2   : > { %v1376_v16 = vadd.f32 %v1338_v4, %v376_v46 }
 0x1b4   : > { %1408 = vst [vmem:[#allocation2 + $0x88] sm:$0xff] %v1376_v16 }
 0x1b5   : > { %v1290_v5 = vpop.f32.mrf.mxu2  ;;  %v1195_v7 = vpop.f32.mrf.mxu0 }
 0x1b6   : > { %v1291_v6 = vadd.f32 %v1290_v5, %v1242_v17  ;;  %v1339_v47 = vpop.f32.mrf.mxu3  ;;  %v1244_v49 = vpop.f32.mrf.mxu1 }
 0x1b7   : > { %v1245_v25 = vadd.f32 %v1244_v49, %v1195_v7  ;;  %v392_v7 = vld [vmem:[#allocation2 + $0xd0] sm:$0xff] }
 0x1b8   : > { %v1340_v8 = vadd.f32 %v1339_v47, %v1291_v6 }
 0x1ba   : > { %v1378_v9 = vadd.f32 %v1340_v8, %v378_v48 }
 0x1bc   : > { %1410 = vst [vmem:[#allocation2 + $0xb8] sm:$0xff] %v1378_v9 }
 0x1bd   : > { %v1293_v26 = vpop.f32.mrf.mxu2  ;;  %v1197_v28 = vpop.f32.mrf.mxu0 }
 0x1be   : > { %v1294_v34 = vadd.f32 %v1293_v26, %v1245_v25  ;;  %v1342_v58 = vpop.f32.mrf.mxu3  ;;  %v1246_v35 = vpop.f32.mrf.mxu1 }
 0x1bf   : > { %v1247_v59 = vadd.f32 %v1246_v35, %v1197_v28 }
 0x1c0   : > { %v1343_v30 = vadd.f32 %v1342_v58, %v1294_v34  ;;  %v394_v58 = vld [vmem:[#allocation2 + $0x28] sm:$0xff] }
 0x1c2   : > { %v1380_v36 = vadd.f32 %v1343_v30, %v380_v29 }
 0x1c4   : > { %1412 = vst [vmem:[#allocation2 + $0xf0] sm:$0xff] %v1380_v36 }
 0x1c5   : > { %v1295_v37 = vpop.f32.mrf.mxu2  ;;  %v1200_v60 = vpop.f32.mrf.mxu0 }
 0x1c6   : > { %v1296_v31 = vadd.f32 %v1295_v37, %v1247_v59  ;;  %v1344_v10 = vpop.f32.mrf.mxu3  ;;  %v1249_v32 = vpop.f32.mrf.mxu1 }
 0x1c7   : > { %v1250_v12 = vadd.f32 %v1249_v32, %v1200_v60 }
 0x1c8   : > { %v1345_v11 = vadd.f32 %v1344_v10, %v1296_v31  ;;  %v396_v10 = vld [vmem:[#allocation2 + $0xf8] sm:$0xff] }
 0x1ca   : > { %v1382_v33 = vadd.f32 %v1345_v11, %v382_v61 }
 0x1cc   : > { %1414 = vst [vmem:[#allocation2 + $0x78] sm:$0xff] %v1382_v33 }
 0x1cd   : > { %v1298_v13 = vpop.f32.mrf.mxu2  ;;  %v1202_v40 = vpop.f32.mrf.mxu0 }
 0x1ce   : > { %v1299_v38 = vadd.f32 %v1298_v13, %v1250_v12  ;;  %v1347_v39 = vpop.f32.mrf.mxu3  ;;  %v1251_v50 = vpop.f32.mrf.mxu1 }
 0x1cf   : > { %v1252_v53 = vadd.f32 %v1251_v50, %v1202_v40 }
 0x1d0   : > { %v1348_v51 = vadd.f32 %v1347_v39, %v1299_v38  ;;  %v398_v38 = vld [vmem:[#allocation2 + $0x98] sm:$0xff] }
 0x1d2   : > { %v1384_v52 = vadd.f32 %v1348_v51, %v384_v41 }
 0x1d4   : > { %1416 = vst [vmem:[#allocation2 + $0x58] sm:$0xff] %v1384_v52 }
 0x1d5   : > { %v1300_v19 = vpop.f32.mrf.mxu2  ;;  %v1205_v55 = vpop.f32.mrf.mxu0 }
 0x1d6   : > { %v1301_v54 = vadd.f32 %v1300_v19, %v1252_v53  ;;  %v1349_v42 = vpop.f32.mrf.mxu3  ;;  %v1254_v20 = vpop.f32.mrf.mxu1 }
 0x1d7   : > { %v1255_v44 = vadd.f32 %v1254_v20, %v1205_v55 }
 0x1d8   : > { %v1350_v43 = vadd.f32 %v1349_v42, %v1301_v54 }
 0x1da   : > { %v1386_v57 = vadd.f32 %v1350_v43, %v386_v56 }
 0x1dc   : > { %1418 = vst [vmem:[#allocation2 + $0xc8] sm:$0xff] %v1386_v57 }
 0x1dd   : > { %v1303_v45 = vpop.f32.mrf.mxu2  ;;  %v1207_v62 = vpop.f32.mrf.mxu0 }
 0x1de   : > { %v1304_v21 = vadd.f32 %v1303_v45, %v1255_v44  ;;  %v1352_v22 = vpop.f32.mrf.mxu3  ;;  %v1256_v18 = vpop.f32.mrf.mxu1 }
 0x1df   : > { %v1257_v23 = vadd.f32 %v1256_v18, %v1207_v62 }
 0x1e0   : > { %v1353_v0 = vadd.f32 %v1352_v22, %v1304_v21 }
 0x1e2   : > { %v1388_v1 = vadd.f32 %v1353_v0, %v388_v63 }
 0x1e4   : > { %1420 = vst [vmem:[#allocation2 + $0x90] sm:$0xff] %v1388_v1 }
 0x1e5   : > { %v1305_v2 = vpop.f32.mrf.mxu2  ;;  %v1210_v27 = vpop.f32.mrf.mxu0 }
 0x1e6   : > { %v1306_v24 = vadd.f32 %v1305_v2, %v1257_v23  ;;  %v1354_v14 = vpop.f32.mrf.mxu3  ;;  %v1259_v46 = vpop.f32.mrf.mxu1 }
 0x1e7   : > { %v1260_v16 = vadd.f32 %v1259_v46, %v1210_v27 }
 0x1e8   : > { %v1355_v15 = vadd.f32 %v1354_v14, %v1306_v24 }
 0x1ea   : > { %v1390_v4 = vadd.f32 %v1355_v15, %v390_v3 }
 0x1ec   : > { %1422 = vst [vmem:[#allocation2 + $0xc0] sm:$0xff] %v1390_v4 }
 0x1ed   : > { %v1308_v17 = vpop.f32.mrf.mxu2  ;;  %v1212_v47 = vpop.f32.mrf.mxu0 }
 0x1ee   : > { %v1309_v5 = vadd.f32 %v1308_v17, %v1260_v16  ;;  %v1357_v6 = vpop.f32.mrf.mxu3  ;;  %v1261_v48 = vpop.f32.mrf.mxu1 }
 0x1ef   : > { %v1262_v9 = vadd.f32 %v1261_v48, %v1212_v47 }
 0x1f0   : > { %v1358_v49 = vadd.f32 %v1357_v6, %v1309_v5 }
 0x1f2   : > { %v1392_v8 = vadd.f32 %v1358_v49, %v392_v7 }
 0x1f4   : > { %1424 = vst [vmem:[#allocation2 + $0xd0] sm:$0xff] %v1392_v8 }
 0x1f5   : > { %v1310_v25 = vpop.f32.mrf.mxu2  ;;  %v1215_v28 = vpop.f32.mrf.mxu0 }
 0x1f6   : > { %v1311_v26 = vadd.f32 %v1310_v25, %v1262_v9  ;;  %v1359_v34 = vpop.f32.mrf.mxu3  ;;  %v1264_v29 = vpop.f32.mrf.mxu1 }
 0x1f7   : > { %v1265_v36 = vadd.f32 %v1264_v29, %v1215_v28 }
 0x1f8   : > { %v1360_v35 = vadd.f32 %v1359_v34, %v1311_v26 }
 0x1fa   : > { %v1394_v30 = vadd.f32 %v1360_v35, %v394_v58 }
 0x1fc   : > { %1426 = vst [vmem:[#allocation2 + $0x28] sm:$0xff] %v1394_v30 }
 0x1fd   : > { %v1313_v59 = vpop.f32.mrf.mxu2  ;;  %v1217_v61 = vpop.f32.mrf.mxu0 }
 0x1fe   : > { %v1314_v37 = vadd.f32 %v1313_v59, %v1265_v36  ;;  %v1362_v31 = vpop.f32.mrf.mxu3  ;;  %v1266_v32 = vpop.f32.mrf.mxu1 }
 0x1ff   : > { %v1267_v33 = vadd.f32 %v1266_v32, %v1217_v61 }
 0x200   : > { %v1363_v60 = vadd.f32 %v1362_v31, %v1314_v37 }
 0x202   : > { %v1396_v11 = vadd.f32 %v1363_v60, %v396_v10 }
 0x204   : > { %1428 = vst [vmem:[#allocation2 + $0xf8] sm:$0xff] %v1396_v11 }
 0x205   : > { %v1315_v12 = vpop.f32.mrf.mxu2 }
 0x206   : > { %v1316_v13 = vadd.f32 %v1315_v12, %v1267_v33  ;;  %v1364_v39 = vpop.f32.mrf.mxu3 }
 0x208   : > { %v1365_v40 = vadd.f32 %v1364_v39, %v1316_v13  ;;  %1434 = sbr.rel (%p2236_p12) target bundleno = 582 (0x246), region = 67 }
 0x20a   : > { %v1398_v41 = vadd.f32 %v1365_v40, %v398_v38 }
 0x20c   : > { %1430 = vst [vmem:[#allocation2 + $0x98] sm:$0xff] %v1398_v41 }
 0x20d   : > { %v1435_v50 = vld [vmem:[#allocation2 + $0xb0] sm:$0xff]  ;;  %v1467_v51 = vld [vmem:[%s3055_s2] sm:$0x3]  ;;  %v1437_v54 = vld [vmem:[#allocation2 + $0xd8] sm:$0xff]  ;;  %vm1736_vm0 = vcmask 1040384   ;;  %vm1743_vm1 = vcmask 1041408  }
 0x20e   : > { %v1436_v52 = vld [vmem:[#allocation2] sm:$0xff]  ;;  %v2900_v53 = vperm.slane %v1467_v51, 0  ;;  %v2902_v19 = vperm.slane %v1467_v51, 1  ;;  %v1438_v42 = vld [vmem:[#allocation2 + $0x18] sm:$0xff]  ;;  %v1439_v55 = vld [vmem:[#allocation2 + $0x50] sm:$0xff] }
 0x20f   : > { %v1440_v56 = vld [vmem:[#allocation2 + $0x68] sm:$0xff]  ;;  %v1441_v20 = vld [vmem:[#allocation2 + $0x30] sm:$0xff]  ;;  %v1443_v24 = vld [vmem:[#allocation2 + $0x80] sm:$0xff] }
 0x210   : > { %v1442_v43 = vld [vmem:[#allocation2 + $0x48] sm:$0xff]  ;;  %v1473_v57 = vadd.f32 %v2900_v53, %v1435_v50  ;;  %v1474_v44 = vadd.f32 %v2902_v19, %v1436_v52  ;;  %v1475_v45 = vadd.f32 %v2900_v53, %v1437_v54  ;;  %v1476_v21 = vadd.f32 %v2902_v19, %v1438_v42  ;;  %v1446_v16 = vld [vmem:[#allocation2 + $0xb8] sm:$0xff]  ;;  %v1447_v58 = vld [vmem:[#allocation2 + $0x60] sm:$0xff] }
 0x211   : > { %v1477_v22 = vadd.f32 %v2900_v53, %v1439_v55  ;;  %v1478_v62 = vadd.f32 %v2902_v19, %v1440_v56  ;;  %v1479_v63 = vadd.f32 %v2900_v53, %v1441_v20  ;;  %v1480_v18 = vadd.f32 %v2902_v19, %v1442_v43  ;;  %v1444_v14 = vld [vmem:[#allocation2 + $0x88] sm:$0xff]  ;;  %v1448_v28 = vld [vmem:[#allocation2 + $0xf0] sm:$0xff]  ;;  %v1450_v37 = vld [vmem:[#allocation2 + $0x78] sm:$0xff] }
 0x212   : > { %1505 = vst [vmem:[%s3056_s3] sm:$0xff] %v1473_v57  ;;  %v1662_v0 = vmul.f32 %v1473_v57, %v1473_v57  ;;  %v1663_v1 = vmul.f32 %v1474_v44, %v1474_v44  ;;  %v1620_v23 = vadd.f32 %v1475_v45, %v1473_v57  ;;  %v1664_v2 = vmul.f32 %v1475_v45, %v1475_v45  ;;  %v1445_v4 = vld [vmem:[#allocation2 + $0xe8] sm:$0xff]  ;;  %v1451_v41 = vld [vmem:[#allocation2 + $0x38] sm:$0xff]  ;;  %v1453_v55 = vld [vmem:[#allocation2 + $0x40] sm:$0xff] }
 0x213   : > { %1506 = vst [vmem:[%s3056_s3 + $0x8] sm:$0xff] %v1474_v44  ;;  %v1641_v27 = vadd.f32 %v1476_v21, %v1474_v44  ;;  %v1665_v3 = vmul.f32 %v1476_v21, %v1476_v21  ;;  %v1666_v46 = vmul.f32 %v1477_v22, %v1477_v22  ;;  %v1667_v15 = vmul.f32 %v1478_v62, %v1478_v62  ;;  %v1449_v59 = vld [vmem:[#allocation2 + $0x8] sm:$0xff]  ;;  %v1452_v50 = vld [vmem:[#allocation2 + $0x58] sm:$0xff] }
 0x214   : > { %1507 = vst [vmem:[%s3056_s3 + $0x10] sm:$0xff] %v1475_v45  ;;  %v1694_v17 = vadd.f32 %v1664_v2, %v1662_v0  ;;  %v1621_v5 = vadd.f32 %v1620_v23, %v1477_v22  ;;  %v1668_v6 = vmul.f32 %v1479_v63, %v1479_v63  ;;  %v1669_v47 = vmul.f32 %v1480_v18, %v1480_v18  ;;  %v1454_v56 = vld [vmem:[#allocation2 + $0xc8] sm:$0xff]  ;;  %v1455_v23 = vld [vmem:[#allocation2 + $0xe0] sm:$0xff]  ;;  %v1456_v2 = vld [vmem:[#allocation2 + $0x90] sm:$0xff] }
 0x215   : > { %1508 = vst [vmem:[%s3056_s3 + $0x18] sm:$0xff] %v1476_v21  ;;  %v1715_v7 = vadd.f32 %v1665_v3, %v1663_v1  ;;  %v1642_v48 = vadd.f32 %v1641_v27, %v1478_v62  ;;  %v1481_v49 = vadd.f32 %v2900_v53, %v1443_v24  ;;  %v1482_v8 = vadd.f32 %v2902_v19, %v1444_v14 }
 0x216   : > { %1509 = vst [vmem:[%s3056_s3 + $0x20] sm:$0xff] %v1477_v22  ;;  %v1695_v9 = vadd.f32 %v1694_v17, %v1666_v46  ;;  %v1622_v25 = vadd.f32 %v1621_v5, %v1479_v63  ;;  %v1483_v26 = vadd.f32 %v2900_v53, %v1445_v4  ;;  %v1484_v34 = vadd.f32 %v2902_v19, %v1446_v16  ;;  %v1457_v46 = vld [vmem:[#allocation2 + $0x70] sm:$0xff] }
 0x217   : > { %1510 = vst [vmem:[%s3056_s3 + $0x28] sm:$0xff] %v1478_v62  ;;  %v1716_v29 = vadd.f32 %v1715_v7, %v1667_v15  ;;  %v1643_v35 = vadd.f32 %v1642_v48, %v1480_v18  ;;  %v1670_v30 = vmul.f32 %v1481_v49, %v1481_v49  ;;  %v1671_v36 = vmul.f32 %v1482_v8, %v1482_v8  ;;  %v1458_v15 = vld [vmem:[#allocation2 + $0xc0] sm:$0xff] }
 0x218   : > { %1511 = vst [vmem:[%s3056_s3 + $0x30] sm:$0xff] %v1479_v63  ;;  %v1696_v31 = vadd.f32 %v1695_v9, %v1668_v6  ;;  %v1623_v10 = vadd.f32 %v1622_v25, %v1481_v49  ;;  %v1672_v60 = vmul.f32 %v1483_v26, %v1483_v26  ;;  %v1673_v61 = vmul.f32 %v1484_v34, %v1484_v34 }
 0x219   : > { %1512 = vst [vmem:[%s3056_s3 + $0x38] sm:$0xff] %v1480_v18  ;;  %v1717_v32 = vadd.f32 %v1716_v29, %v1669_v47  ;;  %v1644_v11 = vadd.f32 %v1643_v35, %v1482_v8  ;;  %v1485_v33 = vadd.f32 %v2900_v53, %v1447_v58  ;;  %v1486_v12 = vadd.f32 %v2902_v19, %v1448_v28 }
 0x21a   : > { %1513 = vst [vmem:[%s3056_s3 + $0x40] sm:$0xff] %v1481_v49  ;;  %v1697_v13 = vadd.f32 %v1696_v31, %v1670_v30  ;;  %v1624_v38 = vadd.f32 %v1623_v10, %v1483_v26  ;;  %v1487_v39 = vadd.f32 %v2900_v53, %v1449_v59  ;;  %v1488_v40 = vadd.f32 %v2902_v19, %v1450_v37  ;;  %v1461_v30 = vld [vmem:[#allocation2 + $0x10] sm:$0xff] }
 0x21b   : > { %1514 = vst [vmem:[%s3056_s3 + $0x48] sm:$0xff] %v1482_v8  ;;  %v1718_v51 = vadd.f32 %v1717_v32, %v1671_v36  ;;  %v1645_v52 = vadd.f32 %v1644_v11, %v1484_v34  ;;  %v1674_v54 = vmul.f32 %v1485_v33, %v1485_v33  ;;  %v1675_v42 = vmul.f32 %v1486_v12, %v1486_v12  ;;  %v1462_v36 = vld [vmem:[#allocation2 + $0x28] sm:$0xff] }
 0x21c   : > { %1515 = vst [vmem:[%s3056_s3 + $0x50] sm:$0xff] %v1483_v26  ;;  %v1698_v20 = vadd.f32 %v1697_v13, %v1672_v60  ;;  %v1625_v43 = vadd.f32 %v1624_v38, %v1485_v33  ;;  %v1676_v57 = vmul.f32 %v1487_v39, %v1487_v39  ;;  %v1677_v44 = vmul.f32 %v1488_v40, %v1488_v40  ;;  %v1459_v26 = vld [vmem:[#allocation2 + $0xa8] sm:$0xff] }
 0x21d   : > { %1516 = vst [vmem:[%s3056_s3 + $0x58] sm:$0xff] %v1484_v34  ;;  %v1719_v45 = vadd.f32 %v1718_v51, %v1673_v61  ;;  %v1646_v21 = vadd.f32 %v1645_v52, %v1486_v12  ;;  %v1489_v22 = vadd.f32 %v2900_v53, %v1451_v41  ;;  %v1490_v62 = vadd.f32 %v2902_v19, %v1452_v50  ;;  %v1460_v34 = vld [vmem:[#allocation2 + $0xd0] sm:$0xff] }
 0x21e   : > { %1517 = vst [vmem:[%s3056_s3 + $0x60] sm:$0xff] %v1485_v33  ;;  %v1699_v63 = vadd.f32 %v1698_v20, %v1674_v54  ;;  %v1626_v18 = vadd.f32 %v1625_v43, %v1487_v39  ;;  %v1491_v0 = vadd.f32 %v2900_v53, %v1453_v55  ;;  %v1492_v1 = vadd.f32 %v2902_v19, %v1454_v56  ;;  %v1465_v54 = vld [vmem:[#allocation2 + $0x20] sm:$0xff] }
 0x21f   : > { %1518 = vst [vmem:[%s3056_s3 + $0x68] sm:$0xff] %v1486_v12  ;;  %v1720_v24 = vadd.f32 %v1719_v45, %v1675_v42  ;;  %v1647_v14 = vadd.f32 %v1646_v21, %v1488_v40  ;;  %v1678_v27 = vmul.f32 %v1489_v22, %v1489_v22  ;;  %v1679_v3 = vmul.f32 %v1490_v62, %v1490_v62  ;;  %v1466_v42 = vld [vmem:[#allocation2 + $0x98] sm:$0xff] }
 0x220   : > { %1519 = vst [vmem:[%s3056_s3 + $0x70] sm:$0xff] %v1487_v39  ;;  %v1700_v4 = vadd.f32 %v1699_v63, %v1676_v57  ;;  %v1627_v16 = vadd.f32 %v1626_v18, %v1489_v22  ;;  %v1680_v17 = vmul.f32 %v1491_v0, %v1491_v0  ;;  %v1681_v5 = vmul.f32 %v1492_v1, %v1492_v1  ;;  %v1463_v39 = vld [vmem:[#allocation2 + $0xa0] sm:$0xff] }
 0x221   : > { %1520 = vst [vmem:[%s3056_s3 + $0x78] sm:$0xff] %v1488_v40  ;;  %v1721_v6 = vadd.f32 %v1720_v24, %v1677_v44  ;;  %v1648_v47 = vadd.f32 %v1647_v14, %v1490_v62  ;;  %v1493_v7 = vadd.f32 %v2900_v53, %v1455_v23  ;;  %v1494_v48 = vadd.f32 %v2902_v19, %v1456_v2  ;;  %v1464_v40 = vld [vmem:[#allocation2 + $0xf8] sm:$0xff] }
 0x222   : > { %1521 = vst [vmem:[%s3056_s3 + $0x80] sm:$0xff] %v1489_v22  ;;  %v1701_v49 = vadd.f32 %v1700_v4, %v1678_v27  ;;  %v1628_v8 = vadd.f32 %v1627_v16, %v1491_v0  ;;  %v1495_v9 = vadd.f32 %v2900_v53, %v1457_v46  ;;  %v1496_v25 = vadd.f32 %v2902_v19, %v1458_v15 }
 0x223   : > { %1522 = vst [vmem:[%s3056_s3 + $0x88] sm:$0xff] %v1490_v62  ;;  %v1722_v58 = vadd.f32 %v1721_v6, %v1679_v3  ;;  %v1649_v28 = vadd.f32 %v1648_v47, %v1492_v1  ;;  %v1682_v29 = vmul.f32 %v1493_v7, %v1493_v7  ;;  %v1683_v35 = vmul.f32 %v1494_v48, %v1494_v48 }
 0x224   : > { %1523 = vst [vmem:[%s3056_s3 + $0x90] sm:$0xff] %v1491_v0  ;;  %v1702_v59 = vadd.f32 %v1701_v49, %v1680_v17  ;;  %v1629_v37 = vadd.f32 %v1628_v8, %v1493_v7  ;;  %v1684_v31 = vmul.f32 %v1495_v9, %v1495_v9  ;;  %v1685_v10 = vmul.f32 %v1496_v25, %v1496_v25 }
 0x225   : > { %1524 = vst [vmem:[%s3056_s3 + $0x98] sm:$0xff] %v1492_v1  ;;  %v1723_v60 = vadd.f32 %v1722_v58, %v1681_v5  ;;  %v1650_v61 = vadd.f32 %v1649_v28, %v1494_v48  ;;  %v1497_v32 = vadd.f32 %v2900_v53, %v1459_v26  ;;  %v1498_v11 = vadd.f32 %v2902_v19, %v1460_v34 }
 0x226   : > { %1525 = vst [vmem:[%s3056_s3 + $0xa0] sm:$0xff] %v1493_v7  ;;  %v1703_v33 = vadd.f32 %v1702_v59, %v1682_v29  ;;  %v1630_v12 = vadd.f32 %v1629_v37, %v1495_v9  ;;  %v1499_v13 = vadd.f32 %v2900_v53, %v1461_v30  ;;  %v1500_v38 = vadd.f32 %v2902_v19, %v1462_v36 }
 0x227   : > { %1526 = vst [vmem:[%s3056_s3 + $0xa8] sm:$0xff] %v1494_v48  ;;  %v1724_v41 = vadd.f32 %v1723_v60, %v1683_v35  ;;  %v1651_v50 = vadd.f32 %v1650_v61, %v1496_v25  ;;  %v1686_v51 = vmul.f32 %v1497_v32, %v1497_v32  ;;  %v1687_v52 = vmul.f32 %v1498_v11, %v1498_v11 }
 0x228   : > { %1527 = vst [vmem:[%s3056_s3 + $0xb0] sm:$0xff] %v1495_v9  ;;  %v1704_v55 = vadd.f32 %v1703_v33, %v1684_v31  ;;  %v1631_v56 = vadd.f32 %v1630_v12, %v1497_v32  ;;  %v1688_v20 = vmul.f32 %v1499_v13, %v1499_v13  ;;  %v1689_v43 = vmul.f32 %v1500_v38, %v1500_v38 }
 0x229   : > { %1528 = vst [vmem:[%s3056_s3 + $0xb8] sm:$0xff] %v1496_v25  ;;  %v1725_v57 = vadd.f32 %v1724_v41, %v1685_v10  ;;  %v1652_v44 = vadd.f32 %v1651_v50, %v1498_v11  ;;  %v1501_v45 = vadd.f32 %v2900_v53, %v1463_v39  ;;  %v1502_v21 = vadd.f32 %v2902_v19, %v1464_v40 }
 0x22a   : > { %1529 = vst [vmem:[%s3056_s3 + $0xc0] sm:$0xff] %v1497_v32  ;;  %v1705_v22 = vadd.f32 %v1704_v55, %v1686_v51  ;;  %v1632_v62 = vadd.f32 %v1631_v56, %v1499_v13  ;;  %v1503_v63 = vadd.f32 %v2900_v53, %v1465_v54  ;;  %v1504_v18 = vadd.f32 %v2902_v19, %v1466_v42 }
 0x22b   : > { %1530 = vst [vmem:[%s3056_s3 + $0xc8] sm:$0xff] %v1498_v11  ;;  %v1726_v0 = vadd.f32 %v1725_v57, %v1687_v52  ;;  %v1653_v1 = vadd.f32 %v1652_v44, %v1500_v38  ;;  %v1690_v23 = vmul.f32 %v1501_v45, %v1501_v45  ;;  %v1691_v2 = vmul.f32 %v1502_v21, %v1502_v21 }
 0x22c   : > { %1531 = vst [vmem:[%s3056_s3 + $0xd0] sm:$0xff] %v1499_v13  ;;  %v1706_v24 = vadd.f32 %v1705_v22, %v1688_v20  ;;  %v1633_v14 = vadd.f32 %v1632_v62, %v1501_v45  ;;  %v1692_v27 = vmul.f32 %v1503_v63, %v1503_v63  ;;  %v1693_v3 = vmul.f32 %v1504_v18, %v1504_v18  ;;  %v1739_v13 = vld [vmem:[%s3057_s4] sm:$0xf] }
 0x22d   : > { %1532 = vst [vmem:[%s3056_s3 + $0xd8] sm:$0xff] %v1500_v38  ;;  %v1727_v53 = vadd.f32 %v1726_v0, %v1689_v43  ;;  %v1654_v19 = vadd.f32 %v1653_v1, %v1502_v21 }
 0x22e   : > { %1533 = vst [vmem:[%s3056_s3 + $0xe0] sm:$0xff] %v1501_v45  ;;  %v1707_v46 = vadd.f32 %v1706_v24, %v1690_v23  ;;  %v1634_v15 = vadd.f32 %v1633_v14, %v1503_v63 }
 0x22f   : > { %1534 = vst [vmem:[%s3056_s3 + $0xe8] sm:$0xff] %v1502_v21  ;;  %v1728_v4 = vadd.f32 %v1727_v53, %v1691_v2  ;;  %v1655_v16 = vadd.f32 %v1654_v19, %v1504_v18 }
 0x230   : > { %1535 = vst [vmem:[%s3056_s3 + $0xf0] sm:$0xff] %v1503_v63  ;;  %v1635_v17 = vrot.slane %v1634_v15, 4  ;;  %v1708_v5 = vadd.f32 %v1707_v46, %v1692_v27 }
 0x231   : > { %1536 = vst [vmem:[%s3056_s3 + $0xf8] sm:$0xff] %v1504_v18  ;;  %v1656_v6 = vrot.slane %v1655_v16, 4  ;;  %v1729_v47 = vadd.f32 %v1728_v4, %v1693_v3 }
 0x232   : > { %v1636_v7 = vadd.f32 %v1635_v17, %v1634_v15  ;;  %v1709_v48 = vrot.slane %v1708_v5, 4 }
 0x233   : > { %v1657_v49 = vadd.f32 %v1656_v6, %v1655_v16  ;;  %v1730_v8 = vrot.slane %v1729_v47, 4 }
 0x234   : > { %v1637_v9 = vrot.slane %v1636_v7, 2  ;;  %v1710_v25 = vadd.f32 %v1709_v48, %v1708_v5 }
 0x235   : > { %v1658_v26 = vrot.slane %v1657_v49, 2  ;;  %v1731_v34 = vadd.f32 %v1730_v8, %v1729_v47 }
 0x236   : > { %v1638_v58 = vadd.f32 %v1637_v9, %v1636_v7  ;;  %v1711_v28 = vrot.slane %v1710_v25, 2 }
 0x237   : > { %v1659_v29 = vadd.f32 %v1658_v26, %v1657_v49  ;;  %v1732_v35 = vrot.slane %v1731_v34, 2 }
 0x238   : > { %v1639_v30 = vrot.slane %v1638_v58, 1  ;;  %v1712_v36 = vadd.f32 %v1711_v28, %v1710_v25 }
 0x239   : > { %v1660_v59 = vrot.slane %v1659_v29, 1  ;;  %v1733_v37 = vadd.f32 %v1732_v35, %v1731_v34 }
 0x23a   : > { %v1713_v31 = vrot.slane %v1712_v36, 1  ;;  %v1640_v10 = vadd.f32 %v1639_v30, %v1638_v58 }
 0x23b   : > { %v1661_v60 = vadd.f32 %v1660_v59, %v1659_v29  ;;  %v1734_v61 = vrot.slane %v1733_v37, 1 }
 0x23c   : > { %v1714_v32 = vadd.f32 %v1713_v31, %v1712_v36 }
 0x23d   : > { %v1735_v11 = vadd.f32 %v1734_v61, %v1733_v37 }
 0x23e   : > { %v1737_v33 = vsel %vm1736_vm0, %v1640_v10, %v1714_v32 }
 0x23f   : > { %v1738_v12 = vsel %vm1736_vm0, %v1661_v60, %v1735_v11 }
 0x240   : > { %v1742_v38 = vrot.slane %v1738_v12, 6 }
 0x242   : > { %v1744_v39 = vsel %vm1743_vm1, %v1737_v33, %v1742_v38 }
 0x243   : > { %v1746_v40 = vadd.f32 %v1744_v39, %v1739_v13 }
 0x245   : > { %1747 = vst [vmem:[%s3057_s4] sm:$0xf] %v1746_v40 }
 0x246 PF: > { %s15_s19 = sadd.s32 1, %s2420_s19   ;;  %s3058_s15 = smov %s2408_s16 }
 0x247   : > { %p12_p13 = scmp.ge.s32.totalorder %s15_s19, 6   ;;  %s3059_s16 = smov %s2484_s23 }
 0x248   : > { %s3060_s17 = smov %s2416_s18  ;;  %s3061_s18 = smov %s3063_s20 }
 0x249   :  { %14 = sbr.rel (!%p12_p13) target bundleno = 3 (0x3), region = 113 }

// kernel: patch_discriminator.14
= control target key start
LH: loop header
LB: loop body
LE: loop exit
PB: predicated region body
PF: predicated region fallthrough
CT: control target
= control target key end

     0   :  { %s381_s1 = inlined_call_operand.vmem [shape: f32[2,512], index: 1, kind: input, shape index: {}]   ;;  %s382_s0 = inlined_call_operand.vmem [shape: f32[32,512], index: 0, kind: input, shape index: {}]   ;;  %s383_s3 = inlined_call_operand.vmem [shape: f32[1,512], index: 3, kind: input, shape index: {}]   ;;  %s384_s2 = inlined_call_operand.vmem [shape: f32[1,512], index: 2, kind: input, shape index: {}]   ;;  %s385_s4 = inlined_call_operand.vmem [shape: f32[32,512], index: 4, kind: output, shape index: {}]  }
   0x1   :  { %v17_v0 = vld [vmem:[%s381_s1] ss:$2 sm:$0xf]  ;;  %v182_v1 = vld [vmem:[%s381_s1 + $0x1] ss:$2 sm:$0xf] }
   0x2   :  { %v18_v2 = vmul.f32 0.03125, %v17_v0  ;;  %v21_v3 = vmul.f32 0.03125, %v182_v1  ;;  %v38_v12 = vld [vmem:[%s382_s0] sm:$0xff]  ;;  %v39_v18 = vld [vmem:[%s382_s0 + $0x8] sm:$0xff]  ;;  %v40_v19 = vld [vmem:[%s382_s0 + $0x10] sm:$0xff] }
   0x3   :  { %v104_v14 = vld [vmem:[%s383_s3] sm:$0xf]  ;;  %v41_v21 = vld [vmem:[%s382_s0 + $0x18] sm:$0xff]  ;;  %v43_v25 = vld [vmem:[%s382_s0 + $0x28] sm:$0xff] }
   0x4   :  { %v22_v4 = vmul.f32 %v18_v2, %v18_v2  ;;  %v219_v13 = vperm.slane %v18_v2, 0  ;;  %v224_v15 = vperm.slane %v18_v2, 1  ;;  %v36_v17 = vld [vmem:[%s384_s2] sm:$0xf]  ;;  %v235_v20 = vperm.slane %v18_v2, 2  ;;  %v44_v29 = vld [vmem:[%s382_s0 + $0x30] sm:$0xff] }
   0x5   :  { %v240_v22 = vperm.slane %v18_v2, 3  ;;  %v42_v24 = vld [vmem:[%s382_s0 + $0x20] sm:$0xff]  ;;  %v252_v27 = vperm.slane %v104_v14, 0  ;;  %v254_v28 = vperm.slane %v104_v14, 1  ;;  %v45_v30 = vld [vmem:[%s382_s0 + $0x38] sm:$0xff]  ;;  %v267_v34 = vperm.slane %v104_v14, 2 }
   0x6   :  { %v23_v5 = vsub.f32 %v21_v3, %v22_v4  ;;  %v46_v31 = vld [vmem:[%s382_s0 + $0x40] sm:$0xff]  ;;  %v63_v32 = vsub.f32 %v38_v12, %v219_v13  ;;  %v64_v33 = vsub.f32 %v39_v18, %v224_v15  ;;  %v269_v35 = vperm.slane %v104_v14, 3  ;;  %v47_v36 = vld [vmem:[%s382_s0 + $0x48] sm:$0xff]  ;;  %v277_v37 = vld [vmem:[%s382_s0 + $0x50] sm:$0xff] }
   0x7   :  { %v282_v38 = vld [vmem:[%s382_s0 + $0x58] sm:$0xff]  ;;  %v65_v40 = vsub.f32 %v40_v19, %v235_v20  ;;  %v66_v41 = vsub.f32 %v41_v21, %v240_v22  ;;  %v67_v42 = vsub.f32 %v42_v24, %v219_v13  ;;  %v50_v43 = vld [vmem:[%s382_s0 + $0x60] sm:$0xff]  ;;  %v68_v45 = vsub.f32 %v43_v25, %v224_v15  ;;  %v51_v48 = vld [vmem:[%s382_s0 + $0x68] sm:$0xff] }
   0x8   :  { %v24_v6 = vmax.f32 %v23_v5, 0.0  ;;  %v69_v46 = vsub.f32 %v44_v29, %v235_v20  ;;  %v70_v47 = vsub.f32 %v45_v30, %v240_v22  ;;  %v52_v49 = vld [vmem:[%s382_s0 + $0x70] sm:$0xff]  ;;  %v304_v50 = vld [vmem:[%s382_s0 + $0x78] sm:$0xff]  ;;  %v71_v51 = vsub.f32 %v46_v31, %v219_v13 }
   0x9   :  { %v72_v52 = vsub.f32 %v47_v36, %v224_v15  ;;  %v73_v53 = vsub.f32 %v277_v37, %v235_v20  ;;  %v74_v54 = vsub.f32 %v282_v38, %v240_v22  ;;  %v75_v59 = vsub.f32 %v50_v43, %v219_v13 }
   0xa   :  { %v25_v7 = vadd.f32 1e-05, %v24_v6  ;;  %v76_v60 = vsub.f32 %v51_v48, %v224_v15  ;;  %v77_v61 = vsub.f32 %v52_v49, %v235_v20  ;;  %v78_v62 = vsub.f32 %v304_v50, %v240_v22 }
   0xc   :  { %183 = vrsqrt.f32 %v25_v7  ;;  %vm32_vm0 = vweird.f32 %v25_v7 }
  0x12   :  { %v184_v8 = vpop.eup %183 }
  0x13   :  { %v27_v9 = vmul.f32 %v184_v8, %v25_v7  ;;  %vm33_vm1 = vweird.f32 %v184_v8 }
  0x14   :  { %vm242_vm2 = vmor %vm32_vm0, %vm33_vm1 }
  0x15   :  { %v28_v10 = vmul.f32 %v184_v8, %v27_v9 }
  0x17   :  { %v29_v11 = vmul.f32 0.5, %v28_v10 }
  0x19   :  { %v30_v16 = vsub.f32 1.5, %v29_v11 }
  0x1b   :  { %v31_v26 = vmul.f32 %v184_v8, %v30_v16 }
  0x1d   :  { %v35_v39 = vsel %vm242_vm2, %v184_v8, %v31_v26 }
  0x1e   :  { %v37_v44 = vmul.f32 %v36_v17, %v35_v39 }
  0x20   :  { %v80_v55 = vperm.slane %v37_v44, 0  ;;  %v81_v56 = vperm.slane %v37_v44, 1  ;;  %v82_v57 = vperm.slane %v37_v44, 2  ;;  %v83_v58 = vperm.slane %v37_v44, 3 }
  0x22   :  { %v88_v63 = vmul.f32 %v80_v55, %v63_v32  ;;  %v89_v0 = vmul.f32 %v81_v56, %v64_v33  ;;  %v90_v1 = vmul.f32 %v82_v57, %v65_v40  ;;  %v91_v2 = vmul.f32 %v83_v58, %v66_v41 }
  0x23   :  { %v92_v3 = vmul.f32 %v80_v55, %v67_v42  ;;  %v93_v4 = vmul.f32 %v81_v56, %v68_v45  ;;  %v94_v5 = vmul.f32 %v82_v57, %v69_v46  ;;  %v95_v6 = vmul.f32 %v83_v58, %v70_v47 }
  0x24   :  { %v114_v7 = vadd.f32 %v252_v27, %v88_v63  ;;  %v115_v8 = vadd.f32 %v254_v28, %v89_v0  ;;  %v116_v9 = vadd.f32 %v267_v34, %v90_v1  ;;  %v117_v10 = vadd.f32 %v269_v35, %v91_v2 }
  0x25   :  { %v118_v11 = vadd.f32 %v252_v27, %v92_v3  ;;  %v119_v12 = vadd.f32 %v254_v28, %v93_v4  ;;  %v120_v13 = vadd.f32 %v267_v34, %v94_v5  ;;  %v121_v14 = vadd.f32 %v269_v35, %v95_v6 }
  0x26   :  { %v130_v15 = vmul.f32 0.2, %v114_v7  ;;  %v131_v16 = vmul.f32 0.2, %v115_v8  ;;  %v132_v17 = vmul.f32 0.2, %v116_v9  ;;  %v96_v18 = vmul.f32 %v80_v55, %v71_v51 }
  0x27   :  { %v133_v19 = vmul.f32 0.2, %v117_v10  ;;  %v134_v20 = vmul.f32 0.2, %v118_v11  ;;  %v135_v21 = vmul.f32 0.2, %v119_v12  ;;  %v97_v22 = vmul.f32 %v81_v56, %v72_v52 }
  0x28   :  { %v146_v23 = vmax.f32 %v114_v7, %v130_v15  ;;  %v147_v24 = vmax.f32 %v115_v8, %v131_v16  ;;  %v148_v25 = vmax.f32 %v116_v9, %v132_v17  ;;  %v136_v26 = vmul.f32 0.2, %v120_v13 }
  0x29   :  { %v149_v29 = vmax.f32 %v117_v10, %v133_v19  ;;  %v150_v30 = vmax.f32 %v118_v11, %v134_v20  ;;  %v151_v31 = vmax.f32 %v119_v12, %v135_v21  ;;  %v137_v32 = vmul.f32 0.2, %v121_v14 }
  0x2a   :  { %162 = vst [vmem:[%s385_s4] sm:$0xff] %v146_v23  ;;  %v152_v33 = vmax.f32 %v120_v13, %v136_v26  ;;  %v122_v36 = vadd.f32 %v252_v27, %v96_v18  ;;  %v123_v37 = vadd.f32 %v254_v28, %v97_v22  ;;  %v98_v38 = vmul.f32 %v82_v57, %v73_v53 }
  0x2b   :  { %163 = vst [vmem:[%s385_s4 + $0x8] sm:$0xff] %v147_v24  ;;  %v153_v39 = vmax.f32 %v121_v14, %v137_v32  ;;  %v99_v40 = vmul.f32 %v83_v58, %v74_v54  ;;  %v100_v41 = vmul.f32 %v80_v55, %v75_v59  ;;  %v101_v42 = vmul.f32 %v81_v56, %v76_v60 }
  0x2c   :  { %164 = vst [vmem:[%s385_s4 + $0x10] sm:$0xff] %v148_v25  ;;  %v138_v43 = vmul.f32 0.2, %v122_v36  ;;  %v139_v44 = vmul.f32 0.2, %v123_v37  ;;  %v124_v45 = vadd.f32 %v267_v34, %v98_v38  ;;  %v102_v46 = vmul.f32 %v82_v57, %v77_v61 }
  0x2d   :  { %165 = vst [vmem:[%s385_s4 + $0x18] sm:$0xff] %v149_v29  ;;  %v125_v47 = vadd.f32 %v269_v35, %v99_v40  ;;  %v126_v48 = vadd.f32 %v252_v27, %v100_v41  ;;  %v127_v49 = vadd.f32 %v254_v28, %v101_v42  ;;  %v103_v50 = vmul.f32 %v83_v58, %v78_v62 }
  0x2e   :  { %166 = vst [vmem:[%s385_s4 + $0x20] sm:$0xff] %v150_v30  ;;  %v154_v51 = vmax.f32 %v122_v36, %v138_v43  ;;  %v140_v52 = vmul.f32 0.2, %v124_v45  ;;  %v128_v53 = vadd.f32 %v267_v34, %v102_v46  ;;  %v155_v54 = vmax.f32 %v123_v37, %v139_v44 }
  0x2f   :  { %167 = vst [vmem:[%s385_s4 + $0x28] sm:$0xff] %v151_v31  ;;  %v141_v55 = vmul.f32 0.2, %v125_v47  ;;  %v142_v56 = vmul.f32 0.2, %v126_v48  ;;  %v129_v27 = vadd.f32 %v269_v35, %v103_v50 }
  0x30   :  { %168 = vst [vmem:[%s385_s4 + $0x30] sm:$0xff] %v152_v33  ;;  %v156_v28 = vmax.f32 %v124_v45, %v140_v52  ;;  %v143_v57 = vmul.f32 0.2, %v127_v49  ;;  %v144_v58 = vmul.f32 0.2, %v128_v53 }
  0x31   :  { %169 = vst [vmem:[%s385_s4 + $0x38] sm:$0xff] %v153_v39  ;;  %v157_v34 = vmax.f32 %v125_v47, %v141_v55  ;;  %v145_v59 = vmul.f32 0.2, %v129_v27  ;;  %v158_v60 = vmax.f32 %v126_v48, %v142_v56 }
  0x32   :  { %170 = vst [vmem:[%s385_s4 + $0x40] sm:$0xff] %v154_v51  ;;  %v159_v35 = vmax.f32 %v127_v49, %v143_v57  ;;  %v160_v61 = vmax.f32 %v128_v53, %v144_v58 }
  0x33   :  { %171 = vst [vmem:[%s385_s4 + $0x48] sm:$0xff] %v155_v54  ;;  %v161_v62 = vmax.f32 %v129_v27, %v145_v59 }
  0x34   :  { %172 = vst [vmem:[%s385_s4 + $0x50] sm:$0xff] %v156_v28 }
  0x35   :  { %173 = vst [vmem:[%s385_s4 + $0x58] sm:$0xff] %v157_v34 }
  0x36   :  { %174 = vst [vmem:[%s385_s4 + $0x60] sm:$0xff] %v158_v60 }
  0x37   :  { %175 = vst [vmem:[%s385_s4 + $0x68] sm:$0xff] %v159_v35 }
  0x38   :  { %176 = vst [vmem:[%s385_s4 + $0x70] sm:$0xff] %v160_v61 }
  0x39   :  { %177 = vst [vmem:[%s385_s4 + $0x78] sm:$0xff] %v161_v62 }

// kernel: patch_discriminator.13
= control target key start
LH: loop header
LB: loop body
LE: loop exit
PB: predicated region body
PF: predicated region fallthrough
CT: control target
= control target key end

     0   :  { %s2575_s15 = smov 0   ;;  %s2577_s16 = smov 0   ;;  %s3055_s0 = inlined_call_operand.vmem [shape: bf16[32,4096], index: 0, kind: input, shape index: {}]   ;;  %s3056_s1 = inlined_call_operand.vmem [shape: bf16[4096,512], index: 1, kind: input, shape index: {}]   ;;  %s3057_s2 = inlined_call_operand.vmem [shape: f32[1,512], index: 2, kind: input, shape index: {}]   ;;  %s3058_s3 = inlined_call_operand.vmem [shape: f32[32,512], index: 3, kind: output, shape index: {0}]   ;;  %s3059_s4 = inlined_call_operand.vmem [shape: f32[2,512], index: 4, kind: output, shape index: {1}]  }
   0x1   :  { %s2579_s17 = smov 0   ;;  %s2581_s18 = smov 0  }
   0x2   :  { %s2583_s19 = smov 0  }
   0x3 LB: > { %s24_s20 = sadd.s32 1, %s2542_s18  ;;  %p43_p1 = scmp.ne.s32.totalorder %s2534_s16, %s2530_s15  ;;  %s2546_s19 = sphi %s2583_s19, %s15_s19   ;;  %s2542_s18 = sphi %s2581_s18, %s3063_s18   ;;  %s2538_s17 = sphi %s2579_s17, %s3062_s17   ;;  %s2534_s16 = sphi %s2577_s16, %s3061_s16   ;;  %s2530_s15 = sphi %s2575_s15, %s3060_s15  }
   0x4   : > { %p25_p0 = scmp.ge.s32.totalorder %s24_s20, 8  ;;  %p44_p2 = scmp.eq.s32.totalorder %s2546_s19, 0 }
   0x5   : > { %s36_s22 = sadd.s32 1, %s2534_s16  ;;  %p1767_p5 = scmp.ge.s32.totalorder %s2546_s19, 8 }
   0x6   : > { %s3065_s20 = smov (%p25_p0, %s24_s20), 0  ;;  %p45_p3 = por %p44_p2, %p43_p1 }
   0x7   : > { %s32_s21 = ssub.s32 %s2542_s18, %s3065_s20  ;;  %166 = sbr.rel (%p1767_p5) target bundleno = 24 (0x18), region = 20 }
   0x8   : > { %p34_p4 = scmp.eq.s32.totalorder %s32_s21, 0 }
   0xa   : > { %s2610_s23 = scalar_select %p34_p4, %s2534_s16, %s36_s22  }
   0xc   : > { %169 = sbr.rel (!%p45_p3) target bundleno = 24 (0x18), region = 24  ;;  %s171_s24 = sand.u32 (%p45_p3), 1, %s2534_s16  }
   0xd   : > { %s2327_s25 = sshll.u32 (%p45_p3), %s2542_s18, 4  ;;  %s1768_s26 = sshll.u32 (%p45_p3), %s171_s24, 6 }
   0xe   : > { %s179_s29 = scalar_lea.vmem (%p45_p3), %s3055_s0, %s2327_s25  ;;  %s173_s30 = scalar_lea.vmem (%p45_p3), [#allocation3], %s1768_s26 }
   0xf   : > { %v192_v0 = vld [vmem:[%s179_s29] sm:$0xff] (%p45_p3)  ;;  %v194_v1 = vld [vmem:[%s179_s29 + $0x8] sm:$0xff] (%p45_p3) }
  0x10   : > { %v196_v2 = vld [vmem:[%s179_s29 + $0x80] sm:$0xff] (%p45_p3)  ;;  %193 = vst [vmem:[%s173_s30] sm:$0xff] (%p45_p3), %v192_v0  ;;  %v198_v3 = vld [vmem:[%s179_s29 + $0x88] sm:$0xff] (%p45_p3) }
  0x11   : > { %195 = vst [vmem:[%s173_s30 + $0x8] sm:$0xff] %v194_v1  ;;  %v200_v4 = vld [vmem:[%s179_s29 + $0x100] sm:$0xff]  ;;  %v202_v5 = vld [vmem:[%s179_s29 + $0x108] sm:$0xff] }
  0x12   : > { %197 = vst [vmem:[%s173_s30 + $0x10] sm:$0xff] %v196_v2  ;;  %v204_v6 = vld [vmem:[%s179_s29 + $0x180] sm:$0xff]  ;;  %v206_v7 = vld [vmem:[%s179_s29 + $0x188] sm:$0xff] }
  0x13   : > { %199 = vst [vmem:[%s173_s30 + $0x18] sm:$0xff] %v198_v3 }
  0x14   : > { %201 = vst [vmem:[%s173_s30 + $0x20] sm:$0xff] %v200_v4 }
  0x15   : > { %203 = vst [vmem:[%s173_s30 + $0x28] sm:$0xff] %v202_v5 }
  0x16   : > { %205 = vst [vmem:[%s173_s30 + $0x30] sm:$0xff] %v204_v6 }
  0x17   : > { %207 = vst [vmem:[%s173_s30 + $0x38] sm:$0xff] %v206_v7 }
  0x18 PF: > { %p1771_p6 = scmp.ge.s32.totalorder %s2546_s19, 1  ;;  %p222_p7 = scmp.lt.s32.totalorder %s2546_s19, 9 }
  0x1a   : > { %p223_p8 = pnand %p1771_p6, %p222_p7 }
  0x1b   : > { %s229_s5 = sand.u32 (!%p223_p8), 1, %s2530_s15   ;;  %s1773_s6 = sshll.u32 (!%p223_p8), %s2538_s17, 6 }
  0x1c   : > { %226 = sbr.rel (%p223_p8) target bundleno = 397 (0x18d), region = 51  ;;  %s1772_s7 = sshll.u32 (!%p223_p8), %s229_s5, 6 }
  0x1d   : > { %p264_p9 = scmp.lt.s32.totalorder (!%p223_p8), %s1773_s6, 511  ;;  %p278_p10 = scmp.eq.s32.totalorder (!%p223_p8), %s2538_s17, 0 }
  0x1e   : > { %s2628_s12 = scalar_lea.vmem (!%p223_p8), [#allocation3], %s1772_s7 }
  0x21   : > { %s3067_s6 = smov (!%p264_p9, %s1773_s6), 511  ;;  %282 = sbr.rel (!%p278_p10) target bundleno = 38 (0x26), region = 59  ;;  %v2548_v8 = vmov (%p278_p10), 0.0  }
  0x22   : > { %s2328_s8 = sshll.u32 %s3067_s6, 4  ;;  %283 = vst [vmem:[%s3059_s4] sm:$0xff] (%p278_p10), %v2548_v8 }
  0x23   : > { %s2626_s11 = scalar_lea.vmem %s3056_s1, %s2328_s8 }
  0x26 PF: > { %p1777_p11 = scmp.ne.s32.totalorder %s2538_s17, 0 }
  0x28   : > { %286 = sbr.rel (%p1777_p11) target bundleno = 62 (0x3e), region = 63 }
  0x2d   : > { %v2549_v9 = vmov 0.0  }
  0x2e   : > { %287 = vst [vmem:[#allocation2 + $0x30] sm:$0xff] %v2549_v9 }
  0x2f   : > { %288 = vst [vmem:[#allocation2] sm:$0xff] %v2549_v9 }
  0x30   : > { %289 = vst [vmem:[#allocation2 + $0x58] sm:$0xff] %v2549_v9 }
  0x31   : > { %290 = vst [vmem:[#allocation2 + $0x18] sm:$0xff] %v2549_v9 }
  0x32   : > { %291 = vst [vmem:[#allocation2 + $0x50] sm:$0xff] %v2549_v9 }
  0x33   : > { %292 = vst [vmem:[#allocation2 + $0x68] sm:$0xff] %v2549_v9 }
  0x34   : > { %293 = vst [vmem:[#allocation2 + $0x8] sm:$0xff] %v2549_v9 }
  0x35   : > { %294 = vst [vmem:[#allocation2 + $0x48] sm:$0xff] %v2549_v9 }
  0x36   : > { %295 = vst [vmem:[#allocation2 + $0x40] sm:$0xff] %v2549_v9 }
  0x37   : > { %296 = vst [vmem:[#allocation2 + $0x20] sm:$0xff] %v2549_v9 }
  0x38   : > { %297 = vst [vmem:[#allocation2 + $0x10] sm:$0xff] %v2549_v9 }
  0x39   : > { %298 = vst [vmem:[#allocation2 + $0x38] sm:$0xff] %v2549_v9 }
  0x3a   : > { %299 = vst [vmem:[#allocation2 + $0x60] sm:$0xff] %v2549_v9 }
  0x3b   : > { %300 = vst [vmem:[#allocation2 + $0x70] sm:$0xff] %v2549_v9 }
  0x3c   : > { %301 = vst [vmem:[#allocation2 + $0x78] sm:$0xff] %v2549_v9 }
  0x3d   : > { %302 = vst [vmem:[#allocation2 + $0x28] sm:$0xff] %v2549_v9 }
  0x3e PF: > { %v1924_v10 = vld [vmem:[%s2626_s11 + $0xe0] sm:$0xf]  ;;  %v2368_v11 = vld [vmem:[%s2626_s11 + $0xec] sm:$0xf0]  ;;  %p2322_p12 = scmp.ne.s32.totalorder %s2538_s17, 7 }
  0x3f   : > { %v2052_v12 = vld [vmem:[%s2626_s11 + $0x1e0] sm:$0xf]  ;;  %v1925_v13 = vor.u32 %v2368_v11, %v1924_v10  ;;  %v2400_v14 = vld [vmem:[%s2626_s11 + $0x1ec] sm:$0xf0] }
  0x40   : > { %v2180_v15 = vld [vmem:[%s2626_s11 + $0x2e0] sm:$0xf]  ;;  %v2432_v16 = vld [vmem:[%s2626_s11 + $0x2ec] sm:$0xf0]  ;;  %v2053_v17 = vor.u32 %v2400_v14, %v2052_v12 }
  0x41   : > { %v2181_v18 = vor.u32 %v2432_v16, %v2180_v15  ;;  %v2308_v19 = vld [vmem:[%s2626_s11 + $0x3e0] sm:$0xf]  ;;  %v2464_v20 = vld [vmem:[%s2626_s11 + $0x3ec] sm:$0xf0]  ;;  %1135 = vmatpush.bf16.msra.mxu0 %v1925_v13 }
  0x42   : > { %v1908_v21 = vld [vmem:[%s2626_s11 + $0xc0] sm:$0xf]  ;;  %v2309_v22 = vor.u32 %v2464_v20, %v2308_v19  ;;  %v2364_v23 = vld [vmem:[%s2626_s11 + $0xcc] sm:$0xf0]  ;;  %1154 = vmatpush.bf16.msra.mxu1 %v2053_v17 }
  0x43   : > { %v2036_v24 = vld [vmem:[%s2626_s11 + $0x1c0] sm:$0xf]  ;;  %v2396_v25 = vld [vmem:[%s2626_s11 + $0x1cc] sm:$0xf0]  ;;  %1173 = vmatpush.bf16.msra.mxu2 %v2181_v18  ;;  %v1909_v26 = vor.u32 %v2364_v23, %v1908_v21 }
  0x44   : > { %v2037_v27 = vor.u32 %v2396_v25, %v2036_v24  ;;  %v2164_v28 = vld [vmem:[%s2626_s11 + $0x2c0] sm:$0xf]  ;;  %v2428_v29 = vld [vmem:[%s2626_s11 + $0x2cc] sm:$0xf0]  ;;  %1192 = vmatpush.bf16.msra.mxu3 %v2309_v22 }
  0x45   : > { %v2292_v30 = vld [vmem:[%s2626_s11 + $0x3c0] sm:$0xf]  ;;  %v2165_v31 = vor.u32 %v2428_v29, %v2164_v28  ;;  %v2460_v32 = vld [vmem:[%s2626_s11 + $0x3cc] sm:$0xf0]  ;;  %1136 = vmatpush.bf16.msra.mxu0 %v1909_v26 }
  0x46   : > { %v1892_v33 = vld [vmem:[%s2626_s11 + $0xa0] sm:$0xf]  ;;  %v2360_v34 = vld [vmem:[%s2626_s11 + $0xac] sm:$0xf0]  ;;  %v2293_v35 = vor.u32 %v2460_v32, %v2292_v30  ;;  %1155 = vmatpush.bf16.msra.mxu1 %v2037_v27 }
  0x47   : > { %v2020_v36 = vld [vmem:[%s2626_s11 + $0x1a0] sm:$0xf]  ;;  %v2392_v37 = vld [vmem:[%s2626_s11 + $0x1ac] sm:$0xf0]  ;;  %v1893_v39 = vor.u32 %v2360_v34, %v1892_v33  ;;  %1174 = vmatpush.bf16.msra.mxu2 %v2165_v31 }
  0x48   : > { %v2148_v38 = vld [vmem:[%s2626_s11 + $0x2a0] sm:$0xf]  ;;  %v2424_v40 = vld [vmem:[%s2626_s11 + $0x2ac] sm:$0xf0]  ;;  %v2021_v43 = vor.u32 %v2392_v37, %v2020_v36  ;;  %1193 = vmatpush.bf16.msra.mxu3 %v2293_v35 }
  0x49   : > { %v2276_v41 = vld [vmem:[%s2626_s11 + $0x3a0] sm:$0xf]  ;;  %v2456_v42 = vld [vmem:[%s2626_s11 + $0x3ac] sm:$0xf0]  ;;  %v2149_v44 = vor.u32 %v2424_v40, %v2148_v38  ;;  %1137 = vmatpush.bf16.msra.mxu0 %v1893_v39  ;;  %v2330_v40 = vld [vmem:[%s2628_s12 + $0x4] sm:$0xf] }
  0x4a   : > { %v1876_v45 = vld [vmem:[%s2626_s11 + $0x80] sm:$0xf]  ;;  %v2356_v46 = vld [vmem:[%s2626_s11 + $0x8c] sm:$0xf0]  ;;  %v2277_v48 = vor.u32 %v2456_v42, %v2276_v41  ;;  %1156 = vmatpush.bf16.msra.mxu1 %v2021_v43  ;;  %v1782_v41 = vld [vmem:[%s2628_s12 + $0x10] sm:$0xf0] }
  0x4b   : > { %v2004_v47 = vld [vmem:[%s2626_s11 + $0x180] sm:$0xf]  ;;  %v2388_v49 = vld [vmem:[%s2626_s11 + $0x18c] sm:$0xf0]  ;;  %v1877_v54 = vor.u32 %v2356_v46, %v1876_v45  ;;  %1175 = vmatpush.bf16.msra.mxu2 %v2149_v44  ;;  %v2430_v42 = vld [vmem:[%s2626_s11 + $0x2e4] sm:$0xf] }
  0x4c   : > { %v2132_v50 = vld [vmem:[%s2626_s11 + $0x280] sm:$0xf]  ;;  %v2420_v51 = vld [vmem:[%s2626_s11 + $0x28c] sm:$0xf0]  ;;  %v2005_v55 = vor.u32 %v2388_v49, %v2004_v47  ;;  %1194 = vmatpush.bf16.msra.mxu3 %v2277_v48  ;;  %v2182_v43 = vld [vmem:[%s2626_s11 + $0x2f0] sm:$0xf0] }
  0x4d   : > { %v2260_v52 = vld [vmem:[%s2626_s11 + $0x380] sm:$0xf]  ;;  %v2452_v53 = vld [vmem:[%s2626_s11 + $0x38c] sm:$0xf0]  ;;  %v2133_v56 = vor.u32 %v2420_v51, %v2132_v50  ;;  %1138 = vmatpush.bf16.msra.mxu0 %v1877_v54  ;;  %v1788_v45 = vld [vmem:[%s2628_s12 + $0x8] sm:$0xf]  ;;  %v2185_v54 = vor.u32 %v2430_v42, %v2182_v43 }
  0x4e   : > { %v1860_v57 = vld [vmem:[%s2626_s11 + $0x60] sm:$0xf]  ;;  %v2352_v58 = vld [vmem:[%s2626_s11 + $0x6c] sm:$0xf0]  ;;  %v2261_v60 = vor.u32 %v2452_v53, %v2260_v52  ;;  %1157 = vmatpush.bf16.msra.mxu1 %v2005_v55  ;;  %v2398_v46 = vld [vmem:[%s2626_s11 + $0x1e4] sm:$0xf] }
  0x4f   : > { %v1988_v59 = vld [vmem:[%s2626_s11 + $0x160] sm:$0xf]  ;;  %v2384_v61 = vld [vmem:[%s2626_s11 + $0x16c] sm:$0xf0]  ;;  %v1861_v2 = vor.u32 %v2352_v58, %v1860_v57  ;;  %1176 = vmatpush.bf16.msra.mxu2 %v2133_v56  ;;  %v2054_v47 = vld [vmem:[%s2626_s11 + $0x1f0] sm:$0xf0] }
  0x50   : > { %v2116_v62 = vld [vmem:[%s2626_s11 + $0x260] sm:$0xf]  ;;  %v2416_v63 = vld [vmem:[%s2626_s11 + $0x26c] sm:$0xf0]  ;;  %v1989_v3 = vor.u32 %v2384_v61, %v1988_v59  ;;  %1195 = vmatpush.bf16.msra.mxu3 %v2261_v60  ;;  %v2333_v50 = vld [vmem:[%s2628_s12 + $0x14] sm:$0xf0]  ;;  %v2057_v59 = vor.u32 %v2398_v46, %v2054_v47 }
  0x51   : > { %v2244_v0 = vld [vmem:[%s2626_s11 + $0x360] sm:$0xf]  ;;  %v2448_v1 = vld [vmem:[%s2626_s11 + $0x36c] sm:$0xf0]  ;;  %v2117_v4 = vor.u32 %v2416_v63, %v2116_v62  ;;  %1139 = vmatpush.bf16.msra.mxu0 %v1861_v2  ;;  %v2331_v51 = vld [vmem:[%s2628_s12 + $0xc] sm:$0xf]  ;;  %v2718_v63 = vor.u32 %v2330_v40, %v1782_v41 }
  0x52   : > { %v1844_v5 = vld [vmem:[%s2626_s11 + $0x40] sm:$0xf]  ;;  %v2348_v6 = vld [vmem:[%s2626_s11 + $0x4c] sm:$0xf0]  ;;  %v2245_v8 = vor.u32 %v2448_v1, %v2244_v0  ;;  %1158 = vmatpush.bf16.msra.mxu1 %v1989_v3  ;;  %v1790_v52 = vld [vmem:[%s2628_s12 + $0x18] sm:$0xf0]  ;;  %v2720_v0 = vor.u32 %v2333_v50, %v1788_v45 }
  0x53   : > { %v1972_v7 = vld [vmem:[%s2626_s11 + $0x140] sm:$0xf]  ;;  %v2380_v9 = vld [vmem:[%s2626_s11 + $0x14c] sm:$0xf0]  ;;  %v1845_v14 = vor.u32 %v2348_v6, %v1844_v5  ;;  %1177 = vmatpush.bf16.msra.mxu2 %v2117_v4  ;;  %v2366_v55 = vld [vmem:[%s2626_s11 + $0xe4] sm:$0xf]  ;;  %v2724_v3 = vor.u32 %v2331_v51, %v1790_v52 }
  0x54   : > { %v2100_v10 = vld [vmem:[%s2626_s11 + $0x240] sm:$0xf]  ;;  %v2412_v11 = vld [vmem:[%s2626_s11 + $0x24c] sm:$0xf0]  ;;  %v1973_v15 = vor.u32 %v2380_v9, %v1972_v7  ;;  %1196 = vmatpush.bf16.msra.mxu3 %v2245_v8  ;;  %v1926_v56 = vld [vmem:[%s2626_s11 + $0xf0] sm:$0xf0] }
  0x55   : > { %v2228_v12 = vld [vmem:[%s2626_s11 + $0x340] sm:$0xf]  ;;  %v2444_v13 = vld [vmem:[%s2626_s11 + $0x34c] sm:$0xf0]  ;;  %v2101_v16 = vor.u32 %v2412_v11, %v2100_v10  ;;  %1140 = vmatpush.bf16.msra.mxu0 %v1845_v14  ;;  %v2462_v57 = vld [vmem:[%s2626_s11 + $0x3e4] sm:$0xf]  ;;  %v1929_v4 = vor.u32 %v2366_v55, %v1926_v56 }
  0x56   : > { %v1828_v17 = vld [vmem:[%s2626_s11 + $0x20] sm:$0xf]  ;;  %v2344_v18 = vld [vmem:[%s2626_s11 + $0x2c] sm:$0xf0]  ;;  %v2229_v20 = vor.u32 %v2444_v13, %v2228_v12  ;;  %1159 = vmatpush.bf16.msra.mxu1 %v1973_v15  ;;  %v2310_v60 = vld [vmem:[%s2626_s11 + $0x3f0] sm:$0xf0] }
  0x57   : > { %v1956_v19 = vld [vmem:[%s2626_s11 + $0x120] sm:$0xf]  ;;  %v2376_v21 = vld [vmem:[%s2626_s11 + $0x12c] sm:$0xf0]  ;;  %v1829_v27 = vor.u32 %v2344_v18, %v1828_v17  ;;  %1178 = vmatpush.bf16.msra.mxu2 %v2101_v16  ;;  %v2426_v61 = vld [vmem:[%s2626_s11 + $0x2c4] sm:$0xf]  ;;  %v2313_v5 = vor.u32 %v2462_v57, %v2310_v60 }
  0x58   : > { %v2084_v22 = vld [vmem:[%s2626_s11 + $0x220] sm:$0xf]  ;;  %v2408_v23 = vld [vmem:[%s2626_s11 + $0x22c] sm:$0xf0]  ;;  %v1957_v31 = vor.u32 %v2376_v21, %v1956_v19  ;;  %1197 = vmatpush.bf16.msra.mxu3 %v2229_v20  ;;  %v2166_v62 = vld [vmem:[%s2626_s11 + $0x2d0] sm:$0xf0] }
  0x59   : > { %v2212_v24 = vld [vmem:[%s2626_s11 + $0x320] sm:$0xf]  ;;  %v2440_v25 = vld [vmem:[%s2626_s11 + $0x32c] sm:$0xf0]  ;;  %v2085_v32 = vor.u32 %v2408_v23, %v2084_v22  ;;  %1141 = vmatpush.bf16.msra.mxu0 %v1829_v27  ;;  %v2394_v1 = vld [vmem:[%s2626_s11 + $0x1c4] sm:$0xf]  ;;  %v2169_v6 = vor.u32 %v2426_v61, %v2166_v62 }
  0x5a   : > { %v1812_v26 = vld [vmem:[%s2626_s11] sm:$0xf]  ;;  %v2340_v28 = vld [vmem:[%s2626_s11 + $0xc] sm:$0xf0]  ;;  %v2213_v36 = vor.u32 %v2440_v25, %v2212_v24  ;;  %1160 = vmatpush.bf16.msra.mxu1 %v1957_v31  ;;  %v2038_v2 = vld [vmem:[%s2626_s11 + $0x1d0] sm:$0xf0] }
  0x5b   : > { %v1940_v29 = vld [vmem:[%s2626_s11 + $0x100] sm:$0xf]  ;;  %v2372_v30 = vld [vmem:[%s2626_s11 + $0x10c] sm:$0xf0]  ;;  %v1813_v44 = vor.u32 %v2340_v28, %v1812_v26  ;;  %1179 = vmatpush.bf16.msra.mxu2 %v2085_v32  ;;  %v2362_v7 = vld [vmem:[%s2626_s11 + $0xc4] sm:$0xf]  ;;  %v2041_v10 = vor.u32 %v2394_v1, %v2038_v2 }
  0x5c   : > { %v2068_v33 = vld [vmem:[%s2626_s11 + $0x200] sm:$0xf]  ;;  %v2404_v34 = vld [vmem:[%s2626_s11 + $0x20c] sm:$0xf0]  ;;  %v1941_v48 = vor.u32 %v2372_v30, %v1940_v29  ;;  %1198 = vmatpush.bf16.msra.mxu3 %v2213_v36  ;;  %v1910_v8 = vld [vmem:[%s2626_s11 + $0xd0] sm:$0xf0] }
  0x5d   : > { %v2196_v35 = vld [vmem:[%s2626_s11 + $0x300] sm:$0xf]  ;;  %v2436_v37 = vld [vmem:[%s2626_s11 + $0x30c] sm:$0xf0]  ;;  %v2069_v49 = vor.u32 %v2404_v34, %v2068_v33  ;;  %1142 = vmatpush.bf16.msra.mxu0 %v1813_v44  ;;  %v2458_v9 = vld [vmem:[%s2626_s11 + $0x3c4] sm:$0xf]  ;;  %v1913_v16 = vor.u32 %v2362_v7, %v1910_v8 }
  0x5e   : > { %v1780_v38 = vld [vmem:[%s2628_s12] sm:$0xf]  ;;  %v2332_v39 = vld [vmem:[%s2628_s12 + $0xc] sm:$0xf0]  ;;  %v2197_v53 = vor.u32 %v2436_v37, %v2196_v35  ;;  %1161 = vmatpush.bf16.msra.mxu1 %v1941_v48  ;;  %v2294_v11 = vld [vmem:[%s2626_s11 + $0x3d0] sm:$0xf0] }
  0x5f   : > { %v2713_v58 = vor.u32 %v2332_v39, %v1780_v38  ;;  %1180 = vmatpush.bf16.msra.mxu2 %v2069_v49  ;;  %v2422_v12 = vld [vmem:[%s2626_s11 + $0x2a4] sm:$0xf]  ;;  %v2150_v13 = vld [vmem:[%s2626_s11 + $0x2b0] sm:$0xf0]  ;;  %v2297_v17 = vor.u32 %v2458_v9, %v2294_v11  ;;  %v1796_v35 = vld [vmem:[%s2628_s12 + $0x20] sm:$0xf] }
  0x60   : > { %1199 = vmatpush.bf16.msra.mxu3 %v2197_v53  ;;  %v2390_v14 = vld [vmem:[%s2626_s11 + $0x1a4] sm:$0xf]  ;;  %v2022_v15 = vld [vmem:[%s2626_s11 + $0x1b0] sm:$0xf0]  ;;  %v2153_v18 = vor.u32 %v2422_v12, %v2150_v13  ;;  %v2336_v36 = vld [vmem:[%s2628_s12 + $0x2c] sm:$0xf0] }
  0x61   : > { %1143 = vmatmul.bf16.vlgmr.msra.gmra.mxu0 %v2713_v58  ;;  %1162 = vmatmul.bf16.vlgmr.msra.gmra.mxu1 %v2718_v63  ;;  %v2358_v19 = vld [vmem:[%s2626_s11 + $0xa4] sm:$0xf]  ;;  %v1894_v20 = vld [vmem:[%s2626_s11 + $0xb0] sm:$0xf0]  ;;  %v2025_v22 = vor.u32 %v2390_v14, %v2022_v15  ;;  %v1804_v42 = vld [vmem:[%s2628_s12 + $0x28] sm:$0xf] }
  0x62   : > { %1230 = vmatpush.bf16.msrb.mxu1 %v2057_v59  ;;  %1181 = vmatmul.bf16.vlgmr.msra.gmra.mxu2 %v2720_v0  ;;  %v2454_v21 = vld [vmem:[%s2626_s11 + $0x3a4] sm:$0xf]  ;;  %v2278_v23 = vld [vmem:[%s2626_s11 + $0x3b0] sm:$0xf0]  ;;  %v1897_v28 = vor.u32 %v2358_v19, %v1894_v20  ;;  %v2337_v46 = vld [vmem:[%s2628_s12 + $0x34] sm:$0xf0] }
  0x63   : > { %1249 = vmatpush.bf16.msrb.mxu2 %v2185_v54  ;;  %1200 = vmatmul.bf16.vlgmr.msra.gmra.mxu3 %v2724_v3  ;;  %v2418_v24 = vld [vmem:[%s2626_s11 + $0x284] sm:$0xf]  ;;  %v2134_v25 = vld [vmem:[%s2626_s11 + $0x290] sm:$0xf0]  ;;  %v2281_v32 = vor.u32 %v2454_v21, %v2278_v23  ;;  %v2335_v47 = vld [vmem:[%s2628_s12 + $0x2c] sm:$0xf]  ;;  %v2765_v54 = vor.u32 %v2336_v36, %v1796_v35  ;;  %v2772_v61 = vor.u32 %v2337_v46, %v1804_v42 }
  0x64   : > { %1211 = vmatpush.bf16.msrb.mxu0 %v1929_v4  ;;  %1268 = vmatpush.bf16.msrb.mxu3 %v2313_v5  ;;  %v2386_v26 = vld [vmem:[%s2626_s11 + $0x184] sm:$0xf]  ;;  %v2006_v27 = vld [vmem:[%s2626_s11 + $0x190] sm:$0xf0]  ;;  %v2137_v33 = vor.u32 %v2418_v24, %v2134_v25  ;;  %v1806_v48 = vld [vmem:[%s2628_s12 + $0x38] sm:$0xf0] }
  0x65   : > { %v2354_v29 = vld [vmem:[%s2626_s11 + $0x84] sm:$0xf]  ;;  %v1878_v30 = vld [vmem:[%s2626_s11 + $0x90] sm:$0xf0]  ;;  %v2009_v37 = vor.u32 %v2386_v26, %v2006_v27  ;;  %v2776_v2 = vor.u32 %v2335_v47, %v1806_v48  ;;  %v2369_v42 = vld [vmem:[%s2626_s11 + $0xf4] sm:$0xf0] }
  0x66   : > { %1231 = vmatpush.bf16.msrb.mxu1 %v2041_v10  ;;  %v2450_v31 = vld [vmem:[%s2626_s11 + $0x384] sm:$0xf]  ;;  %v2262_v34 = vld [vmem:[%s2626_s11 + $0x390] sm:$0xf0]  ;;  %v1881_v45 = vor.u32 %v2354_v29, %v1878_v30  ;;  %v2433_v29 = vld [vmem:[%s2626_s11 + $0x2f4] sm:$0xf0] }
  0x67   : > { %1250 = vmatpush.bf16.msrb.mxu2 %v2169_v6  ;;  %v2334_v38 = vld [vmem:[%s2628_s12 + $0x24] sm:$0xf]  ;;  %v1798_v39 = vld [vmem:[%s2628_s12 + $0x30] sm:$0xf0]  ;;  %v2265_v49 = vor.u32 %v2450_v31, %v2262_v34  ;;  %v2172_v46 = vld [vmem:[%s2626_s11 + $0x2c8] sm:$0xf] }
  0x68   : > { %1212 = vmatpush.bf16.msrb.mxu0 %v1913_v16  ;;  %1269 = vmatpush.bf16.msrb.mxu3 %v2297_v17  ;;  %v2414_v40 = vld [vmem:[%s2626_s11 + $0x264] sm:$0xf]  ;;  %v2118_v41 = vld [vmem:[%s2626_s11 + $0x270] sm:$0xf0]  ;;  %v2770_v60 = vor.u32 %v2334_v38, %v1798_v39  ;;  %v2429_v47 = vld [vmem:[%s2626_s11 + $0x2d4] sm:$0xf0] }
  0x69   : > { %v2382_v43 = vld [vmem:[%s2626_s11 + $0x164] sm:$0xf]  ;;  %v1990_v44 = vld [vmem:[%s2626_s11 + $0x170] sm:$0xf0]  ;;  %v2121_v50 = vor.u32 %v2414_v40, %v2118_v41  ;;  %v1932_v41 = vld [vmem:[%s2626_s11 + $0xe8] sm:$0xf] }
  0x6a   : > { %1232 = vmatpush.bf16.msrb.mxu1 %v2025_v22  ;;  %v2350_v51 = vld [vmem:[%s2626_s11 + $0x64] sm:$0xf]  ;;  %v1862_v52 = vld [vmem:[%s2626_s11 + $0x70] sm:$0xf0]  ;;  %v1993_v55 = vor.u32 %v2382_v43, %v1990_v44  ;;  %v2316_v43 = vld [vmem:[%s2626_s11 + $0x3e8] sm:$0xf] }
  0x6b   : > { %1251 = vmatpush.bf16.msrb.mxu2 %v2153_v18  ;;  %v2446_v53 = vld [vmem:[%s2626_s11 + $0x364] sm:$0xf]  ;;  %v2246_v56 = vld [vmem:[%s2626_s11 + $0x370] sm:$0xf0]  ;;  %v1865_v4 = vor.u32 %v2350_v51, %v1862_v52  ;;  %v1916_v51 = vld [vmem:[%s2626_s11 + $0xc8] sm:$0xf] }
  0x6c   : > { %1213 = vmatpush.bf16.msrb.mxu0 %v1897_v28  ;;  %1270 = vmatpush.bf16.msrb.mxu3 %v2281_v32  ;;  %v2410_v57 = vld [vmem:[%s2626_s11 + $0x244] sm:$0xf]  ;;  %v2102_v59 = vld [vmem:[%s2626_s11 + $0x250] sm:$0xf0]  ;;  %v2249_v5 = vor.u32 %v2446_v53, %v2246_v56  ;;  %v2188_v28 = vld [vmem:[%s2626_s11 + $0x2e8] sm:$0xf] }
  0x6d   : > { %v2378_v62 = vld [vmem:[%s2626_s11 + $0x144] sm:$0xf]  ;;  %v1974_v1 = vld [vmem:[%s2626_s11 + $0x150] sm:$0xf0]  ;;  %v2105_v6 = vor.u32 %v2410_v57, %v2102_v59  ;;  %v2060_v32 = vld [vmem:[%s2626_s11 + $0x1e8] sm:$0xf]  ;;  %v2189_v40 = vor.u32 %v2433_v29, %v2188_v28 }
  0x6e   : > { %1233 = vmatpush.bf16.msrb.mxu1 %v2009_v37  ;;  %v2346_v7 = vld [vmem:[%s2626_s11 + $0x44] sm:$0xf]  ;;  %v1846_v8 = vld [vmem:[%s2626_s11 + $0x50] sm:$0xf0]  ;;  %v1977_v10 = vor.u32 %v2378_v62, %v1974_v1  ;;  %v2365_v52 = vld [vmem:[%s2626_s11 + $0xd4] sm:$0xf0] }
  0x6f   : > { %1252 = vmatpush.bf16.msrb.mxu2 %v2137_v33  ;;  %v2442_v9 = vld [vmem:[%s2626_s11 + $0x344] sm:$0xf]  ;;  %v2230_v11 = vld [vmem:[%s2626_s11 + $0x350] sm:$0xf0]  ;;  %v1849_v16 = vor.u32 %v2346_v7, %v1846_v8  ;;  %v2401_v33 = vld [vmem:[%s2626_s11 + $0x1f4] sm:$0xf0] }
  0x70   : > { %1214 = vmatpush.bf16.msrb.mxu0 %v1881_v45  ;;  %1271 = vmatpush.bf16.msrb.mxu3 %v2265_v49  ;;  %v2406_v12 = vld [vmem:[%s2626_s11 + $0x224] sm:$0xf]  ;;  %v2086_v13 = vld [vmem:[%s2626_s11 + $0x230] sm:$0xf0]  ;;  %v2233_v18 = vor.u32 %v2442_v9, %v2230_v11  ;;  %v2061_v44 = vor.u32 %v2401_v33, %v2060_v32  ;;  %v2465_v45 = vld [vmem:[%s2626_s11 + $0x3f4] sm:$0xf0] }
  0x71   : > { %1148 = vmatmul.bf16.gmra.mxu0 %v2765_v54  ;;  %1167 = vmatmul.bf16.gmra.mxu1 %v2770_v60  ;;  %v2374_v14 = vld [vmem:[%s2626_s11 + $0x124] sm:$0xf]  ;;  %v1958_v15 = vld [vmem:[%s2626_s11 + $0x130] sm:$0xf0]  ;;  %v2089_v19 = vor.u32 %v2406_v12, %v2086_v13  ;;  %v2317_v53 = vor.u32 %v2465_v45, %v2316_v43  ;;  %v2044_v56 = vld [vmem:[%s2626_s11 + $0x1c8] sm:$0xf] }
  0x72   : > { %1234 = vmatpush.bf16.msrb.mxu1 %v1993_v55  ;;  %1186 = vmatmul.bf16.gmra.mxu2 %v2772_v61  ;;  %v2342_v17 = vld [vmem:[%s2626_s11 + $0x24] sm:$0xf]  ;;  %v1830_v20 = vld [vmem:[%s2626_s11 + $0x30] sm:$0xf0]  ;;  %v1961_v23 = vor.u32 %v2374_v14, %v1958_v15  ;;  %v2173_v55 = vor.u32 %v2429_v47, %v2172_v46  ;;  %v2397_v57 = vld [vmem:[%s2626_s11 + $0x1d4] sm:$0xf0] }
  0x73   : > { %1253 = vmatpush.bf16.msrb.mxu2 %v2121_v50  ;;  %1205 = vmatmul.bf16.gmra.mxu3 %v2776_v2  ;;  %v2438_v21 = vld [vmem:[%s2626_s11 + $0x324] sm:$0xf]  ;;  %v2214_v22 = vld [vmem:[%s2626_s11 + $0x330] sm:$0xf0]  ;;  %v1833_v30 = vor.u32 %v2342_v17, %v1830_v20  ;;  %v1933_v50 = vor.u32 %v2369_v42, %v1932_v41  ;;  %v2300_v59 = vld [vmem:[%s2626_s11 + $0x3c8] sm:$0xf] }
  0x74   : > { %1215 = vmatpush.bf16.msrb.mxu0 %v1865_v4  ;;  %1272 = vmatpush.bf16.msrb.mxu3 %v2249_v5  ;;  %v2402_v24 = vld [vmem:[%s2626_s11 + $0x204] sm:$0xf]  ;;  %v2070_v25 = vld [vmem:[%s2626_s11 + $0x210] sm:$0xf0]  ;;  %v2217_v34 = vor.u32 %v2438_v21, %v2214_v22  ;;  %v2461_v62 = vld [vmem:[%s2626_s11 + $0x3d4] sm:$0xf0]  ;;  %v1917_v5 = vor.u32 %v2365_v52, %v1916_v51 }
  0x75   : > { %v2370_v26 = vld [vmem:[%s2626_s11 + $0x104] sm:$0xf]  ;;  %v1942_v27 = vld [vmem:[%s2626_s11 + $0x110] sm:$0xf0]  ;;  %v2073_v35 = vor.u32 %v2402_v24, %v2070_v25  ;;  %v2156_v1 = vld [vmem:[%s2626_s11 + $0x2a8] sm:$0xf]  ;;  %v2301_v9 = vor.u32 %v2461_v62, %v2300_v59 }
  0x76   : > { %1235 = vmatpush.bf16.msrb.mxu1 %v1977_v10  ;;  %v2338_v31 = vld [vmem:[%s2626_s11 + $0x4] sm:$0xf]  ;;  %v1814_v36 = vld [vmem:[%s2626_s11 + $0x10] sm:$0xf0]  ;;  %v1945_v39 = vor.u32 %v2370_v26, %v1942_v27  ;;  %v2425_v4 = vld [vmem:[%s2626_s11 + $0x2b4] sm:$0xf0] }
  0x77   : > { %1254 = vmatpush.bf16.msrb.mxu2 %v2105_v6  ;;  %v2434_v37 = vld [vmem:[%s2626_s11 + $0x304] sm:$0xf]  ;;  %v2198_v38 = vld [vmem:[%s2626_s11 + $0x310] sm:$0xf0]  ;;  %v1817_v48 = vor.u32 %v2338_v31, %v1814_v36  ;;  %v2045_v6 = vor.u32 %v2397_v57, %v2044_v56  ;;  %v1900_v7 = vld [vmem:[%s2626_s11 + $0xa8] sm:$0xf]  ;;  %v2157_v10 = vor.u32 %v2425_v4, %v2156_v1 }
  0x78   : > { %1216 = vmatpush.bf16.msrb.mxu0 %v1849_v16  ;;  %1273 = vmatpush.bf16.msrb.mxu3 %v2233_v18  ;;  %v2201_v49 = vor.u32 %v2434_v37, %v2198_v38  ;;  %v2361_v8 = vld [vmem:[%s2626_s11 + $0xb4] sm:$0xf0]  ;;  %v2028_v11 = vld [vmem:[%s2626_s11 + $0x1a8] sm:$0xf] }
  0x79   : > { %v2393_v12 = vld [vmem:[%s2626_s11 + $0x1b4] sm:$0xf0]  ;;  %v2284_v13 = vld [vmem:[%s2626_s11 + $0x3a8] sm:$0xf]  ;;  %v1901_v17 = vor.u32 %v2361_v8, %v1900_v7 }
  0x7a   : > { %1236 = vmatpush.bf16.msrb.mxu1 %v1961_v23  ;;  %v2457_v14 = vld [vmem:[%s2626_s11 + $0x3b4] sm:$0xf0]  ;;  %v2140_v15 = vld [vmem:[%s2626_s11 + $0x288] sm:$0xf]  ;;  %v2029_v18 = vor.u32 %v2393_v12, %v2028_v11 }
  0x7b   : > { %1255 = vmatpush.bf16.msrb.mxu2 %v2089_v19  ;;  %v2421_v16 = vld [vmem:[%s2626_s11 + $0x294] sm:$0xf0]  ;;  %v1884_v19 = vld [vmem:[%s2626_s11 + $0x88] sm:$0xf]  ;;  %v2285_v21 = vor.u32 %v2457_v14, %v2284_v13 }
  0x7c   : > { %1217 = vmatpush.bf16.msrb.mxu0 %v1833_v30  ;;  %1274 = vmatpush.bf16.msrb.mxu3 %v2217_v34  ;;  %v2357_v20 = vld [vmem:[%s2626_s11 + $0x94] sm:$0xf0]  ;;  %v2141_v22 = vor.u32 %v2421_v16, %v2140_v15  ;;  %v2012_v23 = vld [vmem:[%s2626_s11 + $0x188] sm:$0xf] }
  0x7d   : > { %v2389_v24 = vld [vmem:[%s2626_s11 + $0x194] sm:$0xf0]  ;;  %v2268_v25 = vld [vmem:[%s2626_s11 + $0x388] sm:$0xf]  ;;  %v1885_v29 = vor.u32 %v2357_v20, %v1884_v19 }
  0x7e   : > { %1237 = vmatpush.bf16.msrb.mxu1 %v1945_v39  ;;  %v2453_v26 = vld [vmem:[%s2626_s11 + $0x394] sm:$0xf0]  ;;  %v2124_v27 = vld [vmem:[%s2626_s11 + $0x268] sm:$0xf]  ;;  %v2013_v30 = vor.u32 %v2389_v24, %v2012_v23  ;;  %v1934_v23 = vld [vmem:[%s2626_s11 + $0xf8] sm:$0xf0] }
  0x7f   : > { %1256 = vmatpush.bf16.msrb.mxu2 %v2073_v35  ;;  %v2417_v28 = vld [vmem:[%s2626_s11 + $0x274] sm:$0xf0]  ;;  %v1868_v31 = vld [vmem:[%s2626_s11 + $0x68] sm:$0xf]  ;;  %v2269_v33 = vor.u32 %v2453_v26, %v2268_v25  ;;  %v2399_v24 = vld [vmem:[%s2626_s11 + $0x1ec] sm:$0xf] }
  0x80   : > { %1218 = vmatpush.bf16.msrb.mxu0 %v1817_v48  ;;  %1275 = vmatpush.bf16.msrb.mxu3 %v2201_v49  ;;  %v2353_v32 = vld [vmem:[%s2626_s11 + $0x74] sm:$0xf0]  ;;  %v2125_v34 = vor.u32 %v2417_v28, %v2124_v27  ;;  %v1996_v35 = vld [vmem:[%s2626_s11 + $0x168] sm:$0xf]  ;;  %v2062_v25 = vld [vmem:[%s2626_s11 + $0x1f8] sm:$0xf0] }
  0x81   : > { %1238 = vmatmul.bf16.vlgmr.msrb.gmra.mxu1 %v2718_v63  ;;  %v2385_v36 = vld [vmem:[%s2626_s11 + $0x174] sm:$0xf0]  ;;  %v2252_v37 = vld [vmem:[%s2626_s11 + $0x368] sm:$0xf]  ;;  %v1869_v41 = vor.u32 %v2353_v32, %v1868_v31  ;;  %v2463_v26 = vld [vmem:[%s2626_s11 + $0x3ec] sm:$0xf] }
  0x82   : > { %1306 = vmatpush.bf16.msra.mxu1 %v2061_v44  ;;  %1257 = vmatmul.bf16.vlgmr.msrb.gmra.mxu2 %v2720_v0  ;;  %v2449_v38 = vld [vmem:[%s2626_s11 + $0x374] sm:$0xf0]  ;;  %v2108_v39 = vld [vmem:[%s2626_s11 + $0x248] sm:$0xf]  ;;  %v1997_v42 = vor.u32 %v2385_v36, %v1996_v35  ;;  %v2318_v27 = vld [vmem:[%s2626_s11 + $0x3f8] sm:$0xf0] }
  0x83   : > { %1325 = vmatpush.bf16.msra.mxu2 %v2189_v40  ;;  %1219 = vmatmul.bf16.vlgmr.msrb.gmra.mxu0 %v2713_v58  ;;  %v2413_v40 = vld [vmem:[%s2626_s11 + $0x254] sm:$0xf0]  ;;  %v1852_v43 = vld [vmem:[%s2626_s11 + $0x48] sm:$0xf]  ;;  %v2253_v45 = vor.u32 %v2449_v38, %v2252_v37  ;;  %v2174_v31 = vld [vmem:[%s2626_s11 + $0x2d8] sm:$0xf0]  ;;  %v2321_v35 = vor.u32 %v2463_v26, %v2318_v27 }
  0x84   : > { %1287 = vmatpush.bf16.msra.mxu0 %v1933_v50  ;;  %1344 = vmatpush.bf16.msra.mxu3 %v2317_v53  ;;  %v2349_v44 = vld [vmem:[%s2626_s11 + $0x54] sm:$0xf0]  ;;  %v2109_v46 = vor.u32 %v2413_v40, %v2108_v39  ;;  %v1980_v47 = vld [vmem:[%s2626_s11 + $0x148] sm:$0xf]  ;;  %v2363_v36 = vld [vmem:[%s2626_s11 + $0xcc] sm:$0xf] }
  0x85   : > { %1276 = vmatmul.bf16.vlgmr.msrb.gmra.mxu3 %v2724_v3  ;;  %v2381_v48 = vld [vmem:[%s2626_s11 + $0x154] sm:$0xf0]  ;;  %v2236_v49 = vld [vmem:[%s2626_s11 + $0x348] sm:$0xf]  ;;  %v1853_v53 = vor.u32 %v2349_v44, %v1852_v43  ;;  %v1918_v37 = vld [vmem:[%s2626_s11 + $0xd8] sm:$0xf0] }
  0x86   : > { %1307 = vmatpush.bf16.msra.mxu1 %v2045_v6  ;;  %v2445_v50 = vld [vmem:[%s2626_s11 + $0x354] sm:$0xf0]  ;;  %v2092_v51 = vld [vmem:[%s2626_s11 + $0x228] sm:$0xf]  ;;  %v2395_v39 = vld [vmem:[%s2626_s11 + $0x1cc] sm:$0xf] }
  0x87   : > { %1326 = vmatpush.bf16.msra.mxu2 %v2173_v55  ;;  %v2409_v52 = vld [vmem:[%s2626_s11 + $0x234] sm:$0xf0]  ;;  %v1981_v55 = vor.u32 %v2381_v48, %v1980_v47  ;;  %v1836_v56 = vld [vmem:[%s2626_s11 + $0x28] sm:$0xf]  ;;  %v2237_v59 = vor.u32 %v2445_v50, %v2236_v49  ;;  %v2046_v40 = vld [vmem:[%s2626_s11 + $0x1d8] sm:$0xf0] }
  0x88   : > { %1288 = vmatpush.bf16.msra.mxu0 %v1917_v5  ;;  %1345 = vmatpush.bf16.msra.mxu3 %v2301_v9  ;;  %v2345_v57 = vld [vmem:[%s2626_s11 + $0x34] sm:$0xf0]  ;;  %v2093_v62 = vor.u32 %v2409_v52, %v2092_v51  ;;  %v1964_v1 = vld [vmem:[%s2626_s11 + $0x128] sm:$0xf]  ;;  %v2431_v9 = vld [vmem:[%s2626_s11 + $0x2ec] sm:$0xf]  ;;  %v2049_v48 = vor.u32 %v2395_v39, %v2046_v40 }
  0x89   : > { %v2377_v4 = vld [vmem:[%s2626_s11 + $0x134] sm:$0xf0]  ;;  %v2220_v5 = vld [vmem:[%s2626_s11 + $0x328] sm:$0xf]  ;;  %v1837_v11 = vor.u32 %v2345_v57, %v1836_v56  ;;  %v2302_v43 = vld [vmem:[%s2626_s11 + $0x3d8] sm:$0xf0] }
  0x8a   : > { %1308 = vmatpush.bf16.msra.mxu1 %v2029_v18  ;;  %v2441_v6 = vld [vmem:[%s2626_s11 + $0x334] sm:$0xf0]  ;;  %v2076_v7 = vld [vmem:[%s2626_s11 + $0x208] sm:$0xf]  ;;  %v1965_v12 = vor.u32 %v2377_v4, %v1964_v1  ;;  %v2423_v44 = vld [vmem:[%s2626_s11 + $0x2ac] sm:$0xf] }
  0x8b   : > { %1327 = vmatpush.bf16.msra.mxu2 %v2157_v10  ;;  %v2405_v8 = vld [vmem:[%s2626_s11 + $0x214] sm:$0xf0]  ;;  %v2190_v10 = vld [vmem:[%s2626_s11 + $0x2f8] sm:$0xf0]  ;;  %v1820_v13 = vld [vmem:[%s2626_s11 + $0x8] sm:$0xf]  ;;  %v2221_v16 = vor.u32 %v2441_v6, %v2220_v5 }
  0x8c   : > { %1289 = vmatpush.bf16.msra.mxu0 %v1901_v17  ;;  %1346 = vmatpush.bf16.msra.mxu3 %v2285_v21  ;;  %v2341_v14 = vld [vmem:[%s2626_s11 + $0x14] sm:$0xf0]  ;;  %v1948_v15 = vld [vmem:[%s2626_s11 + $0x108] sm:$0xf]  ;;  %v2077_v17 = vor.u32 %v2405_v8, %v2076_v7  ;;  %v2193_v21 = vor.u32 %v2431_v9, %v2190_v10  ;;  %v1902_v47 = vld [vmem:[%s2626_s11 + $0xb8] sm:$0xf0] }
  0x8d   : > { %v2373_v18 = vld [vmem:[%s2626_s11 + $0x114] sm:$0xf0]  ;;  %v2204_v19 = vld [vmem:[%s2626_s11 + $0x308] sm:$0xf]  ;;  %v1821_v28 = vor.u32 %v2341_v14, %v1820_v13  ;;  %v2391_v50 = vld [vmem:[%s2626_s11 + $0x1ac] sm:$0xf] }
  0x8e   : > { %1309 = vmatpush.bf16.msra.mxu1 %v2013_v30  ;;  %v2437_v20 = vld [vmem:[%s2626_s11 + $0x314] sm:$0xf0]  ;;  %v2427_v30 = vld [vmem:[%s2626_s11 + $0x2cc] sm:$0xf]  ;;  %v2030_v51 = vld [vmem:[%s2626_s11 + $0x1b8] sm:$0xf0] }
  0x8f   : > { %1328 = vmatpush.bf16.msra.mxu2 %v2141_v22  ;;  %v2367_v22 = vld [vmem:[%s2626_s11 + $0xec] sm:$0xf]  ;;  %v2205_v32 = vor.u32 %v2437_v20, %v2204_v19  ;;  %v2177_v38 = vor.u32 %v2427_v30, %v2174_v31  ;;  %v2286_v56 = vld [vmem:[%s2626_s11 + $0x3b8] sm:$0xf0]  ;;  %v2033_v4 = vor.u32 %v2391_v50, %v2030_v51 }
  0x90   : > { %1290 = vmatpush.bf16.msra.mxu0 %v1885_v29  ;;  %1347 = vmatpush.bf16.msra.mxu3 %v2269_v33  ;;  %v1949_v29 = vor.u32 %v2373_v18, %v1948_v15  ;;  %v1937_v33 = vor.u32 %v2367_v22, %v1934_v23  ;;  %v2419_v57 = vld [vmem:[%s2626_s11 + $0x28c] sm:$0xf]  ;;  %v1886_v1 = vld [vmem:[%s2626_s11 + $0x98] sm:$0xf0] }
  0x91   : > { %1243 = vmatmul.bf16.gmra.mxu1 %v2770_v60  ;;  %v2387_v6 = vld [vmem:[%s2626_s11 + $0x18c] sm:$0xf]  ;;  %v2014_v7 = vld [vmem:[%s2626_s11 + $0x198] sm:$0xf0] }
  0x92   : > { %1310 = vmatpush.bf16.msra.mxu1 %v1997_v42  ;;  %1262 = vmatmul.bf16.gmra.mxu2 %v2772_v61  ;;  %v2459_v42 = vld [vmem:[%s2626_s11 + $0x3cc] sm:$0xf]  ;;  %v2126_v13 = vld [vmem:[%s2626_s11 + $0x278] sm:$0xf0] }
  0x93   : > { %1329 = vmatpush.bf16.msra.mxu2 %v2125_v34  ;;  %1224 = vmatmul.bf16.gmra.mxu0 %v2765_v54  ;;  %v2065_v34 = vor.u32 %v2399_v24, %v2062_v25  ;;  %v2305_v49 = vor.u32 %v2459_v42, %v2302_v43  ;;  %v2451_v10 = vld [vmem:[%s2626_s11 + $0x38c] sm:$0xf]  ;;  %v1870_v15 = vld [vmem:[%s2626_s11 + $0x78] sm:$0xf0] }
  0x94   : > { %1291 = vmatpush.bf16.msra.mxu0 %v1869_v41  ;;  %1348 = vmatpush.bf16.msra.mxu3 %v2253_v45  ;;  %v1921_v41 = vor.u32 %v2363_v36, %v1918_v37  ;;  %v2158_v45 = vld [vmem:[%s2626_s11 + $0x2b8] sm:$0xf0]  ;;  %v2351_v14 = vld [vmem:[%s2626_s11 + $0x6c] sm:$0xf] }
  0x95   : > { %1281 = vmatmul.bf16.gmra.mxu3 %v2776_v2  ;;  %v2161_v52 = vor.u32 %v2423_v44, %v2158_v45  ;;  %v2383_v18 = vld [vmem:[%s2626_s11 + $0x16c] sm:$0xf]  ;;  %v1998_v19 = vld [vmem:[%s2626_s11 + $0x178] sm:$0xf0] }
  0x96   : > { %1311 = vmatpush.bf16.msra.mxu1 %v1981_v55  ;;  %v2455_v55 = vld [vmem:[%s2626_s11 + $0x3ac] sm:$0xf]  ;;  %v2254_v23 = vld [vmem:[%s2626_s11 + $0x378] sm:$0xf0] }
  0x97   : > { %1330 = vmatpush.bf16.msra.mxu2 %v2109_v46  ;;  %v2359_v46 = vld [vmem:[%s2626_s11 + $0xac] sm:$0xf]  ;;  %v2289_v5 = vor.u32 %v2455_v55, %v2286_v56  ;;  %v2110_v25 = vld [vmem:[%s2626_s11 + $0x258] sm:$0xf0] }
  0x98   : > { %1292 = vmatpush.bf16.msra.mxu0 %v1853_v53  ;;  %1349 = vmatpush.bf16.msra.mxu3 %v2237_v59  ;;  %v1905_v53 = vor.u32 %v2359_v46, %v1902_v47  ;;  %v2142_v59 = vld [vmem:[%s2626_s11 + $0x298] sm:$0xf0]  ;;  %v2447_v22 = vld [vmem:[%s2626_s11 + $0x36c] sm:$0xf] }
  0x99   : > { %v2145_v8 = vor.u32 %v2419_v57, %v2142_v59  ;;  %v2411_v24 = vld [vmem:[%s2626_s11 + $0x24c] sm:$0xf]  ;;  %v1854_v27 = vld [vmem:[%s2626_s11 + $0x58] sm:$0xf0] }
  0x9a   : > { %1312 = vmatpush.bf16.msra.mxu1 %v1965_v12  ;;  %v2415_v12 = vld [vmem:[%s2626_s11 + $0x26c] sm:$0xf]  ;;  %v1982_v31 = vld [vmem:[%s2626_s11 + $0x158] sm:$0xf0] }
  0x9b   : > { %1331 = vmatpush.bf16.msra.mxu2 %v2093_v62  ;;  %v2355_v62 = vld [vmem:[%s2626_s11 + $0x8c] sm:$0xf]  ;;  %v2129_v20 = vor.u32 %v2415_v12, %v2126_v13  ;;  %v2094_v37 = vld [vmem:[%s2626_s11 + $0x238] sm:$0xf0] }
  0x9c   : > { %1293 = vmatpush.bf16.msra.mxu0 %v1837_v11  ;;  %1350 = vmatpush.bf16.msra.mxu3 %v2221_v16  ;;  %v1889_v9 = vor.u32 %v2355_v62, %v1886_v1  ;;  %v2270_v11 = vld [vmem:[%s2626_s11 + $0x398] sm:$0xf0]  ;;  %v2017_v16 = vor.u32 %v2387_v6, %v2014_v7  ;;  %v2347_v26 = vld [vmem:[%s2626_s11 + $0x4c] sm:$0xf] }
  0x9d   : > { %v2379_v30 = vld [vmem:[%s2626_s11 + $0x14c] sm:$0xf]  ;;  %v1838_v39 = vld [vmem:[%s2626_s11 + $0x38] sm:$0xf0] }
  0x9e   : > { %1313 = vmatpush.bf16.msra.mxu1 %v1949_v29  ;;  %v2257_v29 = vor.u32 %v2447_v22, %v2254_v23  ;;  %v2407_v36 = vld [vmem:[%s2626_s11 + $0x22c] sm:$0xf]  ;;  %v1985_v40 = vor.u32 %v2379_v30, %v1982_v31  ;;  %v1966_v43 = vld [vmem:[%s2626_s11 + $0x138] sm:$0xf0]  ;;  %v311_v23 = vld [vmem:[#allocation2 + $0x40] sm:$0xff] }
  0x9f   : > { %1332 = vmatpush.bf16.msra.mxu2 %v2077_v17  ;;  %v2273_v17 = vor.u32 %v2451_v10, %v2270_v11  ;;  %v2375_v42 = vld [vmem:[%s2626_s11 + $0x12c] sm:$0xf]  ;;  %v2097_v44 = vor.u32 %v2407_v36, %v2094_v37  ;;  %v2222_v47 = vld [vmem:[%s2626_s11 + $0x338] sm:$0xf0]  ;;  %v315_v31 = vld [vmem:[#allocation2 + $0x60] sm:$0xff] }
  0xa0   : > { %1294 = vmatpush.bf16.msra.mxu0 %v1821_v28  ;;  %1351 = vmatpush.bf16.msra.mxu3 %v2205_v32  ;;  %v2001_v28 = vor.u32 %v2383_v18, %v1998_v19  ;;  %v2113_v32 = vor.u32 %v2411_v24, %v2110_v25  ;;  %v2439_v46 = vld [vmem:[%s2626_s11 + $0x32c] sm:$0xf]  ;;  %v1822_v51 = vld [vmem:[%s2626_s11 + $0x18] sm:$0xf0] }
  0xa1   : > { %1314 = vmatmul.bf16.vlgmr.msra.gmra.mxu1 %v2718_v63  ;;  %v2339_v50 = vld [vmem:[%s2626_s11 + $0xc] sm:$0xf]  ;;  %v1950_v59 = vld [vmem:[%s2626_s11 + $0x118] sm:$0xf0] }
  0xa2   : > { %1382 = vmatpush.bf16.msrb.mxu1 %v2065_v34  ;;  %1333 = vmatmul.bf16.vlgmr.msra.gmra.mxu2 %v2720_v0  ;;  %v2443_v34 = vld [vmem:[%s2626_s11 + $0x34c] sm:$0xf]  ;;  %v1825_v57 = vor.u32 %v2339_v50, %v1822_v51  ;;  %v2206_v1 = vld [vmem:[%s2626_s11 + $0x318] sm:$0xf0] }
  0xa3   : > { %1401 = vmatpush.bf16.msrb.mxu2 %v2193_v21  ;;  %1295 = vmatmul.bf16.vlgmr.msra.gmra.mxu0 %v2713_v58  ;;  %v1873_v21 = vor.u32 %v2351_v14, %v1870_v15  ;;  %v2371_v55 = vld [vmem:[%s2626_s11 + $0x10c] sm:$0xf] }
  0xa4   : > { %1363 = vmatpush.bf16.msrb.mxu0 %v1937_v33  ;;  %1420 = vmatpush.bf16.msrb.mxu3 %v2321_v35  ;;  %v1857_v33 = vor.u32 %v2347_v26, %v1854_v27  ;;  %v2238_v35 = vld [vmem:[%s2626_s11 + $0x358] sm:$0xf0]  ;;  %v2435_v62 = vld [vmem:[%s2626_s11 + $0x30c] sm:$0xf] }
  0xa5   : > { %1352 = vmatmul.bf16.vlgmr.msra.gmra.mxu3 %v2724_v3  ;;  %v308_v51 = vld [vmem:[#allocation2 + $0x68] sm:$0xff] }
  0xa6   : > { %1383 = vmatpush.bf16.msrb.mxu1 %v2049_v48  ;;  %v2403_v48 = vld [vmem:[%s2626_s11 + $0x20c] sm:$0xf] }
  0xa7   : > { %1402 = vmatpush.bf16.msrb.mxu2 %v2177_v38  ;;  %v2343_v38 = vld [vmem:[%s2626_s11 + $0x2c] sm:$0xf] }
  0xa8   : > { %1364 = vmatpush.bf16.msrb.mxu0 %v1921_v41  ;;  %1421 = vmatpush.bf16.msrb.mxu3 %v2305_v49  ;;  %v2241_v41 = vor.u32 %v2443_v34, %v2238_v35  ;;  %v1841_v45 = vor.u32 %v2343_v38, %v1838_v39  ;;  %v2078_v49 = vld [vmem:[%s2626_s11 + $0x218] sm:$0xf0] }
  0xa9   : > { %v2081_v56 = vor.u32 %v2403_v48, %v2078_v49 }
  0xaa   : > { %1384 = vmatpush.bf16.msrb.mxu1 %v2033_v4  ;;  %v1953_v4 = vor.u32 %v2371_v55, %v1950_v59 }
  0xab   : > { %1403 = vmatpush.bf16.msrb.mxu2 %v2161_v52  ;;  %v1969_v52 = vor.u32 %v2375_v42, %v1966_v43  ;;  %v304_v42 = vld [vmem:[#allocation2] sm:$0xff] }
  0xac   : > { %1365 = vmatpush.bf16.msrb.mxu0 %v1905_v53  ;;  %1422 = vmatpush.bf16.msrb.mxu3 %v2289_v5  ;;  %v2225_v53 = vor.u32 %v2439_v46, %v2222_v47  ;;  %v2209_v5 = vor.u32 %v2435_v62, %v2206_v1 }
  0xae   : > { %1385 = vmatpush.bf16.msrb.mxu1 %v2017_v16 }
  0xaf   : > { %1404 = vmatpush.bf16.msrb.mxu2 %v2145_v8 }
  0xb0   : > { %1366 = vmatpush.bf16.msrb.mxu0 %v1889_v9  ;;  %1423 = vmatpush.bf16.msrb.mxu3 %v2273_v17 }
  0xb1   : > { %1319 = vmatmul.bf16.gmra.mxu1 %v2770_v60 }
  0xb2   : > { %1386 = vmatpush.bf16.msrb.mxu1 %v2001_v28  ;;  %1338 = vmatmul.bf16.gmra.mxu2 %v2772_v61 }
  0xb3   : > { %1405 = vmatpush.bf16.msrb.mxu2 %v2129_v20  ;;  %1300 = vmatmul.bf16.gmra.mxu0 %v2765_v54 }
  0xb4   : > { %1367 = vmatpush.bf16.msrb.mxu0 %v1873_v21  ;;  %1424 = vmatpush.bf16.msrb.mxu3 %v2257_v29 }
  0xb5   : > { %1357 = vmatmul.bf16.gmra.mxu3 %v2776_v2 }
  0xb6   : > { %1387 = vmatpush.bf16.msrb.mxu1 %v1985_v40 }
  0xb7   : > { %1406 = vmatpush.bf16.msrb.mxu2 %v2113_v32 }
  0xb8   : > { %1368 = vmatpush.bf16.msrb.mxu0 %v1857_v33  ;;  %1425 = vmatpush.bf16.msrb.mxu3 %v2241_v41 }
  0xba   : > { %1388 = vmatpush.bf16.msrb.mxu1 %v1969_v52 }
  0xbb   : > { %1407 = vmatpush.bf16.msrb.mxu2 %v2097_v44 }
  0xbc   : > { %1369 = vmatpush.bf16.msrb.mxu0 %v1841_v45  ;;  %1426 = vmatpush.bf16.msrb.mxu3 %v2225_v53 }
  0xbe   : > { %1389 = vmatpush.bf16.msrb.mxu1 %v1953_v4  ;;  %v312_v4 = vld [vmem:[#allocation2 + $0x20] sm:$0xff] }
  0xbf   : > { %1408 = vmatpush.bf16.msrb.mxu2 %v2081_v56 }
  0xc0   : > { %1370 = vmatpush.bf16.msrb.mxu0 %v1825_v57  ;;  %1427 = vmatpush.bf16.msrb.mxu3 %v2209_v5 }
  0xc1   : > { %1390 = vmatmul.bf16.vlgmr.msrb.gmra.mxu1 %v2718_v63  ;;  %v303_v63 = vld [vmem:[#allocation2 + $0x30] sm:$0xff] }
  0xc2   : > { %1409 = vmatmul.bf16.vlgmr.msrb.gmra.mxu2 %v2720_v0 }
  0xc3   : > { %1371 = vmatmul.bf16.vlgmr.msrb.gmra.mxu0 %v2713_v58 }
  0xc5   : > { %1428 = vmatmul.bf16.vlgmr.msrb.gmra.mxu3 %v2724_v3 }
  0xd1   : > { %1395 = vmatmul.bf16.gmra.mxu1 %v2770_v60 }
  0xd2   : > { %1414 = vmatmul.bf16.gmra.mxu2 %v2772_v61  ;;  %v307_v61 = vld [vmem:[#allocation2 + $0x50] sm:$0xff] }
  0xd3   : > { %1376 = vmatmul.bf16.gmra.mxu0 %v2765_v54 }
  0xd5   : > { %1433 = vmatmul.bf16.gmra.mxu3 %v2776_v2 }
  0xde   : > { %v1144_v6 = vpop.f32.mrf.mxu0  ;;  %v1163_v7 = vpop.f32.mrf.mxu1 }
  0xdf   : > { %v1164_v8 = vadd.f32 %v1163_v7, %v1144_v6 }
  0xe5   : > { %v1182_v9 = vpop.f32.mrf.mxu2 }
  0xe6   : > { %v1183_v10 = vadd.f32 %v1182_v9, %v1164_v8  ;;  %v1201_v58 = vpop.f32.mrf.mxu3  ;;  %v1146_v11 = vpop.f32.mrf.mxu0 }
  0xe7   : > { %v1165_v12 = vpop.f32.mrf.mxu1 }
  0xe8   : > { %v1202_v0 = vadd.f32 %v1201_v58, %v1183_v10  ;;  %v1166_v3 = vadd.f32 %v1165_v12, %v1146_v11 }
  0xea   : > { %v1439_v13 = vadd.f32 %v1202_v0, %v303_v63  ;;  %v316_v63 = vld [vmem:[#allocation2 + $0x70] sm:$0xff] }
  0xec   : > { %1455 = vst [vmem:[#allocation2 + $0x30] sm:$0xff] %v1439_v13 }
  0xed   : > { %v1184_v54 = vpop.f32.mrf.mxu2 }
  0xee   : > { %v1185_v14 = vadd.f32 %v1184_v54, %v1166_v3  ;;  %v1203_v60 = vpop.f32.mrf.mxu3  ;;  %v1149_v15 = vpop.f32.mrf.mxu0 }
  0xef   : > { %v1168_v16 = vpop.f32.mrf.mxu1 }
  0xf0   : > { %v1204_v2 = vadd.f32 %v1203_v60, %v1185_v14  ;;  %v1169_v18 = vadd.f32 %v1168_v16, %v1149_v15 }
  0xf2   : > { %v1443_v17 = vadd.f32 %v1204_v2, %v307_v61  ;;  %v305_v61 = vld [vmem:[#allocation2 + $0x58] sm:$0xff] }
  0xf4   : > { %1459 = vst [vmem:[#allocation2 + $0x50] sm:$0xff] %v1443_v17 }
  0xf5   : > { %v1187_v19 = vpop.f32.mrf.mxu2 }
  0xf6   : > { %v1188_v20 = vadd.f32 %v1187_v19, %v1169_v18  ;;  %v1206_v21 = vpop.f32.mrf.mxu3  ;;  %v1151_v22 = vpop.f32.mrf.mxu0 }
  0xf7   : > { %v1170_v24 = vpop.f32.mrf.mxu1 }
  0xf8   : > { %v1207_v25 = vadd.f32 %v1206_v21, %v1188_v20  ;;  %v1171_v27 = vadd.f32 %v1170_v24, %v1151_v22 }
  0xfa   : > { %v1447_v26 = vadd.f32 %v1207_v25, %v311_v23  ;;  %v309_v23 = vld [vmem:[#allocation2 + $0x8] sm:$0xff] }
  0xfc   : > { %1463 = vst [vmem:[#allocation2 + $0x40] sm:$0xff] %v1447_v26 }
  0xfd   : > { %v1189_v28 = vpop.f32.mrf.mxu2 }
  0xfe   : > { %v1190_v29 = vadd.f32 %v1189_v28, %v1171_v27  ;;  %v1208_v30 = vpop.f32.mrf.mxu3 }
  0xff   : > { %v1239_v33 = vpop.f32.mrf.mxu1 }
 0x100   : > { %v1220_v32 = vpop.f32.mrf.mxu0  ;;  %v1209_v34 = vadd.f32 %v1208_v30, %v1190_v29 }
 0x101   : > { %v1240_v36 = vadd.f32 %v1239_v33, %v1220_v32  ;;  %v313_v32 = vld [vmem:[#allocation2 + $0x10] sm:$0xff] }
 0x102   : > { %v1451_v35 = vadd.f32 %v1209_v34, %v315_v31 }
 0x104   : > { %1467 = vst [vmem:[#allocation2 + $0x60] sm:$0xff] %v1451_v35 }
 0x105   : > { %v1258_v37 = vpop.f32.mrf.mxu2 }
 0x106   : > { %v1259_v39 = vadd.f32 %v1258_v37, %v1240_v36 }
 0x107   : > { %v1241_v41 = vpop.f32.mrf.mxu1 }
 0x108   : > { %v1277_v38 = vpop.f32.mrf.mxu3  ;;  %v1222_v40 = vpop.f32.mrf.mxu0 }
 0x109   : > { %v1278_v43 = vadd.f32 %v1277_v38, %v1259_v39  ;;  %v1242_v45 = vadd.f32 %v1241_v41, %v1222_v40  ;;  %v317_v41 = vld [vmem:[#allocation2 + $0x78] sm:$0xff] }
 0x10b   : > { %v1440_v44 = vadd.f32 %v1278_v43, %v304_v42 }
 0x10d   : > { %1456 = vst [vmem:[#allocation2] sm:$0xff] %v1440_v44  ;;  %v1260_v46 = vpop.f32.mrf.mxu2 }
 0x10e   : > { %v1261_v48 = vadd.f32 %v1260_v46, %v1242_v45 }
 0x10f   : > { %v1244_v50 = vpop.f32.mrf.mxu1 }
 0x110   : > { %v1279_v47 = vpop.f32.mrf.mxu3  ;;  %v1225_v49 = vpop.f32.mrf.mxu0 }
 0x111   : > { %v1280_v52 = vadd.f32 %v1279_v47, %v1261_v48  ;;  %v1245_v55 = vadd.f32 %v1244_v50, %v1225_v49  ;;  %v306_v50 = vld [vmem:[#allocation2 + $0x18] sm:$0xff] }
 0x113   : > { %v1444_v53 = vadd.f32 %v1280_v52, %v308_v51 }
 0x115   : > { %1460 = vst [vmem:[#allocation2 + $0x68] sm:$0xff] %v1444_v53  ;;  %v1263_v56 = vpop.f32.mrf.mxu2 }
 0x116   : > { %v1264_v59 = vadd.f32 %v1263_v56, %v1245_v55 }
 0x117   : > { %v1246_v1 = vpop.f32.mrf.mxu1 }
 0x118   : > { %v1282_v57 = vpop.f32.mrf.mxu3  ;;  %v1227_v62 = vpop.f32.mrf.mxu0 }
 0x119   : > { %v1283_v5 = vadd.f32 %v1282_v57, %v1264_v59  ;;  %v1247_v7 = vadd.f32 %v1246_v1, %v1227_v62  ;;  %v310_v59 = vld [vmem:[#allocation2 + $0x48] sm:$0xff] }
 0x11b   : > { %v1448_v6 = vadd.f32 %v1283_v5, %v312_v4 }
 0x11d   : > { %1464 = vst [vmem:[#allocation2 + $0x20] sm:$0xff] %v1448_v6  ;;  %v1265_v8 = vpop.f32.mrf.mxu2 }
 0x11e   : > { %v1266_v10 = vadd.f32 %v1265_v8, %v1247_v7 }
 0x11f   : > { %v1315_v11 = vpop.f32.mrf.mxu1 }
 0x120   : > { %v1284_v9 = vpop.f32.mrf.mxu3  ;;  %v1296_v58 = vpop.f32.mrf.mxu0 }
 0x121   : > { %v1285_v12 = vadd.f32 %v1284_v9, %v1266_v10  ;;  %v1316_v13 = vadd.f32 %v1315_v11, %v1296_v58  ;;  %v314_v10 = vld [vmem:[#allocation2 + $0x38] sm:$0xff] }
 0x123   : > { %v1452_v0 = vadd.f32 %v1285_v12, %v316_v63 }
 0x125   : > { %1468 = vst [vmem:[#allocation2 + $0x70] sm:$0xff] %v1452_v0  ;;  %v1334_v3 = vpop.f32.mrf.mxu2 }
 0x126   : > { %v1335_v14 = vadd.f32 %v1334_v3, %v1316_v13 }
 0x127   : > { %v1317_v15 = vpop.f32.mrf.mxu1 }
 0x128   : > { %v1353_v54 = vpop.f32.mrf.mxu3  ;;  %v1298_v60 = vpop.f32.mrf.mxu0 }
 0x129   : > { %v1354_v16 = vadd.f32 %v1353_v54, %v1335_v14  ;;  %v1318_v17 = vadd.f32 %v1317_v15, %v1298_v60  ;;  %v318_v54 = vld [vmem:[#allocation2 + $0x28] sm:$0xff] }
 0x12b   : > { %v1441_v2 = vadd.f32 %v1354_v16, %v305_v61 }
 0x12d   : > { %1457 = vst [vmem:[#allocation2 + $0x58] sm:$0xff] %v1441_v2  ;;  %v1336_v18 = vpop.f32.mrf.mxu2 }
 0x12e   : > { %v1337_v20 = vadd.f32 %v1336_v18, %v1318_v17 }
 0x12f   : > { %v1320_v22 = vpop.f32.mrf.mxu1 }
 0x130   : > { %v1355_v19 = vpop.f32.mrf.mxu3  ;;  %v1301_v21 = vpop.f32.mrf.mxu0 }
 0x131   : > { %v1356_v24 = vadd.f32 %v1355_v19, %v1337_v20  ;;  %v1321_v26 = vadd.f32 %v1320_v22, %v1301_v21 }
 0x133   : > { %v1445_v25 = vadd.f32 %v1356_v24, %v309_v23 }
 0x135   : > { %1461 = vst [vmem:[#allocation2 + $0x8] sm:$0xff] %v1445_v25  ;;  %v1339_v27 = vpop.f32.mrf.mxu2 }
 0x136   : > { %v1340_v29 = vadd.f32 %v1339_v27, %v1321_v26 }
 0x137   : > { %v1322_v31 = vpop.f32.mrf.mxu1 }
 0x138   : > { %v1358_v28 = vpop.f32.mrf.mxu3  ;;  %v1303_v30 = vpop.f32.mrf.mxu0 }
 0x139   : > { %v1359_v33 = vadd.f32 %v1358_v28, %v1340_v29  ;;  %v1323_v35 = vadd.f32 %v1322_v31, %v1303_v30 }
 0x13b   : > { %v1449_v34 = vadd.f32 %v1359_v33, %v313_v32 }
 0x13d   : > { %1465 = vst [vmem:[#allocation2 + $0x10] sm:$0xff] %v1449_v34  ;;  %v1341_v36 = vpop.f32.mrf.mxu2 }
 0x13e   : > { %v1342_v38 = vadd.f32 %v1341_v36, %v1323_v35 }
 0x13f   : > { %v1391_v40 = vpop.f32.mrf.mxu1 }
 0x140   : > { %v1360_v37 = vpop.f32.mrf.mxu3  ;;  %v1372_v39 = vpop.f32.mrf.mxu0 }
 0x141   : > { %v1361_v42 = vadd.f32 %v1360_v37, %v1342_v38  ;;  %v1392_v44 = vadd.f32 %v1391_v40, %v1372_v39 }
 0x143   : > { %v1453_v43 = vadd.f32 %v1361_v42, %v317_v41 }
 0x145   : > { %1469 = vst [vmem:[#allocation2 + $0x78] sm:$0xff] %v1453_v43  ;;  %v1410_v45 = vpop.f32.mrf.mxu2 }
 0x146   : > { %v1411_v47 = vadd.f32 %v1410_v45, %v1392_v44 }
 0x147   : > { %v1393_v49 = vpop.f32.mrf.mxu1 }
 0x148   : > { %v1429_v46 = vpop.f32.mrf.mxu3  ;;  %v1374_v48 = vpop.f32.mrf.mxu0 }
 0x149   : > { %v1430_v51 = vadd.f32 %v1429_v46, %v1411_v47  ;;  %v1394_v53 = vadd.f32 %v1393_v49, %v1374_v48 }
 0x14b   : > { %v1442_v52 = vadd.f32 %v1430_v51, %v306_v50 }
 0x14d   : > { %1458 = vst [vmem:[#allocation2 + $0x18] sm:$0xff] %v1442_v52  ;;  %v1412_v55 = vpop.f32.mrf.mxu2 }
 0x14e   : > { %v1413_v57 = vadd.f32 %v1412_v55, %v1394_v53 }
 0x14f   : > { %v1396_v1 = vpop.f32.mrf.mxu1 }
 0x150   : > { %v1431_v56 = vpop.f32.mrf.mxu3  ;;  %v1377_v62 = vpop.f32.mrf.mxu0 }
 0x151   : > { %v1432_v4 = vadd.f32 %v1431_v56, %v1413_v57  ;;  %v1397_v6 = vadd.f32 %v1396_v1, %v1377_v62 }
 0x153   : > { %v1446_v5 = vadd.f32 %v1432_v4, %v310_v59 }
 0x155   : > { %1462 = vst [vmem:[#allocation2 + $0x48] sm:$0xff] %v1446_v5  ;;  %v1415_v7 = vpop.f32.mrf.mxu2 }
 0x156   : > { %v1416_v9 = vadd.f32 %v1415_v7, %v1397_v6 }
 0x157   : > { %v1398_v63 = vpop.f32.mrf.mxu1 }
 0x158   : > { %v1434_v8 = vpop.f32.mrf.mxu3  ;;  %v1379_v11 = vpop.f32.mrf.mxu0 }
 0x159   : > { %v1435_v58 = vadd.f32 %v1434_v8, %v1416_v9  ;;  %v1399_v0 = vadd.f32 %v1398_v63, %v1379_v11 }
 0x15b   : > { %v1450_v12 = vadd.f32 %v1435_v58, %v314_v10 }
 0x15d   : > { %1466 = vst [vmem:[#allocation2 + $0x38] sm:$0xff] %v1450_v12  ;;  %v1417_v13 = vpop.f32.mrf.mxu2 }
 0x15e   : > { %v1418_v3 = vadd.f32 %v1417_v13, %v1399_v0 }
 0x160   : > { %v1436_v14 = vpop.f32.mrf.mxu3 }
 0x161   : > { %v1437_v60 = vadd.f32 %v1436_v14, %v1418_v3  ;;  %1474 = sbr.rel (%p2322_p12) target bundleno = 397 (0x18d), region = 67 }
 0x163   : > { %v1454_v15 = vadd.f32 %v1437_v60, %v318_v54 }
 0x165   : > { %1470 = vst [vmem:[#allocation2 + $0x28] sm:$0xff] %v1454_v15 }
 0x166   : > { %v1475_v61 = vld [vmem:[#allocation2 + $0x30] sm:$0xff]  ;;  %v1491_v16 = vld [vmem:[%s3057_s2] sm:$0xf]  ;;  %v1477_v19 = vld [vmem:[#allocation2 + $0x58] sm:$0xff]  ;;  %vm1652_vm0 = vcmask 1040384   ;;  %vm1665_vm1 = vcmask 1041408  }
 0x167   : > { %v1476_v2 = vld [vmem:[#allocation2] sm:$0xff]  ;;  %v2958_v17 = vperm.slane %v1491_v16, 0  ;;  %v2960_v18 = vperm.slane %v1491_v16, 1  ;;  %v2962_v20 = vperm.slane %v1491_v16, 2  ;;  %v1478_v21 = vld [vmem:[#allocation2 + $0x18] sm:$0xff]  ;;  %v2964_v22 = vperm.slane %v1491_v16, 3 }
 0x168   : > { %v1479_v23 = vld [vmem:[#allocation2 + $0x50] sm:$0xff]  ;;  %v1480_v24 = vld [vmem:[#allocation2 + $0x68] sm:$0xff]  ;;  %v1483_v39 = vld [vmem:[#allocation2 + $0x40] sm:$0xff]  ;;  %vm1667_vm2 = vcmask 1045508   ;;  %vm1669_vm3 = vcmask 1043456  }
 0x169   : > { %v1481_v25 = vld [vmem:[#allocation2 + $0x8] sm:$0xff]  ;;  %v1501_v26 = vadd.f32 %v2958_v17, %v1475_v61  ;;  %v1502_v27 = vadd.f32 %v2960_v18, %v1476_v2  ;;  %v1503_v28 = vadd.f32 %v2962_v20, %v1477_v19  ;;  %v1504_v29 = vadd.f32 %v2964_v22, %v1478_v21  ;;  %v1484_v40 = vld [vmem:[#allocation2 + $0x20] sm:$0xff]  ;;  %v1485_v45 = vld [vmem:[#allocation2 + $0x10] sm:$0xff] }
 0x16a   : > { %v1482_v30 = vld [vmem:[#allocation2 + $0x48] sm:$0xff]  ;;  %v1505_v31 = vadd.f32 %v2958_v17, %v1479_v23  ;;  %v1506_v32 = vadd.f32 %v2960_v18, %v1480_v24  ;;  %v1507_v33 = vadd.f32 %v2962_v20, %v1481_v25  ;;  %v1486_v46 = vld [vmem:[#allocation2 + $0x38] sm:$0xff]  ;;  %v1509_v53 = vadd.f32 %v2958_v17, %v1483_v39  ;;  %v1487_v1 = vld [vmem:[#allocation2 + $0x60] sm:$0xff] }
 0x16b   : > { %v1508_v34 = vadd.f32 %v2964_v22, %v1482_v30  ;;  %1517 = vst [vmem:[%s3058_s3] sm:$0xff] %v1501_v26  ;;  %v1600_v35 = vmul.f32 %v1501_v26, %v1501_v26  ;;  %v1601_v36 = vmul.f32 %v1502_v27, %v1502_v27  ;;  %v1602_v37 = vmul.f32 %v1503_v28, %v1503_v28  ;;  %v1488_v4 = vld [vmem:[#allocation2 + $0x70] sm:$0xff]  ;;  %v1489_v9 = vld [vmem:[#allocation2 + $0x78] sm:$0xff] }
 0x16c   : > { %v1603_v38 = vmul.f32 %v1504_v29, %v1504_v29  ;;  %1518 = vst [vmem:[%s3058_s3 + $0x8] sm:$0xff] %v1502_v27  ;;  %v1564_v41 = vadd.f32 %v1505_v31, %v1501_v26  ;;  %v1604_v42 = vmul.f32 %v1505_v31, %v1505_v31  ;;  %v1573_v43 = vadd.f32 %v1506_v32, %v1502_v27  ;;  %v1490_v10 = vld [vmem:[#allocation2 + $0x28] sm:$0xff] }
 0x16d   : > { %v1605_v44 = vmul.f32 %v1506_v32, %v1506_v32  ;;  %1519 = vst [vmem:[%s3058_s3 + $0x10] sm:$0xff] %v1503_v28  ;;  %v1582_v47 = vadd.f32 %v1507_v33, %v1503_v28  ;;  %v1606_v48 = vmul.f32 %v1507_v33, %v1507_v33  ;;  %v1591_v49 = vadd.f32 %v1508_v34, %v1504_v29 }
 0x16e   : > { %v1607_v50 = vmul.f32 %v1508_v34, %v1508_v34  ;;  %1520 = vst [vmem:[%s3058_s3 + $0x18] sm:$0xff] %v1504_v29  ;;  %v1616_v51 = vadd.f32 %v1604_v42, %v1600_v35  ;;  %v1510_v55 = vadd.f32 %v2960_v18, %v1484_v40  ;;  %v1511_v59 = vadd.f32 %v2962_v20, %v1485_v45 }
 0x16f   : > { %v1625_v52 = vadd.f32 %v1605_v44, %v1601_v36  ;;  %1521 = vst [vmem:[%s3058_s3 + $0x20] sm:$0xff] %v1505_v31  ;;  %v1634_v56 = vadd.f32 %v1606_v48, %v1602_v37  ;;  %v1512_v62 = vadd.f32 %v2964_v22, %v1486_v46  ;;  %v1565_v5 = vadd.f32 %v1564_v41, %v1509_v53 }
 0x170   : > { %v1643_v57 = vadd.f32 %v1607_v50, %v1603_v38  ;;  %1522 = vst [vmem:[%s3058_s3 + $0x28] sm:$0xff] %v1506_v32  ;;  %v1608_v6 = vmul.f32 %v1509_v53, %v1509_v53  ;;  %v1574_v7 = vadd.f32 %v1573_v43, %v1510_v55  ;;  %v1609_v8 = vmul.f32 %v1510_v55, %v1510_v55 }
 0x171   : > { %1523 = vst [vmem:[%s3058_s3 + $0x30] sm:$0xff] %v1507_v33  ;;  %v1583_v58 = vadd.f32 %v1582_v47, %v1511_v59  ;;  %v1610_v11 = vmul.f32 %v1511_v59, %v1511_v59  ;;  %v1592_v63 = vadd.f32 %v1591_v49, %v1512_v62  ;;  %v1611_v12 = vmul.f32 %v1512_v62, %v1512_v62 }
 0x172   : > { %1524 = vst [vmem:[%s3058_s3 + $0x38] sm:$0xff] %v1508_v34  ;;  %v1617_v0 = vadd.f32 %v1616_v51, %v1608_v6  ;;  %v1626_v13 = vadd.f32 %v1625_v52, %v1609_v8  ;;  %v1513_v3 = vadd.f32 %v2958_v17, %v1487_v1  ;;  %v1514_v54 = vadd.f32 %v2960_v18, %v1488_v4 }
 0x173   : > { %1525 = vst [vmem:[%s3058_s3 + $0x40] sm:$0xff] %v1509_v53  ;;  %v1635_v14 = vadd.f32 %v1634_v56, %v1610_v11  ;;  %v1644_v60 = vadd.f32 %v1643_v57, %v1611_v12  ;;  %v1515_v15 = vadd.f32 %v2962_v20, %v1489_v9  ;;  %v1516_v61 = vadd.f32 %v2964_v22, %v1490_v10 }
 0x174   : > { %1526 = vst [vmem:[%s3058_s3 + $0x48] sm:$0xff] %v1510_v55  ;;  %v1566_v16 = vadd.f32 %v1565_v5, %v1513_v3  ;;  %v1612_v2 = vmul.f32 %v1513_v3, %v1513_v3  ;;  %v1575_v19 = vadd.f32 %v1574_v7, %v1514_v54  ;;  %v1613_v17 = vmul.f32 %v1514_v54, %v1514_v54 }
 0x175   : > { %1527 = vst [vmem:[%s3058_s3 + $0x50] sm:$0xff] %v1511_v59  ;;  %v1584_v18 = vadd.f32 %v1583_v58, %v1515_v15  ;;  %v1614_v21 = vmul.f32 %v1515_v15, %v1515_v15  ;;  %v1593_v23 = vadd.f32 %v1592_v63, %v1516_v61  ;;  %v1615_v24 = vmul.f32 %v1516_v61, %v1516_v61 }
 0x176   : > { %1528 = vst [vmem:[%s3058_s3 + $0x58] sm:$0xff] %v1512_v62  ;;  %v1567_v20 = vrot.slane %v1566_v16, 4  ;;  %v1618_v22 = vadd.f32 %v1617_v0, %v1612_v2  ;;  %v1576_v25 = vrot.slane %v1575_v19, 4  ;;  %v1627_v26 = vadd.f32 %v1626_v13, %v1613_v17  ;;  %v1657_v17 = vld [vmem:[%s3059_s4] sm:$0xff] }
 0x177   : > { %1529 = vst [vmem:[%s3058_s3 + $0x60] sm:$0xff] %v1513_v3  ;;  %v1585_v27 = vrot.slane %v1584_v18, 4  ;;  %v1636_v28 = vadd.f32 %v1635_v14, %v1614_v21  ;;  %v1594_v29 = vrot.slane %v1593_v23, 4  ;;  %v1645_v30 = vadd.f32 %v1644_v60, %v1615_v24 }
 0x178   : > { %v1568_v31 = vadd.f32 %v1567_v20, %v1566_v16  ;;  %v1619_v32 = vrot.slane %v1618_v22, 4  ;;  %1530 = vst [vmem:[%s3058_s3 + $0x68] sm:$0xff] %v1514_v54  ;;  %v1577_v33 = vadd.f32 %v1576_v25, %v1575_v19  ;;  %v1628_v34 = vrot.slane %v1627_v26, 4 }
 0x179   : > { %1531 = vst [vmem:[%s3058_s3 + $0x70] sm:$0xff] %v1515_v15  ;;  %v1586_v35 = vadd.f32 %v1585_v27, %v1584_v18  ;;  %v1637_v36 = vrot.slane %v1636_v28, 4  ;;  %v1595_v37 = vadd.f32 %v1594_v29, %v1593_v23  ;;  %v1646_v38 = vrot.slane %v1645_v30, 4 }
 0x17a   : > { %v1569_v39 = vrot.slane %v1568_v31, 2  ;;  %v1620_v40 = vadd.f32 %v1619_v32, %v1618_v22  ;;  %v1578_v41 = vrot.slane %v1577_v33, 2  ;;  %v1629_v42 = vadd.f32 %v1628_v34, %v1627_v26  ;;  %1532 = vst [vmem:[%s3058_s3 + $0x78] sm:$0xff] %v1516_v61 }
 0x17b   : > { %v1587_v43 = vrot.slane %v1586_v35, 2  ;;  %v1638_v44 = vadd.f32 %v1637_v36, %v1636_v28  ;;  %v1596_v45 = vrot.slane %v1595_v37, 2  ;;  %v1647_v46 = vadd.f32 %v1646_v38, %v1645_v30 }
 0x17c   : > { %v1570_v47 = vadd.f32 %v1569_v39, %v1568_v31  ;;  %v1621_v48 = vrot.slane %v1620_v40, 2  ;;  %v1579_v49 = vadd.f32 %v1578_v41, %v1577_v33  ;;  %v1630_v50 = vrot.slane %v1629_v42, 2 }
 0x17d   : > { %v1588_v51 = vadd.f32 %v1587_v43, %v1586_v35  ;;  %v1639_v52 = vrot.slane %v1638_v44, 2  ;;  %v1597_v53 = vadd.f32 %v1596_v45, %v1595_v37  ;;  %v1648_v55 = vrot.slane %v1647_v46, 2 }
 0x17e   : > { %v1580_v56 = vrot.slane %v1579_v49, 1  ;;  %v1631_v57 = vadd.f32 %v1630_v50, %v1629_v42  ;;  %v1571_v59 = vrot.slane %v1570_v47, 1  ;;  %v1622_v62 = vadd.f32 %v1621_v48, %v1620_v40 }
 0x17f   : > { %v1589_v1 = vrot.slane %v1588_v51, 1  ;;  %v1640_v4 = vadd.f32 %v1639_v52, %v1638_v44  ;;  %v1598_v5 = vrot.slane %v1597_v53, 1  ;;  %v1649_v6 = vadd.f32 %v1648_v55, %v1647_v46 }
 0x180   : > { %v1572_v7 = vadd.f32 %v1571_v59, %v1570_v47  ;;  %v1581_v8 = vadd.f32 %v1580_v56, %v1579_v49  ;;  %v1623_v9 = vrot.slane %v1622_v62, 1  ;;  %v1632_v10 = vrot.slane %v1631_v57, 1 }
 0x181   : > { %v1590_v58 = vadd.f32 %v1589_v1, %v1588_v51  ;;  %v1599_v11 = vadd.f32 %v1598_v5, %v1597_v53  ;;  %v1641_v63 = vrot.slane %v1640_v4, 1  ;;  %v1650_v12 = vrot.slane %v1649_v6, 1 }
 0x182   : > { %v1624_v0 = vadd.f32 %v1623_v9, %v1622_v62  ;;  %v1633_v13 = vadd.f32 %v1632_v10, %v1631_v57 }
 0x183   : > { %v1642_v3 = vadd.f32 %v1641_v63, %v1640_v4  ;;  %v1651_v54 = vadd.f32 %v1650_v12, %v1649_v6 }
 0x184   : > { %v1653_v14 = vsel %vm1652_vm0, %v1572_v7, %v1624_v0  ;;  %v1654_v60 = vsel %vm1652_vm0, %v1581_v8, %v1633_v13 }
 0x185   : > { %v1655_v15 = vsel %vm1652_vm0, %v1590_v58, %v1642_v3  ;;  %v1656_v61 = vsel %vm1652_vm0, %v1599_v11, %v1651_v54  ;;  %v1662_v16 = vrot.slane %v1654_v60, 6 }
 0x186   : > { %v1663_v2 = vrot.slane %v1655_v15, 4  ;;  %v1664_v19 = vrot.slane %v1656_v61, 2 }
 0x187   : > { %v1666_v18 = vsel %vm1665_vm1, %v1653_v14, %v1662_v16 }
 0x188   : > { %v1668_v21 = vsel %vm1667_vm2, %v1663_v2, %v1664_v19 }
 0x189   : > { %v1670_v23 = vsel %vm1669_vm3, %v1666_v18, %v1668_v21 }
 0x18a   : > { %v1672_v24 = vadd.f32 %v1670_v23, %v1657_v17 }
 0x18c   : > { %1673 = vst [vmem:[%s3059_s4] sm:$0xff] %v1672_v24 }
 0x18d PF: > { %s15_s19 = sadd.s32 1, %s2546_s19   ;;  %s3060_s15 = smov %s2534_s16 }
 0x18e   : > { %p12_p13 = scmp.ge.s32.totalorder %s15_s19, 10   ;;  %s3061_s16 = smov %s2610_s23 }
 0x18f   : > { %s3062_s17 = smov %s2542_s18  ;;  %s3063_s18 = smov %s3065_s20 }
 0x190   :  { %14 = sbr.rel (!%p12_p13) target bundleno = 3 (0x3), region = 113 }

// kernel: patch_discriminator.15
= control target key start
LH: loop header
LB: loop body
LE: loop exit
PB: predicated region body
PF: predicated region fallthrough
CT: control target
= control target key end

     0   :  { %s1070_s12 = smov 0   ;;  %s1072_s13 = smov 0   ;;  %s1204_s0 = inlined_call_operand.vmem [shape: bf16[32,8192], index: 0, kind: input, shape index: {}]   ;;  %s1205_s1 = inlined_call_operand.vmem [shape: bf16[8192,128], index: 1, kind: input, shape index: {}]   ;;  %s1206_s2 = inlined_call_operand.vmem [shape: f32[1,128], index: 2, kind: input, shape index: {}]   ;;  %s1207_s3 = inlined_call_operand.vmem [shape: f32[32,128], index: 3, kind: output, shape index: {}]  }
   0x1   :  { %s1074_s14 = smov 0   ;;  %s1076_s15 = smov 0  }
   0x2   :  { %s1078_s16 = smov 0  }
   0x3 LB: > { %s22_s17 = sadd.s32 1, %s1043_s15  ;;  %p41_p1 = scmp.ne.s32.totalorder %s1035_s13, %s1031_s12  ;;  %s1047_s16 = sphi %s1078_s16, %s13_s16   ;;  %s1043_s15 = sphi %s1076_s15, %s1211_s15   ;;  %s1039_s14 = sphi %s1074_s14, %s1210_s14   ;;  %s1035_s13 = sphi %s1072_s13, %s1209_s13   ;;  %s1031_s12 = sphi %s1070_s12, %s1208_s12  }
   0x4   : > { %p23_p0 = scmp.ge.s32.totalorder %s22_s17, 16  ;;  %p42_p2 = scmp.eq.s32.totalorder %s1047_s16, 0 }
   0x5   : > { %s34_s19 = sadd.s32 1, %s1035_s13  ;;  %p752_p5 = scmp.ge.s32.totalorder %s1047_s16, 16 }
   0x6   : > { %s1213_s17 = smov (%p23_p0, %s22_s17), 0  ;;  %p43_p3 = por %p42_p2, %p41_p1 }
   0x7   : > { %s30_s18 = ssub.s32 %s1043_s15, %s1213_s17  ;;  %143 = sbr.rel (%p752_p5) target bundleno = 24 (0x18), region = 20 }
   0x8   : > { %p32_p4 = scmp.eq.s32.totalorder %s30_s18, 0 }
   0xa   : > { %s1105_s20 = scalar_select %p32_p4, %s1035_s13, %s34_s19  }
   0xc   : > { %146 = sbr.rel (!%p43_p3) target bundleno = 24 (0x18), region = 24  ;;  %s148_s21 = sand.u32 (%p43_p3), 1, %s1035_s13  }
   0xd   : > { %s926_s22 = sshll.u32 (%p43_p3), %s1043_s15, 4  ;;  %s753_s23 = sshll.u32 (%p43_p3), %s148_s21, 6 }
   0xe   : > { %s156_s26 = scalar_lea.vmem (%p43_p3), %s1204_s0, %s926_s22  ;;  %s150_s27 = scalar_lea.vmem (%p43_p3), [#allocation3], %s753_s23 }
   0xf   : > { %v169_v0 = vld [vmem:[%s156_s26] sm:$0xff] (%p43_p3)  ;;  %v171_v1 = vld [vmem:[%s156_s26 + $0x8] sm:$0xff] (%p43_p3) }
  0x10   : > { %v173_v2 = vld [vmem:[%s156_s26 + $0x100] sm:$0xff] (%p43_p3)  ;;  %170 = vst [vmem:[%s150_s27] sm:$0xff] (%p43_p3), %v169_v0  ;;  %v175_v3 = vld [vmem:[%s156_s26 + $0x108] sm:$0xff] (%p43_p3) }
  0x11   : > { %172 = vst [vmem:[%s150_s27 + $0x8] sm:$0xff] %v171_v1  ;;  %v177_v4 = vld [vmem:[%s156_s26 + $0x200] sm:$0xff]  ;;  %v179_v5 = vld [vmem:[%s156_s26 + $0x208] sm:$0xff] }
  0x12   : > { %174 = vst [vmem:[%s150_s27 + $0x10] sm:$0xff] %v173_v2  ;;  %v181_v6 = vld [vmem:[%s156_s26 + $0x300] sm:$0xff]  ;;  %v183_v7 = vld [vmem:[%s156_s26 + $0x308] sm:$0xff] }
  0x13   : > { %176 = vst [vmem:[%s150_s27 + $0x18] sm:$0xff] %v175_v3 }
  0x14   : > { %178 = vst [vmem:[%s150_s27 + $0x20] sm:$0xff] %v177_v4 }
  0x15   : > { %180 = vst [vmem:[%s150_s27 + $0x28] sm:$0xff] %v179_v5 }
  0x16   : > { %182 = vst [vmem:[%s150_s27 + $0x30] sm:$0xff] %v181_v6 }
  0x17   : > { %184 = vst [vmem:[%s150_s27 + $0x38] sm:$0xff] %v183_v7 }
  0x18 PF: > { %p756_p6 = scmp.ge.s32.totalorder %s1047_s16, 1  ;;  %p198_p7 = scmp.lt.s32.totalorder %s1047_s16, 17 }
  0x1a   : > { %p199_p8 = pnand %p756_p6, %p198_p7 }
  0x1b   : > { %s205_s28 = sand.u32 (!%p199_p8), 1, %s1031_s12   ;;  %s758_s29 = sshll.u32 (!%p199_p8), %s1039_s14, 6 }
  0x1c   : > { %202 = sbr.rel (%p199_p8) target bundleno = 250 (0xfa), region = 51  ;;  %s757_s30 = sshll.u32 (!%p199_p8), %s205_s28, 6 }
  0x1d   : > { %p236_p9 = scmp.lt.s32.totalorder (!%p199_p8), %s758_s29, 1023  ;;  %s1122_s8 = scalar_lea.vmem (!%p199_p8), [#allocation3], %s757_s30 }
  0x1e   : > { %p760_p10 = scmp.ne.s32.totalorder (!%p199_p8), %s1039_s14, 0 }
  0x21   : > { %s1215_s29 = smov (!%p236_p9, %s758_s29), 1023  ;;  %250 = sbr.rel (%p760_p10) target bundleno = 43 (0x2b), region = 59 }
  0x22   : > { %s759_s4 = sshll.u32 %s1215_s29, 2 }
  0x23   : > { %s1120_s7 = scalar_lea.vmem %s1205_s1, %s759_s4 }
  0x26   : > { %v1049_v8 = vmov 0.0  }
  0x27   : > { %251 = vst [vmem:[#allocation2 + $0x10] sm:$0xff] %v1049_v8 }
  0x28   : > { %252 = vst [vmem:[#allocation2] sm:$0xff] %v1049_v8 }
  0x29   : > { %253 = vst [vmem:[#allocation2 + $0x18] sm:$0xff] %v1049_v8 }
  0x2a   : > { %254 = vst [vmem:[#allocation2 + $0x8] sm:$0xff] %v1049_v8 }
  0x2b PF: > { %v942_v9 = vld [vmem:[%s1120_s7 + $0x38] sm:$0xff]  ;;  %v941_v13 = vld [vmem:[%s1120_s7 + $0x30] sm:$0xff]  ;;  %v940_v17 = vld [vmem:[%s1120_s7 + $0x28] sm:$0xff]  ;;  %p921_p11 = scmp.ne.s32.totalorder %s1039_s14, 15 }
  0x2c   : > { %v950_v10 = vld [vmem:[%s1120_s7 + $0x78] sm:$0xff]  ;;  %563 = vmatpush.bf16.msra.mxu0 %v942_v9  ;;  %v949_v14 = vld [vmem:[%s1120_s7 + $0x70] sm:$0xff]  ;;  %v948_v18 = vld [vmem:[%s1120_s7 + $0x68] sm:$0xff] }
  0x2d   : > { %v958_v11 = vld [vmem:[%s1120_s7 + $0xb8] sm:$0xff]  ;;  %582 = vmatpush.bf16.msra.mxu1 %v950_v10  ;;  %v957_v15 = vld [vmem:[%s1120_s7 + $0xb0] sm:$0xff]  ;;  %v956_v19 = vld [vmem:[%s1120_s7 + $0xa8] sm:$0xff] }
  0x2e   : > { %v966_v12 = vld [vmem:[%s1120_s7 + $0xf8] sm:$0xff]  ;;  %601 = vmatpush.bf16.msra.mxu2 %v958_v11  ;;  %v965_v16 = vld [vmem:[%s1120_s7 + $0xf0] sm:$0xff]  ;;  %v964_v20 = vld [vmem:[%s1120_s7 + $0xe8] sm:$0xff] }
  0x2f   : > { %620 = vmatpush.bf16.msra.mxu3 %v966_v12  ;;  %v939_v21 = vld [vmem:[%s1120_s7 + $0x20] sm:$0xff]  ;;  %v938_v25 = vld [vmem:[%s1120_s7 + $0x18] sm:$0xff]  ;;  %v937_v29 = vld [vmem:[%s1120_s7 + $0x10] sm:$0xff] }
  0x30   : > { %564 = vmatpush.bf16.msra.mxu0 %v941_v13  ;;  %v947_v22 = vld [vmem:[%s1120_s7 + $0x60] sm:$0xff]  ;;  %v946_v26 = vld [vmem:[%s1120_s7 + $0x58] sm:$0xff]  ;;  %v945_v30 = vld [vmem:[%s1120_s7 + $0x50] sm:$0xff] }
  0x31   : > { %583 = vmatpush.bf16.msra.mxu1 %v949_v14  ;;  %v955_v23 = vld [vmem:[%s1120_s7 + $0xa0] sm:$0xff]  ;;  %v954_v27 = vld [vmem:[%s1120_s7 + $0x98] sm:$0xff]  ;;  %v953_v31 = vld [vmem:[%s1120_s7 + $0x90] sm:$0xff] }
  0x32   : > { %602 = vmatpush.bf16.msra.mxu2 %v957_v15  ;;  %v963_v24 = vld [vmem:[%s1120_s7 + $0xe0] sm:$0xff]  ;;  %v962_v28 = vld [vmem:[%s1120_s7 + $0xd8] sm:$0xff]  ;;  %v961_v32 = vld [vmem:[%s1120_s7 + $0xd0] sm:$0xff] }
  0x33   : > { %621 = vmatpush.bf16.msra.mxu3 %v965_v16  ;;  %v936_v33 = vld [vmem:[%s1120_s7 + $0x8] sm:$0xff]  ;;  %v935_v37 = vld [vmem:[%s1120_s7] sm:$0xff]  ;;  %v929_v42 = vld [vmem:[%s1122_s8 + $0xc] sm:$0xf0] }
  0x34   : > { %565 = vmatpush.bf16.msra.mxu0 %v940_v17  ;;  %v944_v34 = vld [vmem:[%s1120_s7 + $0x48] sm:$0xff]  ;;  %v943_v38 = vld [vmem:[%s1120_s7 + $0x40] sm:$0xff]  ;;  %v765_v44 = vld [vmem:[%s1122_s8 + $0x10] sm:$0xf0] }
  0x35   : > { %584 = vmatpush.bf16.msra.mxu1 %v948_v18  ;;  %v952_v35 = vld [vmem:[%s1120_s7 + $0x88] sm:$0xff]  ;;  %v951_v39 = vld [vmem:[%s1120_s7 + $0x80] sm:$0xff]  ;;  %v930_v46 = vld [vmem:[%s1122_s8 + $0x14] sm:$0xf0] }
  0x36   : > { %603 = vmatpush.bf16.msra.mxu2 %v956_v19  ;;  %v960_v36 = vld [vmem:[%s1120_s7 + $0xc8] sm:$0xff]  ;;  %v959_v40 = vld [vmem:[%s1120_s7 + $0xc0] sm:$0xff]  ;;  %v773_v48 = vld [vmem:[%s1122_s8 + $0x18] sm:$0xf0] }
  0x37   : > { %622 = vmatpush.bf16.msra.mxu3 %v964_v20  ;;  %v763_v41 = vld [vmem:[%s1122_s8] sm:$0xf]  ;;  %v927_v43 = vld [vmem:[%s1122_s8 + $0x4] sm:$0xf]  ;;  %v771_v45 = vld [vmem:[%s1122_s8 + $0x8] sm:$0xf] }
  0x38   : > { %566 = vmatpush.bf16.msra.mxu0 %v939_v21  ;;  %v928_v47 = vld [vmem:[%s1122_s8 + $0xc] sm:$0xf]  ;;  %v764_v49 = vor.u32 %v929_v42, %v763_v41  ;;  %v768_v50 = vor.u32 %v927_v43, %v765_v44  ;;  %v772_v51 = vor.u32 %v930_v46, %v771_v45  ;;  %v779_v53 = vld [vmem:[%s1122_s8 + $0x20] sm:$0xf]  ;;  %v933_v54 = vld [vmem:[%s1122_s8 + $0x2c] sm:$0xf0] }
  0x39   : > { %585 = vmatpush.bf16.msra.mxu1 %v947_v22  ;;  %v776_v52 = vor.u32 %v928_v47, %v773_v48  ;;  %v931_v55 = vld [vmem:[%s1122_s8 + $0x24] sm:$0xf]  ;;  %v781_v56 = vld [vmem:[%s1122_s8 + $0x30] sm:$0xf0]  ;;  %v787_v57 = vld [vmem:[%s1122_s8 + $0x28] sm:$0xf]  ;;  %v780_v61 = vor.u32 %v933_v54, %v779_v53 }
  0x3a   : > { %604 = vmatpush.bf16.msra.mxu2 %v955_v23  ;;  %v934_v58 = vld [vmem:[%s1122_s8 + $0x34] sm:$0xf0]  ;;  %v932_v59 = vld [vmem:[%s1122_s8 + $0x2c] sm:$0xf]  ;;  %v789_v60 = vld [vmem:[%s1122_s8 + $0x38] sm:$0xf0]  ;;  %v784_v62 = vor.u32 %v931_v55, %v781_v56 }
  0x3b   : > { %623 = vmatpush.bf16.msra.mxu3 %v963_v24  ;;  %v788_v63 = vor.u32 %v934_v58, %v787_v57  ;;  %v792_v0 = vor.u32 %v932_v59, %v789_v60  ;;  %v255_v9 = vld [vmem:[#allocation2 + $0x10] sm:$0xff]  ;;  %v256_v16 = vld [vmem:[#allocation2] sm:$0xff] }
  0x3c   : > { %567 = vmatpush.bf16.msra.mxu0 %v938_v25  ;;  %v257_v25 = vld [vmem:[#allocation2 + $0x18] sm:$0xff] }
  0x3d   : > { %586 = vmatpush.bf16.msra.mxu1 %v946_v26 }
  0x3e   : > { %605 = vmatpush.bf16.msra.mxu2 %v954_v27 }
  0x3f   : > { %624 = vmatpush.bf16.msra.mxu3 %v962_v28 }
  0x40   : > { %568 = vmatpush.bf16.msra.mxu0 %v937_v29 }
  0x41   : > { %587 = vmatpush.bf16.msra.mxu1 %v945_v30 }
  0x42   : > { %606 = vmatpush.bf16.msra.mxu2 %v953_v31 }
  0x43   : > { %625 = vmatpush.bf16.msra.mxu3 %v961_v32 }
  0x44   : > { %569 = vmatpush.bf16.msra.mxu0 %v936_v33  ;;  %v258_v33 = vld [vmem:[#allocation2 + $0x8] sm:$0xff] }
  0x45   : > { %588 = vmatpush.bf16.msra.mxu1 %v944_v34 }
  0x46   : > { %607 = vmatpush.bf16.msra.mxu2 %v952_v35 }
  0x47   : > { %626 = vmatpush.bf16.msra.mxu3 %v960_v36 }
  0x48   : > { %570 = vmatpush.bf16.msra.mxu0 %v935_v37 }
  0x49   : > { %589 = vmatpush.bf16.msra.mxu1 %v943_v38 }
  0x4a   : > { %608 = vmatpush.bf16.msra.mxu2 %v951_v39 }
  0x4b   : > { %627 = vmatpush.bf16.msra.mxu3 %v959_v40  ;;  %571 = vmatmul.bf16.vlgmr.msra.gmra.mxu0 %v764_v49 }
  0x4c   : > { %590 = vmatmul.bf16.vlgmr.msra.gmra.mxu1 %v768_v50 }
  0x4d   : > { %609 = vmatmul.bf16.vlgmr.msra.gmra.mxu2 %v772_v51 }
  0x4e   : > { %628 = vmatmul.bf16.vlgmr.msra.gmra.mxu3 %v776_v52 }
  0x5b   : > { %576 = vmatmul.bf16.gmra.mxu0 %v780_v61 }
  0x5c   : > { %595 = vmatmul.bf16.gmra.mxu1 %v784_v62 }
  0x5d   : > { %614 = vmatmul.bf16.gmra.mxu2 %v788_v63 }
  0x5e   : > { %633 = vmatmul.bf16.gmra.mxu3 %v792_v0 }
  0xc8   : > { %v572_v1 = vpop.f32.mrf.mxu0 }
  0xc9   : > { %v591_v2 = vpop.f32.mrf.mxu1 }
  0xca   : > { %v592_v3 = vadd.f32 %v591_v2, %v572_v1 }
  0xd0   : > { %v610_v4 = vpop.f32.mrf.mxu2  ;;  %v574_v7 = vpop.f32.mrf.mxu0 }
  0xd1   : > { %v629_v5 = vpop.f32.mrf.mxu3  ;;  %v611_v6 = vadd.f32 %v610_v4, %v592_v3  ;;  %v593_v8 = vpop.f32.mrf.mxu1 }
  0xd2   : > { %v594_v12 = vadd.f32 %v593_v8, %v574_v7 }
  0xd3   : > { %v630_v10 = vadd.f32 %v629_v5, %v611_v6 }
  0xd5   : > { %v639_v11 = vadd.f32 %v630_v10, %v255_v9 }
  0xd7   : > { %643 = vst [vmem:[#allocation2 + $0x10] sm:$0xff] %v639_v11 }
  0xd8   : > { %v612_v13 = vpop.f32.mrf.mxu2  ;;  %v577_v17 = vpop.f32.mrf.mxu0 }
  0xd9   : > { %v631_v14 = vpop.f32.mrf.mxu3  ;;  %v613_v15 = vadd.f32 %v612_v13, %v594_v12  ;;  %v596_v18 = vpop.f32.mrf.mxu1 }
  0xda   : > { %v597_v21 = vadd.f32 %v596_v18, %v577_v17 }
  0xdb   : > { %v632_v19 = vadd.f32 %v631_v14, %v613_v15 }
  0xdd   : > { %v640_v20 = vadd.f32 %v632_v19, %v256_v16 }
  0xdf   : > { %644 = vst [vmem:[#allocation2] sm:$0xff] %v640_v20 }
  0xe0   : > { %v615_v22 = vpop.f32.mrf.mxu2  ;;  %v579_v27 = vpop.f32.mrf.mxu0 }
  0xe1   : > { %v634_v23 = vpop.f32.mrf.mxu3  ;;  %v616_v24 = vadd.f32 %v615_v22, %v597_v21  ;;  %v598_v28 = vpop.f32.mrf.mxu1 }
  0xe2   : > { %v599_v30 = vadd.f32 %v598_v28, %v579_v27 }
  0xe3   : > { %v635_v26 = vadd.f32 %v634_v23, %v616_v24 }
  0xe5   : > { %v641_v29 = vadd.f32 %v635_v26, %v257_v25 }
  0xe7   : > { %645 = vst [vmem:[#allocation2 + $0x18] sm:$0xff] %v641_v29 }
  0xe8   : > { %v617_v31 = vpop.f32.mrf.mxu2 }
  0xe9   : > { %v618_v32 = vadd.f32 %v617_v31, %v599_v30  ;;  %v636_v34 = vpop.f32.mrf.mxu3 }
  0xeb   : > { %v637_v35 = vadd.f32 %v636_v34, %v618_v32  ;;  %650 = sbr.rel (%p921_p11) target bundleno = 250 (0xfa), region = 63 }
  0xed   : > { %v642_v36 = vadd.f32 %v637_v35, %v258_v33 }
  0xef   : > { %646 = vst [vmem:[#allocation2 + $0x8] sm:$0xff] %v642_v36 }
  0xf0   : > { %v651_v37 = vld [vmem:[#allocation2 + $0x10] sm:$0xff]  ;;  %v1008_v38 = vld [vmem:[%s1206_s2] ss:$0 sm:$0xff]  ;;  %v653_v40 = vld [vmem:[#allocation2 + $0x18] sm:$0xff] }
  0xf1   : > { %v652_v39 = vld [vmem:[#allocation2] sm:$0xff]  ;;  %v659_v42 = vadd.f32 %v1008_v38, %v651_v37  ;;  %v661_v44 = vadd.f32 %v1008_v38, %v653_v40 }
  0xf2   : > { %v660_v43 = vadd.f32 %v1008_v38, %v652_v39 }
  0xf3   : > { %663 = vst [vmem:[%s1207_s3] sm:$0xff] %v659_v42 }
  0xf4   : > { %664 = vst [vmem:[%s1207_s3 + $0x8] sm:$0xff] %v660_v43 }
  0xf5   : > { %665 = vst [vmem:[%s1207_s3 + $0x10] sm:$0xff] %v661_v44 }
  0xf6   : > { %v654_v41 = vld [vmem:[#allocation2 + $0x8] sm:$0xff] }
  0xf7   : > { %v662_v45 = vadd.f32 %v1008_v38, %v654_v41 }
  0xf9   : > { %666 = vst [vmem:[%s1207_s3 + $0x18] sm:$0xff] %v662_v45 }
  0xfa PF: > { %s13_s16 = sadd.s32 1, %s1047_s16   ;;  %s1208_s12 = smov %s1035_s13 }
  0xfb   : > { %p10_p12 = scmp.ge.s32.totalorder %s13_s16, 18   ;;  %s1209_s13 = smov %s1105_s20 }
  0xfc   : > { %s1210_s14 = smov %s1043_s15  ;;  %s1211_s15 = smov %s1213_s17 }
  0xfd   :  { %12 = sbr.rel (!%p10_p12) target bundleno = 3 (0x3), region = 101 }

</bundles_post_ra>
